<compile_context>
chip_gen: v7x
topology: tpu7x:2x2x1
jax: 0.10.0
libtpu: 0.0.40
codegen_flags: <defaults>
</compile_context>

<pallas_src>
import jax
import jax.numpy as jnp
from jax.experimental import pallas as pl
from jax.experimental.pallas import tpu as pltpu
import numpy as np

# ---------------- model config (matches FieldNet construction) -------------
D_IN = 3
D_IN_PAD = 8              # zero-padded input feature rows (sublane-aligned)
HIDDEN = 32
D_OUT = 1
LAYERS = [D_IN, HIDDEN, HIDDEN, HIDDEN, D_OUT]   # opt.layers = [32, 32, 32]
N_LAYERS = len(LAYERS) - 1                        # = 4
OMEGA_0 = 30.0
HALF_W0 = 0.5 * OMEGA_0   # folded scale so that sigmoid(w0*u) = 0.5*tanh(..)+0.5
IS_RESIDUAL = True

TM_MAX = 8192             # max batch tile (points per grid step), lane-dense
                          # (v5e/v6e could push 16384-32768; 8192 is safe on v7x)


def _pick_tile(n):
    """Largest lane-dense tile <= TM_MAX that still gives >= 2 grid steps for
    non-tiny N (so the 'parallel' axis shards across v7x's two TensorCores)."""
    if n <= 512:
        return 256
    half = -(-n // 2)                       # ceil(n/2)
    return min(TM_MAX, 256 * (-(-half // 256)))


# ----------------------------- Pallas kernel --------------------------------
def fieldnet_kernel(xT_ref, w0_ref, w_ref, b_ref, o_ref):
    """xT_ref: [D_IN_PAD, TM]  points in lanes (rows D_IN.. are zero).
       w0_ref: [HIDDEN, D_IN_PAD]  first-layer weight, 0.5*OMEGA_0 folded,
               columns D_IN.. zero.
       w_ref : [5, HIDDEN, HIDDEN] packed [out,in] weights: slots 0..3 are the
               residual-block linears (0.5*OMEGA_0 folded), slot 4 the final
               linear (row 0 real).
       b_ref : [HIDDEN, 8] packed biases: col 0 first layer, cols 1..4
               residual linears (0.5*OMEGA_0 folded), col 5 final bias.
       o_ref : [D_OUT, TM] lane-dense output slab."""
    x = xT_ref[...].astype(jnp.float32)      # [D_IN_PAD, TM]
    b_all = b_ref[...]                       # [HIDDEN, 8]

    def act(z):
        # sigmoid(OMEGA_0*u) == 0.5*tanh(0.5*OMEGA_0*u) + 0.5 ; the
        # 0.5*OMEGA_0 is pre-folded into the packed W/b, so this is a single
        # EUP tanh per vreg plus one VPU fma (half the EUP pressure of
        # exp+reciprocal sigmoid).
        return 0.5 * jnp.tanh(z) + 0.5

    # ---- layer 0: SineLayer(d_in -> hidden), is_first=True (native K=8) ----
    h = act(jnp.dot(w0_ref[...], x, preferred_element_type=jnp.float32)
            + b_all[:, 0:1])                                 # [HIDDEN, TM]

    def sig_layer(idx, h):
        z = (jnp.dot(w_ref[idx], h, preferred_element_type=jnp.float32)
             + b_all[:, idx + 1:idx + 2])                    # bias bcast on lanes
        return act(z)

    # ---- residual block 1 (ndx=1): weight_2 = 1.0, weight_3 = 1.0 ----
    h = h + sig_layer(1, sig_layer(0, h))

    # ---- residual block 2 (ndx=2): weight_2 = 0.5, weight_3 = 1.0 ----
    h = 0.5 * (h + sig_layer(3, sig_layer(2, h)))

    # ---- final linear (hidden -> d_out); only row 0 of slot 4 is real ----
    out_full = (jnp.dot(w_ref[4], h, preferred_element_type=jnp.float32)
                + b_all[:, 5:6])                             # [HIDDEN, TM]
    o_ref[...] = out_full[:D_OUT, :].astype(o_ref.dtype)     # lane-dense [1, TM]


# ------------------------- parameter packing ---------------------------------
def pack_params(params):
    """Fold 0.5*OMEGA_0 into the sigmoid layers (so the kernel's activation is
    0.5*tanh(z)+0.5) and pack everything into three grid-invariant,
    VMEM-resident slabs (one-time wrapper-side transform)."""
    (wA, bA, w1a, b1a, w1b, b1b, w2a, b2a, w2b, b2b, wf, bf) = params

    # first SineLayer: [HIDDEN, D_IN_PAD], zero-padded columns
    w0_pack = jnp.zeros((HIDDEN, D_IN_PAD), jnp.float32)
    w0_pack = w0_pack.at[:, :D_IN].set(HALF_W0 * wA)

    w_pack = jnp.zeros((5, HIDDEN, HIDDEN), jnp.float32)
    b_pack = jnp.zeros((HIDDEN, 8), jnp.float32)
    b_pack = b_pack.at[:, 0].set(HALF_W0 * bA)

    # slots 0..3: residual-block linears
    for i, (w, b) in enumerate(((w1a, b1a), (w1b, b1b), (w2a, b2a), (w2b, b2b))):
        w_pack = w_pack.at[i].set(HALF_W0 * w)
        b_pack = b_pack.at[:, i + 1].set(HALF_W0 * b)

    # slot 4: final linear (no folding), only row 0 used
    w_pack = w_pack.at[4, :D_OUT, :].set(wf)
    b_pack = b_pack.at[:D_OUT, 5].set(bf)
    return w0_pack, w_pack, b_pack


# ------------------------------ wrapper --------------------------------------
def fieldnet_forward(x, params):
    # TODO(synk): for large-N production use, accept x already as [D_IN, N]
    # (and return [D_OUT, N]) so the wrapper-side transposes (separate HBM
    # passes in XLA) disappear; kept here to preserve the module's interface.
    N = x.shape[0]
    tm = _pick_tile(N)
    n_blocks = -(-N // tm)          # ceil-div; arbitrary N handled via padding
    n_pad = n_blocks * tm

    x_t = x.T.astype(jnp.float32)                            # [D_IN, N]
    x_t = jnp.pad(x_t, ((0, D_IN_PAD - D_IN), (0, n_pad - N)))  # [8, n_pad]

    w0_pack, w_pack, b_pack = pack_params(params)

    out_t = pl.pallas_call(
        fieldnet_kernel,
        out_shape=jax.ShapeDtypeStruct((D_OUT, n_pad), jnp.float32),
        grid_spec=pltpu.PrefetchScalarGridSpec(
            num_scalar_prefetch=0,
            grid=(n_blocks,),
            in_specs=[
                pl.BlockSpec((D_IN_PAD, tm), lambda i: (0, i)),
                pl.BlockSpec(w0_pack.shape, lambda i: (0, 0)),      # resident
                pl.BlockSpec(w_pack.shape, lambda i: (0, 0, 0)),    # resident
                pl.BlockSpec(b_pack.shape, lambda i: (0, 0)),       # resident
            ],
            out_specs=pl.BlockSpec((D_OUT, tm), lambda i: (0, i)),
        ),
        compiler_params=pltpu.CompilerParams(
            dimension_semantics=("parallel",),
            vmem_limit_bytes=32 * 1024 * 1024,   # safe on v5e/v6e/v7x; ~6 MiB used
        ),
    )(x_t, w0_pack, w_pack, b_pack)

    return out_t[:, :N].T                                    # [N, D_OUT]


fieldnet_forward_jit = jax.jit(fieldnet_forward)


# ------------------------- parameter construction ---------------------------
def make_linear(key, fan_in, fan_out, w_bound):
    """PyTorch Linear: weight ~ U(-w_bound, w_bound) (from init_weights),
    bias ~ U(-1/sqrt(fan_in), 1/sqrt(fan_in)) (PyTorch default).
    Weight in PyTorch layout (fan_out, fan_in), bias (fan_out,)."""
    kw, kb = jax.random.split(key)
    w = jax.random.uniform(kw, (fan_out, fan_in), jnp.float32, -w_bound, w_bound)
    b_bound = 1.0 / np.sqrt(fan_in)
    b = jax.random.uniform(kb, (fan_out,), jnp.float32, -b_bound, b_bound)
    return w, b


def build_params(key):
    keys = jax.random.split(key, 6)
    params = []
    # layer 0: SineLayer is_first -> bound 1/in_features
    wA, bA = make_linear(keys[0], D_IN, HIDDEN, 1.0 / D_IN)
    params += [wA, bA]
    # residual blocks: bound sqrt(6/features)/omega_0
    rb_bound = np.sqrt(6.0 / HIDDEN) / OMEGA_0
    w1a, b1a = make_linear(keys[1], HIDDEN, HIDDEN, rb_bound)
    w1b, b1b = make_linear(keys[2], HIDDEN, HIDDEN, rb_bound)
    w2a, b2a = make_linear(keys[3], HIDDEN, HIDDEN, rb_bound)
    w2b, b2b = make_linear(keys[4], HIDDEN, HIDDEN, rb_bound)
    params += [w1a, b1a, w1b, b1b, w2a, b2a, w2b, b2b]
    # final linear: bound sqrt(6/layer_in)/30
    wf, bf = make_linear(keys[5], HIDDEN, D_OUT, np.sqrt(6.0 / HIDDEN) / 30.0)
    params += [wf, bf]
    return params


# ----------------------------- JAX reference ---------------------------------
def fieldnet_reference(x, params):
    (wA, bA, w1a, b1a, w1b, b1b, w2a, b2a, w2b, b2b, wf, bf) = params
    h = jax.nn.sigmoid(OMEGA_0 * (x @ wA.T + bA))

    def res(h, wa, ba, wb, bb, weight_2):
        s1 = jax.nn.sigmoid(OMEGA_0 * (h @ wa.T + ba))
        s2 = jax.nn.sigmoid(OMEGA_0 * (s1 @ wb.T + bb))
        return weight_2 * (h + s2)

    h = res(h, w1a, b1a, w1b, b1b, 1.0)
    h = res(h, w2a, b2a, w2b, b2b, 0.5)
    return h @ wf.T + bf


# --------------------------------- main --------------------------------------
if __name__ == "__main__":
    key = jax.random.PRNGKey(0)
    kx, kp = jax.random.split(key)

    # Not a multiple of the tile -> exercises the padded tail; >1 grid step.
    N = 10000
    x = jax.random.uniform(kx, (N, D_IN), jnp.float32, -1.0, 1.0)
    params = build_params(kp)

    out = fieldnet_forward_jit(x, params)
    out = jax.block_until_ready(out)

    ref = fieldnet_reference(x, params)
    np.testing.assert_allclose(np.asarray(out), np.asarray(ref),
                               rtol=1e-5, atol=5e-5)
    assert out.shape == (N, D_OUT)
    print("KERNEL_OK")
</pallas_src>

<mosaic_0001>
module attributes {stable_mosaic.version = 11 : i64} {
  func.func @fieldnet_kernel(%arg0: i32, %arg1: memref<8x5120xf32, #tpu.memory_space<vmem>>, %arg2: memref<32x8xf32, #tpu.memory_space<vmem>>, %arg3: memref<5x32x32xf32, #tpu.memory_space<vmem>>, %arg4: memref<32x8xf32, #tpu.memory_space<vmem>>, %arg5: memref<1x5120xf32, #tpu.memory_space<vmem>>) attributes {dimension_semantics = [#tpu.dimension_semantics<parallel>], iteration_bounds = array<i64: 2>, scalar_prefetch = 0 : i64, scratch_operands = 0 : i64, tpu.core_type = #tpu.core_type<tc>, window_params = [{transform_indices = @transform_0, window_bounds = array<i64: 8, 5120>}, {pipeline_mode = #tpu.pipeline_mode<synchronous>, transform_indices = @transform_1, window_bounds = array<i64: 32, 8>}, {pipeline_mode = #tpu.pipeline_mode<synchronous>, transform_indices = @transform_2, window_bounds = array<i64: 5, 32, 32>}, {pipeline_mode = #tpu.pipeline_mode<synchronous>, transform_indices = @transform_3, window_bounds = array<i64: 32, 8>}, {transform_indices = @transform_4, window_bounds = array<i64: 1, 5120>}]} {
    %c0 = arith.constant 0 : index
    %c0_0 = arith.constant 0 : index
    %0 = vector.load %arg1[%c0, %c0_0] : memref<8x5120xf32, #tpu.memory_space<vmem>>, vector<8x5120xf32>
    %c0_1 = arith.constant 0 : index
    %c0_2 = arith.constant 0 : index
    %1 = vector.load %arg4[%c0_1, %c0_2] : memref<32x8xf32, #tpu.memory_space<vmem>>, vector<32x8xf32>
    %c0_3 = arith.constant 0 : index
    %c0_4 = arith.constant 0 : index
    %2 = vector.load %arg2[%c0_3, %c0_4] : memref<32x8xf32, #tpu.memory_space<vmem>>, vector<32x8xf32>
    %cst = arith.constant dense<0.000000e+00> : vector<32x5120xf32>
    %3 = tpu.matmul %2, %0, %cst {dimension_numbers = #tpu.dot_dimension_numbers<[1], [0], [0], [1], [0, 0, 1, 1], [], []>} : vector<32x8xf32>, vector<8x5120xf32>, vector<32x5120xf32> -> vector<32x5120xf32>
    %4 = vector.extract_strided_slice %1 {offsets = [0, 0], sizes = [32, 1], strides = [1, 1]} : vector<32x8xf32> to vector<32x1xf32>
    %5 = vector.broadcast %4 : vector<32x1xf32> to vector<32x5120xf32>
    %6 = arith.addf %3, %5 : vector<32x5120xf32>
    %7 = math.tanh %6 : vector<32x5120xf32>
    %cst_5 = arith.constant 5.000000e-01 : f32
    %8 = vector.broadcast %cst_5 : f32 to vector<32x5120xf32>
    %9 = arith.mulf %8, %7 : vector<32x5120xf32>
    %cst_6 = arith.constant 5.000000e-01 : f32
    %10 = vector.broadcast %cst_6 : f32 to vector<32x5120xf32>
    %11 = arith.addf %9, %10 : vector<32x5120xf32>
    %c0_7 = arith.constant 0 : index
    %c0_8 = arith.constant 0 : index
    %c0_9 = arith.constant 0 : index
    %12 = vector.load %arg3[%c0_7, %c0_8, %c0_9] : memref<5x32x32xf32, #tpu.memory_space<vmem>>, vector<1x32x32xf32>
    %13 = vector.shape_cast %12 : vector<1x32x32xf32> to vector<32x32xf32>
    %cst_10 = arith.constant dense<0.000000e+00> : vector<32x5120xf32>
    %14 = tpu.matmul %13, %11, %cst_10 {dimension_numbers = #tpu.dot_dimension_numbers<[1], [0], [0], [1], [0, 0, 1, 1], [], []>} : vector<32x32xf32>, vector<32x5120xf32>, vector<32x5120xf32> -> vector<32x5120xf32>
    %15 = vector.extract_strided_slice %1 {offsets = [0, 1], sizes = [32, 1], strides = [1, 1]} : vector<32x8xf32> to vector<32x1xf32>
    %16 = vector.broadcast %15 : vector<32x1xf32> to vector<32x5120xf32>
    %17 = arith.addf %14, %16 : vector<32x5120xf32>
    %18 = math.tanh %17 : vector<32x5120xf32>
    %cst_11 = arith.constant 5.000000e-01 : f32
    %19 = vector.broadcast %cst_11 : f32 to vector<32x5120xf32>
    %20 = arith.mulf %19, %18 : vector<32x5120xf32>
    %cst_12 = arith.constant 5.000000e-01 : f32
    %21 = vector.broadcast %cst_12 : f32 to vector<32x5120xf32>
    %22 = arith.addf %20, %21 : vector<32x5120xf32>
    %c1 = arith.constant 1 : index
    %c0_13 = arith.constant 0 : index
    %c0_14 = arith.constant 0 : index
    %23 = vector.load %arg3[%c1, %c0_13, %c0_14] : memref<5x32x32xf32, #tpu.memory_space<vmem>>, vector<1x32x32xf32>
    %24 = vector.shape_cast %23 : vector<1x32x32xf32> to vector<32x32xf32>
    %cst_15 = arith.constant dense<0.000000e+00> : vector<32x5120xf32>
    %25 = tpu.matmul %24, %22, %cst_15 {dimension_numbers = #tpu.dot_dimension_numbers<[1], [0], [0], [1], [0, 0, 1, 1], [], []>} : vector<32x32xf32>, vector<32x5120xf32>, vector<32x5120xf32> -> vector<32x5120xf32>
    %26 = vector.extract_strided_slice %1 {offsets = [0, 2], sizes = [32, 1], strides = [1, 1]} : vector<32x8xf32> to vector<32x1xf32>
    %27 = vector.broadcast %26 : vector<32x1xf32> to vector<32x5120xf32>
    %28 = arith.addf %25, %27 : vector<32x5120xf32>
    %29 = math.tanh %28 : vector<32x5120xf32>
    %cst_16 = arith.constant 5.000000e-01 : f32
    %30 = vector.broadcast %cst_16 : f32 to vector<32x5120xf32>
    %31 = arith.mulf %30, %29 : vector<32x5120xf32>
    %cst_17 = arith.constant 5.000000e-01 : f32
    %32 = vector.broadcast %cst_17 : f32 to vector<32x5120xf32>
    %33 = arith.addf %31, %32 : vector<32x5120xf32>
    %34 = arith.addf %11, %33 : vector<32x5120xf32>
    %c2 = arith.constant 2 : index
    %c0_18 = arith.constant 0 : index
    %c0_19 = arith.constant 0 : index
    %35 = vector.load %arg3[%c2, %c0_18, %c0_19] : memref<5x32x32xf32, #tpu.memory_space<vmem>>, vector<1x32x32xf32>
    %36 = vector.shape_cast %35 : vector<1x32x32xf32> to vector<32x32xf32>
    %cst_20 = arith.constant dense<0.000000e+00> : vector<32x5120xf32>
    %37 = tpu.matmul %36, %34, %cst_20 {dimension_numbers = #tpu.dot_dimension_numbers<[1], [0], [0], [1], [0, 0, 1, 1], [], []>} : vector<32x32xf32>, vector<32x5120xf32>, vector<32x5120xf32> -> vector<32x5120xf32>
    %38 = vector.extract_strided_slice %1 {offsets = [0, 3], sizes = [32, 1], strides = [1, 1]} : vector<32x8xf32> to vector<32x1xf32>
    %39 = vector.broadcast %38 : vector<32x1xf32> to vector<32x5120xf32>
    %40 = arith.addf %37, %39 : vector<32x5120xf32>
    %41 = math.tanh %40 : vector<32x5120xf32>
    %cst_21 = arith.constant 5.000000e-01 : f32
    %42 = vector.broadcast %cst_21 : f32 to vector<32x5120xf32>
    %43 = arith.mulf %42, %41 : vector<32x5120xf32>
    %cst_22 = arith.constant 5.000000e-01 : f32
    %44 = vector.broadcast %cst_22 : f32 to vector<32x5120xf32>
    %45 = arith.addf %43, %44 : vector<32x5120xf32>
    %c3 = arith.constant 3 : index
    %c0_23 = arith.constant 0 : index
    %c0_24 = arith.constant 0 : index
    %46 = vector.load %arg3[%c3, %c0_23, %c0_24] : memref<5x32x32xf32, #tpu.memory_space<vmem>>, vector<1x32x32xf32>
    %47 = vector.shape_cast %46 : vector<1x32x32xf32> to vector<32x32xf32>
    %cst_25 = arith.constant dense<0.000000e+00> : vector<32x5120xf32>
    %48 = tpu.matmul %47, %45, %cst_25 {dimension_numbers = #tpu.dot_dimension_numbers<[1], [0], [0], [1], [0, 0, 1, 1], [], []>} : vector<32x32xf32>, vector<32x5120xf32>, vector<32x5120xf32> -> vector<32x5120xf32>
    %49 = vector.extract_strided_slice %1 {offsets = [0, 4], sizes = [32, 1], strides = [1, 1]} : vector<32x8xf32> to vector<32x1xf32>
    %50 = vector.broadcast %49 : vector<32x1xf32> to vector<32x5120xf32>
    %51 = arith.addf %48, %50 : vector<32x5120xf32>
    %52 = math.tanh %51 : vector<32x5120xf32>
    %cst_26 = arith.constant 5.000000e-01 : f32
    %53 = vector.broadcast %cst_26 : f32 to vector<32x5120xf32>
    %54 = arith.mulf %53, %52 : vector<32x5120xf32>
    %cst_27 = arith.constant 5.000000e-01 : f32
    %55 = vector.broadcast %cst_27 : f32 to vector<32x5120xf32>
    %56 = arith.addf %54, %55 : vector<32x5120xf32>
    %57 = arith.addf %34, %56 : vector<32x5120xf32>
    %cst_28 = arith.constant 5.000000e-01 : f32
    %58 = vector.broadcast %cst_28 : f32 to vector<32x5120xf32>
    %59 = arith.mulf %58, %57 : vector<32x5120xf32>
    %c4 = arith.constant 4 : index
    %c0_29 = arith.constant 0 : index
    %c0_30 = arith.constant 0 : index
    %60 = vector.load %arg3[%c4, %c0_29, %c0_30] : memref<5x32x32xf32, #tpu.memory_space<vmem>>, vector<1x32x32xf32>
    %61 = vector.shape_cast %60 : vector<1x32x32xf32> to vector<32x32xf32>
    %cst_31 = arith.constant dense<0.000000e+00> : vector<32x5120xf32>
    %62 = tpu.matmul %61, %59, %cst_31 {dimension_numbers = #tpu.dot_dimension_numbers<[1], [0], [0], [1], [0, 0, 1, 1], [], []>} : vector<32x32xf32>, vector<32x5120xf32>, vector<32x5120xf32> -> vector<32x5120xf32>
    %63 = vector.extract_strided_slice %1 {offsets = [0, 5], sizes = [32, 1], strides = [1, 1]} : vector<32x8xf32> to vector<32x1xf32>
    %64 = vector.broadcast %63 : vector<32x1xf32> to vector<32x5120xf32>
    %65 = arith.addf %62, %64 : vector<32x5120xf32>
    %66 = vector.extract_strided_slice %65 {offsets = [0, 0], sizes = [1, 5120], strides = [1, 1]} : vector<32x5120xf32> to vector<1x5120xf32>
    %c0_32 = arith.constant 0 : index
    %c0_33 = arith.constant 0 : index
    %67 = vector.load %arg5[%c0_32, %c0_33] : memref<1x5120xf32, #tpu.memory_space<vmem>>, vector<1x5120xf32>
    tpu.vector_store %arg5[%c0_32, %c0_33], %66 {strides = array<i32>} : memref<1x5120xf32, #tpu.memory_space<vmem>>, vector<1x5120xf32>,
    return
  }
  func.func @transform_0(%arg0: i32) -> (i32, i32) {
    %c0_i32 = arith.constant 0 : i32
    %c0_i32_0 = arith.constant 0 : i32
    return %c0_i32, %arg0 : i32, i32
  }
  func.func @transform_1(%arg0: i32) -> (i32, i32) {
    %c0_i32 = arith.constant 0 : i32
    %c0_i32_0 = arith.constant 0 : i32
    %c0_i32_1 = arith.constant 0 : i32
    return %c0_i32, %c0_i32_0 : i32, i32
  }
  func.func @transform_2(%arg0: i32) -> (i32, i32, i32) {
    %c0_i32 = arith.constant 0 : i32
    %c0_i32_0 = arith.constant 0 : i32
    %c0_i32_1 = arith.constant 0 : i32
    %c0_i32_2 = arith.constant 0 : i32
    return %c0_i32, %c0_i32_0, %c0_i32_1 : i32, i32, i32
  }
  func.func @transform_3(%arg0: i32) -> (i32, i32) {
    %c0_i32 = arith.constant 0 : i32
    %c0_i32_0 = arith.constant 0 : i32
    %c0_i32_1 = arith.constant 0 : i32
    return %c0_i32, %c0_i32_0 : i32, i32
  }
  func.func @transform_4(%arg0: i32) -> (i32, i32) {
    %c0_i32 = arith.constant 0 : i32
    %c0_i32_0 = arith.constant 0 : i32
    return %c0_i32, %arg0 : i32, i32
  }
}

</mosaic_0001>

<bundles_post_ra>
// kernel: fieldnet_forward.1
= control target key start
LH: loop header
LB: loop body
LE: loop exit
PB: predicated region body
PF: predicated region fallthrough
CT: control target
= control target key end

     0   :  { %s17239_s15 = smov 0   ;;  %s23526_s0 = inlined_call_operand.vmem [shape: f32[8,10240], index: 0, kind: input, shape index: {}]   ;;  %s23527_s1 = inlined_call_operand.vmem [shape: f32[32,8], index: 1, kind: input, shape index: {}]   ;;  %s23528_s2 = inlined_call_operand.vmem [shape: f32[5,32,32], index: 2, kind: input, shape index: {}]   ;;  %s23529_s3 = inlined_call_operand.vmem [shape: f32[32,8], index: 3, kind: input, shape index: {}]   ;;  %s23530_s4 = inlined_call_operand.vmem [shape: f32[1,10240], index: 4, kind: output, shape index: {}]  }
   0x1 LB: > { %s14227_s16 = sadd.s32 4294967295, %s17204_s15   ;;  %p14231_p0 = scmp.ge.s32.totalorder %s17204_s15, 1  ;;  %s17204_s15 = sphi %s17239_s15, %s14_s15  }
   0x2   : > { %p163_p1 = scmp.lt.s32.totalorder %s17204_s15, 3 }
   0x4   : > { %p164_p2 = pnand %p14231_p0, %p163_p1 }
   0x6   : > { %167 = sbr.rel (%p164_p2) target bundleno = 1793 (0x701), region = 36 }
   0xd   : > { %s188_s17 = smul.u32 40, %s14227_s16  ;;  %v23533_v0 = vmov 0.0   ;;  %v17252_v1 = vld [vmem:[%s23529_s3] sm:$0xff]  ;;  %v17207_v2 = vmov 0   ;;  %v17257_v3 = vld [vmem:[%s23529_s3 + $0x10] sm:$0xff]  ;;  %v17266_v4 = vld [vmem:[%s23529_s3 + $0x8] sm:$0xff] }
   0xe   : > { %344 = vmatprep.mubr.f32.mxu0 %v23533_v0  ;;  %433 = vmatprep.mubr.f32.mxu1 %v23533_v0  ;;  %v17271_v5 = vld [vmem:[%s23529_s3 + $0x18] sm:$0xff]  ;;  %v17282_v6 = vld [vmem:[%s23527_s1] sm:$0xff]  ;;  %vm267_vm0 = vcmask 64512   ;;  %v17303_v15 = vld [vmem:[%s23527_s1 + $0x8] sm:$0xff]  ;;  %vm2560_vm1 = vcmask 261120  }
   0xf   : > { %p189_p3 = scmp.lt.s32.totalorder %s188_s17, 79  ;;  %15547 = vset.pattern.permute.xlu0 %v17207_v2  ;;  %15548 = vset.pattern.permute.xlu1 %v17207_v2  ;;  %v17316_v18 = vld [vmem:[%s23527_s1 + $0x10] sm:$0xff]  ;;  %v17327_v19 = vld [vmem:[%s23527_s1 + $0x18] sm:$0xff] }
  0x10   : > { %249 = vperm.xlu0 %15547, %v17252_v1   ;;  %259 = vperm.xlu1 %15548, %v17257_v3  }
  0x11   : > { %s24559_s17 = smov (!%p189_p3, %s188_s17), 79 }
  0x12   : > { %s14232_s26 = sshll.u32 %s24559_s17, 3  ;;  %s23466_s14 = scalar_lea.vmem %s23530_s4, %s24559_s17 }
  0x13   : > { %s17277_s29 = scalar_lea.vmem %s23526_s0, %s14232_s26 }
  0x14   : > { %254 = vperm.xlu0 %15547, %v17266_v4   ;;  %264 = vperm.xlu1 %15548, %v17271_v5   ;;  %v200_v7 = vld [vmem:[%s17277_s29 + $0x8] sm:$0xff]  ;;  %v202_v8 = vld [vmem:[%s17277_s29 + $0x18] sm:$0xff]  ;;  %v199_v9 = vld [vmem:[%s17277_s29] sm:$0xff] }
  0x15   : > { %280 = vmatprep.subr.mxu0 %v200_v7  ;;  %369 = vmatprep.subr.mxu1 %v202_v8  ;;  %v201_v10 = vld [vmem:[%s17277_s29 + $0x10] sm:$0xff]  ;;  %v204_v11 = vld [vmem:[%s17277_s29 + $0x28] sm:$0xff]  ;;  %v206_v12 = vld [vmem:[%s17277_s29 + $0x38] sm:$0xff] }
  0x16   : > { %281 = vmatpush1.msra.mxu0 %v199_v9  ;;  %370 = vmatpush1.msra.mxu1 %v201_v10  ;;  %v203_v13 = vld [vmem:[%s17277_s29 + $0x20] sm:$0xff]  ;;  %v205_v14 = vld [vmem:[%s17277_s29 + $0x30] sm:$0xff]  ;;  %v208_v16 = vld [vmem:[%s17277_s29 + $0x48] sm:$0xff] }
  0x17   : > { %14233 = vmatmul.mubr.msk.f32.vlgmr.msra.gmra.mrb[0].mxu0 %vm267_vm0, %v17282_v6  ;;  %14237 = vmatmul.mubr.msk.f32.vlgmr.msra.gmra.mrb[0].mxu1 %vm267_vm0, %v17282_v6  ;;  %v210_v17 = vld [vmem:[%s17277_s29 + $0x58] sm:$0xff]  ;;  %v207_v20 = vld [vmem:[%s17277_s29 + $0x40] sm:$0xff]  ;;  %v209_v21 = vld [vmem:[%s17277_s29 + $0x50] sm:$0xff] }
  0x18   : > { %350 = vmatprep.mubr.f32.mxu0 %v23533_v0  ;;  %439 = vmatprep.mubr.f32.mxu1 %v23533_v0  ;;  %v212_v22 = vld [vmem:[%s17277_s29 + $0x68] sm:$0xff]  ;;  %v214_v23 = vld [vmem:[%s17277_s29 + $0x78] sm:$0xff]  ;;  %v211_v24 = vld [vmem:[%s17277_s29 + $0x60] sm:$0xff] }
  0x19   : > { %458 = vmatprep.subr.mxu0 %v204_v11  ;;  %547 = vmatprep.subr.mxu1 %v206_v12  ;;  %v213_v25 = vld [vmem:[%s17277_s29 + $0x70] sm:$0xff]  ;;  %v216_v26 = vld [vmem:[%s17277_s29 + $0x88] sm:$0xff]  ;;  %v218_v27 = vld [vmem:[%s17277_s29 + $0x98] sm:$0xff] }
  0x1a   : > { %459 = vmatpush1.msra.mxu0 %v203_v13  ;;  %548 = vmatpush1.msra.mxu1 %v205_v14  ;;  %v215_v28 = vld [vmem:[%s17277_s29 + $0x80] sm:$0xff]  ;;  %v217_v29 = vld [vmem:[%s17277_s29 + $0x90] sm:$0xff]  ;;  %v220_v30 = vld [vmem:[%s17277_s29 + $0xa8] sm:$0xff] }
  0x1b   : > { %14234 = vmatmul.mubr.msk.f32.gmra.mrb[2].mxu0 %vm267_vm0, %v17303_v15  ;;  %14238 = vmatmul.mubr.msk.f32.gmra.mrb[2].mxu1 %vm267_vm0, %v17303_v15  ;;  %v222_v31 = vld [vmem:[%s17277_s29 + $0xb8] sm:$0xff]  ;;  %v219_v32 = vld [vmem:[%s17277_s29 + $0xa0] sm:$0xff]  ;;  %v221_v33 = vld [vmem:[%s17277_s29 + $0xb0] sm:$0xff] }
  0x1c   : > { %356 = vmatprep.mubr.f32.mxu0 %v23533_v0  ;;  %445 = vmatprep.mubr.f32.mxu1 %v23533_v0  ;;  %v224_v34 = vld [vmem:[%s17277_s29 + $0xc8] sm:$0xff]  ;;  %v226_v35 = vld [vmem:[%s17277_s29 + $0xd8] sm:$0xff]  ;;  %v223_v36 = vld [vmem:[%s17277_s29 + $0xc0] sm:$0xff] }
  0x1d   : > { %636 = vmatprep.subr.mxu0 %v208_v16  ;;  %725 = vmatprep.subr.mxu1 %v210_v17  ;;  %v225_v37 = vld [vmem:[%s17277_s29 + $0xd0] sm:$0xff]  ;;  %v228_v38 = vld [vmem:[%s17277_s29 + $0xe8] sm:$0xff]  ;;  %v230_v39 = vld [vmem:[%s17277_s29 + $0xf8] sm:$0xff] }
  0x1e   : > { %v227_v40 = vld [vmem:[%s17277_s29 + $0xe0] sm:$0xff]  ;;  %v229_v41 = vld [vmem:[%s17277_s29 + $0xf0] sm:$0xff]  ;;  %v232_v42 = vld [vmem:[%s17277_s29 + $0x108] sm:$0xff] }
  0x1f   : > { %14235 = vmatmul.mubr.msk.f32.gmra.mrb[4].mxu0 %vm267_vm0, %v17316_v18  ;;  %14239 = vmatmul.mubr.msk.f32.gmra.mrb[4].mxu1 %vm267_vm0, %v17316_v18  ;;  %v234_v43 = vld [vmem:[%s17277_s29 + $0x118] sm:$0xff]  ;;  %v231_v44 = vld [vmem:[%s17277_s29 + $0x100] sm:$0xff]  ;;  %v233_v45 = vld [vmem:[%s17277_s29 + $0x110] sm:$0xff] }
  0x20   : > { %362 = vmatprep.mubr.f32.mxu0 %v23533_v0  ;;  %451 = vmatprep.mubr.f32.mxu1 %v23533_v0  ;;  %v236_v46 = vld [vmem:[%s17277_s29 + $0x128] sm:$0xff]  ;;  %v238_v47 = vld [vmem:[%s17277_s29 + $0x138] sm:$0xff]  ;;  %v235_v48 = vld [vmem:[%s17277_s29 + $0x120] sm:$0xff] }
  0x21   : > { %v237_v49 = vld [vmem:[%s17277_s29 + $0x130] sm:$0xff] }
  0x23   : > { %14236 = vmatmul.mubr.msk.f32.gmra.mrb[6].mxu0 %vm267_vm0, %v17327_v19  ;;  %14240 = vmatmul.mubr.msk.f32.gmra.mrb[6].mxu1 %vm267_vm0, %v17327_v19 }
  0x24   : > { %522 = vmatprep.mubr.f32.mxu0 %v23533_v0  ;;  %611 = vmatprep.mubr.f32.mxu1 %v23533_v0 }
  0x27   : > { %14241 = vmatmul.mubr.msk.f32.vlgmr.msra.gmra.mrb[8].mxu0 %vm267_vm0, %v17282_v6  ;;  %14245 = vmatmul.mubr.msk.f32.vlgmr.msra.gmra.mrb[8].mxu1 %vm267_vm0, %v17282_v6 }
  0x28   : > { %528 = vmatprep.mubr.f32.mxu0 %v23533_v0  ;;  %617 = vmatprep.mubr.f32.mxu1 %v23533_v0 }
  0x29   : > { %637 = vmatpush1.msra.mxu0 %v207_v20  ;;  %726 = vmatpush1.msra.mxu1 %v209_v21 }
  0x2a   : > { %814 = vmatprep.subr.mxu0 %v212_v22  ;;  %903 = vmatprep.subr.mxu1 %v214_v23 }
  0x2b   : > { %14242 = vmatmul.mubr.msk.f32.gmra.mrb[10].mxu0 %vm267_vm0, %v17303_v15  ;;  %14246 = vmatmul.mubr.msk.f32.gmra.mrb[10].mxu1 %vm267_vm0, %v17303_v15 }
  0x2c   : > { %534 = vmatprep.mubr.f32.mxu0 %v23533_v0  ;;  %623 = vmatprep.mubr.f32.mxu1 %v23533_v0 }
  0x2f   : > { %14243 = vmatmul.mubr.msk.f32.gmra.mrb[12].mxu0 %vm267_vm0, %v17316_v18  ;;  %14247 = vmatmul.mubr.msk.f32.gmra.mrb[12].mxu1 %vm267_vm0, %v17316_v18 }
  0x30   : > { %540 = vmatprep.mubr.f32.mxu0 %v23533_v0  ;;  %629 = vmatprep.mubr.f32.mxu1 %v23533_v0 }
  0x33   : > { %14244 = vmatmul.mubr.msk.f32.gmra.mrb[14].mxu0 %vm267_vm0, %v17327_v19  ;;  %14248 = vmatmul.mubr.msk.f32.gmra.mrb[14].mxu1 %vm267_vm0, %v17327_v19 }
  0x34   : > { %700 = vmatprep.mubr.f32.mxu0 %v23533_v0  ;;  %789 = vmatprep.mubr.f32.mxu1 %v23533_v0 }
  0x37   : > { %14249 = vmatmul.mubr.msk.f32.vlgmr.msra.gmra.mrb[16].mxu0 %vm267_vm0, %v17282_v6  ;;  %14253 = vmatmul.mubr.msk.f32.vlgmr.msra.gmra.mrb[16].mxu1 %vm267_vm0, %v17282_v6 }
  0x38   : > { %706 = vmatprep.mubr.f32.mxu0 %v23533_v0  ;;  %795 = vmatprep.mubr.f32.mxu1 %v23533_v0 }
  0x39   : > { %815 = vmatpush1.msra.mxu0 %v211_v24  ;;  %904 = vmatpush1.msra.mxu1 %v213_v25 }
  0x3a   : > { %992 = vmatprep.subr.mxu0 %v216_v26  ;;  %1081 = vmatprep.subr.mxu1 %v218_v27  ;;  %v17208_v26 = vmov 1  }
  0x3b   : > { %14250 = vmatmul.mubr.msk.f32.gmra.mrb[18].mxu0 %vm267_vm0, %v17303_v15  ;;  %14254 = vmatmul.mubr.msk.f32.gmra.mrb[18].mxu1 %vm267_vm0, %v17303_v15 }
  0x3c   : > { %712 = vmatprep.mubr.f32.mxu0 %v23533_v0  ;;  %801 = vmatprep.mubr.f32.mxu1 %v23533_v0 }
  0x3d   : > { %15549 = vset.pattern.permute.xlu0 %v17208_v26  ;;  %15550 = vset.pattern.permute.xlu1 %v17208_v26 }
  0x3e   : > { %2545 = vperm.xlu0 %15549, %v17252_v1   ;;  %2549 = vperm.xlu1 %15550, %v17266_v4  }
  0x3f   : > { %14251 = vmatmul.mubr.msk.f32.gmra.mrb[20].mxu0 %vm267_vm0, %v17316_v18  ;;  %14255 = vmatmul.mubr.msk.f32.gmra.mrb[20].mxu1 %vm267_vm0, %v17316_v18 }
  0x40   : > { %718 = vmatprep.mubr.f32.mxu0 %v23533_v0  ;;  %807 = vmatprep.mubr.f32.mxu1 %v23533_v0 }
  0x42   : > { %2553 = vperm.xlu1 %15550, %v17257_v3   ;;  %2557 = vperm.xlu0 %15549, %v17271_v5  }
  0x43   : > { %14252 = vmatmul.mubr.msk.f32.gmra.mrb[22].mxu0 %vm267_vm0, %v17327_v19  ;;  %14256 = vmatmul.mubr.msk.f32.gmra.mrb[22].mxu1 %vm267_vm0, %v17327_v19 }
  0x44   : > { %878 = vmatprep.mubr.f32.mxu0 %v23533_v0  ;;  %967 = vmatprep.mubr.f32.mxu1 %v23533_v0 }
  0x47   : > { %14257 = vmatmul.mubr.msk.f32.vlgmr.msra.gmra.mrb[24].mxu0 %vm267_vm0, %v17282_v6  ;;  %14261 = vmatmul.mubr.msk.f32.vlgmr.msra.gmra.mrb[24].mxu1 %vm267_vm0, %v17282_v6 }
  0x48   : > { %884 = vmatprep.mubr.f32.mxu0 %v23533_v0  ;;  %973 = vmatprep.mubr.f32.mxu1 %v23533_v0 }
  0x49   : > { %993 = vmatpush1.msra.mxu0 %v215_v28  ;;  %1082 = vmatpush1.msra.mxu1 %v217_v29 }
  0x4a   : > { %1170 = vmatprep.subr.mxu0 %v220_v30  ;;  %1259 = vmatprep.subr.mxu1 %v222_v31 }
  0x4b   : > { %14258 = vmatmul.mubr.msk.f32.gmra.mrb[26].mxu0 %vm267_vm0, %v17303_v15  ;;  %14262 = vmatmul.mubr.msk.f32.gmra.mrb[26].mxu1 %vm267_vm0, %v17303_v15 }
  0x4c   : > { %890 = vmatprep.mubr.f32.mxu0 %v23533_v0  ;;  %979 = vmatprep.mubr.f32.mxu1 %v23533_v0 }
  0x4f   : > { %14259 = vmatmul.mubr.msk.f32.gmra.mrb[28].mxu0 %vm267_vm0, %v17316_v18  ;;  %14263 = vmatmul.mubr.msk.f32.gmra.mrb[28].mxu1 %vm267_vm0, %v17316_v18 }
  0x50   : > { %896 = vmatprep.mubr.f32.mxu0 %v23533_v0  ;;  %985 = vmatprep.mubr.f32.mxu1 %v23533_v0 }
  0x53   : > { %14260 = vmatmul.mubr.msk.f32.gmra.mrb[30].mxu0 %vm267_vm0, %v17327_v19  ;;  %14264 = vmatmul.mubr.msk.f32.gmra.mrb[30].mxu1 %vm267_vm0, %v17327_v19 }
  0x54   : > { %1056 = vmatprep.mubr.f32.mxu0 %v23533_v0  ;;  %1145 = vmatprep.mubr.f32.mxu1 %v23533_v0 }
  0x57   : > { %14265 = vmatmul.mubr.msk.f32.vlgmr.msra.gmra.mrb[32].mxu0 %vm267_vm0, %v17282_v6  ;;  %14269 = vmatmul.mubr.msk.f32.vlgmr.msra.gmra.mrb[32].mxu1 %vm267_vm0, %v17282_v6 }
  0x58   : > { %1062 = vmatprep.mubr.f32.mxu0 %v23533_v0  ;;  %1151 = vmatprep.mubr.f32.mxu1 %v23533_v0 }
  0x59   : > { %1171 = vmatpush1.msra.mxu0 %v219_v32  ;;  %1260 = vmatpush1.msra.mxu1 %v221_v33 }
  0x5a   : > { %1348 = vmatprep.subr.mxu0 %v224_v34  ;;  %1437 = vmatprep.subr.mxu1 %v226_v35 }
  0x5b   : > { %14266 = vmatmul.mubr.msk.f32.gmra.mrb[34].mxu0 %vm267_vm0, %v17303_v15  ;;  %14270 = vmatmul.mubr.msk.f32.gmra.mrb[34].mxu1 %vm267_vm0, %v17303_v15 }
  0x5c   : > { %1068 = vmatprep.mubr.f32.mxu0 %v23533_v0  ;;  %1157 = vmatprep.mubr.f32.mxu1 %v23533_v0 }
  0x5f   : > { %14267 = vmatmul.mubr.msk.f32.gmra.mrb[36].mxu0 %vm267_vm0, %v17316_v18  ;;  %14271 = vmatmul.mubr.msk.f32.gmra.mrb[36].mxu1 %vm267_vm0, %v17316_v18 }
  0x60   : > { %1074 = vmatprep.mubr.f32.mxu0 %v23533_v0  ;;  %1163 = vmatprep.mubr.f32.mxu1 %v23533_v0 }
  0x63   : > { %14268 = vmatmul.mubr.msk.f32.gmra.mrb[38].mxu0 %vm267_vm0, %v17327_v19  ;;  %14272 = vmatmul.mubr.msk.f32.gmra.mrb[38].mxu1 %vm267_vm0, %v17327_v19 }
  0x64   : > { %1234 = vmatprep.mubr.f32.mxu0 %v23533_v0  ;;  %1323 = vmatprep.mubr.f32.mxu1 %v23533_v0 }
  0x67   : > { %14273 = vmatmul.mubr.msk.f32.vlgmr.msra.gmra.mrb[40].mxu0 %vm267_vm0, %v17282_v6  ;;  %14277 = vmatmul.mubr.msk.f32.vlgmr.msra.gmra.mrb[40].mxu1 %vm267_vm0, %v17282_v6 }
  0x68   : > { %1240 = vmatprep.mubr.f32.mxu0 %v23533_v0  ;;  %1329 = vmatprep.mubr.f32.mxu1 %v23533_v0 }
  0x69   : > { %1349 = vmatpush1.msra.mxu0 %v223_v36  ;;  %1438 = vmatpush1.msra.mxu1 %v225_v37 }
  0x6a   : > { %1526 = vmatprep.subr.mxu0 %v228_v38  ;;  %1615 = vmatprep.subr.mxu1 %v230_v39 }
  0x6b   : > { %14274 = vmatmul.mubr.msk.f32.gmra.mrb[42].mxu0 %vm267_vm0, %v17303_v15  ;;  %14278 = vmatmul.mubr.msk.f32.gmra.mrb[42].mxu1 %vm267_vm0, %v17303_v15 }
  0x6c   : > { %1246 = vmatprep.mubr.f32.mxu0 %v23533_v0  ;;  %1335 = vmatprep.mubr.f32.mxu1 %v23533_v0 }
  0x6f   : > { %14275 = vmatmul.mubr.msk.f32.gmra.mrb[44].mxu0 %vm267_vm0, %v17316_v18  ;;  %14279 = vmatmul.mubr.msk.f32.gmra.mrb[44].mxu1 %vm267_vm0, %v17316_v18 }
  0x70   : > { %1252 = vmatprep.mubr.f32.mxu0 %v23533_v0  ;;  %1341 = vmatprep.mubr.f32.mxu1 %v23533_v0 }
  0x73   : > { %14276 = vmatmul.mubr.msk.f32.gmra.mrb[46].mxu0 %vm267_vm0, %v17327_v19  ;;  %14280 = vmatmul.mubr.msk.f32.gmra.mrb[46].mxu1 %vm267_vm0, %v17327_v19 }
  0x74   : > { %1412 = vmatprep.mubr.f32.mxu0 %v23533_v0  ;;  %1501 = vmatprep.mubr.f32.mxu1 %v23533_v0 }
  0x77   : > { %14281 = vmatmul.mubr.msk.f32.vlgmr.msra.gmra.mrb[48].mxu0 %vm267_vm0, %v17282_v6  ;;  %14285 = vmatmul.mubr.msk.f32.vlgmr.msra.gmra.mrb[48].mxu1 %vm267_vm0, %v17282_v6 }
  0x78   : > { %1418 = vmatprep.mubr.f32.mxu0 %v23533_v0  ;;  %1507 = vmatprep.mubr.f32.mxu1 %v23533_v0 }
  0x79   : > { %1527 = vmatpush1.msra.mxu0 %v227_v40  ;;  %1616 = vmatpush1.msra.mxu1 %v229_v41 }
  0x7a   : > { %1704 = vmatprep.subr.mxu0 %v232_v42  ;;  %1793 = vmatprep.subr.mxu1 %v234_v43 }
  0x7b   : > { %14282 = vmatmul.mubr.msk.f32.gmra.mrb[50].mxu0 %vm267_vm0, %v17303_v15  ;;  %14286 = vmatmul.mubr.msk.f32.gmra.mrb[50].mxu1 %vm267_vm0, %v17303_v15 }
  0x7c   : > { %1424 = vmatprep.mubr.f32.mxu0 %v23533_v0  ;;  %1513 = vmatprep.mubr.f32.mxu1 %v23533_v0 }
  0x7f   : > { %14283 = vmatmul.mubr.msk.f32.gmra.mrb[52].mxu0 %vm267_vm0, %v17316_v18  ;;  %14287 = vmatmul.mubr.msk.f32.gmra.mrb[52].mxu1 %vm267_vm0, %v17316_v18 }
  0x80   : > { %1430 = vmatprep.mubr.f32.mxu0 %v23533_v0  ;;  %1519 = vmatprep.mubr.f32.mxu1 %v23533_v0 }
  0x83   : > { %14284 = vmatmul.mubr.msk.f32.gmra.mrb[54].mxu0 %vm267_vm0, %v17327_v19  ;;  %14288 = vmatmul.mubr.msk.f32.gmra.mrb[54].mxu1 %vm267_vm0, %v17327_v19 }
  0x84   : > { %1590 = vmatprep.mubr.f32.mxu0 %v23533_v0  ;;  %1679 = vmatprep.mubr.f32.mxu1 %v23533_v0 }
  0x87   : > { %14289 = vmatmul.mubr.msk.f32.vlgmr.msra.gmra.mrb[56].mxu0 %vm267_vm0, %v17282_v6  ;;  %14293 = vmatmul.mubr.msk.f32.vlgmr.msra.gmra.mrb[56].mxu1 %vm267_vm0, %v17282_v6 }
  0x88   : > { %1596 = vmatprep.mubr.f32.mxu0 %v23533_v0  ;;  %1685 = vmatprep.mubr.f32.mxu1 %v23533_v0 }
  0x89   : > { %1705 = vmatpush1.msra.mxu0 %v231_v44  ;;  %1794 = vmatpush1.msra.mxu1 %v233_v45 }
  0x8a   : > { %1882 = vmatprep.subr.mxu0 %v236_v46  ;;  %1971 = vmatprep.subr.mxu1 %v238_v47 }
  0x8b   : > { %14290 = vmatmul.mubr.msk.f32.gmra.mrb[58].mxu0 %vm267_vm0, %v17303_v15  ;;  %14294 = vmatmul.mubr.msk.f32.gmra.mrb[58].mxu1 %vm267_vm0, %v17303_v15 }
  0x8c   : > { %1602 = vmatprep.mubr.f32.mxu0 %v23533_v0  ;;  %1691 = vmatprep.mubr.f32.mxu1 %v23533_v0 }
  0x8f   : > { %14291 = vmatmul.mubr.msk.f32.gmra.mrb[60].mxu0 %vm267_vm0, %v17316_v18  ;;  %14295 = vmatmul.mubr.msk.f32.gmra.mrb[60].mxu1 %vm267_vm0, %v17316_v18  ;;  %v17581_v50 = vpop.permute.xlu0 %249  ;;  %v17589_v60 = vpop.permute.xlu1 %259 }
  0x90   : > { %1608 = vmatprep.mubr.f32.mxu0 %v23533_v0  ;;  %1697 = vmatprep.mubr.f32.mxu1 %v23533_v0 }
  0x93   : > { %14292 = vmatmul.mubr.msk.f32.gmra.mrb[62].mxu0 %vm267_vm0, %v17327_v19  ;;  %14296 = vmatmul.mubr.msk.f32.gmra.mrb[62].mxu1 %vm267_vm0, %v17327_v19  ;;  %v17585_v57 = vpop.permute.xlu0 %254  ;;  %v17598_v17 = vpop.permute.xlu1 %264 }
  0x94   : > { %1768 = vmatprep.mubr.f32.mxu0 %v23533_v0  ;;  %1857 = vmatprep.mubr.f32.mxu1 %v23533_v0 }
  0x97   : > { %14297 = vmatmul.mubr.msk.f32.vlgmr.msra.gmra.mrb[64].mxu0 %vm267_vm0, %v17282_v6  ;;  %14301 = vmatmul.mubr.msk.f32.vlgmr.msra.gmra.mrb[64].mxu1 %vm267_vm0, %v17282_v6 }
  0x98   : > { %1774 = vmatprep.mubr.f32.mxu0 %v23533_v0  ;;  %1863 = vmatprep.mubr.f32.mxu1 %v23533_v0 }
  0x99   : > { %1883 = vmatpush1.msra.mxu0 %v235_v48  ;;  %1972 = vmatpush1.msra.mxu1 %v237_v49 }
  0x9b   : > { %14298 = vmatmul.mubr.msk.f32.gmra.mrb[66].mxu0 %vm267_vm0, %v17303_v15  ;;  %14302 = vmatmul.mubr.msk.f32.gmra.mrb[66].mxu1 %vm267_vm0, %v17303_v15 }
  0x9c   : > { %1780 = vmatprep.mubr.f32.mxu0 %v23533_v0  ;;  %1869 = vmatprep.mubr.f32.mxu1 %v23533_v0 }
  0x9f   : > { %14299 = vmatmul.mubr.msk.f32.gmra.mrb[68].mxu0 %vm267_vm0, %v17316_v18  ;;  %14303 = vmatmul.mubr.msk.f32.gmra.mrb[68].mxu1 %vm267_vm0, %v17316_v18 }
  0xa0   : > { %1786 = vmatprep.mubr.f32.mxu0 %v23533_v0  ;;  %1875 = vmatprep.mubr.f32.mxu1 %v23533_v0 }
  0xa3   : > { %14300 = vmatmul.mubr.msk.f32.gmra.mrb[70].mxu0 %vm267_vm0, %v17327_v19  ;;  %14304 = vmatmul.mubr.msk.f32.gmra.mrb[70].mxu1 %vm267_vm0, %v17327_v19 }
  0xa4   : > { %1946 = vmatprep.mubr.f32.mxu0 %v23533_v0  ;;  %2035 = vmatprep.mubr.f32.mxu1 %v23533_v0 }
  0xa7   : > { %14305 = vmatmul.mubr.msk.f32.vlgmr.msra.gmra.mrb[72].mxu0 %vm267_vm0, %v17282_v6  ;;  %14309 = vmatmul.mubr.msk.f32.vlgmr.msra.gmra.mrb[72].mxu1 %vm267_vm0, %v17282_v6 }
  0xa8   : > { %1952 = vmatprep.mubr.f32.mxu0 %v23533_v0  ;;  %2041 = vmatprep.mubr.f32.mxu1 %v23533_v0 }
  0xab   : > { %14306 = vmatmul.mubr.msk.f32.gmra.mrb[74].mxu0 %vm267_vm0, %v17303_v15  ;;  %14310 = vmatmul.mubr.msk.f32.gmra.mrb[74].mxu1 %vm267_vm0, %v17303_v15 }
  0xac   : > { %1958 = vmatprep.mubr.f32.mxu0 %v23533_v0  ;;  %2047 = vmatprep.mubr.f32.mxu1 %v23533_v0 }
  0xaf   : > { %14307 = vmatmul.mubr.msk.f32.gmra.mrb[76].mxu0 %vm267_vm0, %v17316_v18  ;;  %14311 = vmatmul.mubr.msk.f32.gmra.mrb[76].mxu1 %vm267_vm0, %v17316_v18 }
  0xb0   : > { %1964 = vmatprep.mubr.f32.mxu0 %v23533_v0  ;;  %2053 = vmatprep.mubr.f32.mxu1 %v23533_v0 }
  0xb3   : > { %14308 = vmatmul.mubr.msk.f32.gmra.mrb[78].mxu0 %vm267_vm0, %v17327_v19  ;;  %14312 = vmatmul.mubr.msk.f32.gmra.mrb[78].mxu1 %vm267_vm0, %v17327_v19 }
  0xb4   : > { %2637 = vmatprep.mubr.f32.mxu0 %v23533_v0  ;;  %2726 = vmatprep.mubr.f32.mxu1 %v23533_v0 }
  0xea   : > { %v346_v51 = vpop.f32.mrb[0].mxu0  ;;  %v435_v52 = vpop.f32.mrb[0].mxu1 }
  0xeb   : > { %v347_v53 = vadd.f32 %v346_v51, %v17581_v50  ;;  %v436_v54 = vadd.f32 %v435_v52, %v17581_v50  ;;  %v348_v55 = vpop.f32.mrb[1].mxu0  ;;  %v437_v56 = vpop.f32.mrb[1].mxu1 }
  0xec   : > { %v349_v58 = vadd.f32 %v348_v55, %v17581_v50  ;;  %v438_v59 = vadd.f32 %v437_v56, %v17581_v50 }
  0xed   : > { %15558 = vtanh.f32 %v347_v53 }
  0xee   : > { %15560 = vtanh.f32 %v436_v54  ;;  %v352_v61 = vpop.f32.mrb[2].mxu0  ;;  %v441_v62 = vpop.f32.mrb[2].mxu1 }
  0xef   : > { %15562 = vtanh.f32 %v349_v58  ;;  %v353_v63 = vadd.f32 %v352_v61, %v17585_v57  ;;  %v442_v2 = vadd.f32 %v441_v62, %v17585_v57  ;;  %v354_v6 = vpop.f32.mrb[3].mxu0  ;;  %v443_v7 = vpop.f32.mrb[3].mxu1 }
  0xf0   : > { %15564 = vtanh.f32 %v438_v59  ;;  %v355_v8 = vadd.f32 %v354_v6, %v17585_v57  ;;  %v444_v9 = vadd.f32 %v443_v7, %v17585_v57 }
  0xf1   : > { %15566 = vtanh.f32 %v353_v63 }
  0xf2   : > { %15568 = vtanh.f32 %v442_v2  ;;  %v358_v10 = vpop.f32.mrb[4].mxu0  ;;  %v447_v11 = vpop.f32.mrb[4].mxu1 }
  0xf3   : > { %15570 = vtanh.f32 %v355_v8  ;;  %v359_v12 = vadd.f32 %v358_v10, %v17589_v60  ;;  %v448_v13 = vadd.f32 %v447_v11, %v17589_v60  ;;  %v360_v14 = vpop.f32.mrb[5].mxu0  ;;  %v449_v15 = vpop.f32.mrb[5].mxu1 }
  0xf4   : > { %15572 = vtanh.f32 %v444_v9  ;;  %v361_v16 = vadd.f32 %v360_v14, %v17589_v60  ;;  %v450_v21 = vadd.f32 %v449_v15, %v17589_v60 }
  0xf5   : > { %15574 = vtanh.f32 %v359_v12 }
  0xf6   : > { %v364_v18 = vpop.f32.mrb[6].mxu0  ;;  %v453_v19 = vpop.f32.mrb[6].mxu1  ;;  %15576 = vtanh.f32 %v448_v13 }
  0xf7   : > { %v15559_v20 = vpop.eup %15558  ;;  %v365_v22 = vadd.f32 %v364_v18, %v17598_v17  ;;  %v454_v23 = vadd.f32 %v453_v19, %v17598_v17  ;;  %v366_v24 = vpop.f32.mrb[7].mxu0  ;;  %15578 = vtanh.f32 %v361_v16 }
  0xf8   : > { %v455_v25 = vpop.f32.mrb[7].mxu1  ;;  %v15561_v27 = vpop.eup %15560  ;;  %v367_v28 = vadd.f32 %v366_v24, %v17598_v17  ;;  %v2220_v30 = vmul.f32 0.5, %v15559_v20 }
  0xf9   : > { %v15563_v29 = vpop.eup %15562  ;;  %15580 = vtanh.f32 %v365_v22  ;;  %v456_v32 = vadd.f32 %v455_v25, %v17598_v17  ;;  %v2222_v40 = vmul.f32 0.5, %v15561_v27 }
  0xfa   : > { %v15565_v31 = vpop.eup %15564  ;;  %15582 = vtanh.f32 %v454_v23  ;;  %v524_v33 = vpop.f32.mrb[8].mxu0  ;;  %v17612_v42 = vadd.f32 0.5, %v2220_v30  ;;  %v2221_v48 = vmul.f32 0.5, %v15563_v29 }
  0xfb   : > { %v613_v34 = vpop.f32.mrb[8].mxu1  ;;  %v15567_v35 = vpop.eup %15566  ;;  %15584 = vtanh.f32 %v450_v21  ;;  %v525_v36 = vadd.f32 %v524_v33, %v17581_v50  ;;  %v17617_v55 = vadd.f32 0.5, %v2222_v40  ;;  %v2223_v58 = vmul.f32 0.5, %v15565_v31 }
  0xfc   : > { %v614_v37 = vadd.f32 %v613_v34, %v17581_v50  ;;  %v526_v38 = vpop.f32.mrb[9].mxu0  ;;  %v615_v39 = vpop.f32.mrb[9].mxu1  ;;  %15586 = vtanh.f32 %v367_v28  ;;  %v2260_v43 = vmul.f32 0.5, %v15567_v35  ;;  %v17627_v10 = vadd.f32 0.5, %v2221_v48 }
  0xfd   : > { %v15569_v1 = vpop.eup %15568  ;;  %v527_v4 = vadd.f32 %v526_v38, %v17581_v50  ;;  %15588 = vtanh.f32 %v525_v36  ;;  %v616_v51 = vadd.f32 %v615_v39, %v17581_v50  ;;  %v17632_v21 = vadd.f32 0.5, %v2223_v58 }
  0xfe   : > { %v15571_v41 = vpop.eup %15570  ;;  %v2262_v45 = vmul.f32 0.5, %v15569_v1  ;;  %15590 = vtanh.f32 %v456_v32  ;;  %v530_v46 = vpop.f32.mrb[10].mxu0  ;;  %v17620_v61 = vadd.f32 0.5, %v2260_v43 }
  0xff   : > { %v15573_v44 = vpop.eup %15572  ;;  %v619_v47 = vpop.f32.mrb[10].mxu1  ;;  %v2261_v49 = vmul.f32 0.5, %v15571_v41  ;;  %15592 = vtanh.f32 %v614_v37  ;;  %v531_v52 = vadd.f32 %v530_v46, %v17585_v57 }
 0x100   : > { %v620_v3 = vadd.f32 %v619_v47, %v17585_v57  ;;  %v532_v5 = vpop.f32.mrb[11].mxu0  ;;  %v621_v53 = vpop.f32.mrb[11].mxu1  ;;  %15594 = vtanh.f32 %v527_v4  ;;  %v2263_v63 = vmul.f32 0.5, %v15573_v44  ;;  %v17624_v6 = vadd.f32 0.5, %v2262_v45 }
 0x101   : > { %v15575_v54 = vpop.eup %15574  ;;  %v533_v56 = vadd.f32 %v532_v5, %v17585_v57  ;;  %15596 = vtanh.f32 %v531_v52  ;;  %v17622_v62 = vadd.f32 0.5, %v2261_v49  ;;  %v622_v7 = vadd.f32 %v621_v53, %v17585_v57 }
 0x102   : > { %v15577_v59 = vpop.eup %15576  ;;  %15598 = vtanh.f32 %v620_v3  ;;  %v536_v8 = vpop.f32.mrb[12].mxu0  ;;  %v2300_v12 = vmul.f32 0.5, %v15575_v54  ;;  %v17636_v24 = vadd.f32 0.5, %v2263_v63  ;;  %v14733_v25 = vpack.c.bf16 %v17620_v61, %v17612_v42 }
 0x103   : > { %v15579_v2 = vpop.eup %15578  ;;  %v625_v9 = vpop.f32.mrb[12].mxu1  ;;  %15600 = vtanh.f32 %v616_v51  ;;  %v537_v13 = vadd.f32 %v536_v8, %v17589_v60  ;;  %v2302_v19 = vmul.f32 0.5, %v15577_v59  ;;  %v14731_v23 = vpack.c.bf16 %v17622_v62, %v17627_v10 }
 0x104   : > { %v15581_v11 = vpop.eup %15580  ;;  %v626_v14 = vadd.f32 %v625_v9, %v17589_v60  ;;  %v538_v15 = vpop.f32.mrb[13].mxu0  ;;  %15602 = vtanh.f32 %v533_v56  ;;  %v14739_v33 = vpack.c.bf16 %v17636_v24, %v17632_v21  ;;  %v14741_v34 = vpack.c.bf16 %v17624_v6, %v17617_v55 }
 0x105   : > { %v627_v16 = vpop.f32.mrb[13].mxu1  ;;  %v15583_v18 = vpop.eup %15582  ;;  %v539_v20 = vadd.f32 %v538_v15, %v17589_v60  ;;  %15604 = vtanh.f32 %v537_v13  ;;  %v2340_v27 = vmul.f32 0.5, %v15581_v11  ;;  %14732 = vmatprep.subr.bf16.mxu0 %v14731_v23  ;;  %v2301_v40 = vmul.f32 0.5, %v15579_v2 }
 0x106   : > { %v15585_v22 = vpop.eup %15584  ;;  %v2342_v28 = vmul.f32 0.5, %v15583_v18  ;;  %15606 = vtanh.f32 %v622_v7  ;;  %v628_v29 = vadd.f32 %v627_v16, %v17589_v60  ;;  %v542_v30 = vpop.f32.mrb[14].mxu0  ;;  %14734 = vmatpush1.bf16.msra.mxu0 %v14733_v25  ;;  %v17647_v41 = vadd.f32 0.5, %v2300_v12  ;;  %14740 = vmatprep.subr.bf16.mxu1 %v14739_v33 }
 0x107   : > { %v15587_v26 = vpop.eup %15586  ;;  %v631_v31 = vpop.f32.mrb[14].mxu1  ;;  %15608 = vtanh.f32 %v626_v14  ;;  %v543_v35 = vadd.f32 %v542_v30, %v17598_v17  ;;  %v17652_v46 = vadd.f32 0.5, %v2302_v19  ;;  %v17654_v47 = vadd.f32 0.5, %v2340_v27  ;;  %14742 = vmatpush1.bf16.msra.mxu1 %v14741_v34 }
 0x108   : > { %v15589_v32 = vpop.eup %15588  ;;  %v544_v36 = vpop.f32.mrb[15].mxu0  ;;  %15610 = vtanh.f32 %v539_v20  ;;  %v632_v1 = vadd.f32 %v631_v31, %v17598_v17  ;;  %v2341_v44 = vmul.f32 0.5, %v15587_v26  ;;  %v17657_v3 = vadd.f32 0.5, %v2342_v28 }
 0x109   : > { %v633_v37 = vpop.f32.mrb[15].mxu1  ;;  %v15591_v38 = vpop.eup %15590  ;;  %v2224_v39 = vmul.f32 0.5, %v15589_v32  ;;  %15612 = vtanh.f32 %v543_v35  ;;  %v545_v43 = vadd.f32 %v544_v36, %v17598_v17  ;;  %v2303_v56 = vmul.f32 0.5, %v15585_v22 }
 0x10a   : > { %v15593_v4 = vpop.eup %15592  ;;  %15614 = vtanh.f32 %v632_v1  ;;  %v634_v48 = vadd.f32 %v633_v37, %v17598_v17  ;;  %v702_v49 = vpop.f32.mrb[16].mxu0  ;;  %23845 = vst [vmem:[#allocation2_spill] sm:$0xff] %v17657_v3  ;;  %v17663_v7 = vadd.f32 0.5, %v2301_v40  ;;  %v17666_v11 = vadd.f32 0.5, %v2341_v44  ;;  %v17693_v1 = vld [vmem:[%s23528_s2] sm:$0xff] }
 0x10b   : > { %v17650_v45 = vpop.eup %15594  ;;  %v791_v51 = vpop.f32.mrb[16].mxu1  ;;  %15616 = vtanh.f32 %v628_v29  ;;  %v703_v5 = vadd.f32 %v702_v49, %v17581_v50  ;;  %v17660_v59 = vadd.f32 0.5, %v2224_v39  ;;  %v2226_v63 = vmul.f32 0.5, %v15593_v4 }
 0x10c   : > { %v15597_v52 = vpop.eup %15596  ;;  %v704_v53 = vpop.f32.mrb[17].mxu0  ;;  %v792_v2 = vadd.f32 %v791_v51, %v17581_v50  ;;  %23847 = vst [vmem:[#allocation4_spill] sm:$0xff] %v17663_v7  ;;  %15618 = vtanh.f32 %v545_v43  ;;  %23848 = vst [vmem:[#allocation5_spill] sm:$0xff] %v17666_v11  ;;  %v2343_v12 = vmul.f32 0.5, %v15591_v38  ;;  %v14735_v22 = vpack.c.bf16 %v17666_v11, %v17663_v7 }
 0x10d   : > { %v793_v54 = vpop.f32.mrb[17].mxu1  ;;  %v15599_v58 = vpop.eup %15598  ;;  %23846 = vst [vmem:[#allocation3_spill] sm:$0xff] %v17660_v59  ;;  %v705_v9 = vadd.f32 %v704_v53, %v17581_v50  ;;  %v2264_v14 = vmul.f32 0.5, %v15597_v52  ;;  %15620 = vtanh.f32 %v634_v48  ;;  %v17671_v23 = vadd.f32 0.5, %v2303_v56 }
 0x10e   : > { %v15601_v8 = vpop.eup %15600  ;;  %v2266_v15 = vmul.f32 0.5, %v15599_v58  ;;  %v794_v16 = vadd.f32 %v793_v54, %v17581_v50  ;;  %v708_v18 = vpop.f32.mrb[18].mxu0  ;;  %15622 = vtanh.f32 %v703_v5  ;;  %v17673_v25 = vadd.f32 0.5, %v2343_v12  ;;  %14736 = vmatprep.subr.bf16.mxu0 %v14735_v22 }
 0x10f   : > { %v15603_v13 = vpop.eup %15602  ;;  %v797_v19 = vpop.f32.mrb[18].mxu1  ;;  %23849 = vst [vmem:[#allocation6_spill] sm:$0xff] %v17671_v23  ;;  %15624 = vtanh.f32 %v792_v2  ;;  %v14737_v30 = vpack.c.bf16 %v17654_v47, %v17647_v41  ;;  %v709_v31 = vadd.f32 %v708_v18, %v17585_v57  ;;  %v17684_v37 = vadd.f32 0.5, %v2226_v63 }
 0x110   : > { %v15605_v20 = vpop.eup %15604  ;;  %23850 = vst [vmem:[#allocation7_spill] sm:$0xff] %v17673_v25  ;;  %v710_v26 = vpop.f32.mrb[19].mxu0  ;;  %15626 = vtanh.f32 %v705_v9  ;;  %v14743_v33 = vpack.c.bf16 %v17673_v25, %v17671_v23  ;;  %v798_v34 = vadd.f32 %v797_v19, %v17585_v57  ;;  %v17686_v38 = vadd.f32 0.5, %v2264_v14  ;;  %v17713_v14 = vld [vmem:[%s23528_s2 + $0x8] sm:$0xff] }
 0x111   : > { %v799_v27 = vpop.f32.mrb[19].mxu1  ;;  %v15607_v28 = vpop.eup %15606  ;;  %v2304_v29 = vmul.f32 0.5, %v15605_v20  ;;  %v711_v35 = vadd.f32 %v710_v26, %v17585_v57  ;;  %23851 = vst [vmem:[#allocation8_spill] sm:$0xff] %v17684_v37  ;;  %14738 = vmatpush1.bf16.msra.mxu0 %v14737_v30  ;;  %v14745_v39 = vpack.c.bf16 %v17657_v3, %v17652_v46  ;;  %15628 = vtanh.f32 %v709_v31 }
 0x112   : > { %v15609_v32 = vpop.eup %15608  ;;  %23852 = vst [vmem:[#allocation9_spill] sm:$0xff] %v17686_v38  ;;  %v714_v40 = vpop.f32.mrb[20].mxu0  ;;  %v17695_v44 = vadd.f32 0.5, %v2266_v15  ;;  %14744 = vmatprep.subr.bf16.mxu1 %v14743_v33  ;;  %15630 = vtanh.f32 %v798_v34  ;;  %v800_v48 = vadd.f32 %v799_v27, %v17585_v57  ;;  %v2225_v52 = vmul.f32 0.5, %v17650_v45 }
 0x113   : > { %v17682_v36 = vpop.eup %15610  ;;  %v803_v4 = vpop.f32.mrb[20].mxu1  ;;  %v17699_v53 = vadd.f32 0.5, %v2304_v29  ;;  %v2306_v54 = vmul.f32 0.5, %v15609_v32  ;;  %15632 = vtanh.f32 %v794_v16  ;;  %14746 = vmatpush1.bf16.msra.mxu1 %v14745_v39  ;;  %v715_v56 = vadd.f32 %v714_v40, %v17589_v60 }
 0x114   : > { %v15613_v43 = vpop.eup %15612  ;;  %23853 = vst [vmem:[#allocation10_spill] sm:$0xff] %v17695_v44  ;;  %v716_v49 = vpop.f32.mrb[21].mxu0  ;;  %15634 = vtanh.f32 %v711_v35  ;;  %14313 = vmatmul.mubr.msk.f32.vlgmr.msra.gmra.mrb[80].mxu0 %vm2560_vm1, %v17693_v1  ;;  %v804_v2 = vadd.f32 %v803_v4, %v17589_v60  ;;  %v2265_v9 = vmul.f32 0.5, %v15603_v13  ;;  %v2227_v15 = vmul.f32 0.5, %v15601_v8 }
 0x115   : > { %v805_v51 = vpop.f32.mrb[21].mxu1  ;;  %v15615_v5 = vpop.eup %15614  ;;  %23854 = vst [vmem:[#allocation11_spill] sm:$0xff] %v17699_v53  ;;  %v2344_v63 = vmul.f32 0.5, %v15613_v43  ;;  %2643 = vmatprep.mubr.f32.mxu0 %v23533_v0  ;;  %v717_v45 = vadd.f32 %v716_v49, %v17589_v60  ;;  %v2267_v16 = vmul.f32 0.5, %v15607_v28  ;;  %15636 = vtanh.f32 %v800_v48 }
 0x116   : > { %v17702_v58 = vpop.eup %15616  ;;  %v806_v12 = vadd.f32 %v805_v51, %v17589_v60  ;;  %v720_v18 = vpop.f32.mrb[22].mxu0  ;;  %v2346_v22 = vmul.f32 0.5, %v15615_v5  ;;  %14317 = vmatmul.mubr.msk.f32.vlgmr.msra.gmra.mrb[80].mxu1 %vm2560_vm1, %v17693_v1  ;;  %v17717_v13 = vadd.f32 0.5, %v2225_v52  ;;  %v17719_v26 = vadd.f32 0.5, %v2265_v9 }
 0x117   : > { %v809_v19 = vpop.f32.mrb[22].mxu1  ;;  %v15619_v20 = vpop.eup %15618  ;;  %v17721_v31 = vadd.f32 0.5, %v2306_v54  ;;  %15638 = vtanh.f32 %v715_v56  ;;  %2732 = vmatprep.mubr.f32.mxu1 %v23533_v0  ;;  %v17724_v8 = vadd.f32 0.5, %v2227_v15  ;;  %v17726_v28 = vadd.f32 0.5, %v2267_v16  ;;  %v17753_v56 = vld [vmem:[%s23528_s2 + $0x10] sm:$0xff] }
 0x118   : > { %23855 = vst [vmem:[#allocation12_spill] sm:$0xff] %v17717_v13  ;;  %23856 = vst [vmem:[#allocation13_spill] sm:$0xff] %v17719_v26  ;;  %v722_v27 = vpop.f32.mrb[23].mxu0  ;;  %v811_v29 = vpop.f32.mrb[23].mxu1  ;;  %v17728_v33 = vadd.f32 0.5, %v2344_v63  ;;  %15640 = vtanh.f32 %v804_v2  ;;  %14314 = vmatmul.mubr.msk.f32.gmra.mrb[82].mxu0 %vm2560_vm1, %v17713_v14  ;;  %v14747_v34 = vpack.c.bf16 %v17719_v26, %v17717_v13  ;;  %v14749_v35 = vpack.c.bf16 %v17686_v38, %v17660_v59 }
 0x119   : > { %v15621_v30 = vpop.eup %15620  ;;  %23857 = vst [vmem:[#allocation14_spill] sm:$0xff] %v17721_v31  ;;  %23858 = vst [vmem:[#allocation15_spill] sm:$0xff] %v17724_v8  ;;  %15642 = vtanh.f32 %v717_v45  ;;  %v14755_v40 = vpack.c.bf16 %v17726_v28, %v17724_v8  ;;  %v721_v4 = vadd.f32 %v720_v18, %v17598_v17  ;;  %v810_v43 = vadd.f32 %v809_v19, %v17598_v17 }
 0x11a   : > { %23859 = vst [vmem:[#allocation16_spill] sm:$0xff] %v17726_v28  ;;  %v15623_v32 = vpop.eup %15622  ;;  %23860 = vst [vmem:[#allocation17_spill] sm:$0xff] %v17728_v33  ;;  %2649 = vmatprep.mubr.f32.mxu0 %v23533_v0  ;;  %v880_v48 = vpop.f32.mrb[24].mxu0  ;;  %v17743_v52 = vadd.f32 0.5, %v2346_v22  ;;  %15644 = vtanh.f32 %v806_v12  ;;  %14318 = vmatmul.mubr.msk.f32.gmra.mrb[82].mxu1 %vm2560_vm1, %v17713_v14  ;;  %v14757_v5 = vpack.c.bf16 %v17695_v44, %v17684_v37  ;;  %v2305_v19 = vmul.f32 0.5, %v17682_v36 }
 0x11b   : > { %v15625_v39 = vpop.eup %15624  ;;  %v969_v49 = vpop.f32.mrb[24].mxu1  ;;  %14748 = vmatprep.subr.bf16.mxu0 %v14747_v34  ;;  %v723_v54 = vadd.f32 %v722_v27, %v17598_v17  ;;  %v2228_v45 = vmul.f32 0.5, %v15623_v32  ;;  %14756 = vmatprep.subr.bf16.mxu1 %v14755_v40  ;;  %15646 = vtanh.f32 %v721_v4  ;;  %v812_v12 = vadd.f32 %v811_v29, %v17598_v17 }
 0x11c   : > { %v17741_v51 = vpop.eup %15626  ;;  %23861 = vst [vmem:[#allocation18_spill] sm:$0xff] %v17743_v52  ;;  %v882_v63 = vpop.f32.mrb[25].mxu0  ;;  %14750 = vmatpush1.bf16.msra.mxu0 %v14749_v35  ;;  %v881_v15 = vadd.f32 %v880_v48, %v17581_v50  ;;  %14758 = vmatpush1.bf16.msra.mxu1 %v14757_v5  ;;  %15648 = vtanh.f32 %v810_v43  ;;  %v970_v18 = vadd.f32 %v969_v49, %v17581_v50  ;;  %v2345_v22 = vmul.f32 0.5, %v15619_v20  ;;  %v17773_v20 = vld [vmem:[%s23528_s2 + $0x18] sm:$0xff] }
 0x11d   : > { %v971_v2 = vpop.f32.mrb[25].mxu1  ;;  %v15629_v9 = vpop.eup %15628  ;;  %2738 = vmatprep.mubr.f32.mxu1 %v23533_v0  ;;  %14315 = vmatmul.mubr.msk.f32.gmra.mrb[84].mxu0 %vm2560_vm1, %v17753_v56  ;;  %v883_v29 = vadd.f32 %v882_v63, %v17581_v50  ;;  %v2307_v34 = vmul.f32 0.5, %v17702_v58  ;;  %v2347_v35 = vmul.f32 0.5, %v15621_v30  ;;  %15650 = vtanh.f32 %v723_v54 }
 0x11e   : > { %v15631_v16 = vpop.eup %15630  ;;  %v2268_v32 = vmul.f32 0.5, %v15629_v9  ;;  %v886_v40 = vpop.f32.mrb[26].mxu0  ;;  %14319 = vmatmul.mubr.msk.f32.gmra.mrb[84].mxu1 %vm2560_vm1, %v17753_v56  ;;  %2655 = vmatprep.mubr.f32.mxu0 %v23533_v0  ;;  %v972_v36 = vadd.f32 %v971_v2, %v17581_v50  ;;  %v17775_v48 = vadd.f32 0.5, %v2305_v19  ;;  %v17777_v58 = vadd.f32 0.5, %v2345_v22 }
 0x11f   : > { %v17760_v27 = vpop.eup %15632  ;;  %v975_v4 = vpop.f32.mrb[26].mxu1  ;;  %v2270_v5 = vmul.f32 0.5, %v15631_v16  ;;  %15652 = vtanh.f32 %v881_v15  ;;  %2744 = vmatprep.mubr.f32.mxu1 %v23533_v0  ;;  %v17780_v54 = vadd.f32 0.5, %v2307_v34  ;;  %v17782_v63 = vadd.f32 0.5, %v2347_v35 }
 0x120   : > { %v15635_v43 = vpop.eup %15634  ;;  %23862 = vst [vmem:[#allocation19_spill] sm:$0xff] %v17775_v48  ;;  %23863 = vst [vmem:[#allocation20_spill] sm:$0xff] %v17777_v58  ;;  %v888_v30 = vpop.f32.mrb[27].mxu0  ;;  %v17784_v9 = vadd.f32 0.5, %v2228_v45  ;;  %v2230_v28 = vmul.f32 0.5, %v15625_v39  ;;  %15654 = vtanh.f32 %v970_v18  ;;  %v14751_v19 = vpack.c.bf16 %v17777_v58, %v17775_v48 }
 0x121   : > { %v977_v49 = vpop.f32.mrb[27].mxu1  ;;  %23864 = vst [vmem:[#allocation21_spill] sm:$0xff] %v17780_v54  ;;  %23865 = vst [vmem:[#allocation22_spill] sm:$0xff] %v17782_v63  ;;  %v15637_v2 = vpop.eup %15636  ;;  %v17788_v8 = vadd.f32 0.5, %v2268_v32  ;;  %15656 = vtanh.f32 %v812_v12  ;;  %14316 = vmatmul.mubr.msk.f32.gmra.mrb[86].mxu0 %vm2560_vm1, %v17773_v20  ;;  %v14759_v15 = vpack.c.bf16 %v17782_v63, %v17780_v54  ;;  %v14753_v16 = vpack.c.bf16 %v17728_v33, %v17699_v53 }
 0x122   : > { %23866 = vst [vmem:[#allocation23_spill] sm:$0xff] %v17784_v9  ;;  %v15639_v22 = vpop.eup %15638  ;;  %v892_v45 = vpop.f32.mrb[28].mxu0  ;;  %15658 = vtanh.f32 %v883_v29  ;;  %14320 = vmatmul.mubr.msk.f32.gmra.mrb[86].mxu1 %vm2560_vm1, %v17773_v20  ;;  %14752 = vmatprep.subr.bf16.mxu0 %v14751_v19  ;;  %v14761_v12 = vpack.c.bf16 %v17743_v52, %v17721_v31  ;;  %v887_v18 = vadd.f32 %v886_v40, %v17585_v57  ;;  %v17804_v54 = vadd.f32 0.5, %v2270_v5 }
 0x123   : > { %23867 = vst [vmem:[#allocation24_spill] sm:$0xff] %v17788_v8  ;;  %v981_v34 = vpop.f32.mrb[28].mxu1  ;;  %v15641_v39 = vpop.eup %15640  ;;  %v976_v32 = vadd.f32 %v975_v4, %v17585_v57  ;;  %15660 = vtanh.f32 %v972_v36  ;;  %14760 = vmatprep.subr.bf16.mxu1 %v14759_v15  ;;  %14754 = vmatpush1.bf16.msra.mxu0 %v14753_v16  ;;  %v889_v29 = vadd.f32 %v888_v30, %v17585_v57  ;;  %v2308_v48 = vmul.f32 0.5, %v15639_v22 }
 0x124   : > { %v894_v35 = vpop.f32.mrb[29].mxu0  ;;  %v983_v0 = vpop.f32.mrb[29].mxu1  ;;  %23868 = vst [vmem:[#allocation25_spill] sm:$0xff] %v17804_v54  ;;  %v978_v19 = vadd.f32 %v977_v49, %v17585_v57  ;;  %14762 = vmatpush1.bf16.msra.mxu1 %v14761_v12  ;;  %15662 = vtanh.f32 %v887_v18  ;;  %v23869_v40 = vmov 0.0   ;;  %v893_v4 = vadd.f32 %v892_v45, %v17589_v60 }
 0x125   : > { %v17802_v63 = vpop.eup %15642  ;;  %2815 = vmatprep.mubr.f32.mxu0 %v23869_v40  ;;  %v982_v26 = vadd.f32 %v981_v34, %v17589_v60  ;;  %15664 = vtanh.f32 %v976_v32  ;;  %2904 = vmatprep.mubr.f32.mxu1 %v23869_v40  ;;  %v2229_v36 = vmul.f32 0.5, %v17741_v51  ;;  %v2269_v30 = vmul.f32 0.5, %v15635_v43 }
 0x126   : > { %v17808_v58 = vpop.eup %15644  ;;  %v2231_v49 = vmul.f32 0.5, %v17760_v27  ;;  %v898_v15 = vpop.f32.mrb[30].mxu0  ;;  %15666 = vtanh.f32 %v889_v29  ;;  %14321 = vmatmul.mubr.msk.f32.vlgmr.msra.gmra.mrb[88].mxu0 %vm2560_vm1, %v17693_v1  ;;  %v895_v45 = vadd.f32 %v894_v35, %v17589_v60  ;;  %v984_v34 = vadd.f32 %v983_v0, %v17589_v60 }
 0x127   : > { %v15647_v5 = vpop.eup %15646  ;;  %v987_v16 = vpop.f32.mrb[30].mxu1  ;;  %v2271_v12 = vmul.f32 0.5, %v15637_v2  ;;  %15668 = vtanh.f32 %v978_v19  ;;  %14325 = vmatmul.mubr.msk.f32.vlgmr.msra.gmra.mrb[88].mxu1 %vm2560_vm1, %v17693_v1  ;;  %2821 = vmatprep.mubr.f32.mxu0 %v23869_v40  ;;  %v17823_v51 = vadd.f32 0.5, %v2229_v36  ;;  %v17825_v27 = vadd.f32 0.5, %v2269_v30 }
 0x128   : > { %v15649_v22 = vpop.eup %15648  ;;  %v900_v18 = vpop.f32.mrb[31].mxu0  ;;  %v2348_v13 = vmul.f32 0.5, %v15647_v5  ;;  %15670 = vtanh.f32 %v893_v4  ;;  %2910 = vmatprep.mubr.f32.mxu1 %v23869_v40  ;;  %v17828_v0 = vadd.f32 0.5, %v2231_v49  ;;  %v17832_v19 = vadd.f32 0.5, %v2230_v28 }
 0x129   : > { %v989_v32 = vpop.f32.mrb[31].mxu1  ;;  %23870 = vst [vmem:[#allocation26_spill] sm:$0xff] %v17823_v51  ;;  %23871 = vst [vmem:[#allocation27_spill] sm:$0xff] %v17825_v27  ;;  %v15651_v43 = vpop.eup %15650  ;;  %v2350_v29 = vmul.f32 0.5, %v15649_v22  ;;  %v17830_v2 = vadd.f32 0.5, %v2271_v12  ;;  %v17834_v5 = vmul.f32 0.5, %v15641_v39  ;;  %15672 = vtanh.f32 %v982_v26 }
 0x12a   : > { %23872 = vst [vmem:[#allocation28_spill] sm:$0xff] %v17828_v0  ;;  %v15653_v35 = vpop.eup %15652  ;;  %23874 = vst [vmem:[#allocation30_spill] sm:$0xff] %v17832_v19  ;;  %v14763_v36 = vpack.c.bf16 %v17825_v27, %v17823_v51  ;;  %v1058_v30 = vpop.f32.mrb[32].mxu0  ;;  %15674 = vtanh.f32 %v895_v45  ;;  %14322 = vmatmul.mubr.msk.f32.gmra.mrb[90].mxu0 %vm2560_vm1, %v17713_v14  ;;  %v14765_v28 = vpack.c.bf16 %v17788_v8, %v17784_v9  ;;  %v17853_v51 = vadd.f32 0.5, %v2308_v48 }
 0x12b   : > { %23873 = vst [vmem:[#allocation29_spill] sm:$0xff] %v17830_v2  ;;  %v1147_v52 = vpop.f32.mrb[32].mxu1  ;;  %v15655_v33 = vpop.eup %15654  ;;  %v14771_v4 = vpack.c.bf16 %v17830_v2, %v17828_v0  ;;  %v899_v39 = vadd.f32 %v898_v15, %v17598_v17  ;;  %15676 = vtanh.f32 %v984_v34  ;;  %14326 = vmatmul.mubr.msk.f32.gmra.mrb[90].mxu1 %vm2560_vm1, %v17713_v14  ;;  %v14773_v45 = vpack.c.bf16 %v17804_v54, %v17832_v19 }
 0x12c   : > { %v1060_v49 = vpop.f32.mrb[33].mxu0  ;;  %v1149_v26 = vpop.f32.mrb[33].mxu1  ;;  %14764 = vmatprep.subr.bf16.mxu0 %v14763_v36  ;;  %v988_v12 = vadd.f32 %v987_v16, %v17598_v17  ;;  %v901_v2 = vadd.f32 %v900_v18, %v17598_v17  ;;  %23875 = vst [vmem:[#allocation31_spill] sm:$0xff] %v17853_v51  ;;  %v17855_v15 = vadd.f32 0.5, %v2348_v13  ;;  %v17857_v27 = vadd.f32 0.5, %v2350_v29  ;;  %2827 = vmatprep.mubr.f32.mxu0 %v23869_v40 }
 0x12d   : > { %v15657_v22 = vpop.eup %15656  ;;  %14772 = vmatprep.subr.bf16.mxu1 %v14771_v4  ;;  %14766 = vmatpush1.bf16.msra.mxu0 %v14765_v28  ;;  %15678 = vtanh.f32 %v899_v39  ;;  %v2232_v36 = vmul.f32 0.5, %v15653_v35  ;;  %v2234_v8 = vmul.f32 0.5, %v15655_v33  ;;  %v990_v16 = vadd.f32 %v989_v32, %v17598_v17 }
 0x12e   : > { %v17851_v0 = vpop.eup %15658  ;;  %23876 = vst [vmem:[#allocation32_spill] sm:$0xff] %v17855_v15  ;;  %23877 = vst [vmem:[#allocation33_spill] sm:$0xff] %v17857_v27  ;;  %14774 = vmatpush1.bf16.msra.mxu1 %v14773_v45  ;;  %15680 = vtanh.f32 %v988_v12  ;;  %v1064_v18 = vpop.f32.mrb[34].mxu0  ;;  %2916 = vmatprep.mubr.f32.mxu1 %v23869_v40  ;;  %v1059_v13 = vadd.f32 %v1058_v30, %v17581_v50  ;;  %v1148_v29 = vadd.f32 %v1147_v52, %v17581_v50 }
 0x12f   : > { %v17859_v34 = vpop.eup %15660  ;;  %v1153_v48 = vpop.f32.mrb[34].mxu1  ;;  %14323 = vmatmul.mubr.msk.f32.gmra.mrb[92].mxu0 %vm2560_vm1, %v17753_v56  ;;  %v2309_v33 = vmul.f32 0.5, %v17802_v63  ;;  %v2349_v35 = vmul.f32 0.5, %v15651_v43  ;;  %15682 = vtanh.f32 %v901_v2  ;;  %14327 = vmatmul.mubr.msk.f32.gmra.mrb[92].mxu1 %vm2560_vm1, %v17753_v56  ;;  %v1061_v32 = vadd.f32 %v1060_v49, %v17581_v50 }
 0x130   : > { %v15663_v54 = vpop.eup %15662  ;;  %v1066_v4 = vpop.f32.mrb[35].mxu0  ;;  %2833 = vmatprep.mubr.f32.mxu0 %v23869_v40  ;;  %v2311_v45 = vmul.f32 0.5, %v17808_v58  ;;  %v2351_v12 = vmul.f32 0.5, %v15657_v22  ;;  %2922 = vmatprep.mubr.f32.mxu1 %v23869_v40  ;;  %v1150_v52 = vadd.f32 %v1149_v26, %v17581_v50  ;;  %15684 = vtanh.f32 %v990_v16 }
 0x131   : > { %v1155_v28 = vpop.f32.mrb[35].mxu1  ;;  %v15665_v39 = vpop.eup %15664  ;;  %v2272_v19 = vmul.f32 0.5, %v15663_v54  ;;  %v17876_v63 = vadd.f32 0.5, %v2309_v33  ;;  %v17878_v43 = vadd.f32 0.5, %v2349_v35  ;;  %v17885_v54 = vadd.f32 0.5, %v17834_v5 }
 0x132   : > { %v15667_v30 = vpop.eup %15666  ;;  %v2274_v9 = vmul.f32 0.5, %v15665_v39  ;;  %v17880_v31 = vadd.f32 0.5, %v2311_v45  ;;  %v17882_v53 = vadd.f32 0.5, %v2351_v12  ;;  %v1070_v49 = vpop.f32.mrb[36].mxu0  ;;  %v17887_v44 = vadd.f32 0.5, %v2232_v36 }
 0x133   : > { %23878 = vst [vmem:[#allocation34_spill] sm:$0xff] %v17876_v63  ;;  %23879 = vst [vmem:[#allocation35_spill] sm:$0xff] %v17878_v43  ;;  %v15669_v2 = vpop.eup %15668  ;;  %v1159_v58 = vpop.f32.mrb[36].mxu1  ;;  %15686 = vtanh.f32 %v1059_v13  ;;  %14324 = vmatmul.mubr.msk.f32.gmra.mrb[94].mxu0 %vm2560_vm1, %v17773_v20  ;;  %v14767_v26 = vpack.c.bf16 %v17878_v43, %v17876_v63  ;;  %v17893_v39 = vadd.f32 0.5, %v2234_v8  ;;  %14328 = vmatmul.mubr.msk.f32.gmra.mrb[94].mxu1 %vm2560_vm1, %v17773_v20 }
 0x134   : > { %23880 = vst [vmem:[#allocation36_spill] sm:$0xff] %v17880_v31  ;;  %23881 = vst [vmem:[#allocation37_spill] sm:$0xff] %v17882_v53  ;;  %v15671_v22 = vpop.eup %15670  ;;  %v1072_v16 = vpop.f32.mrb[37].mxu0  ;;  %15688 = vtanh.f32 %v1148_v29  ;;  %v14775_v5 = vpack.c.bf16 %v17882_v53, %v17880_v31  ;;  %v14769_v36 = vpack.c.bf16 %v17855_v15, %v17853_v51  ;;  %2993 = vmatprep.mubr.f32.mxu0 %v23869_v40  ;;  %3082 = vmatprep.mubr.f32.mxu1 %v23869_v40 }
 0x135   : > { %23882 = vst [vmem:[#allocation38_spill] sm:$0xff] %v17885_v54  ;;  %23883 = vst [vmem:[#allocation39_spill] sm:$0xff] %v17887_v44  ;;  %v1161_v33 = vpop.f32.mrb[37].mxu1  ;;  %v15673_v35 = vpop.eup %15672  ;;  %15690 = vtanh.f32 %v1061_v32  ;;  %14768 = vmatprep.subr.bf16.mxu0 %v14767_v26  ;;  %v14777_v8 = vpack.c.bf16 %v17857_v27, %v17885_v54  ;;  %v1065_v29 = vadd.f32 %v1064_v18, %v17585_v57  ;;  %v17911_v53 = vadd.f32 0.5, %v2272_v19 }
 0x136   : > { %23884 = vst [vmem:[#allocation40_spill] sm:$0xff] %v17893_v39  ;;  %v17902_v13 = vpop.eup %15674  ;;  %v1154_v45 = vadd.f32 %v1153_v48, %v17585_v57  ;;  %v17913_v31 = vadd.f32 0.5, %v2274_v9  ;;  %15692 = vtanh.f32 %v1150_v52  ;;  %14776 = vmatprep.subr.bf16.mxu1 %v14775_v5  ;;  %14770 = vmatpush1.bf16.msra.mxu0 %v14769_v36  ;;  %v1067_v32 = vadd.f32 %v1066_v4, %v17585_v57  ;;  %v1076_v26 = vpop.f32.mrb[38].mxu0 }
 0x137   : > { %v17909_v12 = vpop.eup %15676  ;;  %23885 = vst [vmem:[#allocation41_spill] sm:$0xff] %v17911_v53  ;;  %v1165_v43 = vpop.f32.mrb[38].mxu1  ;;  %v2312_v27 = vmul.f32 0.5, %v15671_v22  ;;  %14778 = vmatpush1.bf16.msra.mxu1 %v14777_v8  ;;  %15694 = vtanh.f32 %v1065_v29  ;;  %v1156_v18 = vadd.f32 %v1155_v28, %v17585_v57  ;;  %v1071_v48 = vadd.f32 %v1070_v49, %v17589_v60 }
 0x138   : > { %23886 = vst [vmem:[#allocation42_spill] sm:$0xff] %v17913_v31  ;;  %v15679_v63 = vpop.eup %15678  ;;  %v1078_v15 = vpop.f32.mrb[39].mxu0  ;;  %15696 = vtanh.f32 %v1154_v45  ;;  %v1160_v9 = vadd.f32 %v1159_v58, %v17589_v60  ;;  %v2233_v52 = vmul.f32 0.5, %v17851_v0  ;;  %v2273_v5 = vmul.f32 0.5, %v15667_v30 }
 0x139   : > { %v1167_v19 = vpop.f32.mrb[39].mxu1  ;;  %v15681_v54 = vpop.eup %15680  ;;  %v2352_v4 = vmul.f32 0.5, %v15679_v63  ;;  %14329 = vmatmul.mubr.msk.f32.vlgmr.msra.gmra.mrb[96].mxu0 %vm2560_vm1, %v17693_v1  ;;  %v1073_v22 = vadd.f32 %v1072_v16, %v17589_v60  ;;  %v2235_v36 = vmul.f32 0.5, %v17859_v34  ;;  %v2275_v28 = vmul.f32 0.5, %v15669_v2 }
 0x13a   : > { %v15683_v8 = vpop.eup %15682  ;;  %15698 = vtanh.f32 %v1067_v32  ;;  %14333 = vmatmul.mubr.msk.f32.vlgmr.msra.gmra.mrb[96].mxu1 %vm2560_vm1, %v17693_v1  ;;  %2999 = vmatprep.mubr.f32.mxu0 %v23869_v40  ;;  %v1162_v49 = vadd.f32 %v1161_v33, %v17589_v60  ;;  %v17928_v0 = vadd.f32 0.5, %v2233_v52  ;;  %v17930_v30 = vadd.f32 0.5, %v2273_v5  ;;  %v1236_v63 = vpop.f32.mrb[40].mxu0 }
 0x13b   : > { %v1325_v58 = vpop.f32.mrb[40].mxu1  ;;  %v2354_v29 = vmul.f32 0.5, %v15681_v54  ;;  %15700 = vtanh.f32 %v1071_v48  ;;  %3088 = vmatprep.mubr.f32.mxu1 %v23869_v40  ;;  %v17933_v34 = vadd.f32 0.5, %v2235_v36  ;;  %v17935_v2 = vadd.f32 0.5, %v2275_v28  ;;  %v1238_v16 = vpop.f32.mrb[41].mxu0 }
 0x13c   : > { %23887 = vst [vmem:[#allocation43_spill] sm:$0xff] %v17928_v0  ;;  %23888 = vst [vmem:[#allocation44_spill] sm:$0xff] %v17930_v30  ;;  %v1327_v45 = vpop.f32.mrb[41].mxu1  ;;  %v15685_v32 = vpop.eup %15684  ;;  %v17937_v51 = vadd.f32 0.5, %v2312_v27  ;;  %v2314_v33 = vmul.f32 0.5, %v15673_v35  ;;  %15702 = vtanh.f32 %v1160_v9  ;;  %v14779_v52 = vpack.c.bf16 %v17930_v30, %v17928_v0 }
 0x13d   : > { %23889 = vst [vmem:[#allocation45_spill] sm:$0xff] %v17933_v34  ;;  %23890 = vst [vmem:[#allocation46_spill] sm:$0xff] %v17935_v2  ;;  %v15687_v5 = vpop.eup %15686  ;;  %v17941_v25 = vadd.f32 0.5, %v2352_v4  ;;  %15704 = vtanh.f32 %v1156_v18  ;;  %14330 = vmatmul.mubr.msk.f32.gmra.mrb[98].mxu0 %vm2560_vm1, %v17713_v14  ;;  %v14787_v54 = vpack.c.bf16 %v17935_v2, %v17933_v34  ;;  %v14781_v48 = vpack.c.bf16 %v17911_v53, %v17887_v44 }
 0x13e   : > { %23891 = vst [vmem:[#allocation47_spill] sm:$0xff] %v17937_v51  ;;  %v15689_v27 = vpop.eup %15688  ;;  %15706 = vtanh.f32 %v1073_v22  ;;  %14334 = vmatmul.mubr.msk.f32.gmra.mrb[98].mxu1 %vm2560_vm1, %v17713_v14  ;;  %14780 = vmatprep.subr.bf16.mxu0 %v14779_v52  ;;  %v14789_v35 = vpack.c.bf16 %v17913_v31, %v17893_v39  ;;  %v1077_v18 = vadd.f32 %v1076_v26, %v17598_v17  ;;  %v1242_v4 = vpop.f32.mrb[42].mxu0  ;;  %v17959_v2 = vadd.f32 0.5, %v2354_v29 }
 0x13f   : > { %23892 = vst [vmem:[#allocation48_spill] sm:$0xff] %v17941_v25  ;;  %v1166_v9 = vadd.f32 %v1165_v43, %v17598_v17  ;;  %v17955_v36 = vpop.f32.mrb[42].mxu1  ;;  %v17957_v28 = vpop.eup %15690  ;;  %15708 = vtanh.f32 %v1162_v49  ;;  %14788 = vmatprep.subr.bf16.mxu1 %v14787_v54  ;;  %14782 = vmatpush1.bf16.msra.mxu0 %v14781_v48  ;;  %v1079_v22 = vadd.f32 %v1078_v15, %v17598_v17  ;;  %v2236_v43 = vmul.f32 0.5, %v15687_v5 }
 0x140   : > { %23893 = vst [vmem:[#allocation49_spill] sm:$0xff] %v17959_v2  ;;  %v1168_v52 = vadd.f32 %v1167_v19, %v17598_v17  ;;  %v1244_v34 = vpop.f32.mrb[43].mxu0  ;;  %v17963_v30 = vpop.f32.mrb[43].mxu1  ;;  %14790 = vmatpush1.bf16.msra.mxu1 %v14789_v35  ;;  %15710 = vtanh.f32 %v1077_v18  ;;  %3005 = vmatprep.mubr.f32.mxu0 %v23869_v40  ;;  %v1237_v29 = vadd.f32 %v1236_v63, %v17581_v50  ;;  %v2313_v15 = vmul.f32 0.5, %v17902_v13 }
 0x141   : > { %v17965_v26 = vpop.eup %15692  ;;  %v1326_v49 = vadd.f32 %v1325_v58, %v17581_v50  ;;  %15712 = vtanh.f32 %v1166_v9  ;;  %3094 = vmatprep.mubr.f32.mxu1 %v23869_v40  ;;  %14331 = vmatmul.mubr.msk.f32.gmra.mrb[100].mxu0 %vm2560_vm1, %v17753_v56  ;;  %v2353_v19 = vmul.f32 0.5, %v15683_v8  ;;  %v2315_v5 = vmul.f32 0.5, %v17909_v12 }
 0x142   : > { %v15695_v54 = vpop.eup %15694  ;;  %15714 = vtanh.f32 %v1079_v22  ;;  %14335 = vmatmul.mubr.msk.f32.gmra.mrb[100].mxu1 %vm2560_vm1, %v17753_v56  ;;  %3011 = vmatprep.mubr.f32.mxu0 %v23869_v40  ;;  %v1239_v63 = vadd.f32 %v1238_v16, %v17581_v50  ;;  %v1328_v58 = vadd.f32 %v1327_v45, %v17581_v50  ;;  %v2355_v35 = vmul.f32 0.5, %v15685_v32  ;;  %v1248_v18 = vpop.f32.mrb[44].mxu0 }
 0x143   : > { %v15697_v48 = vpop.eup %15696  ;;  %v1337_v9 = vpop.f32.mrb[44].mxu1  ;;  %v2276_v0 = vmul.f32 0.5, %v15695_v54  ;;  %15716 = vtanh.f32 %v1168_v52  ;;  %3100 = vmatprep.mubr.f32.mxu1 %v23869_v40  ;;  %v17981_v13 = vadd.f32 0.5, %v2313_v15  ;;  %v17983_v12 = vadd.f32 0.5, %v2353_v19 }
 0x144   : > { %v1250_v8 = vpop.f32.mrb[45].mxu0  ;;  %v1339_v22 = vpop.f32.mrb[45].mxu1  ;;  %v2278_v53 = vmul.f32 0.5, %v15697_v48  ;;  %15718 = vtanh.f32 %v1237_v29  ;;  %v17985_v39 = vadd.f32 0.5, %v2315_v5  ;;  %v17987_v16 = vadd.f32 0.5, %v2355_v35 }
 0x145   : > { %23894 = vst [vmem:[#allocation50_spill] sm:$0xff] %v17981_v13  ;;  %23895 = vst [vmem:[#allocation51_spill] sm:$0xff] %v17983_v12  ;;  %v15699_v31 = vpop.eup %15698  ;;  %v17989_v32 = vadd.f32 0.5, %v2314_v33  ;;  %v17991_v54 = vmul.f32 0.5, %v15689_v27  ;;  %15720 = vtanh.f32 %v1326_v49  ;;  %14332 = vmatmul.mubr.msk.f32.gmra.mrb[102].mxu0 %vm2560_vm1, %v17773_v20  ;;  %v14783_v52 = vpack.c.bf16 %v17983_v12, %v17981_v13 }
 0x146   : > { %23896 = vst [vmem:[#allocation52_spill] sm:$0xff] %v17985_v39  ;;  %23897 = vst [vmem:[#allocation53_spill] sm:$0xff] %v17987_v16  ;;  %v15701_v45 = vpop.eup %15700  ;;  %15722 = vtanh.f32 %v1239_v63  ;;  %14336 = vmatmul.mubr.msk.f32.gmra.mrb[102].mxu1 %vm2560_vm1, %v17773_v20  ;;  %v14791_v29 = vpack.c.bf16 %v17987_v16, %v17985_v39  ;;  %v14785_v33 = vpack.c.bf16 %v17941_v25, %v17937_v51  ;;  %3171 = vmatprep.mubr.f32.mxu0 %v23869_v40  ;;  %v18005_v49 = vpop.f32.mrb[46].mxu0 }
 0x147   : > { %23898 = vst [vmem:[#allocation54_spill] sm:$0xff] %v17989_v32  ;;  %v15703_v15 = vpop.eup %15702  ;;  %v1243_v27 = vadd.f32 %v1242_v4, %v17585_v57  ;;  %v18007_v19 = vpop.f32.mrb[46].mxu1  ;;  %15724 = vtanh.f32 %v1328_v58  ;;  %14784 = vmatprep.subr.bf16.mxu0 %v14783_v52  ;;  %v14793_v48 = vpack.c.bf16 %v17959_v2, %v17989_v32  ;;  %v1332_v63 = vadd.f32 %v17955_v36, %v17585_v57 }
 0x148   : > { %v15705_v5 = vpop.eup %15704  ;;  %3260 = vmatprep.mubr.f32.mxu1 %v23869_v40  ;;  %v1245_v35 = vadd.f32 %v1244_v34, %v17585_v57  ;;  %v18015_v4 = vpop.f32.mrb[47].mxu0  ;;  %v18021_v13 = vadd.f32 0.5, %v2236_v43  ;;  %v18023_v58 = vadd.f32 0.5, %v2276_v0  ;;  %v18025_v52 = vadd.f32 0.5, %v2278_v53  ;;  %14792 = vmatprep.subr.bf16.mxu1 %v14791_v29 }
 0x149   : > { %v18017_v16 = vpop.f32.mrb[47].mxu1  ;;  %v18019_v39 = vpop.eup %15706  ;;  %14786 = vmatpush1.bf16.msra.mxu0 %v14785_v33  ;;  %15726 = vtanh.f32 %v1243_v27  ;;  %v2316_v12 = vmul.f32 0.5, %v15701_v45  ;;  %v2318_v2 = vmul.f32 0.5, %v15703_v15  ;;  %14794 = vmatpush1.bf16.msra.mxu1 %v14793_v48  ;;  %v1334_v34 = vadd.f32 %v17963_v30, %v17585_v57 }
 0x14a   : > { %23899 = vst [vmem:[#allocation55_spill] sm:$0xff] %v18021_v13  ;;  %23900 = vst [vmem:[#allocation56_spill] sm:$0xff] %v18023_v58  ;;  %v18027_v36 = vpop.eup %15708  ;;  %15728 = vtanh.f32 %v1332_v63  ;;  %v1249_v43 = vadd.f32 %v1248_v18, %v17589_v60  ;;  %v1338_v0 = vadd.f32 %v1337_v9, %v17589_v60  ;;  %v2237_v53 = vmul.f32 0.5, %v17957_v28  ;;  %v1414_v29 = vpop.f32.mrb[48].mxu0 }
 0x14b   : > { %23901 = vst [vmem:[#allocation57_spill] sm:$0xff] %v18025_v52  ;;  %v15711_v25 = vpop.eup %15710  ;;  %v2277_v32 = vmul.f32 0.5, %v15699_v31  ;;  %v18034_v33 = vpop.f32.mrb[48].mxu1  ;;  %15730 = vtanh.f32 %v1245_v35  ;;  %v1251_v45 = vadd.f32 %v1250_v8, %v17589_v60  ;;  %v2239_v30 = vmul.f32 0.5, %v17965_v26 }
 0x14c   : > { %v15713_v27 = vpop.eup %15712  ;;  %14337 = vmatmul.mubr.msk.f32.vlgmr.msra.gmra.mrb[104].mxu0 %vm2560_vm1, %v17693_v1  ;;  %v2279_v15 = vmul.f32 0.5, %v15705_v5  ;;  %v18040_v48 = vpop.f32.mrb[49].mxu0  ;;  %v2356_v28 = vmul.f32 0.5, %v15711_v25  ;;  %14341 = vmatmul.mubr.msk.f32.vlgmr.msra.gmra.mrb[104].mxu1 %vm2560_vm1, %v17693_v1  ;;  %v1340_v31 = vadd.f32 %v1339_v22, %v17589_v60  ;;  %v18048_v63 = vadd.f32 0.5, %v2237_v53 }
 0x14d   : > { %v18042_v18 = vpop.f32.mrb[49].mxu1  ;;  %v15715_v9 = vpop.eup %15714  ;;  %3177 = vmatprep.mubr.f32.mxu0 %v23869_v40  ;;  %v18050_v35 = vadd.f32 0.5, %v2277_v32  ;;  %v2358_v26 = vmul.f32 0.5, %v15713_v27  ;;  %15732 = vtanh.f32 %v1334_v34  ;;  %3266 = vmatprep.mubr.f32.mxu1 %v23869_v40  ;;  %v18053_v5 = vadd.f32 0.5, %v2239_v30 }
 0x14e   : > { %23902 = vst [vmem:[#allocation58_spill] sm:$0xff] %v18048_v63  ;;  %v15717_v8 = vpop.eup %15716  ;;  %v18055_v51 = vadd.f32 0.5, %v2279_v15  ;;  %v18058_v1 = vadd.f32 0.5, %v17991_v54  ;;  %v18060_v44 = vadd.f32 0.5, %v2316_v12  ;;  %15734 = vtanh.f32 %v1249_v43  ;;  %v18064_v32 = vpop.f32.mrb[50].mxu0 }
 0x14f   : > { %23903 = vst [vmem:[#allocation59_spill] sm:$0xff] %v18050_v35  ;;  %23904 = vst [vmem:[#allocation60_spill] sm:$0xff] %v18053_v5  ;;  %v15719_v25 = vpop.eup %15718  ;;  %v14795_v22 = vpack.c.bf16 %v18050_v35, %v18048_v63  ;;  %v18066_v53 = vpop.f32.mrb[50].mxu1  ;;  %v18068_v27 = vadd.f32 0.5, %v2318_v2  ;;  %15736 = vtanh.f32 %v1338_v0  ;;  %v14797_v12 = vpack.c.bf16 %v18023_v58, %v18021_v13 }
 0x150   : > { %23905 = vst [vmem:[#allocation61_spill] sm:$0xff] %v18055_v51  ;;  %23906 = vst [vmem:[#allocation62_spill] sm:$0xff] %v18058_v1  ;;  %v15721_v34 = vpop.eup %15720  ;;  %14338 = vmatmul.mubr.msk.f32.gmra.mrb[106].mxu0 %vm2560_vm1, %v17713_v14  ;;  %v14803_v54 = vpack.c.bf16 %v18055_v51, %v18053_v5  ;;  %v18076_v43 = vpop.f32.mrb[51].mxu0  ;;  %15738 = vtanh.f32 %v1251_v45  ;;  %14342 = vmatmul.mubr.msk.f32.gmra.mrb[106].mxu1 %vm2560_vm1, %v17713_v14  ;;  %v14805_v2 = vpack.c.bf16 %v18025_v52, %v18058_v1 }
 0x151   : > { %23907 = vst [vmem:[#allocation63_spill] sm:$0xff] %v18060_v44  ;;  %23908 = vst [vmem:[#allocation64_spill] sm:$0xff] %v18068_v27  ;;  %v18078_v30 = vpop.f32.mrb[51].mxu1  ;;  %v18080_v15 = vpop.eup %15722  ;;  %14796 = vmatprep.subr.bf16.mxu0 %v14795_v22  ;;  %v1255_v0 = vadd.f32 %v18005_v49, %v17598_v17  ;;  %v1344_v51 = vadd.f32 %v18007_v19, %v17598_v17  ;;  %v18092_v35 = vadd.f32 0.5, %v2356_v28  ;;  %v18094_v63 = vadd.f32 0.5, %v2358_v26 }
 0x152   : > { %v18090_v5 = vpop.eup %15724  ;;  %15740 = vtanh.f32 %v1340_v31  ;;  %14804 = vmatprep.subr.bf16.mxu1 %v14803_v54  ;;  %14798 = vmatpush1.bf16.msra.mxu0 %v14797_v12  ;;  %v1257_v14 = vadd.f32 %v18015_v4, %v17598_v17  ;;  %v2240_v22 = vmul.f32 0.5, %v15719_v25  ;;  %v1346_v49 = vadd.f32 %v18017_v16, %v17598_v17  ;;  %v18102_v28 = vpop.f32.mrb[52].mxu0 }
 0x153   : > { %23909 = vst [vmem:[#allocation65_spill] sm:$0xff] %v18092_v35  ;;  %23910 = vst [vmem:[#allocation66_spill] sm:$0xff] %v18094_v63  ;;  %v15727_v45 = vpop.eup %15726  ;;  %14806 = vmatpush1.bf16.msra.mxu1 %v14805_v2  ;;  %15742 = vtanh.f32 %v1255_v0  ;;  %3183 = vmatprep.mubr.f32.mxu0 %v23869_v40  ;;  %v1415_v19 = vadd.f32 %v1414_v29, %v17581_v50  ;;  %v18104_v26 = vpop.f32.mrb[52].mxu1  ;;  %v1504_v4 = vadd.f32 %v18034_v33, %v17581_v50 }
 0x154   : > { %v15729_v31 = vpop.eup %15728  ;;  %15744 = vtanh.f32 %v1344_v51  ;;  %3272 = vmatprep.mubr.f32.mxu1 %v23869_v40  ;;  %14339 = vmatmul.mubr.msk.f32.gmra.mrb[108].mxu0 %vm2560_vm1, %v17753_v56  ;;  %v2317_v25 = vmul.f32 0.5, %v18019_v39  ;;  %v2357_v54 = vmul.f32 0.5, %v15715_v9  ;;  %v18112_v16 = vpop.f32.mrb[53].mxu0  ;;  %v2280_v12 = vmul.f32 0.5, %v15727_v45 }
 0x155   : > { %v18114_v29 = vpop.f32.mrb[53].mxu1  ;;  %14343 = vmatmul.mubr.msk.f32.gmra.mrb[108].mxu1 %vm2560_vm1, %v17753_v56  ;;  %3189 = vmatprep.mubr.f32.mxu0 %v23869_v40  ;;  %v1417_v51 = vadd.f32 %v18040_v48, %v17581_v50  ;;  %v2319_v2 = vmul.f32 0.5, %v18027_v36  ;;  %v2359_v0 = vmul.f32 0.5, %v15717_v8  ;;  %v15731_v33 = vpop.eup %15730  ;;  %15746 = vtanh.f32 %v1257_v14 }
 0x156   : > { %3278 = vmatprep.mubr.f32.mxu1 %v23869_v40  ;;  %v1506_v39 = vadd.f32 %v18042_v18, %v17581_v50  ;;  %v18125_v9 = vadd.f32 0.5, %v2317_v25  ;;  %v18127_v45 = vadd.f32 0.5, %v2357_v54  ;;  %v2282_v56 = vmul.f32 0.5, %v15729_v31  ;;  %v18133_v48 = vpop.f32.mrb[54].mxu0  ;;  %v18135_v36 = vpop.f32.mrb[54].mxu1 }
 0x157   : > { %15748 = vtanh.f32 %v1415_v19  ;;  %v18129_v52 = vadd.f32 0.5, %v2319_v2  ;;  %v18131_v58 = vadd.f32 0.5, %v2359_v0  ;;  %v15733_v8 = vpop.eup %15732  ;;  %v18137_v14 = vadd.f32 0.5, %v2240_v22  ;;  %v18145_v19 = vpop.f32.mrb[55].mxu0 }
 0x158   : > { %23911 = vst [vmem:[#allocation67_spill] sm:$0xff] %v18125_v9  ;;  %23912 = vst [vmem:[#allocation68_spill] sm:$0xff] %v18127_v45  ;;  %v18139_v1 = vmul.f32 0.5, %v15721_v34  ;;  %15750 = vtanh.f32 %v1504_v4  ;;  %14340 = vmatmul.mubr.msk.f32.gmra.mrb[110].mxu0 %vm2560_vm1, %v17773_v20  ;;  %v14799_v18 = vpack.c.bf16 %v18127_v45, %v18125_v9  ;;  %v18147_v31 = vpop.f32.mrb[55].mxu1  ;;  %v15735_v25 = vpop.eup %15734  ;;  %v18149_v54 = vadd.f32 0.5, %v2280_v12 }
 0x159   : > { %23913 = vst [vmem:[#allocation69_spill] sm:$0xff] %v18129_v52  ;;  %23914 = vst [vmem:[#allocation70_spill] sm:$0xff] %v18131_v58  ;;  %15752 = vtanh.f32 %v1346_v49  ;;  %14344 = vmatmul.mubr.msk.f32.gmra.mrb[110].mxu1 %vm2560_vm1, %v17773_v20  ;;  %v14807_v34 = vpack.c.bf16 %v18131_v58, %v18129_v52  ;;  %v14801_v22 = vpack.c.bf16 %v18092_v35, %v18060_v44  ;;  %3349 = vmatprep.mubr.f32.mxu0 %v23869_v40  ;;  %v15737_v4 = vpop.eup %15736 }
 0x15a   : > { %23915 = vst [vmem:[#allocation71_spill] sm:$0xff] %v18137_v14  ;;  %23916 = vst [vmem:[#allocation72_spill] sm:$0xff] %v18149_v54  ;;  %15754 = vtanh.f32 %v1417_v51  ;;  %14800 = vmatprep.subr.bf16.mxu0 %v14799_v18  ;;  %v14809_v2 = vpack.c.bf16 %v18094_v63, %v18068_v27  ;;  %v1421_v49 = vadd.f32 %v18064_v32, %v17585_v57  ;;  %3438 = vmatprep.mubr.f32.mxu1 %v23869_v40  ;;  %v18165_v12 = vpop.eup %15738  ;;  %v18173_v58 = vpop.f32.mrb[56].mxu0 }
 0x15b   : > { %v1510_v20 = vadd.f32 %v18066_v53, %v17585_v57  ;;  %v18167_v0 = vadd.f32 0.5, %v2282_v56  ;;  %15756 = vtanh.f32 %v1506_v39  ;;  %14808 = vmatprep.subr.bf16.mxu1 %v14807_v34  ;;  %14802 = vmatpush1.bf16.msra.mxu0 %v14801_v22  ;;  %v1423_v51 = vadd.f32 %v18076_v43, %v17585_v57  ;;  %v18175_v32 = vpop.f32.mrb[56].mxu1  ;;  %v18183_v34 = vpop.f32.mrb[57].mxu0 }
 0x15c   : > { %v1512_v18 = vadd.f32 %v18078_v30, %v17585_v57  ;;  %v18177_v53 = vpop.eup %15740  ;;  %v2320_v52 = vmul.f32 0.5, %v15735_v25  ;;  %14810 = vmatpush1.bf16.msra.mxu1 %v14809_v2  ;;  %15758 = vtanh.f32 %v1421_v49  ;;  %v1427_v39 = vadd.f32 %v18102_v28, %v17589_v60  ;;  %v18185_v43 = vpop.f32.mrb[57].mxu1  ;;  %v18192_v28 = vld [vmem:[%s23528_s2] sm:$0xff] }
 0x15d   : > { %23917 = vst [vmem:[#allocation73_spill] sm:$0xff] %v18167_v0  ;;  %v1516_v56 = vadd.f32 %v18104_v26, %v17589_v60  ;;  %v15743_v30 = vpop.eup %15742  ;;  %15760 = vtanh.f32 %v1510_v20  ;;  %v2241_v22 = vmul.f32 0.5, %v18080_v15  ;;  %v2281_v45 = vmul.f32 0.5, %v15731_v33 }
 0x15e   : > { %v2243_v9 = vmul.f32 0.5, %v18090_v5  ;;  %v15745_v25 = vpop.eup %15744  ;;  %15762 = vtanh.f32 %v1423_v51  ;;  %14345 = vmatmul.mubr.msk.f32.vlgmr.msra.gmra.mrb[112].mxu0 %vm2560_vm1, %v18192_v28  ;;  %v1429_v26 = vadd.f32 %v18112_v16, %v17589_v60  ;;  %v1518_v2 = vadd.f32 %v18114_v29, %v17589_v60  ;;  %v18207_v20 = vpop.f32.mrb[58].mxu0 }
 0x15f   : > { %v2283_v15 = vmul.f32 0.5, %v15733_v8  ;;  %v2360_v33 = vmul.f32 0.5, %v15743_v30  ;;  %15764 = vtanh.f32 %v1512_v18  ;;  %14349 = vmatmul.mubr.msk.f32.vlgmr.msra.gmra.mrb[112].mxu1 %vm2560_vm1, %v18192_v28  ;;  %3355 = vmatprep.mubr.f32.mxu0 %v23869_v40  ;;  %v18203_v5 = vadd.f32 0.5, %v2241_v22  ;;  %v18209_v51 = vpop.f32.mrb[58].mxu1  ;;  %v15747_v16 = vpop.eup %15746 }
 0x160   : > { %v18205_v49 = vadd.f32 0.5, %v2281_v45  ;;  %v2362_v63 = vmul.f32 0.5, %v15745_v25  ;;  %15766 = vtanh.f32 %v1427_v39  ;;  %3444 = vmatprep.mubr.f32.mxu1 %v23869_v40  ;;  %v18212_v29 = vadd.f32 0.5, %v2243_v9  ;;  %v18216_v18 = vpop.f32.mrb[59].mxu0  ;;  %v18218_v30 = vpop.f32.mrb[59].mxu1  ;;  %v18230_v9 = vld [vmem:[%s23528_s2 + $0x8] sm:$0xff] }
 0x161   : > { %23918 = vst [vmem:[#allocation74_spill] sm:$0xff] %v18203_v5  ;;  %v18214_v8 = vadd.f32 0.5, %v2283_v15  ;;  %v15749_v22 = vpop.eup %15748  ;;  %v18221_v45 = vadd.f32 0.5, %v18139_v1  ;;  %v18223_v35 = vmul.f32 0.5, %v15737_v4  ;;  %15768 = vtanh.f32 %v1516_v56 }
 0x162   : > { %23919 = vst [vmem:[#allocation75_spill] sm:$0xff] %v18205_v49  ;;  %23920 = vst [vmem:[#allocation76_spill] sm:$0xff] %v18212_v29  ;;  %v14811_v39 = vpack.c.bf16 %v18205_v49, %v18203_v5  ;;  %v15751_v25 = vpop.eup %15750  ;;  %15770 = vtanh.f32 %v1429_v26  ;;  %14346 = vmatmul.mubr.msk.f32.gmra.mrb[114].mxu0 %vm2560_vm1, %v18230_v9  ;;  %v14813_v4 = vpack.c.bf16 %v18149_v54, %v18137_v14  ;;  %v18250_v49 = vpop.f32.mrb[60].mxu1  ;;  %v18256_v54 = vadd.f32 0.5, %v2360_v33 }
 0x163   : > { %23921 = vst [vmem:[#allocation77_spill] sm:$0xff] %v18214_v8  ;;  %23922 = vst [vmem:[#allocation78_spill] sm:$0xff] %v18221_v45  ;;  %v14819_v1 = vpack.c.bf16 %v18214_v8, %v18212_v29  ;;  %v1433_v56 = vadd.f32 %v18133_v48, %v17598_v17  ;;  %v15753_v15 = vpop.eup %15752  ;;  %15772 = vtanh.f32 %v1518_v2  ;;  %14350 = vmatmul.mubr.msk.f32.gmra.mrb[114].mxu1 %vm2560_vm1, %v18230_v9  ;;  %v18248_v29 = vpop.f32.mrb[60].mxu0  ;;  %v18254_v2 = vadd.f32 0.5, %v2320_v52 }
 0x164   : > { %14812 = vmatprep.subr.bf16.mxu0 %v14811_v39  ;;  %v14821_v26 = vpack.c.bf16 %v18167_v0, %v18221_v45  ;;  %v1522_v5 = vadd.f32 %v18135_v36, %v17598_v17  ;;  %v1435_v8 = vadd.f32 %v18145_v19, %v17598_v17  ;;  %v18252_v48 = vpop.eup %15754  ;;  %23924 = vst [vmem:[#allocation80_spill] sm:$0xff] %v18256_v54  ;;  %v18258_v39 = vadd.f32 0.5, %v2362_v63  ;;  %v18260_v0 = vpop.f32.mrb[61].mxu0 }
 0x165   : > { %23923 = vst [vmem:[#allocation79_spill] sm:$0xff] %v18254_v2  ;;  %14820 = vmatprep.subr.bf16.mxu1 %v14819_v1  ;;  %14814 = vmatpush1.bf16.msra.mxu0 %v14813_v4  ;;  %15774 = vtanh.f32 %v1433_v56  ;;  %v18262_v36 = vpop.f32.mrb[61].mxu1  ;;  %v18264_v19 = vpop.eup %15756  ;;  %v2244_v45 = vmul.f32 0.5, %v15749_v22  ;;  %v2246_v14 = vmul.f32 0.5, %v15751_v25  ;;  %v1593_v52 = vadd.f32 %v18173_v58, %v17581_v50  ;;  %v18275_v1 = vld [vmem:[%s23528_s2 + $0x10] sm:$0xff] }
 0x166   : > { %23925 = vst [vmem:[#allocation81_spill] sm:$0xff] %v18258_v39  ;;  %14822 = vmatpush1.bf16.msra.mxu1 %v14821_v26  ;;  %15776 = vtanh.f32 %v1522_v5  ;;  %3361 = vmatprep.mubr.f32.mxu0 %v23869_v40  ;;  %v15759_v63 = vpop.eup %15758  ;;  %v1524_v33 = vadd.f32 %v18147_v31, %v17598_v17  ;;  %v1682_v5 = vadd.f32 %v18175_v32, %v17581_v50  ;;  %v2321_v22 = vmul.f32 0.5, %v18165_v12  ;;  %v18288_v26 = vpop.f32.mrb[62].mxu0 }
 0x167   : > { %3450 = vmatprep.mubr.f32.mxu1 %v23869_v40  ;;  %14347 = vmatmul.mubr.msk.f32.gmra.mrb[116].mxu0 %vm2560_vm1, %v18275_v1  ;;  %v2361_v58 = vmul.f32 0.5, %v15747_v16  ;;  %v15761_v25 = vpop.eup %15760  ;;  %15778 = vtanh.f32 %v1435_v8  ;;  %v1595_v31 = vadd.f32 %v18183_v34, %v17581_v50  ;;  %v2323_v4 = vmul.f32 0.5, %v18177_v53  ;;  %v18290_v27 = vpop.f32.mrb[62].mxu1 }
 0x168   : > { %14351 = vmatmul.mubr.msk.f32.gmra.mrb[116].mxu1 %vm2560_vm1, %v18275_v1  ;;  %3367 = vmatprep.mubr.f32.mxu0 %v23869_v40  ;;  %v2363_v56 = vmul.f32 0.5, %v15753_v15  ;;  %v15763_v32 = vpop.eup %15762  ;;  %v2284_v12 = vmul.f32 0.5, %v15759_v63  ;;  %v1684_v16 = vadd.f32 %v18185_v43, %v17581_v50  ;;  %v18295_v8 = vadd.f32 0.5, %v2321_v22  ;;  %v18299_v13 = vpop.f32.mrb[63].mxu0  ;;  %v18315_v22 = vld [vmem:[%s23528_s2 + $0x18] sm:$0xff] }
 0x169   : > { %3456 = vmatprep.mubr.f32.mxu1 %v23869_v40  ;;  %v18297_v44 = vadd.f32 0.5, %v2361_v58  ;;  %v18301_v34 = vpop.f32.mrb[63].mxu1  ;;  %v15765_v53 = vpop.eup %15764  ;;  %v2286_v15 = vmul.f32 0.5, %v15761_v25  ;;  %15780 = vtanh.f32 %v1593_v52  ;;  %v18303_v23 = vadd.f32 0.5, %v2323_v4 }
 0x16a   : > { %23926 = vst [vmem:[#allocation82_spill] sm:$0xff] %v18295_v8  ;;  %v18305_v38 = vadd.f32 0.5, %v2363_v56  ;;  %v15767_v63 = vpop.eup %15766  ;;  %v18308_v11 = vadd.f32 0.5, %v18223_v35  ;;  %v18310_v43 = vadd.f32 0.5, %v2244_v45  ;;  %15782 = vtanh.f32 %v1682_v5  ;;  %v18330_v5 = vpop.f32.mrb[64].mxu0 }
 0x16b   : > { %23927 = vst [vmem:[#allocation83_spill] sm:$0xff] %v18297_v44  ;;  %23928 = vst [vmem:[#allocation84_spill] sm:$0xff] %v18303_v23  ;;  %14348 = vmatmul.mubr.msk.f32.gmra.mrb[118].mxu0 %vm2560_vm1, %v18315_v22  ;;  %v14815_v52 = vpack.c.bf16 %v18297_v44, %v18295_v8  ;;  %v15769_v58 = vpop.eup %15768  ;;  %v18321_v25 = vadd.f32 0.5, %v2246_v14  ;;  %15784 = vtanh.f32 %v1524_v33  ;;  %v14817_v45 = vpack.c.bf16 %v18256_v54, %v18254_v2  ;;  %v18332_v4 = vpop.f32.mrb[64].mxu1 }
 0x16c   : > { %23929 = vst [vmem:[#allocation85_spill] sm:$0xff] %v18305_v38  ;;  %23930 = vst [vmem:[#allocation86_spill] sm:$0xff] %v18308_v11  ;;  %14352 = vmatmul.mubr.msk.f32.gmra.mrb[118].mxu1 %vm2560_vm1, %v18315_v22  ;;  %v14823_v35 = vpack.c.bf16 %v18305_v38, %v18303_v23  ;;  %3527 = vmatprep.mubr.f32.mxu0 %v23869_v40  ;;  %v18334_v56 = vpop.eup %15770  ;;  %15786 = vtanh.f32 %v1595_v31  ;;  %v14825_v14 = vpack.c.bf16 %v18258_v39, %v18308_v11  ;;  %v18343_v23 = vpop.f32.mrb[65].mxu0 }
 0x16d   : > { %23931 = vst [vmem:[#allocation87_spill] sm:$0xff] %v18310_v43  ;;  %23932 = vst [vmem:[#allocation88_spill] sm:$0xff] %v18321_v25  ;;  %14816 = vmatprep.subr.bf16.mxu0 %v14815_v52  ;;  %v1599_v33 = vadd.f32 %v18207_v20, %v17585_v57  ;;  %v1688_v38 = vadd.f32 %v18209_v51, %v17585_v57  ;;  %3616 = vmatprep.mubr.f32.mxu1 %v23869_v40  ;;  %v18345_v44 = vpop.f32.mrb[65].mxu1  ;;  %v18347_v8 = vpop.eup %15772  ;;  %v18349_v54 = vadd.f32 0.5, %v2284_v12 }
 0x16e   : > { %v18351_v31 = vadd.f32 0.5, %v2286_v15  ;;  %15788 = vtanh.f32 %v1684_v16  ;;  %14824 = vmatprep.subr.bf16.mxu1 %v14823_v35  ;;  %14818 = vmatpush1.bf16.msra.mxu0 %v14817_v45  ;;  %v1601_v20 = vadd.f32 %v18216_v18, %v17585_v57  ;;  %v2324_v51 = vmul.f32 0.5, %v15767_v63  ;;  %v18362_v45 = vpop.f32.mrb[66].mxu0  ;;  %v18364_v18 = vpop.f32.mrb[66].mxu1 }
 0x16f   : > { %23933 = vst [vmem:[#allocation89_spill] sm:$0xff] %v18349_v54  ;;  %v15775_v52 = vpop.eup %15774  ;;  %14826 = vmatpush1.bf16.msra.mxu1 %v14825_v14  ;;  %15790 = vtanh.f32 %v1599_v33  ;;  %v1690_v39 = vadd.f32 %v18218_v30, %v17585_v57  ;;  %v1605_v11 = vadd.f32 %v18248_v29, %v17589_v60  ;;  %v1694_v16 = vadd.f32 %v18250_v49, %v17589_v60  ;;  %v18371_v14 = vpop.f32.mrb[67].mxu0 }
 0x170   : > { %23934 = vst [vmem:[#allocation90_spill] sm:$0xff] %v18351_v31  ;;  %v15777_v12 = vpop.eup %15776  ;;  %15792 = vtanh.f32 %v1688_v38  ;;  %v2245_v15 = vmul.f32 0.5, %v18252_v48  ;;  %v2285_v35 = vmul.f32 0.5, %v15763_v32  ;;  %v2364_v63 = vmul.f32 0.5, %v15775_v52  ;;  %v18373_v49 = vpop.f32.mrb[67].mxu1 }
 0x171   : > { %14353 = vmatmul.mubr.msk.f32.vlgmr.msra.gmra.mrb[120].mxu0 %vm2560_vm1, %v18192_v28  ;;  %v1607_v30 = vadd.f32 %v18260_v0, %v17589_v60  ;;  %v2247_v29 = vmul.f32 0.5, %v18264_v19  ;;  %v2287_v38 = vmul.f32 0.5, %v15765_v53  ;;  %v15779_v48 = vpop.eup %15778  ;;  %15794 = vtanh.f32 %v1601_v20 }
 0x172   : > { %14357 = vmatmul.mubr.msk.f32.vlgmr.msra.gmra.mrb[120].mxu1 %vm2560_vm1, %v18192_v28  ;;  %3533 = vmatprep.mubr.f32.mxu0 %v23869_v40  ;;  %v1696_v32 = vadd.f32 %v18262_v36, %v17589_v60  ;;  %v18380_v33 = vadd.f32 0.5, %v2245_v15  ;;  %v18382_v0 = vadd.f32 0.5, %v2285_v35  ;;  %v2366_v19 = vmul.f32 0.5, %v15777_v12  ;;  %v18395_v15 = vpop.f32.mrb[68].mxu0  ;;  %v18397_v35 = vpop.f32.mrb[68].mxu1 }
 0x173   : > { %15796 = vtanh.f32 %v1605_v11  ;;  %3622 = vmatprep.mubr.f32.mxu1 %v23869_v40  ;;  %v18385_v53 = vadd.f32 0.5, %v2247_v29  ;;  %v18387_v52 = vadd.f32 0.5, %v2287_v38  ;;  %v15781_v20 = vpop.eup %15780  ;;  %v18389_v2 = vadd.f32 0.5, %v2324_v51  ;;  %v18409_v29 = vpop.f32.mrb[69].mxu1 }
 0x174   : > { %23935 = vst [vmem:[#allocation91_spill] sm:$0xff] %v18380_v33  ;;  %23936 = vst [vmem:[#allocation92_spill] sm:$0xff] %v18382_v0  ;;  %v18391_v7 = vmul.f32 0.5, %v15769_v58  ;;  %15798 = vtanh.f32 %v1694_v16  ;;  %v14827_v36 = vpack.c.bf16 %v18382_v0, %v18380_v33  ;;  %v15783_v11 = vpop.eup %15782  ;;  %v18399_v12 = vadd.f32 0.5, %v2364_v63  ;;  %v18407_v16 = vpop.f32.mrb[69].mxu0 }
 0x175   : > { %23937 = vst [vmem:[#allocation93_spill] sm:$0xff] %v18385_v53  ;;  %23938 = vst [vmem:[#allocation94_spill] sm:$0xff] %v18387_v52  ;;  %15800 = vtanh.f32 %v1690_v39  ;;  %14354 = vmatmul.mubr.msk.f32.gmra.mrb[122].mxu0 %vm2560_vm1, %v18230_v9  ;;  %v14835_v51 = vpack.c.bf16 %v18387_v52, %v18385_v53  ;;  %v14829_v58 = vpack.c.bf16 %v18349_v54, %v18310_v43  ;;  %v15785_v38 = vpop.eup %15784  ;;  %v18421_v0 = vadd.f32 0.5, %v2366_v19 }
 0x176   : > { %23939 = vst [vmem:[#allocation95_spill] sm:$0xff] %v18389_v2  ;;  %23940 = vst [vmem:[#allocation96_spill] sm:$0xff] %v18399_v12  ;;  %15802 = vtanh.f32 %v1607_v30  ;;  %14358 = vmatmul.mubr.msk.f32.gmra.mrb[122].mxu1 %vm2560_vm1, %v18230_v9  ;;  %14828 = vmatprep.subr.bf16.mxu0 %v14827_v36  ;;  %v14837_v39 = vpack.c.bf16 %v18351_v31, %v18321_v25  ;;  %v1611_v63 = vadd.f32 %v18288_v26, %v17598_v17  ;;  %v18419_v53 = vpop.eup %15786  ;;  %v18432_v19 = vpop.f32.mrb[70].mxu0 }
 0x177   : > { %v1700_v52 = vadd.f32 %v18290_v27, %v17598_v17  ;;  %23941 = vst [vmem:[#allocation97_spill] sm:$0xff] %v18421_v0  ;;  %v2248_v33 = vmul.f32 0.5, %v15781_v20  ;;  %15804 = vtanh.f32 %v1696_v32  ;;  %14836 = vmatprep.subr.bf16.mxu1 %v14835_v51  ;;  %14830 = vmatpush1.bf16.msra.mxu0 %v14829_v58  ;;  %v1613_v30 = vadd.f32 %v18299_v13, %v17598_v17  ;;  %v18434_v32 = vpop.f32.mrb[70].mxu1 }
 0x178   : > { %v18425_v36 = vpop.eup %15788  ;;  %v2250_v31 = vmul.f32 0.5, %v15783_v11  ;;  %14838 = vmatpush1.bf16.msra.mxu1 %v14837_v39  ;;  %15806 = vtanh.f32 %v1611_v63  ;;  %3539 = vmatprep.mubr.f32.mxu0 %v23869_v40  ;;  %v1771_v27 = vadd.f32 %v18330_v5, %v17581_v50  ;;  %v1860_v26 = vadd.f32 %v18332_v4, %v17581_v50  ;;  %v18441_v5 = vpop.f32.mrb[71].mxu0 }
 0x179   : > { %v15791_v20 = vpop.eup %15790  ;;  %15808 = vtanh.f32 %v1700_v52  ;;  %3628 = vmatprep.mubr.f32.mxu1 %v23869_v40  ;;  %14355 = vmatmul.mubr.msk.f32.gmra.mrb[124].mxu0 %vm2560_vm1, %v18275_v1  ;;  %v2325_v13 = vmul.f32 0.5, %v18334_v56  ;;  %v2365_v11 = vmul.f32 0.5, %v15779_v48  ;;  %v2327_v51 = vmul.f32 0.5, %v18347_v8  ;;  %v18443_v58 = vpop.f32.mrb[71].mxu1 }
 0x17a   : > { %v15793_v4 = vpop.eup %15792  ;;  %v1702_v39 = vadd.f32 %v18301_v34, %v17598_v17  ;;  %14359 = vmatmul.mubr.msk.f32.gmra.mrb[124].mxu1 %vm2560_vm1, %v18275_v1  ;;  %3545 = vmatprep.mubr.f32.mxu0 %v23869_v40  ;;  %v1773_v52 = vadd.f32 %v18343_v23, %v17581_v50  ;;  %v1862_v56 = vadd.f32 %v18345_v44, %v17581_v50  ;;  %v2367_v8 = vmul.f32 0.5, %v15785_v38  ;;  %v18463_v23 = vpop.f32.mrb[72].mxu0 }
 0x17b   : > { %v2288_v48 = vmul.f32 0.5, %v15791_v20  ;;  %15810 = vtanh.f32 %v1613_v30  ;;  %3634 = vmatprep.mubr.f32.mxu1 %v23869_v40  ;;  %v18455_v63 = vadd.f32 0.5, %v2325_v13  ;;  %v18457_v54 = vadd.f32 0.5, %v2365_v11  ;;  %v15795_v34 = vpop.eup %15794  ;;  %v18465_v59 = vpop.f32.mrb[72].mxu1 }
 0x17c   : > { %v2290_v25 = vmul.f32 0.5, %v15793_v4  ;;  %15812 = vtanh.f32 %v1771_v27  ;;  %v18459_v43 = vadd.f32 0.5, %v2327_v51  ;;  %v18461_v37 = vadd.f32 0.5, %v2367_v8  ;;  %v18476_v20 = vpop.f32.mrb[73].mxu0  ;;  %v18478_v13 = vpop.f32.mrb[73].mxu1 }
 0x17d   : > { %23942 = vst [vmem:[#allocation98_spill] sm:$0xff] %v18455_v63  ;;  %23943 = vst [vmem:[#allocation99_spill] sm:$0xff] %v18457_v54  ;;  %v15797_v44 = vpop.eup %15796  ;;  %v18468_v38 = vadd.f32 0.5, %v18391_v7  ;;  %15814 = vtanh.f32 %v1860_v26  ;;  %14356 = vmatmul.mubr.msk.f32.gmra.mrb[126].mxu0 %vm2560_vm1, %v18315_v22  ;;  %v14831_v30 = vpack.c.bf16 %v18457_v54, %v18455_v63  ;;  %v14833_v27 = vpack.c.bf16 %v18399_v12, %v18389_v2 }
 0x17e   : > { %23944 = vst [vmem:[#allocation100_spill] sm:$0xff] %v18459_v43  ;;  %23945 = vst [vmem:[#allocation101_spill] sm:$0xff] %v18461_v37  ;;  %v15799_v11 = vpop.eup %15798  ;;  %v2328_v51 = vmul.f32 0.5, %v15797_v44  ;;  %15816 = vtanh.f32 %v1702_v39  ;;  %14360 = vmatmul.mubr.msk.f32.gmra.mrb[126].mxu1 %vm2560_vm1, %v18315_v22  ;;  %v14839_v7 = vpack.c.bf16 %v18461_v37, %v18459_v43  ;;  %v1777_v26 = vadd.f32 %v18362_v45, %v17585_v57 }
 0x17f   : > { %23946 = vst [vmem:[#allocation102_spill] sm:$0xff] %v18468_v38  ;;  %3705 = vmatprep.mubr.f32.mxu0 %v23869_v40  ;;  %v15801_v4 = vpop.eup %15800  ;;  %v18487_v8 = vadd.f32 0.5, %v2248_v33  ;;  %15818 = vtanh.f32 %v1773_v52  ;;  %14832 = vmatprep.subr.bf16.mxu0 %v14831_v30  ;;  %v14841_v44 = vpack.c.bf16 %v18421_v0, %v18468_v38  ;;  %v1866_v39 = vadd.f32 %v18364_v18, %v17585_v57  ;;  %v18502_v33 = vpop.f32.mrb[74].mxu0 }
 0x180   : > { %3794 = vmatprep.mubr.f32.mxu1 %v23869_v40  ;;  %v18494_v63 = vpop.eup %15802  ;;  %v18496_v37 = vadd.f32 0.5, %v2250_v31  ;;  %v18498_v45 = vadd.f32 0.5, %v2288_v48  ;;  %v18500_v43 = vadd.f32 0.5, %v2290_v25  ;;  %15820 = vtanh.f32 %v1862_v56  ;;  %14840 = vmatprep.subr.bf16.mxu1 %v14839_v7  ;;  %v18504_v52 = vpop.f32.mrb[74].mxu1 }
 0x181   : > { %14834 = vmatpush1.bf16.msra.mxu0 %v14833_v27  ;;  %v18506_v30 = vpop.eup %15804  ;;  %v18508_v18 = vadd.f32 0.5, %v2328_v51  ;;  %v2330_v54 = vmul.f32 0.5, %v15799_v11  ;;  %14842 = vmatpush1.bf16.msra.mxu1 %v14841_v44  ;;  %15822 = vtanh.f32 %v1777_v26  ;;  %v1779_v31 = vadd.f32 %v18371_v14, %v17585_v57  ;;  %v18512_v48 = vpop.f32.mrb[75].mxu0 }
 0x182   : > { %23947 = vst [vmem:[#allocation103_spill] sm:$0xff] %v18498_v45  ;;  %23948 = vst [vmem:[#allocation104_spill] sm:$0xff] %v18500_v43  ;;  %v18514_v25 = vpop.f32.mrb[75].mxu1  ;;  %v15807_v56 = vpop.eup %15806  ;;  %15824 = vtanh.f32 %v1866_v39  ;;  %v1868_v27 = vadd.f32 %v18373_v49, %v17585_v57  ;;  %v2249_v7 = vmul.f32 0.5, %v18419_v53  ;;  %v2289_v0 = vmul.f32 0.5, %v15795_v34 }
 0x183   : > { %23949 = vst [vmem:[#allocation105_spill] sm:$0xff] %v18508_v18  ;;  %v15809_v51 = vpop.eup %15808  ;;  %v2368_v12 = vmul.f32 0.5, %v15807_v56  ;;  %v1783_v14 = vadd.f32 %v18395_v15, %v17589_v60  ;;  %v2251_v11 = vmul.f32 0.5, %v18425_v36  ;;  %v2291_v26 = vmul.f32 0.5, %v15801_v4  ;;  %v18535_v39 = vpop.f32.mrb[76].mxu0 }
 0x184   : > { %14361 = vmatmul.mubr.msk.f32.vlgmr.msra.gmra.mrb[128].mxu0 %vm2560_vm1, %v18192_v28  ;;  %14365 = vmatmul.mubr.msk.f32.vlgmr.msra.gmra.mrb[128].mxu1 %vm2560_vm1, %v18192_v28  ;;  %v1872_v49 = vadd.f32 %v18397_v35, %v17589_v60  ;;  %v1785_v53 = vadd.f32 %v18407_v16, %v17589_v60  ;;  %v18531_v34 = vadd.f32 0.5, %v2249_v7  ;;  %v18533_v44 = vadd.f32 0.5, %v2289_v0  ;;  %v18537_v15 = vpop.f32.mrb[76].mxu1  ;;  %v18544_v38 = vpop.f32.mrb[77].mxu0 }
 0x185   : > { %3711 = vmatprep.mubr.f32.mxu0 %v23869_v40  ;;  %v15811_v36 = vpop.eup %15810  ;;  %v2370_v4 = vmul.f32 0.5, %v15809_v51  ;;  %15826 = vtanh.f32 %v1779_v31  ;;  %3800 = vmatprep.mubr.f32.mxu1 %v23869_v40  ;;  %v18540_v56 = vadd.f32 0.5, %v2251_v11  ;;  %v18542_v35 = vadd.f32 0.5, %v2291_v26  ;;  %v18546_v16 = vpop.f32.mrb[77].mxu1 }
 0x186   : > { %23950 = vst [vmem:[#allocation106_spill] sm:$0xff] %v18531_v34  ;;  %23951 = vst [vmem:[#allocation107_spill] sm:$0xff] %v18533_v44  ;;  %v15813_v7 = vpop.eup %15812  ;;  %v18548_v0 = vadd.f32 0.5, %v2330_v54  ;;  %15828 = vtanh.f32 %v1868_v27  ;;  %v1874_v2 = vadd.f32 %v18409_v29, %v17589_v60  ;;  %v14843_v31 = vpack.c.bf16 %v18533_v44, %v18531_v34  ;;  %v18570_v26 = vpop.f32.mrb[78].mxu0 }
 0x187   : > { %23952 = vst [vmem:[#allocation108_spill] sm:$0xff] %v18540_v56  ;;  %23953 = vst [vmem:[#allocation109_spill] sm:$0xff] %v18542_v35  ;;  %v15815_v51 = vpop.eup %15814  ;;  %v18554_v3 = vadd.f32 0.5, %v2368_v12  ;;  %15830 = vtanh.f32 %v1783_v14  ;;  %v14851_v11 = vpack.c.bf16 %v18542_v35, %v18540_v56  ;;  %v14845_v54 = vpack.c.bf16 %v18498_v45, %v18487_v8  ;;  %v18572_v35 = vpop.f32.mrb[78].mxu1 }
 0x188   : > { %23954 = vst [vmem:[#allocation110_spill] sm:$0xff] %v18548_v0  ;;  %14362 = vmatmul.mubr.msk.f32.gmra.mrb[130].mxu0 %vm2560_vm1, %v18230_v9  ;;  %v15817_v27 = vpop.eup %15816  ;;  %15832 = vtanh.f32 %v1872_v49  ;;  %14366 = vmatmul.mubr.msk.f32.gmra.mrb[130].mxu1 %vm2560_vm1, %v18230_v9  ;;  %v14853_v12 = vpack.c.bf16 %v18500_v43, %v18496_v37  ;;  %v1789_v29 = vadd.f32 %v18432_v19, %v17598_v17  ;;  %v18576_v49 = vadd.f32 0.5, %v2370_v4  ;;  %v18580_v34 = vpop.f32.mrb[79].mxu0 }
 0x189   : > { %23955 = vst [vmem:[#allocation111_spill] sm:$0xff] %v18554_v3  ;;  %14844 = vmatprep.subr.bf16.mxu0 %v14843_v31  ;;  %v1878_v14 = vadd.f32 %v18434_v32, %v17598_v17  ;;  %v18574_v56 = vpop.eup %15818  ;;  %v2252_v44 = vmul.f32 0.5, %v15813_v7  ;;  %15834 = vtanh.f32 %v1785_v53  ;;  %14852 = vmatprep.subr.bf16.mxu1 %v14851_v11  ;;  %v1791_v31 = vadd.f32 %v18441_v5, %v17598_v17  ;;  %v18582_v19 = vpop.f32.mrb[79].mxu1 }
 0x18a   : > { %23956 = vst [vmem:[#allocation112_spill] sm:$0xff] %v18576_v49  ;;  %14846 = vmatpush1.bf16.msra.mxu0 %v14845_v54  ;;  %v18584_v32 = vpop.eup %15820  ;;  %v2254_v43 = vmul.f32 0.5, %v15815_v51  ;;  %15836 = vtanh.f32 %v1874_v2  ;;  %14854 = vmatpush1.bf16.msra.mxu1 %v14853_v12  ;;  %v1880_v4 = vadd.f32 %v18443_v58, %v17598_v17  ;;  %v1949_v53 = vadd.f32 %v18463_v23, %v17581_v50 }
 0x18b   : > { %3717 = vmatprep.mubr.f32.mxu0 %v23869_v40  ;;  %v15823_v7 = vpop.eup %15822  ;;  %15838 = vtanh.f32 %v1789_v29  ;;  %3806 = vmatprep.mubr.f32.mxu1 %v23869_v40  ;;  %v2038_v5 = vadd.f32 %v18465_v59, %v17581_v50  ;;  %v2329_v2 = vmul.f32 0.5, %v18494_v63  ;;  %v2369_v51 = vmul.f32 0.5, %v15811_v36 }
 0x18c   : > { %14363 = vmatmul.mubr.msk.f32.gmra.mrb[132].mxu0 %vm2560_vm1, %v18275_v1  ;;  %v15825_v11 = vpop.eup %15824  ;;  %15840 = vtanh.f32 %v1878_v14  ;;  %14367 = vmatmul.mubr.msk.f32.gmra.mrb[132].mxu1 %vm2560_vm1, %v18275_v1  ;;  %v1951_v58 = vadd.f32 %v18476_v20, %v17581_v50  ;;  %v2331_v23 = vmul.f32 0.5, %v18506_v30  ;;  %v2371_v54 = vmul.f32 0.5, %v15817_v27 }
 0x18d   : > { %3723 = vmatprep.mubr.f32.mxu0 %v23869_v40  ;;  %15842 = vtanh.f32 %v1791_v31  ;;  %3812 = vmatprep.mubr.f32.mxu1 %v23869_v40  ;;  %v2040_v59 = vadd.f32 %v18478_v13, %v17581_v50  ;;  %v18606_v63 = vadd.f32 0.5, %v2329_v2  ;;  %v18608_v36 = vadd.f32 0.5, %v2369_v51 }
 0x18e   : > { %v2292_v12 = vmul.f32 0.5, %v15823_v7  ;;  %15844 = vtanh.f32 %v1880_v4  ;;  %v18610_v29 = vadd.f32 0.5, %v2331_v23  ;;  %v18612_v14 = vadd.f32 0.5, %v2371_v54 }
 0x18f   : > { %23957 = vst [vmem:[#allocation113_spill] sm:$0xff] %v18606_v63  ;;  %23958 = vst [vmem:[#allocation114_spill] sm:$0xff] %v18608_v36  ;;  %v15827_v20 = vpop.eup %15826  ;;  %v18614_v45 = vadd.f32 0.5, %v2252_v44  ;;  %v2294_v30 = vmul.f32 0.5, %v15825_v11  ;;  %15846 = vtanh.f32 %v1949_v53  ;;  %v14847_v50 = vpack.c.bf16 %v18608_v36, %v18606_v63  ;;  %v24082_v36 = vld [vmem:[#allocation36_spill] sm:$0xff] }
 0x190   : > { %23959 = vst [vmem:[#allocation115_spill] sm:$0xff] %v18610_v29  ;;  %23960 = vst [vmem:[#allocation116_spill] sm:$0xff] %v18612_v14  ;;  %14364 = vmatmul.mubr.msk.f32.gmra.mrb[134].mxu0 %vm2560_vm1, %v18315_v22  ;;  %v15829_v13 = vpop.eup %15828  ;;  %v18620_v27 = vadd.f32 0.5, %v2254_v43  ;;  %15848 = vtanh.f32 %v2038_v5  ;;  %14368 = vmatmul.mubr.msk.f32.gmra.mrb[134].mxu1 %vm2560_vm1, %v18315_v22  ;;  %v14855_v31 = vpack.c.bf16 %v18612_v14, %v18610_v29  ;;  %v18636_v2 = vadd.f32 0.5, %v2292_v12 }
 0x191   : > { %23961 = vst [vmem:[#allocation117_spill] sm:$0xff] %v18614_v45  ;;  %v14849_v44 = vpack.c.bf16 %v18554_v3, %v18508_v18  ;;  %3883 = vmatprep.mubr.f32.mxu0 %v23869_v40  ;;  %v15831_v4 = vpop.eup %15830  ;;  %15850 = vtanh.f32 %v1951_v58  ;;  %14848 = vmatprep.subr.bf16.mxu0 %v14847_v50  ;;  %v14857_v53 = vpack.c.bf16 %v18576_v49, %v18548_v0  ;;  %v18642_v23 = vadd.f32 0.5, %v2294_v30 }
 0x192   : > { %23962 = vst [vmem:[#allocation118_spill] sm:$0xff] %v18620_v27  ;;  %v1955_v43 = vadd.f32 %v18502_v33, %v17585_v57  ;;  %v2044_v7 = vadd.f32 %v18504_v52, %v17585_v57  ;;  %3972 = vmatprep.mubr.f32.mxu1 %v23869_v40  ;;  %v15833_v5 = vpop.eup %15832  ;;  %23963 = vst [vmem:[#allocation119_spill] sm:$0xff] %v18636_v2  ;;  %15852 = vtanh.f32 %v2040_v59  ;;  %14856 = vmatprep.subr.bf16.mxu1 %v14855_v31 }
 0x193   : > { %14850 = vmatpush1.bf16.msra.mxu0 %v14849_v44  ;;  %v1957_v51 = vadd.f32 %v18512_v48, %v17585_v57  ;;  %v2046_v11 = vadd.f32 %v18514_v25, %v17585_v57  ;;  %v15835_v58 = vpop.eup %15834  ;;  %23964 = vst [vmem:[#allocation120_spill] sm:$0xff] %v18642_v23  ;;  %14858 = vmatpush1.bf16.msra.mxu1 %v14857_v53  ;;  %v2253_v59 = vmul.f32 0.5, %v18574_v56  ;;  %v2293_v12 = vmul.f32 0.5, %v15827_v20 }
 0x194   : > { %15854 = vtanh.f32 %v1955_v43  ;;  %v1961_v33 = vadd.f32 %v18535_v39, %v17589_v60  ;;  %v2050_v52 = vadd.f32 %v18537_v15, %v17589_v60  ;;  %v15837_v54 = vpop.eup %15836  ;;  %v2255_v48 = vmul.f32 0.5, %v18584_v32 }
 0x195   : > { %15856 = vtanh.f32 %v2044_v7  ;;  %v15839_v50 = vpop.eup %15838  ;;  %v2332_v57 = vmul.f32 0.5, %v15831_v4  ;;  %v1963_v25 = vadd.f32 %v18544_v38, %v17589_v60  ;;  %v2295_v39 = vmul.f32 0.5, %v15829_v13 }
 0x196   : > { %15858 = vtanh.f32 %v1957_v51  ;;  %14369 = vmatmul.mubr.msk.f32.vlgmr.msra.gmra.mrb[136].mxu0 %vm2560_vm1, %v18192_v28  ;;  %v15841_v30 = vpop.eup %15840  ;;  %14373 = vmatmul.mubr.msk.f32.vlgmr.msra.gmra.mrb[136].mxu1 %vm2560_vm1, %v18192_v28  ;;  %v2052_v15 = vadd.f32 %v18546_v16, %v17589_v60  ;;  %v18659_v56 = vadd.f32 0.5, %v2253_v59  ;;  %v18661_v32 = vadd.f32 0.5, %v2293_v12 }
 0x197   : > { %15860 = vtanh.f32 %v2046_v11  ;;  %3889 = vmatprep.mubr.f32.mxu0 %v23869_v40  ;;  %v15843_v20 = vpop.eup %15842  ;;  %v2334_v31 = vmul.f32 0.5, %v15833_v5  ;;  %3978 = vmatprep.mubr.f32.mxu1 %v23869_v40  ;;  %v18664_v38 = vadd.f32 0.5, %v2255_v48  ;;  %v18666_v13 = vadd.f32 0.5, %v2295_v39 }
 0x198   : > { %23965 = vst [vmem:[#allocation121_spill] sm:$0xff] %v18659_v56  ;;  %23966 = vst [vmem:[#allocation122_spill] sm:$0xff] %v18661_v32  ;;  %15862 = vtanh.f32 %v1961_v33  ;;  %v15845_v44 = vpop.eup %15844  ;;  %v2372_v4 = vmul.f32 0.5, %v15839_v50  ;;  %v14859_v53 = vpack.c.bf16 %v18661_v32, %v18659_v56  ;;  %v14861_v60 = vpack.c.bf16 %v18636_v2, %v18614_v45 }
 0x199   : > { %23967 = vst [vmem:[#allocation123_spill] sm:$0xff] %v18664_v38  ;;  %23968 = vst [vmem:[#allocation124_spill] sm:$0xff] %v18666_v13  ;;  %15864 = vtanh.f32 %v2050_v52  ;;  %v15847_v16 = vpop.eup %15846  ;;  %v2374_v43 = vmul.f32 0.5, %v15841_v30  ;;  %v14867_v7 = vpack.c.bf16 %v18666_v13, %v18664_v38  ;;  %v1967_v5 = vadd.f32 %v18570_v26, %v17598_v17 }
 0x19a   : > { %15866 = vtanh.f32 %v1963_v25  ;;  %14370 = vmatmul.mubr.msk.f32.gmra.mrb[138].mxu0 %vm2560_vm1, %v18230_v9  ;;  %v15849_v51 = vpop.eup %15848  ;;  %14374 = vmatmul.mubr.msk.f32.gmra.mrb[138].mxu1 %vm2560_vm1, %v18230_v9  ;;  %v14869_v11 = vpack.c.bf16 %v18642_v23, %v18620_v27  ;;  %v2056_v33 = vadd.f32 %v18572_v35, %v17598_v17  ;;  %v1969_v52 = vadd.f32 %v18580_v34, %v17598_v17 }
 0x19b   : > { %15868 = vtanh.f32 %v2052_v15  ;;  %14860 = vmatprep.subr.bf16.mxu0 %v14859_v53  ;;  %v15851_v59 = vpop.eup %15850  ;;  %v18686_v12 = vadd.f32 0.5, %v2332_v57  ;;  %14868 = vmatprep.subr.bf16.mxu1 %v14867_v7  ;;  %v2058_v26 = vadd.f32 %v18582_v19, %v17598_v17  ;;  %v2333_v48 = vmul.f32 0.5, %v15835_v58 }
 0x19c   : > { %14862 = vmatpush1.bf16.msra.mxu0 %v14861_v60  ;;  %15870 = vtanh.f32 %v1967_v5  ;;  %v15853_v50 = vpop.eup %15852  ;;  %v18690_v25 = vadd.f32 0.5, %v2334_v31  ;;  %14870 = vmatpush1.bf16.msra.mxu1 %v14869_v11  ;;  %v2373_v35 = vmul.f32 0.5, %v15843_v20  ;;  %v2335_v39 = vmul.f32 0.5, %v15837_v54 }
 0x19d   : > { %23969 = vst [vmem:[#allocation125_spill] sm:$0xff] %v18686_v12  ;;  %15872 = vtanh.f32 %v2056_v33  ;;  %3895 = vmatprep.mubr.f32.mxu0 %v23869_v40  ;;  %v18693_v30 = vadd.f32 0.5, %v2372_v4  ;;  %v18695_v57 = vadd.f32 0.5, %v2374_v43  ;;  %3984 = vmatprep.mubr.f32.mxu1 %v23869_v40  ;;  %v2375_v17 = vmul.f32 0.5, %v15845_v44 }
 0x19e   : > { %23970 = vst [vmem:[#allocation126_spill] sm:$0xff] %v18690_v25  ;;  %v15855_v34 = vpop.eup %15854  ;;  %15874 = vtanh.f32 %v1969_v52  ;;  %14371 = vmatmul.mubr.msk.f32.gmra.mrb[140].mxu0 %vm2560_vm1, %v18275_v1  ;;  %14375 = vmatmul.mubr.msk.f32.gmra.mrb[140].mxu1 %vm2560_vm1, %v18275_v1  ;;  %v18703_v54 = vadd.f32 0.5, %v2333_v48  ;;  %v18705_v15 = vadd.f32 0.5, %v2373_v35  ;;  %v18708_v4 = vadd.f32 0.5, %v2335_v39 }
 0x19f   : > { %23971 = vst [vmem:[#allocation127_spill] sm:$0xff] %v18693_v30  ;;  %23972 = vst [vmem:[#allocation128_spill] sm:$0xff] %v18695_v57  ;;  %v15857_v19 = vpop.eup %15856  ;;  %v2296_v58 = vmul.f32 0.5, %v15855_v34  ;;  %15876 = vtanh.f32 %v2058_v26  ;;  %3901 = vmatprep.mubr.f32.mxu0 %v23869_v40  ;;  %3990 = vmatprep.mubr.f32.mxu1 %v23869_v40  ;;  %v18710_v53 = vadd.f32 0.5, %v2375_v17  ;;  %v2257_v44 = vmul.f32 0.5, %v15851_v59 }
 0x1a0   : > { %23973 = vst [vmem:[#allocation129_spill] sm:$0xff] %v18703_v54  ;;  %23974 = vst [vmem:[#allocation130_spill] sm:$0xff] %v18705_v15  ;;  %v15859_v20 = vpop.eup %15858  ;;  %v2298_v31 = vmul.f32 0.5, %v15857_v19  ;;  %v2256_v43 = vmul.f32 0.5, %v15847_v16  ;;  %v14863_v7 = vpack.c.bf16 %v18705_v15, %v18703_v54  ;;  %v2259_v11 = vmul.f32 0.5, %v15853_v50 }
 0x1a1   : > { %23975 = vst [vmem:[#allocation131_spill] sm:$0xff] %v18708_v4  ;;  %23976 = vst [vmem:[#allocation132_spill] sm:$0xff] %v18710_v53  ;;  %v15861_v60 = vpop.eup %15860  ;;  %v2297_v5 = vmul.f32 0.5, %v15859_v20  ;;  %v2258_v52 = vmul.f32 0.5, %v15849_v51  ;;  %v14871_v26 = vpack.c.bf16 %v18710_v53, %v18708_v4  ;;  %v14865_v48 = vpack.c.bf16 %v18693_v30, %v18686_v12 }
 0x1a2   : > { %v15863_v33 = vpop.eup %15862  ;;  %14372 = vmatmul.mubr.msk.f32.gmra.mrb[142].mxu0 %vm2560_vm1, %v18315_v22  ;;  %v2299_v35 = vmul.f32 0.5, %v15861_v60  ;;  %v18720_v39 = vadd.f32 0.5, %v2296_v58  ;;  %14376 = vmatmul.mubr.msk.f32.gmra.mrb[142].mxu1 %vm2560_vm1, %v18315_v22  ;;  %v14873_v16 = vpack.c.bf16 %v18695_v57, %v18690_v25  ;;  %v18726_v51 = vadd.f32 0.5, %v2257_v44 }
 0x1a3   : > { %v15865_v59 = vpop.eup %15864  ;;  %14864 = vmatprep.subr.bf16.mxu0 %v14863_v7  ;;  %v18728_v50 = vadd.f32 0.5, %v2297_v5  ;;  %v18730_v17 = vadd.f32 0.5, %v2298_v31  ;;  %14872 = vmatprep.subr.bf16.mxu1 %v14871_v26  ;;  %v18732_v19 = vadd.f32 0.5, %v2259_v11  ;;  %v18736_v60 = vadd.f32 0.5, %v2256_v43 }
 0x1a4   : > { %23977 = vst [vmem:[#allocation133_spill] sm:$0xff] %v18720_v39  ;;  %23978 = vst [vmem:[#allocation134_spill] sm:$0xff] %v18726_v51  ;;  %v15867_v34 = vpop.eup %15866  ;;  %14866 = vmatpush1.bf16.msra.mxu0 %v14865_v48  ;;  %v18734_v58 = vadd.f32 0.5, %v2299_v35  ;;  %14874 = vmatpush1.bf16.msra.mxu1 %v14873_v16  ;;  %v18741_v5 = vadd.f32 0.5, %v2258_v52 }
 0x1a5   : > { %23979 = vst [vmem:[#allocation135_spill] sm:$0xff] %v18728_v50  ;;  %23980 = vst [vmem:[#allocation136_spill] sm:$0xff] %v18730_v17  ;;  %v15869_v20 = vpop.eup %15868  ;;  %4061 = vmatprep.mubr.f32.mxu0 %v23869_v40  ;;  %v14875_v44 = vpack.c.bf16 %v18728_v50, %v18726_v51  ;;  %4150 = vmatprep.mubr.f32.mxu1 %v23869_v40  ;;  %v14877_v43 = vpack.c.bf16 %v18720_v39, %v18736_v60  ;;  %v2337_v26 = vmul.f32 0.5, %v15867_v34 }
 0x1a6   : > { %23981 = vst [vmem:[#allocation137_spill] sm:$0xff] %v18732_v19  ;;  %23982 = vst [vmem:[#allocation138_spill] sm:$0xff] %v18734_v58  ;;  %v15871_v7 = vpop.eup %15870  ;;  %v14883_v31 = vpack.c.bf16 %v18734_v58, %v18732_v19  ;;  %v14885_v52 = vpack.c.bf16 %v18730_v17, %v18741_v5  ;;  %v2339_v58 = vmul.f32 0.5, %v15869_v20  ;;  %v2336_v50 = vmul.f32 0.5, %v15863_v33 }
 0x1a7   : > { %23983 = vst [vmem:[#allocation139_spill] sm:$0xff] %v18736_v60  ;;  %23984 = vst [vmem:[#allocation140_spill] sm:$0xff] %v18741_v5  ;;  %v15873_v11 = vpop.eup %15872  ;;  %14377 = vmatmul.mubr.msk.f32.vlgmr.msra.gmra.mrb[144].mxu0 %vm2560_vm1, %v18192_v28  ;;  %14876 = vmatprep.subr.bf16.mxu0 %v14875_v44  ;;  %v2376_v35 = vmul.f32 0.5, %v15871_v7  ;;  %v2338_v60 = vmul.f32 0.5, %v15865_v59 }
 0x1a8   : > { %v15875_v48 = vpop.eup %15874  ;;  %v2378_v16 = vmul.f32 0.5, %v15873_v11  ;;  %14381 = vmatmul.mubr.msk.f32.vlgmr.msra.gmra.mrb[144].mxu1 %vm2560_vm1, %v18192_v28  ;;  %4067 = vmatprep.mubr.f32.mxu0 %v23869_v40  ;;  %v18758_v28 = vadd.f32 0.5, %v2337_v26  ;;  %v18769_v33 = vadd.f32 0.5, %v2339_v58 }
 0x1a9   : > { %v15877_v19 = vpop.eup %15876  ;;  %4156 = vmatprep.mubr.f32.mxu1 %v23869_v40  ;;  %14884 = vmatprep.subr.bf16.mxu1 %v14883_v31  ;;  %v2377_v44 = vmul.f32 0.5, %v15875_v48  ;;  %v18762_v11 = vadd.f32 0.5, %v2376_v35  ;;  %v18776_v31 = vadd.f32 0.5, %v2336_v50 }
 0x1aa   : > { %14878 = vmatpush1.bf16.msra.mxu0 %v14877_v43  ;;  %14886 = vmatpush1.bf16.msra.mxu1 %v14885_v52  ;;  %v2379_v34 = vmul.f32 0.5, %v15877_v19  ;;  %23985 = vst [vmem:[#allocation141_spill] sm:$0xff] %v18758_v28  ;;  %v18764_v20 = vadd.f32 0.5, %v2378_v16  ;;  %23989 = vst [vmem:[#allocation145_spill] sm:$0xff] %v18769_v33  ;;  %v18778_v43 = vadd.f32 0.5, %v2338_v60  ;;  %v17162_v60 = vld [vmem:[%s23528_s2] sm:$0xff] }
 0x1ab   : > { %14378 = vmatmul.mubr.msk.f32.gmra.mrb[146].mxu0 %vm2560_vm1, %v18230_v9  ;;  %v18760_v7 = vadd.f32 0.5, %v2377_v44  ;;  %23987 = vst [vmem:[#allocation143_spill] sm:$0xff] %v18762_v11  ;;  %23991 = vst [vmem:[#allocation147_spill] sm:$0xff] %v18776_v31  ;;  %v14881_v58 = vpack.c.bf16 %v18762_v11, %v18776_v31 }
 0x1ac   : > { %23988 = vst [vmem:[#allocation144_spill] sm:$0xff] %v18764_v20  ;;  %14382 = vmatmul.mubr.msk.f32.gmra.mrb[146].mxu1 %vm2560_vm1, %v18230_v9  ;;  %4073 = vmatprep.mubr.f32.mxu0 %v23869_v40  ;;  %v18771_v59 = vadd.f32 0.5, %v2379_v34  ;;  %23992 = vst [vmem:[#allocation148_spill] sm:$0xff] %v18778_v43  ;;  %v14889_v50 = vpack.c.bf16 %v18764_v20, %v18778_v43 }
 0x1ad   : > { %23986 = vst [vmem:[#allocation142_spill] sm:$0xff] %v18760_v7  ;;  %4162 = vmatprep.mubr.f32.mxu1 %v23869_v40  ;;  %v14879_v19 = vpack.c.bf16 %v18760_v7, %v18758_v28 }
 0x1ae   : > { %23990 = vst [vmem:[#allocation146_spill] sm:$0xff] %v18771_v59  ;;  %v14887_v26 = vpack.c.bf16 %v18771_v59, %v18769_v33 }
 0x1af   : > { %14379 = vmatmul.mubr.msk.f32.gmra.mrb[148].mxu0 %vm2560_vm1, %v18275_v1  ;;  %14880 = vmatprep.subr.bf16.mxu0 %v14879_v19 }
 0x1b0   : > { %14383 = vmatmul.mubr.msk.f32.gmra.mrb[148].mxu1 %vm2560_vm1, %v18275_v1  ;;  %4079 = vmatprep.mubr.f32.mxu0 %v23869_v40 }
 0x1b1   : > { %4168 = vmatprep.mubr.f32.mxu1 %v23869_v40  ;;  %14888 = vmatprep.subr.bf16.mxu1 %v14887_v26 }
 0x1b2   : > { %14882 = vmatpush1.bf16.msra.mxu0 %v14881_v58  ;;  %14890 = vmatpush1.bf16.msra.mxu1 %v14889_v50 }
 0x1b3   : > { %14380 = vmatmul.mubr.msk.f32.gmra.mrb[150].mxu0 %vm2560_vm1, %v18315_v22 }
 0x1b4   : > { %14384 = vmatmul.mubr.msk.f32.gmra.mrb[150].mxu1 %vm2560_vm1, %v18315_v22  ;;  %4239 = vmatprep.mubr.f32.mxu0 %v23869_v40 }
 0x1b5   : > { %4328 = vmatprep.mubr.f32.mxu1 %v23869_v40 }
 0x1b7   : > { %14385 = vmatmul.mubr.msk.f32.vlgmr.msra.gmra.mrb[152].mxu0 %vm2560_vm1, %v17162_v60 }
 0x1b8   : > { %14389 = vmatmul.mubr.msk.f32.vlgmr.msra.gmra.mrb[152].mxu1 %vm2560_vm1, %v17162_v60  ;;  %4245 = vmatprep.mubr.f32.mxu0 %v23869_v40 }
 0x1b9   : > { %4334 = vmatprep.mubr.f32.mxu1 %v23869_v40 }
 0x1bb   : > { %14386 = vmatmul.mubr.msk.f32.gmra.mrb[154].mxu0 %vm2560_vm1, %v18230_v9 }
 0x1bc   : > { %14390 = vmatmul.mubr.msk.f32.gmra.mrb[154].mxu1 %vm2560_vm1, %v18230_v9  ;;  %4251 = vmatprep.mubr.f32.mxu0 %v23869_v40  ;;  %v18823_v9 = vpop.permute.xlu0 %2545 }
 0x1bd   : > { %4340 = vmatprep.mubr.f32.mxu1 %v23869_v40 }
 0x1bf   : > { %14387 = vmatmul.mubr.msk.f32.gmra.mrb[156].mxu0 %vm2560_vm1, %v18275_v1 }
 0x1c0   : > { %14391 = vmatmul.mubr.msk.f32.gmra.mrb[156].mxu1 %vm2560_vm1, %v18275_v1  ;;  %4257 = vmatprep.mubr.f32.mxu0 %v23869_v40  ;;  %v18826_v1 = vpop.permute.xlu1 %2549 }
 0x1c1   : > { %4346 = vmatprep.mubr.f32.mxu1 %v23869_v40 }
 0x1c3   : > { %14388 = vmatmul.mubr.msk.f32.gmra.mrb[158].mxu0 %vm2560_vm1, %v18315_v22 }
 0x1c4   : > { %14392 = vmatmul.mubr.msk.f32.gmra.mrb[158].mxu1 %vm2560_vm1, %v18315_v22  ;;  %4930 = vmatprep.mubr.f32.mxu0 %v23869_v40 }
 0x1c5   : > { %5019 = vmatprep.mubr.f32.mxu1 %v23869_v40 }
 0x1e7   : > { %v2639_v48 = vpop.f32.mrb[80].mxu0 }
 0x1e8   : > { %v2640_v35 = vadd.f32 %v2639_v48, %v18823_v9  ;;  %v2641_v16 = vpop.f32.mrb[81].mxu0 }
 0x1e9   : > { %v2728_v52 = vpop.f32.mrb[80].mxu1  ;;  %v2642_v44 = vadd.f32 %v2641_v16, %v18823_v9  ;;  %v18834_v16 = vpop.permute.xlu1 %2553 }
 0x1ea   : > { %15878 = vtanh.f32 %v2640_v35  ;;  %v2729_v34 = vadd.f32 %v2728_v52, %v18823_v9  ;;  %v2730_v19 = vpop.f32.mrb[81].mxu1 }
 0x1eb   : > { %15880 = vtanh.f32 %v2642_v44  ;;  %v2731_v22 = vadd.f32 %v2730_v19, %v18823_v9  ;;  %v2645_v26 = vpop.f32.mrb[82].mxu0  ;;  %v17209_v19 = vmov 2  }
 0x1ec   : > { %15882 = vtanh.f32 %v2729_v34  ;;  %v2646_v58 = vadd.f32 %v2645_v26, %v18826_v1  ;;  %v2647_v50 = vpop.f32.mrb[83].mxu0  ;;  %15551 = vset.pattern.permute.xlu1 %v17209_v19  ;;  %15552 = vset.pattern.permute.xlu0 %v17209_v19 }
 0x1ed   : > { %15884 = vtanh.f32 %v2731_v22  ;;  %v2734_v60 = vpop.f32.mrb[82].mxu1  ;;  %v2648_v48 = vadd.f32 %v2647_v50, %v18826_v1  ;;  %v17164_v50 = vld [vmem:[%s23529_s3 + $0x8] sm:$0xff] }
 0x1ee   : > { %15886 = vtanh.f32 %v2646_v58  ;;  %v2735_v43 = vadd.f32 %v2734_v60, %v18826_v1  ;;  %v2736_v35 = vpop.f32.mrb[83].mxu1  ;;  %v17163_v58 = vld [vmem:[%s23529_s3] sm:$0xff]  ;;  %4843 = vperm.xlu0 %15552, %v17164_v50  }
 0x1ef   : > { %15888 = vtanh.f32 %v2648_v48  ;;  %v2737_v52 = vadd.f32 %v2736_v35, %v18826_v1  ;;  %4839 = vperm.xlu1 %15551, %v17163_v58  }
 0x1f0   : > { %15890 = vtanh.f32 %v2735_v43  ;;  %v2651_v44 = vpop.f32.mrb[84].mxu0 }
 0x1f1   : > { %15892 = vtanh.f32 %v2737_v52  ;;  %v2652_v34 = vadd.f32 %v2651_v44, %v18834_v16  ;;  %v2740_v22 = vpop.f32.mrb[84].mxu1  ;;  %v2653_v26 = vpop.f32.mrb[85].mxu0 }
 0x1f2   : > { %v2741_v43 = vadd.f32 %v2740_v22, %v18834_v16  ;;  %v2654_v60 = vadd.f32 %v2653_v26, %v18834_v16  ;;  %v2742_v48 = vpop.f32.mrb[85].mxu1  ;;  %v18847_v44 = vpop.permute.xlu0 %2557  ;;  %v17165_v22 = vld [vmem:[%s23529_s3 + $0x10] sm:$0xff] }
 0x1f3   : > { %15894 = vtanh.f32 %v2652_v34  ;;  %v2743_v35 = vadd.f32 %v2742_v48, %v18834_v16  ;;  %4847 = vperm.xlu1 %15551, %v17165_v22  }
 0x1f4   : > { %v15879_v52 = vpop.eup %15878  ;;  %15896 = vtanh.f32 %v2741_v43  ;;  %v2657_v19 = vpop.f32.mrb[86].mxu0 }
 0x1f5   : > { %v15881_v31 = vpop.eup %15880  ;;  %v4513_v58 = vmul.f32 0.5, %v15879_v52  ;;  %15898 = vtanh.f32 %v2654_v60  ;;  %v2658_v59 = vadd.f32 %v2657_v19, %v18847_v44  ;;  %v2746_v33 = vpop.f32.mrb[86].mxu1 }
 0x1f6   : > { %v2659_v50 = vpop.f32.mrb[87].mxu0  ;;  %v15883_v34 = vpop.eup %15882  ;;  %15900 = vtanh.f32 %v2743_v35  ;;  %v2747_v26 = vadd.f32 %v2746_v33, %v18847_v44  ;;  %v4514_v7 = vmul.f32 0.5, %v15881_v31  ;;  %v17166_v33 = vld [vmem:[%s23529_s3 + $0x18] sm:$0xff] }
 0x1f7   : > { %v2660_v48 = vadd.f32 %v2659_v50, %v18847_v44  ;;  %v2748_v43 = vpop.f32.mrb[87].mxu1  ;;  %v15885_v28 = vpop.eup %15884  ;;  %v4515_v52 = vmul.f32 0.5, %v15883_v34  ;;  %15902 = vtanh.f32 %v2658_v59  ;;  %v4673_v20 = vadd.f32 0.5, %v4513_v58  ;;  %4851 = vperm.xlu1 %15551, %v17166_v33  }
 0x1f8   : > { %v2749_v60 = vadd.f32 %v2748_v43, %v18847_v44  ;;  %v15887_v19 = vpop.eup %15886  ;;  %15904 = vtanh.f32 %v2747_v26  ;;  %v4674_v17 = vadd.f32 0.5, %v4514_v7  ;;  %v4516_v35 = vmul.f32 0.5, %v15885_v28 }
 0x1f9   : > { %v15889_v11 = vpop.eup %15888  ;;  %v4553_v5 = vmul.f32 0.5, %v15887_v19  ;;  %15906 = vtanh.f32 %v2660_v48  ;;  %v2817_v22 = vpop.f32.mrb[88].mxu0  ;;  %v18859_v50 = vadd.f32 0.5, %v4515_v52 }
 0x1fa   : > { %v15891_v31 = vpop.eup %15890  ;;  %15908 = vtanh.f32 %v2749_v60  ;;  %v2818_v59 = vadd.f32 %v2817_v22, %v18823_v9  ;;  %v2906_v34 = vpop.f32.mrb[88].mxu1  ;;  %v4554_v26 = vmul.f32 0.5, %v15889_v11  ;;  %v4676_v4 = vadd.f32 0.5, %v4516_v35 }
 0x1fb   : > { %v2819_v58 = vpop.f32.mrb[89].mxu0  ;;  %v15893_v43 = vpop.eup %15892  ;;  %v4713_v19 = vadd.f32 0.5, %v4553_v5  ;;  %v4555_v48 = vmul.f32 0.5, %v15891_v31  ;;  %v2907_v7 = vadd.f32 %v2906_v34, %v18823_v9 }
 0x1fc   : > { %v2820_v28 = vadd.f32 %v2819_v58, %v18823_v9  ;;  %v2908_v51 = vpop.f32.mrb[89].mxu1  ;;  %15910 = vtanh.f32 %v2818_v59  ;;  %v4714_v39 = vadd.f32 0.5, %v4554_v26  ;;  %v4556_v52 = vmul.f32 0.5, %v15893_v43 }
 0x1fd   : > { %v2909_v33 = vadd.f32 %v2908_v51, %v18823_v9  ;;  %v15895_v53 = vpop.eup %15894  ;;  %v4715_v60 = vadd.f32 0.5, %v4555_v48  ;;  %15912 = vtanh.f32 %v2907_v7  ;;  %v2823_v22 = vpop.f32.mrb[90].mxu0  ;;  %v14893_v15 = vpack.c.bf16 %v4713_v19, %v4673_v20 }
 0x1fe   : > { %v15897_v11 = vpop.eup %15896  ;;  %v4593_v54 = vmul.f32 0.5, %v15895_v53  ;;  %15914 = vtanh.f32 %v2820_v28  ;;  %v2824_v5 = vadd.f32 %v2823_v22, %v18826_v1  ;;  %v2912_v31 = vpop.f32.mrb[90].mxu1  ;;  %v14891_v58 = vpack.c.bf16 %v4714_v39, %v4674_v17 }
 0x1ff   : > { %v2825_v34 = vpop.f32.mrb[91].mxu0  ;;  %v15899_v13 = vpop.eup %15898  ;;  %v4595_v59 = vmul.f32 0.5, %v15897_v11  ;;  %15916 = vtanh.f32 %v2909_v33  ;;  %v2913_v51 = vadd.f32 %v2912_v31, %v18826_v1  ;;  %v4716_v20 = vadd.f32 0.5, %v4556_v52 }
 0x200   : > { %v2826_v26 = vadd.f32 %v2825_v34, %v18826_v1  ;;  %v2914_v43 = vpop.f32.mrb[91].mxu1  ;;  %v15901_v48 = vpop.eup %15900  ;;  %v18868_v7 = vadd.f32 0.5, %v4593_v54  ;;  %15918 = vtanh.f32 %v2824_v5  ;;  %14892 = vmatprep.subr.bf16.mxu0 %v14891_v58  ;;  %v14901_v17 = vpack.c.bf16 %v4715_v60, %v18859_v50 }
 0x201   : > { %v2915_v53 = vadd.f32 %v2914_v43, %v18826_v1  ;;  %v15903_v35 = vpop.eup %15902  ;;  %v18871_v19 = vadd.f32 0.5, %v4595_v59  ;;  %15920 = vtanh.f32 %v2913_v51  ;;  %14894 = vmatpush1.bf16.msra.mxu0 %v14893_v15  ;;  %v4594_v28 = vmul.f32 0.5, %v15899_v13 }
 0x202   : > { %v2829_v39 = vpop.f32.mrb[92].mxu0  ;;  %v15905_v33 = vpop.eup %15904  ;;  %v4633_v22 = vmul.f32 0.5, %v15903_v35  ;;  %15922 = vtanh.f32 %v2826_v26  ;;  %v14899_v31 = vpack.c.bf16 %v4716_v20, %v4676_v4  ;;  %v4596_v20 = vmul.f32 0.5, %v15901_v48 }
 0x203   : > { %v2830_v54 = vadd.f32 %v2829_v39, %v18834_v16  ;;  %v2918_v11 = vpop.f32.mrb[92].mxu1  ;;  %v2831_v5 = vpop.f32.mrb[93].mxu0  ;;  %v4635_v58 = vmul.f32 0.5, %v15905_v33  ;;  %15924 = vtanh.f32 %v2915_v53  ;;  %v4754_v4 = vadd.f32 0.5, %v4594_v28 }
 0x204   : > { %v15907_v34 = vpop.eup %15906  ;;  %v2919_v52 = vadd.f32 %v2918_v11, %v18834_v16  ;;  %v2832_v59 = vadd.f32 %v2831_v5, %v18834_v16  ;;  %v2920_v51 = vpop.f32.mrb[93].mxu1  ;;  %v4793_v43 = vadd.f32 0.5, %v4633_v22  ;;  %14900 = vmatprep.subr.bf16.mxu1 %v14899_v31 }
 0x205   : > { %v15909_v15 = vpop.eup %15908  ;;  %15926 = vtanh.f32 %v2830_v54  ;;  %v2921_v13 = vadd.f32 %v2920_v51, %v18834_v16  ;;  %v4634_v50 = vmul.f32 0.5, %v15907_v34  ;;  %v4795_v60 = vadd.f32 0.5, %v4635_v58  ;;  %14902 = vmatpush1.bf16.msra.mxu1 %v14901_v17 }
 0x206   : > { %15928 = vtanh.f32 %v2919_v52  ;;  %v2835_v26 = vpop.f32.mrb[94].mxu0  ;;  %v15911_v35 = vpop.eup %15910  ;;  %v4636_v5 = vmul.f32 0.5, %v15909_v15  ;;  %v4756_v51 = vadd.f32 0.5, %v4596_v20  ;;  %v14897_v15 = vpack.c.bf16 %v4793_v43, %v18868_v7  ;;  %v18892_v7 = vld [vmem:[%s23528_s2 + $0x20] sm:$0xff] }
 0x207   : > { %15930 = vtanh.f32 %v2832_v59  ;;  %v2836_v53 = vadd.f32 %v2835_v26, %v18847_v44  ;;  %v2924_v39 = vpop.f32.mrb[94].mxu1  ;;  %v2837_v33 = vpop.f32.mrb[95].mxu0  ;;  %v4794_v11 = vadd.f32 0.5, %v4634_v50  ;;  %v4517_v54 = vmul.f32 0.5, %v15911_v35 }
 0x208   : > { %v15913_v22 = vpop.eup %15912  ;;  %15932 = vtanh.f32 %v2921_v13  ;;  %v2925_v31 = vadd.f32 %v2924_v39, %v18847_v44  ;;  %v2838_v34 = vadd.f32 %v2837_v33, %v18847_v44  ;;  %v2926_v58 = vpop.f32.mrb[95].mxu1  ;;  %v4796_v26 = vadd.f32 0.5, %v4636_v5 }
 0x209   : > { %v15915_v17 = vpop.eup %15914  ;;  %v4519_v52 = vmul.f32 0.5, %v15913_v22  ;;  %15934 = vtanh.f32 %v2836_v53  ;;  %v2927_v48 = vadd.f32 %v2926_v58, %v18847_v44  ;;  %v14895_v28 = vpack.c.bf16 %v4794_v11, %v4754_v4 }
 0x20a   : > { %v15917_v59 = vpop.eup %15916  ;;  %15936 = vtanh.f32 %v2925_v31  ;;  %v14905_v13 = vpack.c.bf16 %v4795_v60, %v18871_v19  ;;  %v18884_v39 = vadd.f32 0.5, %v4517_v54  ;;  %v14903_v22 = vpack.c.bf16 %v4796_v26, %v4756_v51 }
 0x20b   : > { %v15919_v50 = vpop.eup %15918  ;;  %15938 = vtanh.f32 %v2838_v34  ;;  %14896 = vmatprep.subr.bf16.mxu0 %v14895_v28  ;;  %v18886_v4 = vadd.f32 0.5, %v4519_v52  ;;  %v4518_v19 = vmul.f32 0.5, %v15915_v17 }
 0x20c   : > { %v15921_v35 = vpop.eup %15920  ;;  %v4557_v33 = vmul.f32 0.5, %v15919_v50  ;;  %15940 = vtanh.f32 %v2927_v48  ;;  %v2995_v53 = vpop.f32.mrb[96].mxu0  ;;  %14898 = vmatpush1.bf16.msra.mxu0 %v14897_v15  ;;  %14904 = vmatprep.subr.bf16.mxu1 %v14903_v22  ;;  %v4520_v48 = vmul.f32 0.5, %v15917_v59 }
 0x20d   : > { %v15923_v58 = vpop.eup %15922  ;;  %v4559_v11 = vmul.f32 0.5, %v15921_v35  ;;  %v2996_v20 = vadd.f32 %v2995_v53, %v18823_v9  ;;  %v3084_v5 = vpop.f32.mrb[96].mxu1  ;;  %14906 = vmatpush1.bf16.msra.mxu1 %v14905_v13  ;;  %v18908_v13 = vld [vmem:[%s23528_s2 + $0x28] sm:$0xff] }
 0x20e   : > { %v2997_v31 = vpop.f32.mrb[97].mxu0  ;;  %v15925_v43 = vpop.eup %15924  ;;  %v3085_v60 = vadd.f32 %v3084_v5, %v18823_v9  ;;  %v4558_v52 = vmul.f32 0.5, %v15923_v58  ;;  %v4717_v51 = vadd.f32 0.5, %v4557_v33 }
 0x20f   : > { %v2998_v54 = vadd.f32 %v2997_v31, %v18823_v9  ;;  %v3086_v34 = vpop.f32.mrb[97].mxu1  ;;  %v15927_v28 = vpop.eup %15926  ;;  %v18896_v26 = vadd.f32 0.5, %v4559_v11  ;;  %15942 = vtanh.f32 %v2996_v20  ;;  %14397 = vmatmul.mubr.msk.f32.vlgmr.msra.gmra.mrb[160].mxu0 %vm2560_vm1, %v18892_v7  ;;  %v4560_v5 = vmul.f32 0.5, %v15925_v43 }
 0x210   : > { %v3087_v50 = vadd.f32 %v3086_v34, %v18823_v9  ;;  %v15929_v15 = vpop.eup %15928  ;;  %v4597_v35 = vmul.f32 0.5, %v15927_v28  ;;  %15944 = vtanh.f32 %v3085_v60  ;;  %v3001_v17 = vpop.f32.mrb[98].mxu0  ;;  %v4718_v53 = vadd.f32 0.5, %v4558_v52  ;;  %4936 = vmatprep.mubr.f32.mxu0 %v23869_v40  ;;  %14401 = vmatmul.mubr.msk.f32.vlgmr.msra.gmra.mrb[160].mxu1 %vm2560_vm1, %v18892_v7 }
 0x211   : > { %v15931_v22 = vpop.eup %15930  ;;  %v18901_v58 = vmul.f32 0.5, %v15929_v15  ;;  %15946 = vtanh.f32 %v2998_v54  ;;  %v3002_v59 = vadd.f32 %v3001_v17, %v18826_v1  ;;  %v3090_v33 = vpop.f32.mrb[98].mxu1  ;;  %v4678_v20 = vadd.f32 0.5, %v4518_v19  ;;  %5025 = vmatprep.mubr.f32.mxu1 %v23869_v40 }
 0x212   : > { %v3003_v11 = vpop.f32.mrb[99].mxu0  ;;  %v15933_v31 = vpop.eup %15932  ;;  %15948 = vtanh.f32 %v3087_v50  ;;  %v3091_v43 = vadd.f32 %v3090_v33, %v18826_v1  ;;  %v4680_v54 = vadd.f32 0.5, %v4520_v48  ;;  %v18914_v28 = vadd.f32 0.5, %v4597_v35 }
 0x213   : > { %v3004_v60 = vadd.f32 %v3003_v11, %v18826_v1  ;;  %v3092_v34 = vpop.f32.mrb[99].mxu1  ;;  %v15935_v52 = vpop.eup %15934  ;;  %15950 = vtanh.f32 %v3002_v59  ;;  %v14907_v19 = vpack.c.bf16 %v4718_v53, %v4678_v20  ;;  %14398 = vmatmul.mubr.msk.f32.gmra.mrb[162].mxu0 %vm2560_vm1, %v18908_v13  ;;  %v4720_v11 = vadd.f32 0.5, %v4560_v5  ;;  %v18928_v20 = vld [vmem:[%s23528_s2 + $0x30] sm:$0xff] }
 0x214   : > { %v3093_v15 = vadd.f32 %v3092_v34, %v18826_v1  ;;  %v15937_v17 = vpop.eup %15936  ;;  %v4637_v50 = vmul.f32 0.5, %v15935_v52  ;;  %15952 = vtanh.f32 %v3091_v43  ;;  %v3007_v33 = vpop.f32.mrb[100].mxu0  ;;  %v14909_v38 = vpack.c.bf16 %v4717_v51, %v18884_v39  ;;  %4942 = vmatprep.mubr.f32.mxu0 %v23869_v40  ;;  %14402 = vmatmul.mubr.msk.f32.gmra.mrb[162].mxu1 %vm2560_vm1, %v18908_v13 }
 0x215   : > { %v15939_v48 = vpop.eup %15938  ;;  %v4639_v32 = vmul.f32 0.5, %v15937_v17  ;;  %15954 = vtanh.f32 %v3004_v60  ;;  %v3008_v35 = vadd.f32 %v3007_v33, %v18834_v16  ;;  %v3096_v59 = vpop.f32.mrb[100].mxu1  ;;  %14908 = vmatprep.subr.bf16.mxu0 %v14907_v19  ;;  %v14917_v53 = vpack.c.bf16 %v18896_v26, %v18886_v4  ;;  %5031 = vmatprep.mubr.f32.mxu1 %v23869_v40 }
 0x216   : > { %v3009_v34 = vpop.f32.mrb[101].mxu0  ;;  %v15941_v5 = vpop.eup %15940  ;;  %v18930_v39 = vadd.f32 0.5, %v4637_v50  ;;  %15956 = vtanh.f32 %v3093_v15  ;;  %v3097_v51 = vadd.f32 %v3096_v59, %v18834_v16  ;;  %14910 = vmatpush1.bf16.msra.mxu0 %v14909_v38  ;;  %v14915_v52 = vpack.c.bf16 %v4720_v11, %v4680_v54  ;;  %v18947_v54 = vld [vmem:[%s23528_s2 + $0x38] sm:$0xff] }
 0x217   : > { %v3010_v43 = vadd.f32 %v3009_v34, %v18834_v16  ;;  %v3098_v60 = vpop.f32.mrb[101].mxu1  ;;  %v18936_v4 = vadd.f32 0.5, %v4639_v32  ;;  %15958 = vtanh.f32 %v3008_v35  ;;  %14399 = vmatmul.mubr.msk.f32.gmra.mrb[164].mxu0 %vm2560_vm1, %v18928_v20  ;;  %v4598_v15 = vmul.f32 0.5, %v15931_v22 }
 0x218   : > { %v3099_v26 = vadd.f32 %v3098_v60, %v18834_v16  ;;  %15960 = vtanh.f32 %v3097_v51  ;;  %v3013_v19 = vpop.f32.mrb[102].mxu0  ;;  %v4638_v17 = vmul.f32 0.5, %v15939_v48  ;;  %v4600_v50 = vmul.f32 0.5, %v15933_v31  ;;  %14916 = vmatprep.subr.bf16.mxu1 %v14915_v52  ;;  %4948 = vmatprep.mubr.f32.mxu0 %v23869_v40 }
 0x219   : > { %v15943_v33 = vpop.eup %15942  ;;  %15962 = vtanh.f32 %v3010_v43  ;;  %v3014_v32 = vadd.f32 %v3013_v19, %v18847_v44  ;;  %v3102_v38 = vpop.f32.mrb[102].mxu1  ;;  %v4640_v11 = vmul.f32 0.5, %v15941_v5  ;;  %v14913_v22 = vpack.c.bf16 %v18930_v39, %v18914_v28  ;;  %14918 = vmatpush1.bf16.msra.mxu1 %v14917_v53 }
 0x21a   : > { %v3015_v35 = vpop.f32.mrb[103].mxu0  ;;  %v15945_v48 = vpop.eup %15944  ;;  %v4521_v31 = vmul.f32 0.5, %v15943_v33  ;;  %15964 = vtanh.f32 %v3099_v26  ;;  %v3103_v59 = vadd.f32 %v3102_v38, %v18847_v44  ;;  %v4759_v60 = vadd.f32 0.5, %v18901_v58  ;;  %14403 = vmatmul.mubr.msk.f32.gmra.mrb[164].mxu1 %vm2560_vm1, %v18928_v20 }
 0x21b   : > { %v3016_v34 = vadd.f32 %v3015_v35, %v18847_v44  ;;  %v3104_v51 = vpop.f32.mrb[103].mxu1  ;;  %v15947_v43 = vpop.eup %15946  ;;  %v4523_v52 = vmul.f32 0.5, %v15945_v48  ;;  %15966 = vtanh.f32 %v3014_v32  ;;  %5037 = vmatprep.mubr.f32.mxu1 %v23869_v40  ;;  %14400 = vmatmul.mubr.msk.f32.gmra.mrb[166].mxu0 %vm2560_vm1, %v18947_v54  ;;  %v4758_v53 = vadd.f32 0.5, %v4598_v15 }
 0x21c   : > { %v3105_v19 = vadd.f32 %v3104_v51, %v18847_v44  ;;  %v15949_v28 = vpop.eup %15948  ;;  %v18957_v5 = vadd.f32 0.5, %v4521_v31  ;;  %15968 = vtanh.f32 %v3103_v59  ;;  %v4798_v39 = vadd.f32 0.5, %v4638_v17  ;;  %5108 = vmatprep.mubr.f32.mxu0 %v23869_v40 }
 0x21d   : > { %v15951_v26 = vpop.eup %15950  ;;  %15970 = vtanh.f32 %v3016_v34  ;;  %v4760_v58 = vadd.f32 0.5, %v4600_v50  ;;  %v4800_v33 = vadd.f32 0.5, %v4640_v11  ;;  %v14921_v32 = vpack.c.bf16 %v18936_v4, %v4759_v60 }
 0x21e   : > { %v15953_v38 = vpop.eup %15952  ;;  %v18964_v35 = vadd.f32 0.5, %v4523_v52  ;;  %v4561_v48 = vmul.f32 0.5, %v15951_v26  ;;  %15972 = vtanh.f32 %v3105_v19  ;;  %v14911_v59 = vpack.c.bf16 %v4798_v39, %v4758_v53  ;;  %14404 = vmatmul.mubr.msk.f32.gmra.mrb[166].mxu1 %vm2560_vm1, %v18947_v54 }
 0x21f   : > { %v3173_v31 = vpop.f32.mrb[104].mxu0  ;;  %v15955_v51 = vpop.eup %15954  ;;  %v4563_v56 = vmul.f32 0.5, %v15953_v38  ;;  %v14919_v50 = vpack.c.bf16 %v4800_v33, %v4760_v58  ;;  %v4522_v4 = vmul.f32 0.5, %v15947_v43  ;;  %5197 = vmatprep.mubr.f32.mxu1 %v23869_v40  ;;  %v4524_v53 = vmul.f32 0.5, %v15949_v28 }
 0x220   : > { %v3174_v15 = vadd.f32 %v3173_v31, %v18823_v9  ;;  %v3262_v17 = vpop.f32.mrb[104].mxu1  ;;  %v3175_v57 = vpop.f32.mrb[105].mxu0  ;;  %14912 = vmatprep.subr.bf16.mxu0 %v14911_v59  ;;  %v4562_v19 = vmul.f32 0.5, %v15955_v51  ;;  %v4721_v26 = vadd.f32 0.5, %v4561_v48 }
 0x221   : > { %v15957_v11 = vpop.eup %15956  ;;  %v3263_v34 = vadd.f32 %v3262_v17, %v18823_v9  ;;  %v3176_v60 = vadd.f32 %v3175_v57, %v18823_v9  ;;  %v3264_v52 = vpop.f32.mrb[105].mxu1  ;;  %v18972_v38 = vadd.f32 0.5, %v4563_v56  ;;  %14920 = vmatprep.subr.bf16.mxu1 %v14919_v50  ;;  %14914 = vmatpush1.bf16.msra.mxu0 %v14913_v22  ;;  %v4682_v51 = vadd.f32 0.5, %v4522_v4 }
 0x222   : > { %v15959_v39 = vpop.eup %15958  ;;  %15974 = vtanh.f32 %v3174_v15  ;;  %v3265_v31 = vadd.f32 %v3264_v52, %v18823_v9  ;;  %14922 = vmatpush1.bf16.msra.mxu1 %v14921_v32  ;;  %v4722_v33 = vadd.f32 0.5, %v4562_v19  ;;  %v4564_v59 = vmul.f32 0.5, %v15957_v11 }
 0x223   : > { %v15961_v43 = vpop.eup %15960  ;;  %v4601_v58 = vmul.f32 0.5, %v15959_v39  ;;  %15976 = vtanh.f32 %v3263_v34  ;;  %v3179_v57 = vpop.f32.mrb[106].mxu0  ;;  %v4684_v32 = vadd.f32 0.5, %v4524_v53  ;;  %v14925_v53 = vpack.c.bf16 %v4721_v26, %v18957_v5 }
 0x224   : > { %v15963_v17 = vpop.eup %15962  ;;  %v18975_v30 = vmul.f32 0.5, %v15961_v43  ;;  %15978 = vtanh.f32 %v3176_v60  ;;  %v3180_v28 = vadd.f32 %v3179_v57, %v18826_v1  ;;  %v3268_v56 = vpop.f32.mrb[106].mxu1  ;;  %14405 = vmatmul.mubr.msk.f32.vlgmr.msra.gmra.mrb[168].mxu0 %vm2560_vm1, %v18892_v7  ;;  %v14923_v4 = vpack.c.bf16 %v4722_v33, %v4682_v51 }
 0x225   : > { %v3181_v48 = vpop.f32.mrb[107].mxu0  ;;  %v15965_v15 = vpop.eup %15964  ;;  %15980 = vtanh.f32 %v3265_v31  ;;  %v3269_v22 = vadd.f32 %v3268_v56, %v18826_v1  ;;  %v18982_v52 = vadd.f32 0.5, %v4601_v58  ;;  %14409 = vmatmul.mubr.msk.f32.vlgmr.msra.gmra.mrb[168].mxu1 %vm2560_vm1, %v18892_v7  ;;  %5114 = vmatprep.mubr.f32.mxu0 %v23869_v40  ;;  %v4724_v43 = vadd.f32 0.5, %v4564_v59 }
 0x226   : > { %v3182_v50 = vadd.f32 %v3181_v48, %v18826_v1  ;;  %v3270_v34 = vpop.f32.mrb[107].mxu1  ;;  %v15967_v11 = vpop.eup %15966  ;;  %15982 = vtanh.f32 %v3180_v28  ;;  %5203 = vmatprep.mubr.f32.mxu1 %v23869_v40  ;;  %14924 = vmatprep.subr.bf16.mxu0 %v14923_v4  ;;  %v14933_v33 = vpack.c.bf16 %v18972_v38, %v18964_v35  ;;  %v4604_v4 = vmul.f32 0.5, %v15965_v15 }
 0x227   : > { %v3271_v60 = vadd.f32 %v3270_v34, %v18826_v1  ;;  %v15969_v19 = vpop.eup %15968  ;;  %v4641_v39 = vmul.f32 0.5, %v15967_v11  ;;  %15984 = vtanh.f32 %v3269_v22  ;;  %v3185_v31 = vpop.f32.mrb[108].mxu0  ;;  %v14931_v35 = vpack.c.bf16 %v4724_v43, %v4684_v32  ;;  %14926 = vmatpush1.bf16.msra.mxu0 %v14925_v53 }
 0x228   : > { %v15971_v58 = vpop.eup %15970  ;;  %v4643_v57 = vmul.f32 0.5, %v15969_v19  ;;  %15986 = vtanh.f32 %v3182_v50  ;;  %v3186_v28 = vadd.f32 %v3185_v31, %v18834_v16  ;;  %v3274_v56 = vpop.f32.mrb[108].mxu1  ;;  %14406 = vmatmul.mubr.msk.f32.gmra.mrb[170].mxu0 %vm2560_vm1, %v18908_v13  ;;  %v4602_v11 = vmul.f32 0.5, %v15963_v17 }
 0x229   : > { %v3187_v48 = vpop.f32.mrb[109].mxu0  ;;  %v15973_v51 = vpop.eup %15972  ;;  %v18993_v34 = vadd.f32 0.5, %v4641_v39  ;;  %15988 = vtanh.f32 %v3271_v60  ;;  %v3275_v22 = vadd.f32 %v3274_v56, %v18834_v16  ;;  %14410 = vmatmul.mubr.msk.f32.gmra.mrb[170].mxu1 %vm2560_vm1, %v18908_v13  ;;  %5120 = vmatprep.mubr.f32.mxu0 %v23869_v40  ;;  %v4642_v60 = vmul.f32 0.5, %v15971_v58 }
 0x22a   : > { %v3188_v59 = vadd.f32 %v3187_v48, %v18834_v16  ;;  %v3276_v5 = vpop.f32.mrb[109].mxu1  ;;  %v18999_v26 = vadd.f32 0.5, %v4643_v57  ;;  %15990 = vtanh.f32 %v3186_v28  ;;  %5209 = vmatprep.mubr.f32.mxu1 %v23869_v40  ;;  %14932 = vmatprep.subr.bf16.mxu1 %v14931_v35  ;;  %v4644_v28 = vmul.f32 0.5, %v15973_v51 }
 0x22b   : > { %v3277_v50 = vadd.f32 %v3276_v5, %v18834_v16  ;;  %15992 = vtanh.f32 %v3275_v22  ;;  %v3191_v38 = vpop.f32.mrb[110].mxu0  ;;  %v14929_v32 = vpack.c.bf16 %v18993_v34, %v18982_v52  ;;  %14934 = vmatpush1.bf16.msra.mxu1 %v14933_v33  ;;  %v4763_v48 = vadd.f32 0.5, %v18975_v30 }
 0x22c   : > { %v15975_v19 = vpop.eup %15974  ;;  %15994 = vtanh.f32 %v3188_v59  ;;  %v3192_v39 = vadd.f32 %v3191_v38, %v18847_v44  ;;  %v3280_v31 = vpop.f32.mrb[110].mxu1  ;;  %14407 = vmatmul.mubr.msk.f32.gmra.mrb[172].mxu0 %vm2560_vm1, %v18928_v20  ;;  %v4762_v34 = vadd.f32 0.5, %v4602_v11  ;;  %v4802_v59 = vadd.f32 0.5, %v4642_v60 }
 0x22d   : > { %v3193_v57 = vpop.f32.mrb[111].mxu0  ;;  %v15977_v43 = vpop.eup %15976  ;;  %v4525_v53 = vmul.f32 0.5, %v15975_v19  ;;  %15996 = vtanh.f32 %v3277_v50  ;;  %v3281_v56 = vadd.f32 %v3280_v31, %v18847_v44  ;;  %14411 = vmatmul.mubr.msk.f32.gmra.mrb[172].mxu1 %vm2560_vm1, %v18928_v20  ;;  %5126 = vmatprep.mubr.f32.mxu0 %v23869_v40  ;;  %v4764_v30 = vadd.f32 0.5, %v4604_v4 }
 0x22e   : > { %v3194_v17 = vadd.f32 %v3193_v57, %v18847_v44  ;;  %v3282_v15 = vpop.f32.mrb[111].mxu1  ;;  %v15979_v58 = vpop.eup %15978  ;;  %v4527_v22 = vmul.f32 0.5, %v15977_v43  ;;  %15998 = vtanh.f32 %v3192_v39  ;;  %5215 = vmatprep.mubr.f32.mxu1 %v23869_v40  ;;  %v4804_v50 = vadd.f32 0.5, %v4644_v28 }
 0x22f   : > { %v3283_v51 = vadd.f32 %v3282_v15, %v18847_v44  ;;  %v15981_v52 = vpop.eup %15980  ;;  %v19018_v33 = vadd.f32 0.5, %v4525_v53  ;;  %16000 = vtanh.f32 %v3281_v56  ;;  %v14937_v35 = vpack.c.bf16 %v18999_v26, %v4763_v48 }
 0x230   : > { %v15983_v5 = vpop.eup %15982  ;;  %16002 = vtanh.f32 %v3194_v17  ;;  %v19022_v19 = vadd.f32 0.5, %v4527_v22  ;;  %14408 = vmatmul.mubr.msk.f32.gmra.mrb[174].mxu0 %vm2560_vm1, %v18947_v54  ;;  %v14927_v57 = vpack.c.bf16 %v4802_v59, %v4762_v34  ;;  %v14935_v26 = vpack.c.bf16 %v4804_v50, %v4764_v30 }
 0x231   : > { %v15985_v38 = vpop.eup %15984  ;;  %v4565_v39 = vmul.f32 0.5, %v15983_v5  ;;  %16004 = vtanh.f32 %v3283_v51  ;;  %v3351_v31 = vpop.f32.mrb[112].mxu0  ;;  %14412 = vmatmul.mubr.msk.f32.gmra.mrb[174].mxu1 %vm2560_vm1, %v18947_v54  ;;  %5286 = vmatprep.mubr.f32.mxu0 %v23869_v40  ;;  %v4526_v4 = vmul.f32 0.5, %v15979_v58  ;;  %v4528_v51 = vmul.f32 0.5, %v15981_v52 }
 0x232   : > { %v15987_v43 = vpop.eup %15986  ;;  %v4567_v53 = vmul.f32 0.5, %v15985_v38  ;;  %v3352_v11 = vadd.f32 %v3351_v31, %v18823_v9  ;;  %v3440_v60 = vpop.f32.mrb[112].mxu1  ;;  %14928 = vmatprep.subr.bf16.mxu0 %v14927_v57  ;;  %5375 = vmatprep.mubr.f32.mxu1 %v23869_v40 }
 0x233   : > { %v3353_v56 = vpop.f32.mrb[113].mxu0  ;;  %v15989_v28 = vpop.eup %15988  ;;  %v3441_v17 = vadd.f32 %v3440_v60, %v18823_v9  ;;  %v4566_v22 = vmul.f32 0.5, %v15987_v43  ;;  %v4725_v59 = vadd.f32 0.5, %v4565_v39  ;;  %14936 = vmatprep.subr.bf16.mxu1 %v14935_v26  ;;  %14930 = vmatpush1.bf16.msra.mxu0 %v14929_v32 }
 0x234   : > { %v3354_v15 = vadd.f32 %v3353_v56, %v18823_v9  ;;  %v3442_v48 = vpop.f32.mrb[113].mxu1  ;;  %v15991_v34 = vpop.eup %15990  ;;  %v19033_v5 = vadd.f32 0.5, %v4567_v53  ;;  %16006 = vtanh.f32 %v3352_v11  ;;  %14938 = vmatpush1.bf16.msra.mxu1 %v14937_v35  ;;  %v4568_v57 = vmul.f32 0.5, %v15989_v28 }
 0x235   : > { %v3443_v30 = vadd.f32 %v3442_v48, %v18823_v9  ;;  %v15993_v58 = vpop.eup %15992  ;;  %v4605_v50 = vmul.f32 0.5, %v15991_v34  ;;  %16008 = vtanh.f32 %v3441_v17  ;;  %v3357_v38 = vpop.f32.mrb[114].mxu0  ;;  %v4726_v31 = vadd.f32 0.5, %v4566_v22 }
 0x236   : > { %v15995_v60 = vpop.eup %15994  ;;  %v19036_v56 = vmul.f32 0.5, %v15993_v58  ;;  %16010 = vtanh.f32 %v3354_v15  ;;  %v3358_v52 = vadd.f32 %v3357_v38, %v18826_v1  ;;  %v3446_v39 = vpop.f32.mrb[114].mxu1  ;;  %v4686_v53 = vadd.f32 0.5, %v4526_v4  ;;  %14413 = vmatmul.mubr.msk.f32.vlgmr.msra.gmra.mrb[176].mxu0 %vm2560_vm1, %v18892_v7 }
 0x237   : > { %v3359_v43 = vpop.f32.mrb[115].mxu0  ;;  %v15997_v11 = vpop.eup %15996  ;;  %16012 = vtanh.f32 %v3443_v30  ;;  %v3447_v32 = vadd.f32 %v3446_v39, %v18826_v1  ;;  %v4688_v35 = vadd.f32 0.5, %v4528_v51  ;;  %v19043_v48 = vadd.f32 0.5, %v4605_v50  ;;  %14417 = vmatmul.mubr.msk.f32.vlgmr.msra.gmra.mrb[176].mxu1 %vm2560_vm1, %v18892_v7  ;;  %5292 = vmatprep.mubr.f32.mxu0 %v23869_v40 }
 0x238   : > { %v3360_v26 = vadd.f32 %v3359_v43, %v18826_v1  ;;  %v3448_v17 = vpop.f32.mrb[115].mxu1  ;;  %v15999_v28 = vpop.eup %15998  ;;  %16014 = vtanh.f32 %v3358_v52  ;;  %v14939_v4 = vpack.c.bf16 %v4726_v31, %v4686_v53  ;;  %5381 = vmatprep.mubr.f32.mxu1 %v23869_v40  ;;  %v4728_v58 = vadd.f32 0.5, %v4568_v57 }
 0x239   : > { %v3449_v15 = vadd.f32 %v3448_v17, %v18826_v1  ;;  %v16001_v22 = vpop.eup %16000  ;;  %v4645_v34 = vmul.f32 0.5, %v15999_v28  ;;  %16016 = vtanh.f32 %v3447_v32  ;;  %v14941_v51 = vpack.c.bf16 %v4725_v59, %v19018_v33 }
 0x23a   : > { %v3363_v30 = vpop.f32.mrb[116].mxu0  ;;  %v16003_v50 = vpop.eup %16002  ;;  %v4647_v38 = vmul.f32 0.5, %v16001_v22  ;;  %16018 = vtanh.f32 %v3360_v26  ;;  %14940 = vmatprep.subr.bf16.mxu0 %v14939_v4  ;;  %v14949_v31 = vpack.c.bf16 %v19033_v5, %v19022_v19  ;;  %14414 = vmatmul.mubr.msk.f32.gmra.mrb[178].mxu0 %vm2560_vm1, %v18908_v13  ;;  %v14947_v19 = vpack.c.bf16 %v4728_v58, %v4688_v35 }
 0x23b   : > { %v3364_v52 = vadd.f32 %v3363_v30, %v18834_v16  ;;  %v3452_v39 = vpop.f32.mrb[116].mxu1  ;;  %v3365_v43 = vpop.f32.mrb[117].mxu0  ;;  %v19054_v17 = vadd.f32 0.5, %v4645_v34  ;;  %16020 = vtanh.f32 %v3449_v15  ;;  %14418 = vmatmul.mubr.msk.f32.gmra.mrb[178].mxu1 %vm2560_vm1, %v18908_v13  ;;  %14942 = vmatpush1.bf16.msra.mxu0 %v14941_v51  ;;  %v4606_v28 = vmul.f32 0.5, %v15995_v60 }
 0x23c   : > { %v16005_v53 = vpop.eup %16004  ;;  %v3453_v32 = vadd.f32 %v3452_v39, %v18834_v16  ;;  %v3366_v57 = vadd.f32 %v3365_v43, %v18834_v16  ;;  %v3454_v33 = vpop.f32.mrb[117].mxu1  ;;  %v19060_v59 = vadd.f32 0.5, %v4647_v38  ;;  %5298 = vmatprep.mubr.f32.mxu0 %v23869_v40  ;;  %5387 = vmatprep.mubr.f32.mxu1 %v23869_v40  ;;  %v4646_v15 = vmul.f32 0.5, %v16003_v50 }
 0x23d   : > { %16022 = vtanh.f32 %v3364_v52  ;;  %v3455_v26 = vadd.f32 %v3454_v33, %v18834_v16  ;;  %v4608_v4 = vmul.f32 0.5, %v15997_v11  ;;  %14948 = vmatprep.subr.bf16.mxu1 %v14947_v19  ;;  %v4648_v52 = vmul.f32 0.5, %v16005_v53 }
 0x23e   : > { %16024 = vtanh.f32 %v3453_v32  ;;  %v3369_v5 = vpop.f32.mrb[118].mxu0  ;;  %v16007_v22 = vpop.eup %16006  ;;  %v14945_v35 = vpack.c.bf16 %v19054_v17, %v19043_v48  ;;  %14950 = vmatpush1.bf16.msra.mxu1 %v14949_v31  ;;  %14415 = vmatmul.mubr.msk.f32.gmra.mrb[180].mxu0 %vm2560_vm1, %v18928_v20  ;;  %v4767_v43 = vadd.f32 0.5, %v19036_v56  ;;  %v4766_v17 = vadd.f32 0.5, %v4606_v28 }
 0x23f   : > { %16026 = vtanh.f32 %v3366_v57  ;;  %v3370_v34 = vadd.f32 %v3369_v5, %v18847_v44  ;;  %v3458_v30 = vpop.f32.mrb[118].mxu1  ;;  %v3371_v38 = vpop.f32.mrb[119].mxu0  ;;  %v4529_v51 = vmul.f32 0.5, %v16007_v22  ;;  %14419 = vmatmul.mubr.msk.f32.gmra.mrb[180].mxu1 %vm2560_vm1, %v18928_v20  ;;  %5304 = vmatprep.mubr.f32.mxu0 %v23869_v40  ;;  %v4806_v57 = vadd.f32 0.5, %v4646_v15 }
 0x240   : > { %v16009_v58 = vpop.eup %16008  ;;  %16028 = vtanh.f32 %v3455_v26  ;;  %v3459_v39 = vadd.f32 %v3458_v30, %v18847_v44  ;;  %v3372_v60 = vadd.f32 %v3371_v38, %v18847_v44  ;;  %v3460_v11 = vpop.f32.mrb[119].mxu1  ;;  %5393 = vmatprep.mubr.f32.mxu1 %v23869_v40  ;;  %v4768_v56 = vadd.f32 0.5, %v4608_v4 }
 0x241   : > { %v16011_v50 = vpop.eup %16010  ;;  %v4531_v32 = vmul.f32 0.5, %v16009_v58  ;;  %16030 = vtanh.f32 %v3370_v34  ;;  %v3461_v53 = vadd.f32 %v3460_v11, %v18847_v44  ;;  %v19079_v31 = vadd.f32 0.5, %v4529_v51 }
 0x242   : > { %v16013_v48 = vpop.eup %16012  ;;  %16032 = vtanh.f32 %v3459_v39  ;;  %v4808_v26 = vadd.f32 0.5, %v4648_v52  ;;  %v14953_v19 = vpack.c.bf16 %v19060_v59, %v4767_v43  ;;  %14416 = vmatmul.mubr.msk.f32.gmra.mrb[182].mxu0 %vm2560_vm1, %v18947_v54  ;;  %v14943_v38 = vpack.c.bf16 %v4806_v57, %v4766_v17 }
 0x243   : > { %v16015_v33 = vpop.eup %16014  ;;  %16034 = vtanh.f32 %v3372_v60  ;;  %v19083_v22 = vadd.f32 0.5, %v4531_v32  ;;  %14420 = vmatmul.mubr.msk.f32.gmra.mrb[182].mxu1 %vm2560_vm1, %v18947_v54  ;;  %5464 = vmatprep.mubr.f32.mxu0 %v23869_v40  ;;  %v4530_v4 = vmul.f32 0.5, %v16011_v50 }
 0x244   : > { %v16017_v5 = vpop.eup %16016  ;;  %v4569_v34 = vmul.f32 0.5, %v16015_v33  ;;  %16036 = vtanh.f32 %v3461_v53  ;;  %v3529_v30 = vpop.f32.mrb[120].mxu0  ;;  %v14951_v59 = vpack.c.bf16 %v4808_v26, %v4768_v56  ;;  %14944 = vmatprep.subr.bf16.mxu0 %v14943_v38  ;;  %5553 = vmatprep.mubr.f32.mxu1 %v23869_v40  ;;  %v4532_v53 = vmul.f32 0.5, %v16013_v48 }
 0x245   : > { %v16019_v58 = vpop.eup %16018  ;;  %v4571_v51 = vmul.f32 0.5, %v16017_v5  ;;  %v3530_v28 = vadd.f32 %v3529_v30, %v18823_v9  ;;  %v3618_v15 = vpop.f32.mrb[120].mxu1  ;;  %14946 = vmatpush1.bf16.msra.mxu0 %v14945_v35 }
 0x246   : > { %v3531_v39 = vpop.f32.mrb[121].mxu0  ;;  %v16021_v52 = vpop.eup %16020  ;;  %v3619_v60 = vadd.f32 %v3618_v15, %v18823_v9  ;;  %v4570_v32 = vmul.f32 0.5, %v16019_v58  ;;  %v4729_v57 = vadd.f32 0.5, %v4569_v34  ;;  %14952 = vmatprep.subr.bf16.mxu1 %v14951_v59 }
 0x247   : > { %v3532_v11 = vadd.f32 %v3531_v39, %v18823_v9  ;;  %v3620_v43 = vpop.f32.mrb[121].mxu1  ;;  %v16023_v17 = vpop.eup %16022  ;;  %v19094_v33 = vadd.f32 0.5, %v4571_v51  ;;  %16038 = vtanh.f32 %v3530_v28  ;;  %14954 = vmatpush1.bf16.msra.mxu1 %v14953_v19  ;;  %v4572_v38 = vmul.f32 0.5, %v16021_v52 }
 0x248   : > { %v3621_v56 = vadd.f32 %v3620_v43, %v18823_v9  ;;  %v16025_v50 = vpop.eup %16024  ;;  %v4609_v26 = vmul.f32 0.5, %v16023_v17  ;;  %16040 = vtanh.f32 %v3619_v60  ;;  %v3535_v5 = vpop.f32.mrb[122].mxu0  ;;  %v4730_v30 = vadd.f32 0.5, %v4570_v32  ;;  %14421 = vmatmul.mubr.msk.f32.vlgmr.msra.gmra.mrb[184].mxu0 %vm2560_vm1, %v18892_v7 }
 0x249   : > { %v16027_v15 = vpop.eup %16026  ;;  %v19097_v39 = vmul.f32 0.5, %v16025_v50  ;;  %16042 = vtanh.f32 %v3532_v11  ;;  %v3536_v48 = vadd.f32 %v3535_v5, %v18826_v1  ;;  %v3624_v34 = vpop.f32.mrb[122].mxu1  ;;  %v4690_v51 = vadd.f32 0.5, %v4530_v4  ;;  %5470 = vmatprep.mubr.f32.mxu0 %v23869_v40 }
 0x24a   : > { %v3537_v58 = vpop.f32.mrb[123].mxu0  ;;  %v16029_v28 = vpop.eup %16028  ;;  %16044 = vtanh.f32 %v3621_v56  ;;  %v3625_v35 = vadd.f32 %v3624_v34, %v18826_v1  ;;  %v4692_v19 = vadd.f32 0.5, %v4532_v53  ;;  %v19104_v43 = vadd.f32 0.5, %v4609_v26  ;;  %14425 = vmatmul.mubr.msk.f32.vlgmr.msra.gmra.mrb[184].mxu1 %vm2560_vm1, %v18892_v7 }
 0x24b   : > { %v3538_v59 = vadd.f32 %v3537_v58, %v18826_v1  ;;  %v3626_v60 = vpop.f32.mrb[123].mxu1  ;;  %v16031_v52 = vpop.eup %16030  ;;  %16046 = vtanh.f32 %v3536_v48  ;;  %v14955_v4 = vpack.c.bf16 %v4730_v30, %v4690_v51  ;;  %5559 = vmatprep.mubr.f32.mxu1 %v23869_v40  ;;  %v4732_v50 = vadd.f32 0.5, %v4572_v38 }
 0x24c   : > { %v3627_v11 = vadd.f32 %v3626_v60, %v18826_v1  ;;  %v16033_v32 = vpop.eup %16032  ;;  %v4649_v17 = vmul.f32 0.5, %v16031_v52  ;;  %16048 = vtanh.f32 %v3625_v35  ;;  %v3541_v56 = vpop.f32.mrb[124].mxu0  ;;  %v14957_v53 = vpack.c.bf16 %v4729_v57, %v19079_v31  ;;  %14422 = vmatmul.mubr.msk.f32.gmra.mrb[186].mxu0 %vm2560_vm1, %v18908_v13 }
 0x24d   : > { %v16035_v26 = vpop.eup %16034  ;;  %v4651_v5 = vmul.f32 0.5, %v16033_v32  ;;  %16050 = vtanh.f32 %v3538_v59  ;;  %v3542_v48 = vadd.f32 %v3541_v56, %v18834_v16  ;;  %v3630_v34 = vpop.f32.mrb[124].mxu1  ;;  %14956 = vmatprep.subr.bf16.mxu0 %v14955_v4  ;;  %v14965_v7 = vpack.c.bf16 %v19094_v33, %v19083_v22  ;;  %5476 = vmatprep.mubr.f32.mxu0 %v23869_v40 }
 0x24e   : > { %v3543_v58 = vpop.f32.mrb[125].mxu0  ;;  %v16037_v30 = vpop.eup %16036  ;;  %v19115_v51 = vadd.f32 0.5, %v4649_v17  ;;  %16052 = vtanh.f32 %v3627_v11  ;;  %v3631_v35 = vadd.f32 %v3630_v34, %v18834_v16  ;;  %14426 = vmatmul.mubr.msk.f32.gmra.mrb[186].mxu1 %vm2560_vm1, %v18908_v13  ;;  %v14963_v22 = vpack.c.bf16 %v4732_v50, %v4692_v19  ;;  %14958 = vmatpush1.bf16.msra.mxu0 %v14957_v53 }
 0x24f   : > { %v3544_v38 = vadd.f32 %v3543_v58, %v18834_v16  ;;  %v3632_v31 = vpop.f32.mrb[125].mxu1  ;;  %v19121_v57 = vadd.f32 0.5, %v4651_v5  ;;  %16054 = vtanh.f32 %v3542_v48  ;;  %5565 = vmatprep.mubr.f32.mxu1 %v23869_v40  ;;  %v4610_v60 = vmul.f32 0.5, %v16027_v15 }
 0x250   : > { %v3633_v59 = vadd.f32 %v3632_v31, %v18834_v16  ;;  %16056 = vtanh.f32 %v3631_v35  ;;  %v3547_v33 = vpop.f32.mrb[126].mxu0  ;;  %v4650_v52 = vmul.f32 0.5, %v16035_v26  ;;  %v4612_v11 = vmul.f32 0.5, %v16029_v28  ;;  %14964 = vmatprep.subr.bf16.mxu1 %v14963_v22  ;;  %14423 = vmatmul.mubr.msk.f32.gmra.mrb[188].mxu0 %vm2560_vm1, %v18928_v20 }
 0x251   : > { %v16039_v4 = vpop.eup %16038  ;;  %16058 = vtanh.f32 %v3544_v38  ;;  %v3548_v32 = vadd.f32 %v3547_v33, %v18847_v44  ;;  %v3636_v17 = vpop.f32.mrb[126].mxu1  ;;  %v4652_v5 = vmul.f32 0.5, %v16037_v30  ;;  %v14961_v13 = vpack.c.bf16 %v19115_v51, %v19104_v43  ;;  %14966 = vmatpush1.bf16.msra.mxu1 %v14965_v7  ;;  %5482 = vmatprep.mubr.f32.mxu0 %v23869_v40 }
 0x252   : > { %v3549_v56 = vpop.f32.mrb[127].mxu0  ;;  %v16041_v19 = vpop.eup %16040  ;;  %v4533_v50 = vmul.f32 0.5, %v16039_v4  ;;  %16060 = vtanh.f32 %v3633_v59  ;;  %v3637_v53 = vadd.f32 %v3636_v17, %v18847_v44  ;;  %v4771_v48 = vadd.f32 0.5, %v19097_v39  ;;  %14427 = vmatmul.mubr.msk.f32.gmra.mrb[188].mxu1 %vm2560_vm1, %v18928_v20 }
 0x253   : > { %v3550_v15 = vadd.f32 %v3549_v56, %v18847_v44  ;;  %v3638_v28 = vpop.f32.mrb[127].mxu1  ;;  %v16043_v26 = vpop.eup %16042  ;;  %v4535_v34 = vmul.f32 0.5, %v16041_v19  ;;  %16062 = vtanh.f32 %v3548_v32  ;;  %5571 = vmatprep.mubr.f32.mxu1 %v23869_v40  ;;  %v4770_v30 = vadd.f32 0.5, %v4610_v60 }
 0x254   : > { %v3639_v58 = vadd.f32 %v3638_v28, %v18847_v44  ;;  %v16045_v43 = vpop.eup %16044  ;;  %v19140_v7 = vadd.f32 0.5, %v4533_v50  ;;  %16064 = vtanh.f32 %v3637_v53  ;;  %v4810_v51 = vadd.f32 0.5, %v4650_v52  ;;  %14424 = vmatmul.mubr.msk.f32.gmra.mrb[190].mxu0 %vm2560_vm1, %v18947_v54 }
 0x255   : > { %v16047_v35 = vpop.eup %16046  ;;  %16066 = vtanh.f32 %v3550_v15  ;;  %v4772_v39 = vadd.f32 0.5, %v4612_v11  ;;  %v4812_v38 = vadd.f32 0.5, %v4652_v5  ;;  %v14969_v31 = vpack.c.bf16 %v19121_v57, %v4771_v48  ;;  %5642 = vmatprep.mubr.f32.mxu0 %v23869_v40 }
 0x256   : > { %v16049_v59 = vpop.eup %16048  ;;  %v19144_v22 = vadd.f32 0.5, %v4535_v34  ;;  %v4573_v20 = vmul.f32 0.5, %v16047_v35  ;;  %16068 = vtanh.f32 %v3639_v58  ;;  %v14959_v4 = vpack.c.bf16 %v4810_v51, %v4770_v30  ;;  %14428 = vmatmul.mubr.msk.f32.gmra.mrb[190].mxu1 %vm2560_vm1, %v18947_v54 }
 0x257   : > { %v3707_v33 = vpop.f32.mrb[128].mxu0  ;;  %v16051_v32 = vpop.eup %16050  ;;  %v4575_v17 = vmul.f32 0.5, %v16049_v59  ;;  %v14967_v57 = vpack.c.bf16 %v4812_v38, %v4772_v39  ;;  %v4534_v11 = vmul.f32 0.5, %v16043_v26  ;;  %5731 = vmatprep.mubr.f32.mxu1 %v23869_v40  ;;  %v4536_v28 = vmul.f32 0.5, %v16045_v43 }
 0x258   : > { %v3708_v60 = vadd.f32 %v3707_v33, %v18823_v9  ;;  %v3796_v52 = vpop.f32.mrb[128].mxu1  ;;  %v3709_v56 = vpop.f32.mrb[129].mxu0  ;;  %14960 = vmatprep.subr.bf16.mxu0 %v14959_v4  ;;  %v4574_v15 = vmul.f32 0.5, %v16051_v32  ;;  %v19155_v34 = vadd.f32 0.5, %v4573_v20 }
 0x259   : > { %v16053_v5 = vpop.eup %16052  ;;  %v3797_v19 = vadd.f32 %v3796_v52, %v18823_v9  ;;  %v3710_v50 = vadd.f32 %v3709_v56, %v18823_v9  ;;  %v3798_v53 = vpop.f32.mrb[129].mxu1  ;;  %v19157_v58 = vadd.f32 0.5, %v4575_v17  ;;  %14968 = vmatprep.subr.bf16.mxu1 %v14967_v57  ;;  %14962 = vmatpush1.bf16.msra.mxu0 %v14961_v13  ;;  %v4694_v4 = vadd.f32 0.5, %v4534_v11 }
 0x25a   : > { %v16055_v48 = vpop.eup %16054  ;;  %16070 = vtanh.f32 %v3708_v60  ;;  %v3799_v54 = vadd.f32 %v3798_v53, %v18823_v9  ;;  %14970 = vmatpush1.bf16.msra.mxu1 %v14969_v31  ;;  %v4734_v35 = vadd.f32 0.5, %v4574_v15  ;;  %v4576_v39 = vmul.f32 0.5, %v16053_v5  ;;  %v19168_v31 = vld [vmem:[%s23528_s2 + $0x20] sm:$0xff] }
 0x25b   : > { %v16057_v26 = vpop.eup %16056  ;;  %v4613_v30 = vmul.f32 0.5, %v16055_v48  ;;  %16072 = vtanh.f32 %v3797_v19  ;;  %v3713_v51 = vpop.f32.mrb[130].mxu0  ;;  %v4696_v52 = vadd.f32 0.5, %v4536_v28  ;;  %v14973_v28 = vpack.c.bf16 %v19155_v34, %v19140_v7  ;;  %v19191_v34 = vld [vmem:[%s23528_s2 + $0x28] sm:$0xff] }
 0x25c   : > { %v16059_v38 = vpop.eup %16058  ;;  %v19160_v59 = vmul.f32 0.5, %v16057_v26  ;;  %16074 = vtanh.f32 %v3710_v50  ;;  %v3714_v43 = vadd.f32 %v3713_v51, %v18826_v1  ;;  %v3802_v20 = vpop.f32.mrb[130].mxu1  ;;  %14429 = vmatmul.mubr.msk.f32.vlgmr.msra.gmra.mrb[192].mxu0 %vm2560_vm1, %v19168_v31  ;;  %v14971_v5 = vpack.c.bf16 %v4734_v35, %v4694_v4 }
 0x25d   : > { %v3715_v33 = vpop.f32.mrb[131].mxu0  ;;  %v16061_v32 = vpop.eup %16060  ;;  %16076 = vtanh.f32 %v3799_v54  ;;  %v3803_v13 = vadd.f32 %v3802_v20, %v18826_v1  ;;  %v19172_v57 = vadd.f32 0.5, %v4613_v30  ;;  %14433 = vmatmul.mubr.msk.f32.vlgmr.msra.gmra.mrb[192].mxu1 %vm2560_vm1, %v19168_v31  ;;  %5648 = vmatprep.mubr.f32.mxu0 %v23869_v40  ;;  %v4736_v15 = vadd.f32 0.5, %v4576_v39 }
 0x25e   : > { %v3716_v17 = vadd.f32 %v3715_v33, %v18826_v1  ;;  %v3804_v60 = vpop.f32.mrb[131].mxu1  ;;  %v16063_v56 = vpop.eup %16062  ;;  %16078 = vtanh.f32 %v3714_v43  ;;  %5737 = vmatprep.mubr.f32.mxu1 %v23869_v40  ;;  %14972 = vmatprep.subr.bf16.mxu0 %v14971_v5  ;;  %v14981_v35 = vpack.c.bf16 %v19157_v58, %v19144_v22 }
 0x25f   : > { %v3805_v11 = vadd.f32 %v3804_v60, %v18826_v1  ;;  %v16065_v19 = vpop.eup %16064  ;;  %v4653_v50 = vmul.f32 0.5, %v16063_v56  ;;  %16080 = vtanh.f32 %v3803_v13  ;;  %v3719_v53 = vpop.f32.mrb[132].mxu0  ;;  %v14979_v58 = vpack.c.bf16 %v4736_v15, %v4696_v52  ;;  %14974 = vmatpush1.bf16.msra.mxu0 %v14973_v28 }
 0x260   : > { %v16067_v48 = vpop.eup %16066  ;;  %v4655_v54 = vmul.f32 0.5, %v16065_v19  ;;  %16082 = vtanh.f32 %v3716_v17  ;;  %v3720_v26 = vadd.f32 %v3719_v53, %v18834_v16  ;;  %v3808_v30 = vpop.f32.mrb[132].mxu1  ;;  %14430 = vmatmul.mubr.msk.f32.gmra.mrb[194].mxu0 %vm2560_vm1, %v19191_v34  ;;  %v4614_v17 = vmul.f32 0.5, %v16059_v38 }
 0x261   : > { %v3721_v51 = vpop.f32.mrb[133].mxu0  ;;  %v16069_v43 = vpop.eup %16068  ;;  %v19184_v20 = vadd.f32 0.5, %v4653_v50  ;;  %16084 = vtanh.f32 %v3805_v11  ;;  %v3809_v39 = vadd.f32 %v3808_v30, %v18834_v16  ;;  %14434 = vmatmul.mubr.msk.f32.gmra.mrb[194].mxu1 %vm2560_vm1, %v19191_v34  ;;  %5654 = vmatprep.mubr.f32.mxu0 %v23869_v40  ;;  %v4654_v60 = vmul.f32 0.5, %v16067_v48  ;;  %v19210_v48 = vld [vmem:[%s23528_s2 + $0x30] sm:$0xff] }
 0x262   : > { %v3722_v33 = vadd.f32 %v3721_v51, %v18834_v16  ;;  %v3810_v7 = vpop.f32.mrb[133].mxu1  ;;  %v19195_v4 = vadd.f32 0.5, %v4655_v54  ;;  %16086 = vtanh.f32 %v3720_v26  ;;  %5743 = vmatprep.mubr.f32.mxu1 %v23869_v40  ;;  %v4616_v56 = vmul.f32 0.5, %v16061_v32  ;;  %14980 = vmatprep.subr.bf16.mxu1 %v14979_v58 }
 0x263   : > { %v3811_v22 = vadd.f32 %v3810_v7, %v18834_v16  ;;  %16088 = vtanh.f32 %v3809_v39  ;;  %v3725_v13 = vpop.f32.mrb[134].mxu0  ;;  %v3814_v19 = vpop.f32.mrb[134].mxu1  ;;  %v4656_v53 = vmul.f32 0.5, %v16069_v43  ;;  %v14977_v52 = vpack.c.bf16 %v19184_v20, %v19172_v57  ;;  %14982 = vmatpush1.bf16.msra.mxu1 %v14981_v35 }
 0x264   : > { %v16071_v11 = vpop.eup %16070  ;;  %16090 = vtanh.f32 %v3722_v33  ;;  %v3726_v5 = vadd.f32 %v3725_v13, %v18847_v44  ;;  %v3727_v50 = vpop.f32.mrb[135].mxu0  ;;  %v3815_v54 = vadd.f32 %v3814_v19, %v18847_v44  ;;  %14431 = vmatmul.mubr.msk.f32.gmra.mrb[196].mxu0 %vm2560_vm1, %v19210_v48  ;;  %v4775_v57 = vadd.f32 0.5, %v19160_v59  ;;  %v19228_v19 = vld [vmem:[%s23528_s2 + $0x38] sm:$0xff] }
 0x265   : > { %v16073_v15 = vpop.eup %16072  ;;  %v4537_v28 = vmul.f32 0.5, %v16071_v11  ;;  %16092 = vtanh.f32 %v3811_v22  ;;  %v3728_v38 = vadd.f32 %v3727_v50, %v18847_v44  ;;  %v3816_v32 = vpop.f32.mrb[135].mxu1  ;;  %14435 = vmatmul.mubr.msk.f32.gmra.mrb[196].mxu1 %vm2560_vm1, %v19210_v48  ;;  %5660 = vmatprep.mubr.f32.mxu0 %v23869_v40  ;;  %v4774_v20 = vadd.f32 0.5, %v4614_v17 }
 0x266   : > { %v16075_v26 = vpop.eup %16074  ;;  %v4539_v30 = vmul.f32 0.5, %v16073_v15  ;;  %16094 = vtanh.f32 %v3726_v5  ;;  %v3817_v51 = vadd.f32 %v3816_v32, %v18847_v44  ;;  %5749 = vmatprep.mubr.f32.mxu1 %v23869_v40  ;;  %v4814_v39 = vadd.f32 0.5, %v4654_v60 }
 0x267   : > { %v16077_v35 = vpop.eup %16076  ;;  %v19219_v43 = vadd.f32 0.5, %v4537_v28  ;;  %16096 = vtanh.f32 %v3815_v54  ;;  %v4776_v59 = vadd.f32 0.5, %v4616_v56  ;;  %v4816_v7 = vadd.f32 0.5, %v4656_v53 }
 0x268   : > { %v16079_v33 = vpop.eup %16078  ;;  %16098 = vtanh.f32 %v3728_v38  ;;  %v14985_v22 = vpack.c.bf16 %v19195_v4, %v4775_v57  ;;  %v19223_v13 = vadd.f32 0.5, %v4539_v30  ;;  %14432 = vmatmul.mubr.msk.f32.gmra.mrb[198].mxu0 %vm2560_vm1, %v19228_v19  ;;  %v14975_v17 = vpack.c.bf16 %v4814_v39, %v4774_v20 }
 0x269   : > { %v16081_v58 = vpop.eup %16080  ;;  %v4577_v11 = vmul.f32 0.5, %v16079_v33  ;;  %16100 = vtanh.f32 %v3817_v51  ;;  %v3885_v5 = vpop.f32.mrb[136].mxu0  ;;  %14436 = vmatmul.mubr.msk.f32.gmra.mrb[198].mxu1 %vm2560_vm1, %v19228_v19  ;;  %v14983_v15 = vpack.c.bf16 %v4816_v7, %v4776_v59  ;;  %5820 = vmatprep.mubr.f32.mxu0 %v23869_v40  ;;  %v4538_v28 = vmul.f32 0.5, %v16075_v26 }
 0x26a   : > { %v16083_v60 = vpop.eup %16082  ;;  %v4579_v56 = vmul.f32 0.5, %v16081_v58  ;;  %v3886_v50 = vadd.f32 %v3885_v5, %v18823_v9  ;;  %v3974_v4 = vpop.f32.mrb[136].mxu1  ;;  %14976 = vmatprep.subr.bf16.mxu0 %v14975_v17  ;;  %5909 = vmatprep.mubr.f32.mxu1 %v23869_v40  ;;  %v4540_v51 = vmul.f32 0.5, %v16077_v35 }
 0x26b   : > { %v3887_v53 = vpop.f32.mrb[137].mxu0  ;;  %v16085_v54 = vpop.eup %16084  ;;  %v3975_v38 = vadd.f32 %v3974_v4, %v18823_v9  ;;  %v4578_v30 = vmul.f32 0.5, %v16083_v60  ;;  %v4737_v39 = vadd.f32 0.5, %v4577_v11  ;;  %14984 = vmatprep.subr.bf16.mxu1 %v14983_v15  ;;  %14978 = vmatpush1.bf16.msra.mxu0 %v14977_v52 }
 0x26c   : > { %v3888_v32 = vadd.f32 %v3887_v53, %v18823_v9  ;;  %v3976_v57 = vpop.f32.mrb[137].mxu1  ;;  %v16087_v20 = vpop.eup %16086  ;;  %v19239_v33 = vadd.f32 0.5, %v4579_v56  ;;  %16102 = vtanh.f32 %v3886_v50  ;;  %14986 = vmatpush1.bf16.msra.mxu1 %v14985_v22  ;;  %v4580_v17 = vmul.f32 0.5, %v16085_v54 }
 0x26d   : > { %v3977_v59 = vadd.f32 %v3976_v57, %v18823_v9  ;;  %v16089_v26 = vpop.eup %16088  ;;  %v4617_v7 = vmul.f32 0.5, %v16087_v20  ;;  %16104 = vtanh.f32 %v3975_v38  ;;  %v3891_v58 = vpop.f32.mrb[138].mxu0  ;;  %v4738_v5 = vadd.f32 0.5, %v4578_v30 }
 0x26e   : > { %v16091_v4 = vpop.eup %16090  ;;  %v19242_v53 = vmul.f32 0.5, %v16089_v26  ;;  %16106 = vtanh.f32 %v3888_v32  ;;  %v3892_v35 = vadd.f32 %v3891_v58, %v18826_v1  ;;  %v3980_v11 = vpop.f32.mrb[138].mxu1  ;;  %v4698_v56 = vadd.f32 0.5, %v4538_v28  ;;  %14437 = vmatmul.mubr.msk.f32.vlgmr.msra.gmra.mrb[200].mxu0 %vm2560_vm1, %v19168_v31 }
 0x26f   : > { %v3893_v60 = vpop.f32.mrb[139].mxu0  ;;  %v16093_v50 = vpop.eup %16092  ;;  %16108 = vtanh.f32 %v3977_v59  ;;  %v3981_v52 = vadd.f32 %v3980_v11, %v18826_v1  ;;  %v4700_v22 = vadd.f32 0.5, %v4540_v51  ;;  %v19249_v57 = vadd.f32 0.5, %v4617_v7  ;;  %14441 = vmatmul.mubr.msk.f32.vlgmr.msra.gmra.mrb[200].mxu1 %vm2560_vm1, %v19168_v31  ;;  %5826 = vmatprep.mubr.f32.mxu0 %v23869_v40 }
 0x270   : > { %v3894_v15 = vadd.f32 %v3893_v60, %v18826_v1  ;;  %v3982_v38 = vpop.f32.mrb[139].mxu1  ;;  %v16095_v54 = vpop.eup %16094  ;;  %16110 = vtanh.f32 %v3892_v35  ;;  %v14987_v28 = vpack.c.bf16 %v4738_v5, %v4698_v56  ;;  %5915 = vmatprep.mubr.f32.mxu1 %v23869_v40  ;;  %v4740_v26 = vadd.f32 0.5, %v4580_v17 }
 0x271   : > { %v3983_v32 = vadd.f32 %v3982_v38, %v18826_v1  ;;  %v16097_v30 = vpop.eup %16096  ;;  %v4657_v20 = vmul.f32 0.5, %v16095_v54  ;;  %16112 = vtanh.f32 %v3981_v52  ;;  %v3897_v59 = vpop.f32.mrb[140].mxu0  ;;  %v14989_v51 = vpack.c.bf16 %v4737_v39, %v19219_v43 }
 0x272   : > { %v16099_v7 = vpop.eup %16098  ;;  %v4659_v58 = vmul.f32 0.5, %v16097_v30  ;;  %16114 = vtanh.f32 %v3894_v15  ;;  %v3898_v35 = vadd.f32 %v3897_v59, %v18834_v16  ;;  %v3986_v11 = vpop.f32.mrb[140].mxu1  ;;  %14988 = vmatprep.subr.bf16.mxu0 %v14987_v28  ;;  %v14997_v5 = vpack.c.bf16 %v19239_v33, %v19223_v13  ;;  %14438 = vmatmul.mubr.msk.f32.gmra.mrb[202].mxu0 %vm2560_vm1, %v19191_v34 }
 0x273   : > { %v3899_v60 = vpop.f32.mrb[141].mxu0  ;;  %v16101_v56 = vpop.eup %16100  ;;  %v19260_v38 = vadd.f32 0.5, %v4657_v20  ;;  %16116 = vtanh.f32 %v3983_v32  ;;  %v3987_v52 = vadd.f32 %v3986_v11, %v18834_v16  ;;  %14442 = vmatmul.mubr.msk.f32.gmra.mrb[202].mxu1 %vm2560_vm1, %v19191_v34  ;;  %v14995_v13 = vpack.c.bf16 %v4740_v26, %v4700_v22  ;;  %14990 = vmatpush1.bf16.msra.mxu0 %v14989_v51 }
 0x274   : > { %v3900_v17 = vadd.f32 %v3899_v60, %v18834_v16  ;;  %v3988_v43 = vpop.f32.mrb[141].mxu1  ;;  %v19266_v39 = vadd.f32 0.5, %v4659_v58  ;;  %16118 = vtanh.f32 %v3898_v35  ;;  %5832 = vmatprep.mubr.f32.mxu0 %v23869_v40  ;;  %5921 = vmatprep.mubr.f32.mxu1 %v23869_v40  ;;  %v4618_v54 = vmul.f32 0.5, %v16091_v4 }
 0x275   : > { %v3989_v15 = vadd.f32 %v3988_v43, %v18834_v16  ;;  %16120 = vtanh.f32 %v3987_v52  ;;  %v3903_v33 = vpop.f32.mrb[142].mxu0  ;;  %v4658_v32 = vmul.f32 0.5, %v16099_v7  ;;  %v4620_v28 = vmul.f32 0.5, %v16093_v50  ;;  %14996 = vmatprep.subr.bf16.mxu1 %v14995_v13  ;;  %v3992_v59 = vpop.f32.mrb[142].mxu1 }
 0x276   : > { %v16103_v30 = vpop.eup %16102  ;;  %16122 = vtanh.f32 %v3900_v17  ;;  %v3904_v20 = vadd.f32 %v3903_v33, %v18847_v44  ;;  %v3905_v58 = vpop.f32.mrb[143].mxu0  ;;  %v4660_v35 = vmul.f32 0.5, %v16101_v56  ;;  %v14993_v22 = vpack.c.bf16 %v19260_v38, %v19249_v57  ;;  %14998 = vmatpush1.bf16.msra.mxu1 %v14997_v5  ;;  %14439 = vmatmul.mubr.msk.f32.gmra.mrb[204].mxu0 %vm2560_vm1, %v19210_v48 }
 0x277   : > { %v16105_v26 = vpop.eup %16104  ;;  %v4541_v51 = vmul.f32 0.5, %v16103_v30  ;;  %16124 = vtanh.f32 %v3989_v15  ;;  %v3993_v11 = vadd.f32 %v3992_v59, %v18847_v44  ;;  %v3906_v4 = vadd.f32 %v3905_v58, %v18847_v44  ;;  %v3994_v50 = vpop.f32.mrb[143].mxu1  ;;  %14443 = vmatmul.mubr.msk.f32.gmra.mrb[204].mxu1 %vm2560_vm1, %v19210_v48  ;;  %5838 = vmatprep.mubr.f32.mxu0 %v23869_v40 }
 0x278   : > { %v16107_v7 = vpop.eup %16106  ;;  %v4779_v60 = vadd.f32 0.5, %v19242_v53  ;;  %v4543_v52 = vmul.f32 0.5, %v16105_v26  ;;  %16126 = vtanh.f32 %v3904_v20  ;;  %v3995_v56 = vadd.f32 %v3994_v50, %v18847_v44  ;;  %5927 = vmatprep.mubr.f32.mxu1 %v23869_v40 }
 0x279   : > { %v16109_v57 = vpop.eup %16108  ;;  %v19285_v5 = vadd.f32 0.5, %v4541_v51  ;;  %16128 = vtanh.f32 %v3993_v11  ;;  %v4778_v38 = vadd.f32 0.5, %v4618_v54  ;;  %v4818_v17 = vadd.f32 0.5, %v4658_v32 }
 0x27a   : > { %v16111_v43 = vpop.eup %16110  ;;  %16130 = vtanh.f32 %v3906_v4  ;;  %v4063_v53 = vpop.f32.mrb[144].mxu0  ;;  %v4780_v15 = vadd.f32 0.5, %v4620_v28  ;;  %v4820_v13 = vadd.f32 0.5, %v4660_v35  ;;  %v15001_v33 = vpack.c.bf16 %v19266_v39, %v4779_v60  ;;  %14440 = vmatmul.mubr.msk.f32.gmra.mrb[206].mxu0 %vm2560_vm1, %v19228_v19 }
 0x27b   : > { %v16113_v30 = vpop.eup %16112  ;;  %v4581_v20 = vmul.f32 0.5, %v16111_v43  ;;  %16132 = vtanh.f32 %v3995_v56  ;;  %v4064_v59 = vadd.f32 %v4063_v53, %v18823_v9  ;;  %v4152_v58 = vpop.f32.mrb[144].mxu1  ;;  %v14991_v51 = vpack.c.bf16 %v4818_v17, %v4778_v38  ;;  %14444 = vmatmul.mubr.msk.f32.gmra.mrb[206].mxu1 %vm2560_vm1, %v19228_v19  ;;  %5998 = vmatprep.mubr.f32.mxu0 %v23869_v40 }
 0x27c   : > { %v4065_v26 = vpop.f32.mrb[145].mxu0  ;;  %v16115_v54 = vpop.eup %16114  ;;  %v4583_v32 = vmul.f32 0.5, %v16113_v30  ;;  %v4153_v11 = vadd.f32 %v4152_v58, %v18823_v9  ;;  %v14999_v39 = vpack.c.bf16 %v4820_v13, %v4780_v15  ;;  %v19297_v50 = vadd.f32 0.5, %v4543_v52  ;;  %6087 = vmatprep.mubr.f32.mxu1 %v23869_v40 }
 0x27d   : > { %v4066_v28 = vadd.f32 %v4065_v26, %v18823_v9  ;;  %v4154_v35 = vpop.f32.mrb[145].mxu1  ;;  %v16117_v4 = vpop.eup %16116  ;;  %16134 = vtanh.f32 %v4064_v59  ;;  %14992 = vmatprep.subr.bf16.mxu0 %v14991_v51  ;;  %v4542_v56 = vmul.f32 0.5, %v16107_v7  ;;  %v19301_v17 = vadd.f32 0.5, %v4581_v20 }
 0x27e   : > { %v4155_v60 = vadd.f32 %v4154_v35, %v18823_v9  ;;  %v16119_v38 = vpop.eup %16118  ;;  %v19303_v43 = vadd.f32 0.5, %v4583_v32  ;;  %16136 = vtanh.f32 %v4153_v11  ;;  %15000 = vmatprep.subr.bf16.mxu1 %v14999_v39  ;;  %14994 = vmatpush1.bf16.msra.mxu0 %v14993_v22  ;;  %v4069_v53 = vpop.f32.mrb[146].mxu0  ;;  %v4582_v15 = vmul.f32 0.5, %v16115_v54 }
 0x27f   : > { %v16121_v13 = vpop.eup %16120  ;;  %v4621_v52 = vmul.f32 0.5, %v16119_v38  ;;  %16138 = vtanh.f32 %v4066_v28  ;;  %15002 = vmatpush1.bf16.msra.mxu1 %v15001_v33  ;;  %v4070_v30 = vadd.f32 %v4069_v53, %v18826_v1  ;;  %v4158_v59 = vpop.f32.mrb[146].mxu1  ;;  %v4544_v26 = vmul.f32 0.5, %v16109_v57 }
 0x280   : > { %v4071_v58 = vpop.f32.mrb[147].mxu0  ;;  %v16123_v7 = vpop.eup %16122  ;;  %v4623_v51 = vmul.f32 0.5, %v16121_v13  ;;  %16140 = vtanh.f32 %v4155_v60  ;;  %v4159_v20 = vadd.f32 %v4158_v59, %v18826_v1  ;;  %v4702_v33 = vadd.f32 0.5, %v4542_v56 }
 0x281   : > { %v4072_v32 = vadd.f32 %v4071_v58, %v18826_v1  ;;  %v4160_v11 = vpop.f32.mrb[147].mxu1  ;;  %v19308_v22 = vpop.eup %16124  ;;  %16142 = vtanh.f32 %v4070_v30  ;;  %14445 = vmatmul.mubr.msk.f32.vlgmr.msra.gmra.mrb[208].mxu0 %vm2560_vm1, %v19168_v31  ;;  %v4742_v28 = vadd.f32 0.5, %v4582_v15  ;;  %v19313_v57 = vadd.f32 0.5, %v4621_v52 }
 0x282   : > { %v4161_v54 = vadd.f32 %v4160_v11, %v18826_v1  ;;  %v16127_v35 = vpop.eup %16126  ;;  %v19315_v39 = vadd.f32 0.5, %v4623_v51  ;;  %16144 = vtanh.f32 %v4159_v20  ;;  %14449 = vmatmul.mubr.msk.f32.vlgmr.msra.gmra.mrb[208].mxu1 %vm2560_vm1, %v19168_v31  ;;  %v4075_v60 = vpop.f32.mrb[148].mxu0  ;;  %6004 = vmatprep.mubr.f32.mxu0 %v23869_v40  ;;  %v4584_v38 = vmul.f32 0.5, %v16117_v4 }
 0x283   : > { %v16129_v53 = vpop.eup %16128  ;;  %v4661_v13 = vmul.f32 0.5, %v16127_v35  ;;  %16146 = vtanh.f32 %v4072_v32  ;;  %v4076_v30 = vadd.f32 %v4075_v60, %v18834_v16  ;;  %v4164_v56 = vpop.f32.mrb[148].mxu1  ;;  %6093 = vmatprep.mubr.f32.mxu1 %v23869_v40  ;;  %v15003_v52 = vpack.c.bf16 %v4742_v28, %v4702_v33 }
 0x284   : > { %v4077_v15 = vpop.f32.mrb[149].mxu0  ;;  %v16131_v59 = vpop.eup %16130  ;;  %16148 = vtanh.f32 %v4161_v54  ;;  %v4165_v58 = vadd.f32 %v4164_v56, %v18834_v16  ;;  %v4704_v11 = vadd.f32 0.5, %v4544_v26  ;;  %v4663_v4 = vmul.f32 0.5, %v16129_v53 }
 0x285   : > { %v4078_v51 = vadd.f32 %v4077_v15, %v18834_v16  ;;  %v4166_v20 = vpop.f32.mrb[149].mxu1  ;;  %v19324_v25 = vpop.eup %16132  ;;  %16150 = vtanh.f32 %v4076_v30  ;;  %14446 = vmatmul.mubr.msk.f32.gmra.mrb[210].mxu0 %vm2560_vm1, %v19191_v34  ;;  %15004 = vmatprep.subr.bf16.mxu0 %v15003_v52  ;;  %v4744_v35 = vadd.f32 0.5, %v4584_v38  ;;  %v19329_v33 = vadd.f32 0.5, %v4661_v13 }
 0x286   : > { %v4167_v32 = vadd.f32 %v4166_v20, %v18834_v16  ;;  %16152 = vtanh.f32 %v4165_v58  ;;  %14450 = vmatmul.mubr.msk.f32.gmra.mrb[210].mxu1 %vm2560_vm1, %v19191_v34  ;;  %v15005_v26 = vpack.c.bf16 %v19301_v17, %v19285_v5  ;;  %v15013_v54 = vpack.c.bf16 %v19303_v43, %v19297_v50  ;;  %v4081_v28 = vpop.f32.mrb[150].mxu0  ;;  %6010 = vmatprep.mubr.f32.mxu0 %v23869_v40 }
 0x287   : > { %v16135_v60 = vpop.eup %16134  ;;  %16154 = vtanh.f32 %v4078_v51  ;;  %v15011_v53 = vpack.c.bf16 %v4744_v35, %v4704_v11  ;;  %v4082_v38 = vadd.f32 %v4081_v28, %v18847_v44  ;;  %v4170_v13 = vpop.f32.mrb[150].mxu1  ;;  %6099 = vmatprep.mubr.f32.mxu1 %v23869_v40  ;;  %v4622_v56 = vmul.f32 0.5, %v16123_v7 }
 0x288   : > { %v4083_v30 = vpop.f32.mrb[151].mxu0  ;;  %v16137_v15 = vpop.eup %16136  ;;  %v4545_v52 = vmul.f32 0.5, %v16135_v60  ;;  %16156 = vtanh.f32 %v4167_v32  ;;  %15006 = vmatpush1.bf16.msra.mxu0 %v15005_v26  ;;  %v4171_v5 = vadd.f32 %v4170_v13, %v18847_v44  ;;  %v4662_v7 = vmul.f32 0.5, %v16131_v59 }
 0x289   : > { %v4084_v50 = vadd.f32 %v4083_v30, %v18847_v44  ;;  %v4172_v17 = vpop.f32.mrb[151].mxu1  ;;  %v19342_v43 = vpop.eup %16138  ;;  %v4547_v58 = vmul.f32 0.5, %v16137_v15  ;;  %15012 = vmatprep.subr.bf16.mxu1 %v15011_v53  ;;  %16158 = vtanh.f32 %v4082_v38  ;;  %14447 = vmatmul.mubr.msk.f32.gmra.mrb[212].mxu0 %vm2560_vm1, %v19210_v48  ;;  %v19349_v11 = vadd.f32 0.5, %v4663_v4 }
 0x28a   : > { %v4173_v51 = vadd.f32 %v4172_v17, %v18847_v44  ;;  %v19347_v20 = vpop.eup %16140  ;;  %v19351_v32 = vadd.f32 0.5, %v4545_v52  ;;  %15014 = vmatpush1.bf16.msra.mxu1 %v15013_v54  ;;  %16160 = vtanh.f32 %v4171_v5  ;;  %v4241_v35 = vpop.f32.mrb[152].mxu0  ;;  %6016 = vmatprep.mubr.f32.mxu0 %v23869_v40  ;;  %v4782_v26 = vadd.f32 0.5, %v4622_v56 }
 0x28b   : > { %v16143_v28 = vpop.eup %16142  ;;  %16162 = vtanh.f32 %v4084_v50  ;;  %14451 = vmatmul.mubr.msk.f32.gmra.mrb[212].mxu1 %vm2560_vm1, %v19210_v48  ;;  %v4242_v60 = vadd.f32 %v4241_v35, %v18823_v9  ;;  %v4330_v59 = vpop.f32.mrb[152].mxu1  ;;  %v4822_v38 = vadd.f32 0.5, %v4662_v7  ;;  %v4624_v4 = vmul.f32 0.5, %v19308_v22 }
 0x28c   : > { %v4243_v53 = vpop.f32.mrb[153].mxu0  ;;  %v16145_v13 = vpop.eup %16144  ;;  %v4585_v30 = vmul.f32 0.5, %v16143_v28  ;;  %16164 = vtanh.f32 %v4173_v51  ;;  %v4331_v54 = vadd.f32 %v4330_v59, %v18823_v9  ;;  %6105 = vmatprep.mubr.f32.mxu1 %v23869_v40  ;;  %v19361_v5 = vadd.f32 0.5, %v4547_v58 }
 0x28d   : > { %v4244_v56 = vadd.f32 %v4243_v53, %v18823_v9  ;;  %v4332_v15 = vpop.f32.mrb[153].mxu1  ;;  %v16147_v52 = vpop.eup %16146  ;;  %16166 = vtanh.f32 %v4242_v60  ;;  %14448 = vmatmul.mubr.msk.f32.gmra.mrb[214].mxu0 %vm2560_vm1, %v19228_v19  ;;  %v15007_v22 = vpack.c.bf16 %v4822_v38, %v4782_v26  ;;  %v4587_v7 = vmul.f32 0.5, %v16145_v13 }
 0x28e   : > { %v4333_v50 = vadd.f32 %v4332_v15, %v18823_v9  ;;  %v19366_v17 = vpop.eup %16148  ;;  %v19368_v51 = vadd.f32 0.5, %v4585_v30  ;;  %16168 = vtanh.f32 %v4331_v54  ;;  %v4664_v35 = vmul.f32 0.5, %v19324_v25  ;;  %v4247_v28 = vpop.f32.mrb[154].mxu0  ;;  %6176 = vmatprep.mubr.f32.mxu0 %v23869_v40 }
 0x28f   : > { %v16151_v58 = vpop.eup %16150  ;;  %16170 = vtanh.f32 %v4244_v56  ;;  %14452 = vmatmul.mubr.msk.f32.gmra.mrb[214].mxu1 %vm2560_vm1, %v19228_v19  ;;  %15008 = vmatprep.subr.bf16.mxu0 %v15007_v22  ;;  %v4784_v9 = vadd.f32 0.5, %v4624_v4  ;;  %v15009_v26 = vpack.c.bf16 %v19329_v33, %v19313_v57  ;;  %v15017_v60 = vpack.c.bf16 %v19349_v11, %v19315_v39  ;;  %v4336_v59 = vpop.f32.mrb[154].mxu1 }
 0x290   : > { %v4249_v53 = vpop.f32.mrb[155].mxu0  ;;  %v16153_v38 = vpop.eup %16152  ;;  %v4625_v25 = vmul.f32 0.5, %v16151_v58  ;;  %16172 = vtanh.f32 %v4333_v50  ;;  %v4824_v13 = vadd.f32 0.5, %v4664_v35  ;;  %v4248_v30 = vadd.f32 %v4247_v28, %v18826_v1  ;;  %6265 = vmatprep.mubr.f32.mxu1 %v23869_v40 }
 0x291   : > { %v4338_v54 = vpop.f32.mrb[155].mxu1  ;;  %v19380_v56 = vpop.eup %16154  ;;  %v4627_v4 = vmul.f32 0.5, %v16153_v38  ;;  %15010 = vmatpush1.bf16.msra.mxu0 %v15009_v26  ;;  %v4337_v57 = vadd.f32 %v4336_v59, %v18826_v1  ;;  %v4250_v33 = vadd.f32 %v4249_v53, %v18826_v1  ;;  %v19387_v15 = vadd.f32 0.5, %v4587_v7 }
 0x292   : > { %v4339_v39 = vadd.f32 %v4338_v54, %v18826_v1  ;;  %v19385_v11 = vpop.eup %16156  ;;  %v15015_v50 = vpack.c.bf16 %v4824_v13, %v4784_v9  ;;  %16174 = vtanh.f32 %v4248_v30  ;;  %v4253_v22 = vpop.f32.mrb[156].mxu0  ;;  %v4546_v35 = vmul.f32 0.5, %v19342_v43 }
 0x293   : > { %v16159_v28 = vpop.eup %16158  ;;  %v19390_v58 = vadd.f32 0.5, %v4625_v25  ;;  %16176 = vtanh.f32 %v4337_v57  ;;  %v4254_v26 = vadd.f32 %v4253_v22, %v18834_v16  ;;  %v4342_v59 = vpop.f32.mrb[156].mxu1  ;;  %v4586_v53 = vmul.f32 0.5, %v16147_v52 }
 0x294   : > { %v4255_v38 = vpop.f32.mrb[157].mxu0  ;;  %v16161_v12 = vpop.eup %16160  ;;  %v4665_v1 = vmul.f32 0.5, %v16159_v28  ;;  %15016 = vmatprep.subr.bf16.mxu1 %v15015_v50  ;;  %16178 = vtanh.f32 %v4250_v33  ;;  %14453 = vmatmul.mubr.msk.f32.vlgmr.msra.gmra.mrb[216].mxu0 %vm2560_vm1, %v19168_v31  ;;  %v4343_v7 = vadd.f32 %v4342_v59, %v18834_v16  ;;  %v19397_v13 = vadd.f32 0.5, %v4627_v4 }
 0x295   : > { %v4256_v43 = vadd.f32 %v4255_v38, %v18834_v16  ;;  %v4344_v9 = vpop.f32.mrb[157].mxu1  ;;  %v16163_v25 = vpop.eup %16162  ;;  %v4667_v30 = vmul.f32 0.5, %v16161_v12  ;;  %15018 = vmatpush1.bf16.msra.mxu1 %v15017_v60  ;;  %16180 = vtanh.f32 %v4339_v39  ;;  %6182 = vmatprep.mubr.f32.mxu0 %v23869_v40  ;;  %v4706_v57 = vadd.f32 0.5, %v4546_v35 }
 0x296   : > { %v4345_v52 = vadd.f32 %v4344_v9, %v18834_v16  ;;  %v16165_v54 = vpop.eup %16164  ;;  %16182 = vtanh.f32 %v4254_v26  ;;  %v4746_v33 = vadd.f32 0.5, %v4586_v53  ;;  %v4548_v50 = vmul.f32 0.5, %v19347_v20  ;;  %v4259_v22 = vpop.f32.mrb[158].mxu0 }
 0x297   : > { %v16167_v28 = vpop.eup %16166  ;;  %v19402_v59 = vadd.f32 0.5, %v4665_v1  ;;  %16184 = vtanh.f32 %v4343_v7  ;;  %v4588_v4 = vmul.f32 0.5, %v19366_v17  ;;  %v15021_v12 = vpack.c.bf16 %v19368_v51, %v19351_v32  ;;  %v4348_v60 = vpop.f32.mrb[158].mxu1 }
 0x298   : > { %v4261_v39 = vpop.f32.mrb[159].mxu0  ;;  %v16169_v38 = vpop.eup %16168  ;;  %v19407_v16 = vadd.f32 0.5, %v4667_v30  ;;  %v4549_v26 = vmul.f32 0.5, %v16167_v28  ;;  %14457 = vmatmul.mubr.msk.f32.vlgmr.msra.gmra.mrb[216].mxu1 %vm2560_vm1, %v19168_v31  ;;  %16186 = vtanh.f32 %v4256_v43  ;;  %14454 = vmatmul.mubr.msk.f32.gmra.mrb[218].mxu0 %vm2560_vm1, %v19191_v34  ;;  %v15019_v20 = vpack.c.bf16 %v4746_v33, %v4706_v57 }
 0x299   : > { %v4350_v35 = vpop.f32.mrb[159].mxu1  ;;  %v16171_v53 = vpop.eup %16170  ;;  %v4551_v17 = vmul.f32 0.5, %v16169_v38  ;;  %6271 = vmatprep.mubr.f32.mxu1 %v23869_v40  ;;  %v4708_v32 = vadd.f32 0.5, %v4548_v50  ;;  %v4748_v51 = vadd.f32 0.5, %v4588_v4  ;;  %v15029_v1 = vpack.c.bf16 %v19387_v15, %v19361_v5  ;;  %6188 = vmatprep.mubr.f32.mxu0 %v23869_v40 }
 0x29a   : > { %v16173_v7 = vpop.eup %16172  ;;  %16188 = vtanh.f32 %v4345_v52  ;;  %15020 = vmatprep.subr.bf16.mxu0 %v15019_v20  ;;  %v4260_v43 = vadd.f32 %v4259_v22, %v18847_v44  ;;  %v4349_v9 = vadd.f32 %v4348_v60, %v18847_v44  ;;  %v4262_v30 = vadd.f32 %v4261_v39, %v18847_v44 }
 0x29b   : > { %v19420_v57 = vadd.f32 0.5, %v4549_v26  ;;  %v15027_v33 = vpack.c.bf16 %v4748_v51, %v4708_v32  ;;  %15022 = vmatpush1.bf16.msra.mxu0 %v15021_v12  ;;  %v4351_v50 = vadd.f32 %v4350_v35, %v18847_v44  ;;  %v4626_v28 = vmul.f32 0.5, %v19380_v56 }
 0x29c   : > { %v16175_v5 = vpop.eup %16174  ;;  %14458 = vmatmul.mubr.msk.f32.gmra.mrb[218].mxu1 %vm2560_vm1, %v19191_v34  ;;  %16190 = vtanh.f32 %v4260_v43  ;;  %14455 = vmatmul.mubr.msk.f32.gmra.mrb[220].mxu0 %vm2560_vm1, %v19210_v48  ;;  %v4666_v15 = vmul.f32 0.5, %v16163_v25  ;;  %v4628_v52 = vmul.f32 0.5, %v19385_v11  ;;  %v4668_v22 = vmul.f32 0.5, %v16165_v54 }
 0x29d   : > { %v16177_v4 = vpop.eup %16176  ;;  %v4589_v60 = vmul.f32 0.5, %v16175_v5  ;;  %15028 = vmatprep.subr.bf16.mxu1 %v15027_v33  ;;  %16192 = vtanh.f32 %v4349_v9  ;;  %6277 = vmatprep.mubr.f32.mxu1 %v23869_v40  ;;  %v4786_v44 = vadd.f32 0.5, %v4626_v28  ;;  %v15025_v56 = vpack.c.bf16 %v19402_v59, %v19390_v58 }
 0x29e   : > { %v16179_v12 = vpop.eup %16178  ;;  %v4591_v39 = vmul.f32 0.5, %v16177_v4  ;;  %15030 = vmatpush1.bf16.msra.mxu1 %v15029_v1  ;;  %16194 = vtanh.f32 %v4262_v30  ;;  %6194 = vmatprep.mubr.f32.mxu0 %v23869_v40  ;;  %v4826_v25 = vadd.f32 0.5, %v4666_v15  ;;  %v4788_v38 = vadd.f32 0.5, %v4628_v52 }
 0x29f   : > { %v16181_v11 = vpop.eup %16180  ;;  %v4749_v54 = vadd.f32 0.5, %v4589_v60  ;;  %16196 = vtanh.f32 %v4351_v50  ;;  %v4828_v26 = vadd.f32 0.5, %v4668_v22  ;;  %v15033_v20 = vpack.c.bf16 %v19407_v16, %v19397_v13 }
 0x2a0   : > { %v16183_v35 = vpop.eup %16182  ;;  %v4751_v32 = vadd.f32 0.5, %v4591_v39  ;;  %14459 = vmatmul.mubr.msk.f32.gmra.mrb[220].mxu1 %vm2560_vm1, %v19210_v48  ;;  %14456 = vmatmul.mubr.msk.f32.gmra.mrb[222].mxu0 %vm2560_vm1, %v19228_v19  ;;  %v15023_v58 = vpack.c.bf16 %v4826_v25, %v4786_v44  ;;  %v4550_v59 = vmul.f32 0.5, %v16171_v53  ;;  %v4590_v51 = vmul.f32 0.5, %v16179_v12 }
 0x2a1   : > { %v16185_v1 = vpop.eup %16184  ;;  %v4711_v43 = vadd.f32 0.5, %v4551_v17  ;;  %6283 = vmatprep.mubr.f32.mxu1 %v23869_v40  ;;  %v15031_v9 = vpack.c.bf16 %v4828_v26, %v4788_v38  ;;  %6354 = vmatprep.mubr.f32.mxu0 %v23869_v40  ;;  %v4552_v30 = vmul.f32 0.5, %v16173_v7  ;;  %v4592_v13 = vmul.f32 0.5, %v16181_v11 }
 0x2a2   : > { %v16187_v16 = vpop.eup %16186  ;;  %15024 = vmatprep.subr.bf16.mxu0 %v15023_v58  ;;  %v4710_v33 = vadd.f32 0.5, %v4550_v59  ;;  %v4750_v50 = vadd.f32 0.5, %v4590_v51  ;;  %v15037_v28 = vpack.c.bf16 %v4749_v54, %v19420_v57  ;;  %v4629_v22 = vmul.f32 0.5, %v16183_v35 }
 0x2a3   : > { %15032 = vmatprep.subr.bf16.mxu1 %v15031_v9  ;;  %15026 = vmatpush1.bf16.msra.mxu0 %v15025_v56  ;;  %v4712_v5 = vadd.f32 0.5, %v4552_v30  ;;  %v4752_v53 = vadd.f32 0.5, %v4592_v13  ;;  %v15045_v15 = vpack.c.bf16 %v4751_v32, %v4711_v43  ;;  %v4631_v60 = vmul.f32 0.5, %v16185_v1  ;;  %v17172_v13 = vld [vmem:[%s23528_s2 + $0x28] sm:$0xff] }
 0x2a4   : > { %v16189_v52 = vpop.eup %16188  ;;  %14460 = vmatmul.mubr.msk.f32.gmra.mrb[222].mxu1 %vm2560_vm1, %v19228_v19  ;;  %v15035_v17 = vpack.c.bf16 %v4750_v50, %v4710_v33  ;;  %v4630_v56 = vmul.f32 0.5, %v16187_v16  ;;  %v4789_v11 = vadd.f32 0.5, %v4629_v22  ;;  %v19495_v16 = vpop.permute.xlu1 %4839 }
 0x2a5   : > { %15034 = vmatpush1.bf16.msra.mxu1 %v15033_v20  ;;  %6443 = vmatprep.mubr.f32.mxu1 %v23869_v40  ;;  %v15043_v7 = vpack.c.bf16 %v4752_v53, %v4712_v5  ;;  %v4632_v25 = vmul.f32 0.5, %v16189_v52  ;;  %v4791_v20 = vadd.f32 0.5, %v4631_v60  ;;  %v19499_v53 = vpop.permute.xlu0 %4843 }
 0x2a6   : > { %v16191_v4 = vpop.eup %16190  ;;  %14461 = vmatmul.mubr.msk.f32.vlgmr.msra.gmra.mrb[224].mxu0 %vm2560_vm1, %v19168_v31  ;;  %15036 = vmatprep.subr.bf16.mxu0 %v15035_v17  ;;  %v4790_v58 = vadd.f32 0.5, %v4630_v56 }
 0x2a7   : > { %v16193_v57 = vpop.eup %16192  ;;  %v4669_v44 = vmul.f32 0.5, %v16191_v4  ;;  %6360 = vmatprep.mubr.f32.mxu0 %v23869_v40  ;;  %15044 = vmatprep.subr.bf16.mxu1 %v15043_v7  ;;  %v4792_v51 = vadd.f32 0.5, %v4632_v25 }
 0x2a8   : > { %v16195_v12 = vpop.eup %16194  ;;  %v4671_v39 = vmul.f32 0.5, %v16193_v57  ;;  %14465 = vmatmul.mubr.msk.f32.vlgmr.msra.gmra.mrb[224].mxu1 %vm2560_vm1, %v19168_v31  ;;  %15038 = vmatpush1.bf16.msra.mxu0 %v15037_v28  ;;  %v19503_v22 = vpop.permute.xlu1 %4847 }
 0x2a9   : > { %v16197_v38 = vpop.eup %16196  ;;  %v4829_v54 = vadd.f32 0.5, %v4669_v44  ;;  %6449 = vmatprep.mubr.f32.mxu1 %v23869_v40  ;;  %15046 = vmatpush1.bf16.msra.mxu1 %v15045_v15  ;;  %v4670_v26 = vmul.f32 0.5, %v16195_v12 }
 0x2aa   : > { %v4831_v35 = vadd.f32 0.5, %v4671_v39  ;;  %14462 = vmatmul.mubr.msk.f32.gmra.mrb[226].mxu0 %vm2560_vm1, %v19191_v34  ;;  %v4672_v32 = vmul.f32 0.5, %v16197_v38 }
 0x2ab   : > { %6366 = vmatprep.mubr.f32.mxu0 %v23869_v40  ;;  %v4830_v59 = vadd.f32 0.5, %v4670_v26  ;;  %v15041_v31 = vpack.c.bf16 %v4829_v54, %v4789_v11 }
 0x2ac   : > { %14466 = vmatmul.mubr.msk.f32.gmra.mrb[226].mxu1 %vm2560_vm1, %v19191_v34  ;;  %v4832_v1 = vadd.f32 0.5, %v4672_v32  ;;  %v15049_v43 = vpack.c.bf16 %v4831_v35, %v4791_v20  ;;  %v17171_v34 = vld [vmem:[%s23528_s2 + $0x20] sm:$0xff]  ;;  %v19511_v54 = vpop.permute.xlu1 %4851 }
 0x2ad   : > { %6455 = vmatprep.mubr.f32.mxu1 %v23869_v40  ;;  %v15039_v9 = vpack.c.bf16 %v4830_v59, %v4790_v58 }
 0x2ae   : > { %14463 = vmatmul.mubr.msk.f32.gmra.mrb[228].mxu0 %vm2560_vm1, %v19210_v48  ;;  %v15047_v30 = vpack.c.bf16 %v4832_v1, %v4792_v51 }
 0x2af   : > { %6372 = vmatprep.mubr.f32.mxu0 %v23869_v40  ;;  %15040 = vmatprep.subr.bf16.mxu0 %v15039_v9 }
 0x2b0   : > { %14467 = vmatmul.mubr.msk.f32.gmra.mrb[228].mxu1 %vm2560_vm1, %v19210_v48  ;;  %15048 = vmatprep.subr.bf16.mxu1 %v15047_v30 }
 0x2b1   : > { %6461 = vmatprep.mubr.f32.mxu1 %v23869_v40  ;;  %15042 = vmatpush1.bf16.msra.mxu0 %v15041_v31 }
 0x2b2   : > { %14464 = vmatmul.mubr.msk.f32.gmra.mrb[230].mxu0 %vm2560_vm1, %v19228_v19  ;;  %15050 = vmatpush1.bf16.msra.mxu1 %v15049_v43 }
 0x2b3   : > { %6532 = vmatprep.mubr.f32.mxu0 %v23869_v40 }
 0x2b4   : > { %14468 = vmatmul.mubr.msk.f32.gmra.mrb[230].mxu1 %vm2560_vm1, %v19228_v19 }
 0x2b5   : > { %6621 = vmatprep.mubr.f32.mxu1 %v23869_v40 }
 0x2b6   : > { %14469 = vmatmul.mubr.msk.f32.vlgmr.msra.gmra.mrb[232].mxu0 %vm2560_vm1, %v17171_v34 }
 0x2b7   : > { %6538 = vmatprep.mubr.f32.mxu0 %v23869_v40 }
 0x2b8   : > { %14473 = vmatmul.mubr.msk.f32.vlgmr.msra.gmra.mrb[232].mxu1 %vm2560_vm1, %v17171_v34 }
 0x2b9   : > { %6627 = vmatprep.mubr.f32.mxu1 %v23869_v40 }
 0x2ba   : > { %14470 = vmatmul.mubr.msk.f32.gmra.mrb[234].mxu0 %vm2560_vm1, %v17172_v13 }
 0x2bb   : > { %6544 = vmatprep.mubr.f32.mxu0 %v23869_v40 }
 0x2bc   : > { %14474 = vmatmul.mubr.msk.f32.gmra.mrb[234].mxu1 %vm2560_vm1, %v17172_v13 }
 0x2bd   : > { %6633 = vmatprep.mubr.f32.mxu1 %v23869_v40 }
 0x2be   : > { %14471 = vmatmul.mubr.msk.f32.gmra.mrb[236].mxu0 %vm2560_vm1, %v19210_v48 }
 0x2bf   : > { %6550 = vmatprep.mubr.f32.mxu0 %v23869_v40 }
 0x2c0   : > { %14475 = vmatmul.mubr.msk.f32.gmra.mrb[236].mxu1 %vm2560_vm1, %v19210_v48 }
 0x2c1   : > { %6639 = vmatprep.mubr.f32.mxu1 %v23869_v40 }
 0x2c2   : > { %14472 = vmatmul.mubr.msk.f32.gmra.mrb[238].mxu0 %vm2560_vm1, %v19228_v19 }
 0x2c3   : > { %7383 = vmatprep.mubr.f32.mxu0 %v23869_v40 }
 0x2c4   : > { %14476 = vmatmul.mubr.msk.f32.gmra.mrb[238].mxu1 %vm2560_vm1, %v19228_v19 }
 0x2c5   : > { %7472 = vmatprep.mubr.f32.mxu1 %v23869_v40 }
 0x2e2   : > { %v4932_v33 = vpop.f32.mrb[160].mxu0 }
 0x2e3   : > { %v4933_v50 = vadd.f32 %v4932_v33, %v19495_v16  ;;  %v4934_v28 = vpop.f32.mrb[161].mxu0  ;;  %v5021_v5 = vpop.f32.mrb[160].mxu1 }
 0x2e4   : > { %v4935_v48 = vadd.f32 %v4934_v28, %v19495_v16  ;;  %v5022_v15 = vadd.f32 %v5021_v5, %v19495_v16  ;;  %v5023_v52 = vpop.f32.mrb[161].mxu1 }
 0x2e5   : > { %16198 = vtanh.f32 %v4933_v50  ;;  %v5024_v19 = vadd.f32 %v5023_v52, %v19495_v16 }
 0x2e6   : > { %16200 = vtanh.f32 %v4935_v48  ;;  %v4938_v17 = vpop.f32.mrb[162].mxu0 }
 0x2e7   : > { %16202 = vtanh.f32 %v5022_v15  ;;  %v4939_v7 = vadd.f32 %v4938_v17, %v19499_v53  ;;  %v4940_v4 = vpop.f32.mrb[163].mxu0  ;;  %v5027_v60 = vpop.f32.mrb[162].mxu1 }
 0x2e8   : > { %16204 = vtanh.f32 %v5024_v19  ;;  %v4941_v57 = vadd.f32 %v4940_v4, %v19499_v53  ;;  %v5028_v44 = vadd.f32 %v5027_v60, %v19499_v53  ;;  %v5029_v56 = vpop.f32.mrb[163].mxu1 }
 0x2e9   : > { %16206 = vtanh.f32 %v4939_v7  ;;  %v5030_v12 = vadd.f32 %v5029_v56, %v19499_v53 }
 0x2ea   : > { %16208 = vtanh.f32 %v4941_v57  ;;  %v4944_v39 = vpop.f32.mrb[164].mxu0 }
 0x2eb   : > { %16210 = vtanh.f32 %v5028_v44  ;;  %v4945_v25 = vadd.f32 %v4944_v39, %v19503_v22  ;;  %v4946_v38 = vpop.f32.mrb[165].mxu0 }
 0x2ec   : > { %16212 = vtanh.f32 %v5030_v12  ;;  %v4947_v11 = vadd.f32 %v4946_v38, %v19503_v22 }
 0x2ed   : > { %16214 = vtanh.f32 %v4945_v25  ;;  %v5033_v26 = vpop.f32.mrb[164].mxu1 }
 0x2ee   : > { %v5034_v20 = vadd.f32 %v5033_v26, %v19503_v22  ;;  %16216 = vtanh.f32 %v4947_v11  ;;  %v5035_v35 = vpop.f32.mrb[165].mxu1  ;;  %v4950_v32 = vpop.f32.mrb[166].mxu0 }
 0x2ef   : > { %v16199_v58 = vpop.eup %16198  ;;  %v5036_v59 = vadd.f32 %v5035_v35, %v19503_v22  ;;  %v4951_v31 = vadd.f32 %v4950_v32, %v19511_v54  ;;  %v4952_v51 = vpop.f32.mrb[167].mxu0 }
 0x2f0   : > { %v16201_v1 = vpop.eup %16200  ;;  %v6806_v43 = vmul.f32 0.5, %v16199_v58  ;;  %16218 = vtanh.f32 %v5034_v20  ;;  %v4953_v9 = vadd.f32 %v4952_v51, %v19511_v54 }
 0x2f1   : > { %v16203_v30 = vpop.eup %16202  ;;  %v6807_v34 = vmul.f32 0.5, %v16201_v1  ;;  %16220 = vtanh.f32 %v5036_v59  ;;  %v5039_v13 = vpop.f32.mrb[166].mxu1 }
 0x2f2   : > { %v16205_v33 = vpop.eup %16204  ;;  %v6966_v50 = vadd.f32 0.5, %v6806_v43  ;;  %v6808_v28 = vmul.f32 0.5, %v16203_v30  ;;  %16222 = vtanh.f32 %v4951_v31  ;;  %v5040_v5 = vadd.f32 %v5039_v13, %v19511_v54  ;;  %v5041_v48 = vpop.f32.mrb[167].mxu1 }
 0x2f3   : > { %v16207_v15 = vpop.eup %16206  ;;  %v6967_v52 = vadd.f32 0.5, %v6807_v34  ;;  %v6809_v19 = vmul.f32 0.5, %v16205_v33  ;;  %16224 = vtanh.f32 %v4953_v9  ;;  %v5042_v17 = vadd.f32 %v5041_v48, %v19511_v54 }
 0x2f4   : > { %v16209_v7 = vpop.eup %16208  ;;  %v6968_v4 = vadd.f32 0.5, %v6808_v28  ;;  %v6846_v60 = vmul.f32 0.5, %v16207_v15  ;;  %16226 = vtanh.f32 %v5040_v5  ;;  %v19520_v11 = vadd.f32 %v6966_v50, %v17612_v42 }
 0x2f5   : > { %v16211_v57 = vpop.eup %16210  ;;  %v6847_v44 = vmul.f32 0.5, %v16209_v7  ;;  %16228 = vtanh.f32 %v5042_v17  ;;  %v6969_v12 = vadd.f32 0.5, %v6809_v19  ;;  %v19524_v32 = vadd.f32 %v6967_v52, %v17627_v10 }
 0x2f6   : > { %v16213_v56 = vpop.eup %16212  ;;  %v6848_v39 = vmul.f32 0.5, %v16211_v57  ;;  %23993 = vst [vmem:[#allocation149_spill] sm:$0xff] %v19520_v11  ;;  %v19527_v59 = vadd.f32 %v6968_v4, %v17617_v55  ;;  %v7006_v31 = vadd.f32 0.5, %v6846_v60 }
 0x2f7   : > { %v5110_v25 = vpop.f32.mrb[168].mxu0  ;;  %v16215_v38 = vpop.eup %16214  ;;  %23994 = vst [vmem:[#allocation150_spill] sm:$0xff] %v19524_v32  ;;  %v7007_v9 = vadd.f32 0.5, %v6847_v44  ;;  %v6849_v30 = vmul.f32 0.5, %v16213_v56  ;;  %v19533_v50 = vadd.f32 %v6969_v12, %v17632_v21 }
 0x2f8   : > { %v5111_v26 = vadd.f32 %v5110_v25, %v19495_v16  ;;  %v5199_v20 = vpop.f32.mrb[168].mxu1  ;;  %v5112_v35 = vpop.f32.mrb[169].mxu0  ;;  %23995 = vst [vmem:[#allocation151_spill] sm:$0xff] %v19527_v59  ;;  %v6886_v51 = vmul.f32 0.5, %v16215_v38  ;;  %v7008_v13 = vadd.f32 0.5, %v6848_v39  ;;  %v19538_v44 = vadd.f32 %v7006_v31, %v17620_v61 }
 0x2f9   : > { %v16217_v58 = vpop.eup %16216  ;;  %v5200_v1 = vadd.f32 %v5199_v20, %v19495_v16  ;;  %v5201_v43 = vpop.f32.mrb[169].mxu1  ;;  %v5113_v42 = vadd.f32 %v5112_v35, %v19495_v16  ;;  %23996 = vst [vmem:[#allocation152_spill] sm:$0xff] %v19533_v50  ;;  %v7009_v25 = vadd.f32 0.5, %v6849_v30 }
 0x2fa   : > { %16230 = vtanh.f32 %v5111_v26  ;;  %v16219_v34 = vpop.eup %16218  ;;  %v5202_v10 = vadd.f32 %v5201_v43, %v19495_v16  ;;  %v7046_v28 = vadd.f32 0.5, %v6886_v51  ;;  %v6887_v5 = vmul.f32 0.5, %v16217_v58  ;;  %23997 = vst [vmem:[#allocation153_spill] sm:$0xff] %v19538_v44 }
 0x2fb   : > { %16232 = vtanh.f32 %v5200_v1  ;;  %v5116_v33 = vpop.f32.mrb[170].mxu0  ;;  %v16221_v55 = vpop.eup %16220  ;;  %v6888_v17 = vmul.f32 0.5, %v16219_v34  ;;  %v19542_v39 = vadd.f32 %v7008_v13, %v17624_v6 }
 0x2fc   : > { %16234 = vtanh.f32 %v5113_v42  ;;  %v5117_v48 = vadd.f32 %v5116_v33, %v19499_v53  ;;  %v5205_v15 = vpop.f32.mrb[170].mxu1  ;;  %v5118_v52 = vpop.f32.mrb[171].mxu0  ;;  %v6889_v7 = vmul.f32 0.5, %v16221_v55  ;;  %v19546_v35 = vadd.f32 %v7046_v28, %v17647_v41 }
 0x2fd   : > { %v16223_v19 = vpop.eup %16222  ;;  %16236 = vtanh.f32 %v5202_v10  ;;  %v5206_v4 = vadd.f32 %v5205_v15, %v19499_v53  ;;  %v5207_v60 = vpop.f32.mrb[171].mxu1  ;;  %v5119_v56 = vadd.f32 %v5118_v52, %v19499_v53  ;;  %23998 = vst [vmem:[#allocation154_spill] sm:$0xff] %v19542_v39  ;;  %v19548_v58 = vadd.f32 0.5, %v6887_v5 }
 0x2fe   : > { %v16225_v57 = vpop.eup %16224  ;;  %v6926_v21 = vmul.f32 0.5, %v16223_v19  ;;  %16238 = vtanh.f32 %v5117_v48  ;;  %v5208_v38 = vadd.f32 %v5207_v60, %v19499_v53  ;;  %23999 = vst [vmem:[#allocation155_spill] sm:$0xff] %v19546_v35  ;;  %v7048_v1 = vadd.f32 0.5, %v6888_v17 }
 0x2ff   : > { %v16227_v12 = vpop.eup %16226  ;;  %16240 = vtanh.f32 %v5206_v4  ;;  %v5122_v26 = vpop.f32.mrb[172].mxu0  ;;  %v19550_v43 = vadd.f32 0.5, %v6889_v7  ;;  %v6927_v34 = vmul.f32 0.5, %v16225_v57  ;;  %v19557_v55 = vadd.f32 %v7007_v9, %v17622_v62 }
 0x300   : > { %v16229_v20 = vpop.eup %16228  ;;  %v6928_v61 = vmul.f32 0.5, %v16227_v12  ;;  %16242 = vtanh.f32 %v5119_v56  ;;  %v5211_v31 = vpop.f32.mrb[172].mxu1  ;;  %v5123_v6 = vadd.f32 %v5122_v26, %v19503_v22  ;;  %v7086_v42 = vadd.f32 0.5, %v6926_v21 }
 0x301   : > { %v5124_v51 = vpop.f32.mrb[173].mxu0  ;;  %16244 = vtanh.f32 %v5208_v38  ;;  %v5213_v30 = vpop.f32.mrb[173].mxu1  ;;  %v5212_v13 = vadd.f32 %v5211_v31, %v19503_v22  ;;  %v6929_v10 = vmul.f32 0.5, %v16229_v20  ;;  %24000 = vst [vmem:[#allocation156_spill] sm:$0xff] %v19557_v55  ;;  %v19560_v15 = vadd.f32 %v7009_v25, %v17636_v24 }
 0x302   : > { %v5125_v41 = vadd.f32 %v5124_v51, %v19503_v22  ;;  %16246 = vtanh.f32 %v5123_v6  ;;  %v5214_v33 = vadd.f32 %v5213_v30, %v19503_v22  ;;  %v7088_v48 = vadd.f32 0.5, %v6928_v61 }
 0x303   : > { %v5128_v28 = vpop.f32.mrb[174].mxu0  ;;  %16248 = vtanh.f32 %v5212_v13  ;;  %24001 = vst [vmem:[#allocation157_spill] sm:$0xff] %v19560_v15  ;;  %v15051_v60 = vpack.c.bf16 %v19557_v55, %v19524_v32  ;;  %v15059_v24 = vpack.c.bf16 %v19560_v15, %v19533_v50  ;;  %v15053_v56 = vpack.c.bf16 %v19538_v44, %v19520_v11  ;;  %v24020_v15 = vld [vmem:[#allocation10_spill] sm:$0xff] }
 0x304   : > { %v16231_v5 = vpop.eup %16230  ;;  %v5129_v52 = vadd.f32 %v5128_v28, %v19511_v54  ;;  %v5217_v19 = vpop.f32.mrb[174].mxu1  ;;  %16250 = vtanh.f32 %v5125_v41  ;;  %v19571_v25 = vadd.f32 %v7048_v1, %v17652_v46  ;;  %v15061_v26 = vpack.c.bf16 %v19542_v39, %v19527_v59  ;;  %v24004_v28 = vld [vmem:[#allocation2_spill] sm:$0xff] }
 0x305   : > { %v5130_v17 = vpop.f32.mrb[175].mxu0  ;;  %v16233_v7 = vpop.eup %16232  ;;  %v6810_v4 = vmul.f32 0.5, %v16231_v5  ;;  %v5218_v62 = vadd.f32 %v5217_v19, %v19511_v54  ;;  %16252 = vtanh.f32 %v5214_v33  ;;  %15052 = vmatprep.subr.bf16.mxu0 %v15051_v60  ;;  %v7087_v61 = vadd.f32 0.5, %v6927_v34  ;;  %15060 = vmatprep.subr.bf16.mxu1 %v15059_v24  ;;  %v24008_v24 = vld [vmem:[#allocation8_spill] sm:$0xff] }
 0x306   : > { %v5219_v9 = vpop.f32.mrb[175].mxu1  ;;  %v16235_v57 = vpop.eup %16234  ;;  %v6812_v21 = vmul.f32 0.5, %v16233_v7  ;;  %24002 = vst [vmem:[#allocation158_spill] sm:$0xff] %v19571_v25  ;;  %16254 = vtanh.f32 %v5129_v52  ;;  %15054 = vmatpush1.bf16.msra.mxu0 %v15053_v56  ;;  %v5131_v51 = vadd.f32 %v5130_v17, %v19511_v54  ;;  %v19577_v30 = vadd.f32 %v7086_v42, %v17654_v47  ;;  %15062 = vmatpush1.bf16.msra.mxu1 %v15061_v26 }
 0x307   : > { %v16237_v12 = vpop.eup %16236  ;;  %v6970_v38 = vadd.f32 0.5, %v6810_v4  ;;  %v6811_v31 = vmul.f32 0.5, %v16235_v57  ;;  %16256 = vtanh.f32 %v5218_v62  ;;  %v5220_v13 = vadd.f32 %v5219_v9, %v19511_v54  ;;  %v24006_v4 = vld [vmem:[#allocation3_spill] sm:$0xff] }
 0x308   : > { %v16239_v20 = vpop.eup %16238  ;;  %24003 = vst [vmem:[#allocation159_spill] sm:$0xff] %v19577_v30  ;;  %v6972_v46 = vadd.f32 0.5, %v6812_v21  ;;  %v19581_v5 = vadd.f32 %v7088_v48, %v24004_v28  ;;  %v7089_v34 = vadd.f32 0.5, %v6929_v10  ;;  %16258 = vtanh.f32 %v5131_v51 }
 0x309   : > { %v16241_v6 = vpop.eup %16240  ;;  %v6850_v1 = vmul.f32 0.5, %v16239_v20  ;;  %v5288_v41 = vpop.f32.mrb[176].mxu0  ;;  %v19584_v60 = vadd.f32 %v6970_v38, %v24006_v4  ;;  %v6813_v47 = vmul.f32 0.5, %v16237_v12  ;;  %16260 = vtanh.f32 %v5220_v13 }
 0x30a   : > { %v16243_v33 = vpop.eup %16242  ;;  %24005 = vst [vmem:[#allocation2_spill] sm:$0xff] %v19581_v5  ;;  %v6852_v52 = vmul.f32 0.5, %v16241_v6  ;;  %v5377_v19 = vpop.f32.mrb[176].mxu1  ;;  %v5289_v42 = vadd.f32 %v5288_v41, %v19495_v16  ;;  %v19587_v9 = vadd.f32 0.5, %v6811_v31  ;;  %v19592_v56 = vadd.f32 %v6972_v46, %v24008_v24  ;;  %v24012_v46 = vld [vmem:[#allocation5_spill] sm:$0xff] }
 0x30b   : > { %v5290_v7 = vpop.f32.mrb[177].mxu0  ;;  %v16245_v17 = vpop.eup %16244  ;;  %24007 = vst [vmem:[#allocation3_spill] sm:$0xff] %v19584_v60  ;;  %v7010_v57 = vadd.f32 0.5, %v6850_v1  ;;  %v5378_v48 = vadd.f32 %v5377_v19, %v19495_v16  ;;  %v6851_v26 = vmul.f32 0.5, %v16243_v33  ;;  %v24010_v19 = vld [vmem:[#allocation4_spill] sm:$0xff]  ;;  %v19600_v33 = vadd.f32 %v7087_v61, %v24012_v46  ;;  %v24018_v61 = vld [vmem:[#allocation7_spill] sm:$0xff] }
 0x30c   : > { %v5379_v62 = vpop.f32.mrb[177].mxu1  ;;  %v5291_v10 = vadd.f32 %v5290_v7, %v19495_v16  ;;  %v16247_v21 = vpop.eup %16246  ;;  %24009 = vst [vmem:[#allocation8_spill] sm:$0xff] %v19592_v56  ;;  %16262 = vtanh.f32 %v5289_v42  ;;  %v7012_v51 = vadd.f32 0.5, %v6852_v52  ;;  %v6853_v6 = vmul.f32 0.5, %v16245_v17  ;;  %v24014_v52 = vld [vmem:[#allocation9_spill] sm:$0xff] }
 0x30d   : > { %v5380_v38 = vadd.f32 %v5379_v62, %v19495_v16  ;;  %v5294_v12 = vpop.f32.mrb[178].mxu0  ;;  %v16249_v20 = vpop.eup %16248  ;;  %v6890_v13 = vmul.f32 0.5, %v16247_v21  ;;  %16264 = vtanh.f32 %v5378_v48  ;;  %v19597_v7 = vadd.f32 %v19548_v58, %v24010_v19  ;;  %24013 = vst [vmem:[#allocation5_spill] sm:$0xff] %v19600_v33 }
 0x30e   : > { %v5383_v31 = vpop.f32.mrb[178].mxu1  ;;  %v5296_v1 = vpop.f32.mrb[179].mxu0  ;;  %v6892_v28 = vmul.f32 0.5, %v16249_v20  ;;  %16266 = vtanh.f32 %v5291_v10  ;;  %v19602_v62 = vadd.f32 0.5, %v6813_v47  ;;  %v19605_v17 = vadd.f32 %v7010_v57, %v24014_v52  ;;  %v24016_v20 = vld [vmem:[#allocation6_spill] sm:$0xff] }
 0x30f   : > { %v16251_v41 = vpop.eup %16250  ;;  %24011 = vst [vmem:[#allocation4_spill] sm:$0xff] %v19597_v7  ;;  %v5385_v4 = vpop.f32.mrb[179].mxu1  ;;  %v7050_v48 = vadd.f32 0.5, %v6890_v13  ;;  %16268 = vtanh.f32 %v5380_v38  ;;  %v15055_v10 = vpack.c.bf16 %v19600_v33, %v19597_v7  ;;  %v19611_v58 = vadd.f32 %v19550_v43, %v24016_v20 }
 0x310   : > { %v16253_v42 = vpop.eup %16252  ;;  %24015 = vst [vmem:[#allocation9_spill] sm:$0xff] %v19605_v17  ;;  %v6891_v24 = vmul.f32 0.5, %v16251_v41  ;;  %v19614_v19 = vadd.f32 %v7089_v34, %v24018_v61  ;;  %v19617_v55 = vadd.f32 %v7012_v51, %v24020_v15  ;;  %v7011_v57 = vadd.f32 0.5, %v6851_v26  ;;  %v24022_v51 = vld [vmem:[#allocation11_spill] sm:$0xff] }
 0x311   : > { %v16255_v21 = vpop.eup %16254  ;;  %24017 = vst [vmem:[#allocation6_spill] sm:$0xff] %v19611_v58  ;;  %v5300_v46 = vpop.f32.mrb[180].mxu0  ;;  %v5295_v38 = vadd.f32 %v5294_v12, %v19499_v53  ;;  %v19620_v39 = vadd.f32 0.5, %v6853_v6  ;;  %v7052_v33 = vadd.f32 0.5, %v6892_v28  ;;  %15056 = vmatprep.subr.bf16.mxu0 %v15055_v10  ;;  %v6893_v61 = vmul.f32 0.5, %v16253_v42 }
 0x312   : > { %24019 = vst [vmem:[#allocation7_spill] sm:$0xff] %v19614_v19  ;;  %v16257_v47 = vpop.eup %16256  ;;  %24021 = vst [vmem:[#allocation10_spill] sm:$0xff] %v19617_v55  ;;  %v6930_v13 = vmul.f32 0.5, %v16255_v21  ;;  %v5389_v41 = vpop.f32.mrb[180].mxu1  ;;  %v15063_v43 = vpack.c.bf16 %v19614_v19, %v19611_v58  ;;  %v5384_v15 = vadd.f32 %v5383_v31, %v19499_v53  ;;  %v15057_v26 = vpack.c.bf16 %v19577_v30, %v19546_v35  ;;  %v24024_v19 = vld [vmem:[#allocation14_spill] sm:$0xff] }
 0x313   : > { %v5302_v52 = vpop.f32.mrb[181].mxu0  ;;  %v6932_v7 = vmul.f32 0.5, %v16257_v47  ;;  %v5391_v34 = vpop.f32.mrb[181].mxu1  ;;  %16270 = vtanh.f32 %v5295_v38  ;;  %v19628_v21 = vadd.f32 %v7050_v48, %v24022_v51  ;;  %v19630_v6 = vadd.f32 0.5, %v6891_v24  ;;  %v19639_v48 = vld [vmem:[%s23528_s2 + $0x40] sm:$0xff] }
 0x314   : > { %v16259_v20 = vpop.eup %16258  ;;  %15064 = vmatprep.subr.bf16.mxu1 %v15063_v43  ;;  %v15065_v28 = vpack.c.bf16 %v19581_v5, %v19571_v25  ;;  %v5297_v10 = vadd.f32 %v5296_v1, %v19499_v53  ;;  %v7090_v42 = vadd.f32 0.5, %v6930_v13  ;;  %16272 = vtanh.f32 %v5384_v15  ;;  %15058 = vmatpush1.bf16.msra.mxu0 %v15057_v26 }
 0x315   : > { %v16261_v12 = vpop.eup %16260  ;;  %24023 = vst [vmem:[#allocation11_spill] sm:$0xff] %v19628_v21  ;;  %v5306_v47 = vpop.f32.mrb[182].mxu0  ;;  %v7092_v38 = vadd.f32 0.5, %v6932_v7  ;;  %v5386_v31 = vadd.f32 %v5385_v4, %v19499_v53  ;;  %v19642_v30 = vadd.f32 %v7052_v33, %v24024_v19  ;;  %v6931_v5 = vmul.f32 0.5, %v16259_v20  ;;  %v24026_v20 = vld [vmem:[#allocation17_spill] sm:$0xff] }
 0x316   : > { %v5395_v24 = vpop.f32.mrb[182].mxu1  ;;  %v5308_v51 = vpop.f32.mrb[183].mxu0  ;;  %15066 = vmatpush1.bf16.msra.mxu1 %v15065_v28  ;;  %16274 = vtanh.f32 %v5297_v10  ;;  %v5301_v1 = vadd.f32 %v5300_v46, %v19503_v22  ;;  %v6933_v15 = vmul.f32 0.5, %v16261_v12  ;;  %v5390_v26 = vadd.f32 %v5389_v41, %v19503_v22  ;;  %v24028_v28 = vld [vmem:[#allocation18_spill] sm:$0xff]  ;;  %v24030_v10 = vld [vmem:[#allocation12_spill] sm:$0xff] }
 0x317   : > { %v16263_v43 = vpop.eup %16262  ;;  %24025 = vst [vmem:[#allocation14_spill] sm:$0xff] %v19642_v30  ;;  %v5397_v7 = vpop.f32.mrb[183].mxu1  ;;  %16276 = vtanh.f32 %v5386_v31  ;;  %v19646_v25 = vadd.f32 0.5, %v6893_v61  ;;  %14481 = vmatmul.mubr.msk.f32.vlgmr.msra.gmra.mrb[240].mxu0 %vm2560_vm1, %v19639_v48  ;;  %v5303_v33 = vadd.f32 %v5302_v52, %v19503_v22  ;;  %v19652_v46 = vadd.f32 %v7090_v42, %v24026_v20  ;;  %v19664_v61 = vld [vmem:[%s23528_s2 + $0x48] sm:$0xff] }
 0x318   : > { %v16265_v13 = vpop.eup %16264  ;;  %v6814_v4 = vmul.f32 0.5, %v16263_v43  ;;  %16278 = vtanh.f32 %v5301_v1  ;;  %v19655_v12 = vadd.f32 %v7092_v38, %v24028_v28  ;;  %v5392_v41 = vadd.f32 %v5391_v34, %v19503_v22  ;;  %7389 = vmatprep.mubr.f32.mxu0 %v23869_v40  ;;  %v24032_v38 = vld [vmem:[#allocation13_spill] sm:$0xff] }
 0x319   : > { %v16267_v58 = vpop.eup %16266  ;;  %v6816_v35 = vmul.f32 0.5, %v16265_v13  ;;  %24027 = vst [vmem:[#allocation17_spill] sm:$0xff] %v19652_v46  ;;  %14485 = vmatmul.mubr.msk.f32.vlgmr.msra.gmra.mrb[240].mxu1 %vm2560_vm1, %v19639_v48  ;;  %16280 = vtanh.f32 %v5390_v26  ;;  %v7091_v52 = vadd.f32 0.5, %v6931_v5  ;;  %v19669_v42 = vadd.f32 %v19587_v9, %v24030_v10 }
 0x31a   : > { %v16269_v19 = vpop.eup %16268  ;;  %24029 = vst [vmem:[#allocation18_spill] sm:$0xff] %v19655_v12  ;;  %16282 = vtanh.f32 %v5303_v33  ;;  %7478 = vmatprep.mubr.f32.mxu1 %v23869_v40  ;;  %v19672_v31 = vadd.f32 %v7011_v57, %v24032_v38  ;;  %v19674_v34 = vadd.f32 0.5, %v6933_v15  ;;  %v6974_v1 = vadd.f32 0.5, %v6814_v4  ;;  %v24034_v33 = vld [vmem:[#allocation15_spill] sm:$0xff]  ;;  %v24036_v15 = vld [vmem:[#allocation16_spill] sm:$0xff] }
 0x31b   : > { %24031 = vst [vmem:[#allocation12_spill] sm:$0xff] %v19669_v42  ;;  %v5466_v43 = vpop.f32.mrb[184].mxu0  ;;  %v19676_v13 = vadd.f32 0.5, %v6816_v35  ;;  %v6815_v26 = vmul.f32 0.5, %v16267_v58  ;;  %v19678_v5 = vmul.f32 0.5, %v16269_v19  ;;  %14482 = vmatmul.mubr.msk.f32.gmra.mrb[242].mxu0 %vm2560_vm1, %v19664_v61  ;;  %v19686_v57 = vadd.f32 %v19602_v62, %v24034_v33  ;;  %v19701_v62 = vld [vmem:[%s23528_s2 + $0x50] sm:$0xff] }
 0x31c   : > { %24033 = vst [vmem:[#allocation13_spill] sm:$0xff] %v19672_v31  ;;  %v5468_v28 = vpop.f32.mrb[185].mxu0  ;;  %v15067_v9 = vpack.c.bf16 %v19672_v31, %v19669_v42  ;;  %v19690_v4 = vadd.f32 %v19620_v39, %v24036_v15  ;;  %16284 = vtanh.f32 %v5392_v41  ;;  %v5307_v19 = vadd.f32 %v5306_v47, %v19511_v54  ;;  %7395 = vmatprep.mubr.f32.mxu0 %v23869_v40  ;;  %v24038_v31 = vld [vmem:[#allocation23_spill] sm:$0xff] }
 0x31d   : > { %v5555_v20 = vpop.f32.mrb[184].mxu1  ;;  %24035 = vst [vmem:[#allocation15_spill] sm:$0xff] %v19686_v57  ;;  %v16271_v58 = vpop.eup %16270  ;;  %14486 = vmatmul.mubr.msk.f32.gmra.mrb[242].mxu1 %vm2560_vm1, %v19664_v61  ;;  %v5396_v10 = vadd.f32 %v5395_v24, %v19511_v54  ;;  %v15069_v38 = vpack.c.bf16 %v19605_v17, %v19584_v60  ;;  %v5309_v33 = vadd.f32 %v5308_v51, %v19511_v54  ;;  %v19738_v60 = vadd.f32 0.5, %v6815_v26 }
 0x31e   : > { %24037 = vst [vmem:[#allocation16_spill] sm:$0xff] %v19690_v4  ;;  %v5557_v35 = vpop.f32.mrb[185].mxu1  ;;  %v6854_v39 = vmul.f32 0.5, %v16271_v58  ;;  %15068 = vmatprep.subr.bf16.mxu0 %v15067_v9  ;;  %v15075_v41 = vpack.c.bf16 %v19690_v4, %v19686_v57  ;;  %v5398_v15 = vadd.f32 %v5397_v7, %v19511_v54  ;;  %v16273_v24 = vpop.eup %16272  ;;  %v19711_v17 = vadd.f32 %v6974_v1, %v24038_v31 }
 0x31f   : > { %v19708_v47 = vpop.f32.mrb[186].mxu0  ;;  %16286 = vtanh.f32 %v5307_v19  ;;  %15070 = vmatpush1.bf16.msra.mxu0 %v15069_v38  ;;  %v15077_v9 = vpack.c.bf16 %v19617_v55, %v19592_v56  ;;  %7484 = vmatprep.mubr.f32.mxu1 %v23869_v40  ;;  %v5467_v58 = vadd.f32 %v5466_v43, %v19495_v16  ;;  %v6856_v42 = vmul.f32 0.5, %v16273_v24  ;;  %v19726_v43 = vld [vmem:[%s23528_s2 + $0x58] sm:$0xff] }
 0x320   : > { %24039 = vst [vmem:[#allocation23_spill] sm:$0xff] %v19711_v17  ;;  %v19717_v4 = vpop.f32.mrb[187].mxu0  ;;  %v16275_v7 = vpop.eup %16274  ;;  %v7014_v57 = vadd.f32 0.5, %v6854_v39  ;;  %15076 = vmatprep.subr.bf16.mxu1 %v15075_v41  ;;  %16288 = vtanh.f32 %v5396_v10  ;;  %14483 = vmatmul.mubr.msk.f32.gmra.mrb[244].mxu0 %vm2560_vm1, %v19701_v62  ;;  %v5556_v31 = vadd.f32 %v5555_v20, %v19495_v16  ;;  %v24040_v39 = vld [vmem:[#allocation19_spill] sm:$0xff]  ;;  %v24042_v41 = vld [vmem:[#allocation20_spill] sm:$0xff] }
 0x321   : > { %v5561_v51 = vpop.f32.mrb[186].mxu1  ;;  %v16277_v19 = vpop.eup %16276  ;;  %v6855_v38 = vmul.f32 0.5, %v16275_v7  ;;  %15078 = vmatpush1.bf16.msra.mxu1 %v15077_v9  ;;  %16290 = vtanh.f32 %v5309_v33  ;;  %7401 = vmatprep.mubr.f32.mxu0 %v23869_v40  ;;  %v19730_v10 = vadd.f32 %v19630_v6, %v24040_v39  ;;  %v19733_v24 = vadd.f32 %v7091_v52, %v24042_v41 }
 0x322   : > { %v5563_v1 = vpop.f32.mrb[187].mxu1  ;;  %v16279_v20 = vpop.eup %16278  ;;  %v7016_v55 = vadd.f32 0.5, %v6856_v42  ;;  %v6857_v56 = vmul.f32 0.5, %v16277_v19  ;;  %16292 = vtanh.f32 %v5398_v15  ;;  %14487 = vmatmul.mubr.msk.f32.gmra.mrb[244].mxu1 %vm2560_vm1, %v19701_v62  ;;  %v5469_v33 = vadd.f32 %v5468_v28, %v19495_v16  ;;  %v24044_v15 = vld [vmem:[#allocation30_spill] sm:$0xff] }
 0x323   : > { %24041 = vst [vmem:[#allocation19_spill] sm:$0xff] %v19730_v10  ;;  %24043 = vst [vmem:[#allocation20_spill] sm:$0xff] %v19733_v24  ;;  %v5478_v9 = vpop.f32.mrb[188].mxu0  ;;  %v16281_v7 = vpop.eup %16280  ;;  %v6894_v44 = vmul.f32 0.5, %v16279_v20  ;;  %16294 = vtanh.f32 %v5467_v58  ;;  %7490 = vmatprep.mubr.f32.mxu1 %v23869_v40  ;;  %v15071_v6 = vpack.c.bf16 %v19733_v24, %v19730_v10  ;;  %v19745_v39 = vadd.f32 %v19676_v13, %v24044_v15  ;;  %v24046_v20 = vld [vmem:[#allocation24_spill] sm:$0xff]  ;;  %v24048_v10 = vld [vmem:[#allocation25_spill] sm:$0xff] }
 0x324   : > { %v5480_v42 = vpop.f32.mrb[189].mxu0  ;;  %v16283_v19 = vpop.eup %16282  ;;  %v6896_v41 = vmul.f32 0.5, %v16281_v7  ;;  %16296 = vtanh.f32 %v5556_v31  ;;  %v5558_v28 = vadd.f32 %v5557_v35, %v19495_v16  ;;  %14484 = vmatmul.mubr.msk.f32.gmra.mrb[246].mxu0 %vm2560_vm1, %v19726_v43  ;;  %v19751_v58 = vadd.f32 0.5, %v19678_v5  ;;  %v24050_v35 = vld [vmem:[#allocation21_spill] sm:$0xff]  ;;  %v24052_v31 = vld [vmem:[#allocation22_spill] sm:$0xff] }
 0x325   : > { %v5567_v52 = vpop.f32.mrb[188].mxu1  ;;  %24045 = vst [vmem:[#allocation30_spill] sm:$0xff] %v19745_v39  ;;  %v19754_v24 = vadd.f32 %v7014_v57, %v24046_v20  ;;  %v19757_v50 = vadd.f32 %v7016_v55, %v24048_v10  ;;  %v7015_v32 = vadd.f32 0.5, %v6855_v38  ;;  %15072 = vmatprep.subr.bf16.mxu0 %v15071_v6  ;;  %7561 = vmatprep.mubr.f32.mxu0 %v23869_v40  ;;  %v19760_v13 = vadd.f32 0.5, %v6857_v56 }
 0x326   : > { %v5569_v26 = vpop.f32.mrb[189].mxu1  ;;  %16298 = vtanh.f32 %v5469_v33  ;;  %14488 = vmatmul.mubr.msk.f32.gmra.mrb[246].mxu1 %vm2560_vm1, %v19726_v43  ;;  %v19766_v5 = vadd.f32 %v19646_v25, %v24050_v35  ;;  %v19770_v57 = vadd.f32 %v19674_v34, %v24052_v31  ;;  %v16285_v38 = vpop.eup %16284  ;;  %v7054_v10 = vadd.f32 0.5, %v6894_v44 }
 0x327   : > { %24047 = vst [vmem:[#allocation24_spill] sm:$0xff] %v19754_v24  ;;  %24049 = vst [vmem:[#allocation25_spill] sm:$0xff] %v19757_v50  ;;  %v19772_v55 = vpop.f32.mrb[190].mxu0  ;;  %v6895_v7 = vmul.f32 0.5, %v16283_v19  ;;  %v5473_v56 = vadd.f32 %v19708_v47, %v19499_v53  ;;  %v5562_v33 = vadd.f32 %v5561_v51, %v19499_v53  ;;  %7650 = vmatprep.mubr.f32.mxu1 %v23869_v40  ;;  %v7056_v15 = vadd.f32 0.5, %v6896_v41 }
 0x328   : > { %24051 = vst [vmem:[#allocation21_spill] sm:$0xff] %v19766_v5  ;;  %24053 = vst [vmem:[#allocation22_spill] sm:$0xff] %v19770_v57  ;;  %v19780_v25 = vpop.f32.mrb[191].mxu0  ;;  %16300 = vtanh.f32 %v5558_v28  ;;  %v15079_v34 = vpack.c.bf16 %v19770_v57, %v19766_v5  ;;  %v15073_v44 = vpack.c.bf16 %v19652_v46, %v19628_v21  ;;  %v15081_v47 = vpack.c.bf16 %v19655_v12, %v19642_v30 }
 0x329   : > { %v19778_v6 = vpop.f32.mrb[190].mxu1  ;;  %v16287_v20 = vpop.eup %16286  ;;  %16302 = vtanh.f32 %v5473_v56  ;;  %v5475_v51 = vadd.f32 %v19717_v4, %v19499_v53  ;;  %v5564_v35 = vadd.f32 %v5563_v1, %v19499_v53  ;;  %v5479_v31 = vadd.f32 %v5478_v9, %v19503_v22  ;;  %v24054_v4 = vld [vmem:[#allocation31_spill] sm:$0xff] }
 0x32a   : > { %v19786_v19 = vpop.f32.mrb[191].mxu1  ;;  %v16289_v41 = vpop.eup %16288  ;;  %v6934_v28 = vmul.f32 0.5, %v16287_v20  ;;  %15080 = vmatprep.subr.bf16.mxu1 %v15079_v34  ;;  %16304 = vtanh.f32 %v5562_v33  ;;  %15074 = vmatpush1.bf16.msra.mxu0 %v15073_v44  ;;  %v5568_v57 = vadd.f32 %v5567_v52, %v19503_v22  ;;  %v6897_v5 = vmul.f32 0.5, %v16285_v38  ;;  %v24056_v52 = vld [vmem:[#allocation27_spill] sm:$0xff] }
 0x32b   : > { %v16291_v46 = vpop.eup %16290  ;;  %v6936_v56 = vmul.f32 0.5, %v16289_v41  ;;  %15082 = vmatpush1.bf16.msra.mxu1 %v15081_v47  ;;  %16306 = vtanh.f32 %v5475_v51  ;;  %v5481_v12 = vadd.f32 %v5480_v42, %v19503_v22  ;;  %v19797_v21 = vadd.f32 %v7054_v10, %v24054_v4 }
 0x32c   : > { %v16293_v30 = vpop.eup %16292  ;;  %v7094_v1 = vadd.f32 0.5, %v6934_v28  ;;  %16308 = vtanh.f32 %v5564_v35  ;;  %v5570_v33 = vadd.f32 %v5569_v26, %v19503_v22  ;;  %v6935_v20 = vmul.f32 0.5, %v16291_v46  ;;  %v24058_v46 = vld [vmem:[#allocation26_spill] sm:$0xff] }
 0x32d   : > { %24055 = vst [vmem:[#allocation31_spill] sm:$0xff] %v19797_v21  ;;  %v16295_v44 = vpop.eup %16294  ;;  %v7096_v9 = vadd.f32 0.5, %v6936_v56  ;;  %14489 = vmatmul.mubr.msk.f32.vlgmr.msra.gmra.mrb[248].mxu0 %vm2560_vm1, %v19639_v48  ;;  %16310 = vtanh.f32 %v5479_v31  ;;  %v19803_v38 = vadd.f32 %v7015_v32, %v24056_v52  ;;  %v6937_v51 = vmul.f32 0.5, %v16293_v30  ;;  %v24060_v32 = vld [vmem:[#allocation38_spill] sm:$0xff] }
 0x32e   : > { %v16297_v10 = vpop.eup %16296  ;;  %v6818_v35 = vmul.f32 0.5, %v16295_v44  ;;  %14493 = vmatmul.mubr.msk.f32.vlgmr.msra.gmra.mrb[248].mxu1 %vm2560_vm1, %v19639_v48  ;;  %16312 = vtanh.f32 %v5568_v57  ;;  %7567 = vmatprep.mubr.f32.mxu0 %v23869_v40  ;;  %v19814_v26 = vadd.f32 %v19738_v60, %v24058_v46  ;;  %v19819_v28 = vadd.f32 %v7056_v15, %v24060_v32  ;;  %v24062_v57 = vld [vmem:[#allocation32_spill] sm:$0xff]  ;;  %v24064_v15 = vld [vmem:[#allocation33_spill] sm:$0xff] }
 0x32f   : > { %v5644_v34 = vpop.f32.mrb[192].mxu0  ;;  %24057 = vst [vmem:[#allocation27_spill] sm:$0xff] %v19803_v38  ;;  %v19821_v31 = vadd.f32 0.5, %v6895_v7  ;;  %v6820_v56 = vmul.f32 0.5, %v16297_v10  ;;  %16314 = vtanh.f32 %v5481_v12  ;;  %7656 = vmatprep.mubr.f32.mxu1 %v23869_v40  ;;  %v19824_v4 = vadd.f32 0.5, %v6897_v5  ;;  %v24066_v12 = vld [vmem:[#allocation28_spill] sm:$0xff] }
 0x330   : > { %v19805_v42 = vpop.f32.mrb[192].mxu1  ;;  %v19807_v47 = vpop.f32.mrb[193].mxu0  ;;  %24059 = vst [vmem:[#allocation26_spill] sm:$0xff] %v19814_v26  ;;  %24061 = vst [vmem:[#allocation38_spill] sm:$0xff] %v19819_v28  ;;  %v19827_v44 = vadd.f32 %v7094_v1, %v24062_v57  ;;  %16316 = vtanh.f32 %v5570_v33  ;;  %v15083_v60 = vpack.c.bf16 %v19803_v38, %v19814_v26  ;;  %v19834_v46 = vadd.f32 %v7096_v9, %v24064_v15  ;;  %v24068_v1 = vld [vmem:[#allocation29_spill] sm:$0xff] }
 0x331   : > { %v19816_v41 = vpop.f32.mrb[193].mxu1  ;;  %v16299_v30 = vpop.eup %16298  ;;  %v19836_v7 = vadd.f32 0.5, %v6935_v20  ;;  %14490 = vmatmul.mubr.msk.f32.gmra.mrb[250].mxu0 %vm2560_vm1, %v19664_v61  ;;  %v19842_v5 = vadd.f32 %v19751_v58, %v24066_v12  ;;  %v19846_v33 = vadd.f32 %v19760_v13, %v24068_v1  ;;  %v19852_v9 = vadd.f32 0.5, %v6937_v51 }
 0x332   : > { %24063 = vst [vmem:[#allocation32_spill] sm:$0xff] %v19827_v44  ;;  %24065 = vst [vmem:[#allocation33_spill] sm:$0xff] %v19834_v46  ;;  %v16301_v57 = vpop.eup %16300  ;;  %v6978_v20 = vadd.f32 0.5, %v6818_v35  ;;  %14494 = vmatmul.mubr.msk.f32.gmra.mrb[250].mxu1 %vm2560_vm1, %v19664_v61  ;;  %15084 = vmatprep.subr.bf16.mxu0 %v15083_v60  ;;  %v5485_v58 = vadd.f32 %v19772_v55, %v19511_v54  ;;  %v5574_v15 = vadd.f32 %v19778_v6, %v19511_v54 }
 0x333   : > { %v19831_v52 = vpop.f32.mrb[194].mxu0  ;;  %24067 = vst [vmem:[#allocation28_spill] sm:$0xff] %v19842_v5  ;;  %24069 = vst [vmem:[#allocation29_spill] sm:$0xff] %v19846_v33  ;;  %v16303_v12 = vpop.eup %16302  ;;  %v6980_v1 = vadd.f32 0.5, %v6820_v56  ;;  %v6819_v38 = vmul.f32 0.5, %v16299_v30  ;;  %v15091_v51 = vpack.c.bf16 %v19846_v33, %v19842_v5  ;;  %v15085_v35 = vpack.c.bf16 %v19754_v24, %v19711_v17  ;;  %7573 = vmatprep.mubr.f32.mxu0 %v23869_v40 }
 0x334   : > { %v19848_v10 = vpop.f32.mrb[194].mxu1  ;;  %v19850_v32 = vpop.f32.mrb[195].mxu0  ;;  %7662 = vmatprep.mubr.f32.mxu1 %v23869_v40  ;;  %v6858_v55 = vmul.f32 0.5, %v16303_v12  ;;  %16318 = vtanh.f32 %v5485_v58  ;;  %v15093_v6 = vpack.c.bf16 %v19757_v50, %v19745_v39  ;;  %v5487_v56 = vadd.f32 %v19780_v25, %v19511_v54 }
 0x335   : > { %v19860_v13 = vpop.f32.mrb[195].mxu1  ;;  %v16305_v60 = vpop.eup %16304  ;;  %15092 = vmatprep.subr.bf16.mxu1 %v15091_v51  ;;  %16320 = vtanh.f32 %v5574_v15  ;;  %15086 = vmatpush1.bf16.msra.mxu0 %v15085_v35  ;;  %v5576_v24 = vadd.f32 %v19786_v19, %v19511_v54  ;;  %v5645_v5 = vadd.f32 %v5644_v34, %v19495_v16  ;;  %v6821_v39 = vmul.f32 0.5, %v16301_v57 }
 0x336   : > { %v16307_v26 = vpop.eup %16306  ;;  %v6860_v33 = vmul.f32 0.5, %v16305_v60  ;;  %v7018_v17 = vadd.f32 0.5, %v6858_v55  ;;  %15094 = vmatpush1.bf16.msra.mxu1 %v15093_v6  ;;  %16322 = vtanh.f32 %v5487_v56  ;;  %14491 = vmatmul.mubr.msk.f32.gmra.mrb[252].mxu0 %vm2560_vm1, %v19701_v62  ;;  %v5734_v25 = vadd.f32 %v19805_v42, %v19495_v16  ;;  %v24070_v60 = vld [vmem:[#allocation39_spill] sm:$0xff] }
 0x337   : > { %v19872_v30 = vpop.f32.mrb[196].mxu0  ;;  %v16309_v50 = vpop.eup %16308  ;;  %v6859_v34 = vmul.f32 0.5, %v16307_v26  ;;  %16324 = vtanh.f32 %v5576_v24  ;;  %14495 = vmatmul.mubr.msk.f32.gmra.mrb[252].mxu1 %vm2560_vm1, %v19701_v62  ;;  %v5647_v57 = vadd.f32 %v19807_v47, %v19495_v16  ;;  %7579 = vmatprep.mubr.f32.mxu0 %v23869_v40  ;;  %v19893_v55 = vadd.f32 %v6978_v20, %v24070_v60  ;;  %v24072_v26 = vld [vmem:[#allocation40_spill] sm:$0xff] }
 0x338   : > { %v19877_v12 = vpop.f32.mrb[196].mxu1  ;;  %v19879_v58 = vpop.f32.mrb[197].mxu0  ;;  %v7020_v51 = vadd.f32 0.5, %v6860_v33  ;;  %v6861_v6 = vmul.f32 0.5, %v16309_v50  ;;  %16326 = vtanh.f32 %v5645_v5  ;;  %7668 = vmatprep.mubr.f32.mxu1 %v23869_v40  ;;  %v19899_v56 = vadd.f32 %v6980_v1, %v24072_v26  ;;  %v24074_v5 = vld [vmem:[#allocation41_spill] sm:$0xff]  ;;  %v24076_v1 = vld [vmem:[#allocation42_spill] sm:$0xff] }
 0x339   : > { %v19885_v15 = vpop.f32.mrb[197].mxu1  ;;  %v16311_v19 = vpop.eup %16310  ;;  %24071 = vst [vmem:[#allocation39_spill] sm:$0xff] %v19893_v55  ;;  %v19901_v59 = vadd.f32 0.5, %v6819_v38  ;;  %16328 = vtanh.f32 %v5734_v25  ;;  %v19907_v50 = vadd.f32 0.5, %v6821_v39  ;;  %v5736_v60 = vadd.f32 %v19816_v41, %v19495_v16  ;;  %v24078_v39 = vld [vmem:[#allocation34_spill] sm:$0xff] }
 0x33a   : > { %v16313_v35 = vpop.eup %16312  ;;  %v6898_v42 = vmul.f32 0.5, %v16311_v19  ;;  %24073 = vst [vmem:[#allocation40_spill] sm:$0xff] %v19899_v56  ;;  %v19910_v19 = vadd.f32 %v7018_v17, %v24074_v5  ;;  %16330 = vtanh.f32 %v5647_v57  ;;  %14492 = vmatmul.mubr.msk.f32.gmra.mrb[254].mxu0 %vm2560_vm1, %v19726_v43  ;;  %v19919_v25 = vadd.f32 %v7020_v51, %v24076_v1  ;;  %v24080_v57 = vld [vmem:[#allocation35_spill] sm:$0xff] }
 0x33b   : > { %v19896_v33 = vpop.f32.mrb[198].mxu0  ;;  %v16315_v24 = vpop.eup %16314  ;;  %v6900_v47 = vmul.f32 0.5, %v16313_v35  ;;  %v19921_v35 = vadd.f32 0.5, %v6859_v34  ;;  %14496 = vmatmul.mubr.msk.f32.gmra.mrb[254].mxu1 %vm2560_vm1, %v19726_v43  ;;  %v19927_v17 = vadd.f32 %v19821_v31, %v24078_v39  ;;  %v19931_v41 = vadd.f32 %v19836_v7, %v24080_v57  ;;  %7739 = vmatprep.mubr.f32.mxu0 %v23869_v40  ;;  %v24084_v39 = vld [vmem:[#allocation37_spill] sm:$0xff] }
 0x33c   : > { %v19903_v11 = vpop.f32.mrb[198].mxu1  ;;  %v19905_v14 = vpop.f32.mrb[199].mxu0  ;;  %24075 = vst [vmem:[#allocation41_spill] sm:$0xff] %v19910_v19  ;;  %24077 = vst [vmem:[#allocation42_spill] sm:$0xff] %v19919_v25  ;;  %v19934_v26 = vadd.f32 0.5, %v6861_v6  ;;  %v7058_v5 = vadd.f32 0.5, %v6898_v42  ;;  %7828 = vmatprep.mubr.f32.mxu1 %v23869_v40  ;;  %v19941_v31 = vadd.f32 %v19824_v4, %v24082_v36  ;;  %v19945_v7 = vadd.f32 %v19852_v9, %v24084_v39 }
 0x33d   : > { %v16317_v20 = vpop.eup %16316  ;;  %v19916_v38 = vpop.f32.mrb[199].mxu1  ;;  %24079 = vst [vmem:[#allocation34_spill] sm:$0xff] %v19927_v17  ;;  %24081 = vst [vmem:[#allocation35_spill] sm:$0xff] %v19931_v41  ;;  %v7060_v51 = vadd.f32 0.5, %v6900_v47  ;;  %v6899_v1 = vmul.f32 0.5, %v16315_v24  ;;  %v15087_v29 = vpack.c.bf16 %v19931_v41, %v19927_v17  ;;  %16332 = vtanh.f32 %v5736_v60 }
 0x33e   : > { %v6901_v34 = vmul.f32 0.5, %v16317_v20  ;;  %24083 = vst [vmem:[#allocation36_spill] sm:$0xff] %v19941_v31  ;;  %24085 = vst [vmem:[#allocation37_spill] sm:$0xff] %v19945_v7  ;;  %v16319_v57 = vpop.eup %16318  ;;  %v5651_v6 = vadd.f32 %v19831_v52, %v19499_v53  ;;  %v5740_v42 = vadd.f32 %v19848_v10, %v19499_v53  ;;  %v15089_v24 = vpack.c.bf16 %v19827_v44, %v19797_v21 }
 0x33f   : > { %v16321_v20 = vpop.eup %16320  ;;  %v6938_v36 = vmul.f32 0.5, %v16319_v57  ;;  %15088 = vmatprep.subr.bf16.mxu0 %v15087_v29  ;;  %v15095_v4 = vpack.c.bf16 %v19945_v7, %v19941_v31  ;;  %v5653_v9 = vadd.f32 %v19850_v32, %v19499_v53  ;;  %v5742_v52 = vadd.f32 %v19860_v13, %v19499_v53 }
 0x340   : > { %v16323_v39 = vpop.eup %16322  ;;  %v6940_v41 = vmul.f32 0.5, %v16321_v20  ;;  %16334 = vtanh.f32 %v5651_v6  ;;  %15090 = vmatpush1.bf16.msra.mxu0 %v15089_v24  ;;  %v15097_v29 = vpack.c.bf16 %v19834_v46, %v19819_v28  ;;  %v5657_v57 = vadd.f32 %v19872_v30, %v19503_v22  ;;  %v24086_v20 = vld [vmem:[#allocation47_spill] sm:$0xff] }
 0x341   : > { %v19953_v47 = vpop.f32.mrb[200].mxu0  ;;  %v16325_v32 = vpop.eup %16324  ;;  %v7098_v44 = vadd.f32 0.5, %v6938_v36  ;;  %v6939_v31 = vmul.f32 0.5, %v16323_v39  ;;  %15096 = vmatprep.subr.bf16.mxu1 %v15095_v4  ;;  %16336 = vtanh.f32 %v5740_v42  ;;  %v5746_v13 = vadd.f32 %v19877_v12, %v19503_v22  ;;  %v24088_v4 = vld [vmem:[#allocation54_spill] sm:$0xff] }
 0x342   : > { %v19961_v60 = vpop.f32.mrb[200].mxu1  ;;  %v19963_v10 = vpop.f32.mrb[201].mxu0  ;;  %v19974_v6 = vadd.f32 %v7058_v5, %v24086_v20  ;;  %v7100_v24 = vadd.f32 0.5, %v6940_v41  ;;  %v6941_v21 = vmul.f32 0.5, %v16325_v32  ;;  %15098 = vmatpush1.bf16.msra.mxu1 %v15097_v29  ;;  %16338 = vtanh.f32 %v5653_v9  ;;  %v24094_v20 = vld [vmem:[#allocation43_spill] sm:$0xff] }
 0x343   : > { %v19969_v7 = vpop.f32.mrb[201].mxu1  ;;  %v16327_v17 = vpop.eup %16326  ;;  %v19978_v28 = vadd.f32 0.5, %v6899_v1  ;;  %16340 = vtanh.f32 %v5742_v52  ;;  %14497 = vmatmul.mubr.msk.f32.vlgmr.msra.gmra.mrb[0].mxu0 %vm2560_vm1, %v19639_v48  ;;  %v5659_v12 = vadd.f32 %v19879_v58, %v19503_v22  ;;  %v19989_v9 = vadd.f32 %v7060_v51, %v24088_v4  ;;  %v24090_v52 = vld [vmem:[#allocation48_spill] sm:$0xff] }
 0x344   : > { %24087 = vst [vmem:[#allocation47_spill] sm:$0xff] %v19974_v6  ;;  %v16329_v30 = vpop.eup %16328  ;;  %v6822_v36 = vmul.f32 0.5, %v16327_v17  ;;  %v19991_v39 = vadd.f32 0.5, %v6901_v34  ;;  %16342 = vtanh.f32 %v5657_v57  ;;  %7745 = vmatprep.mubr.f32.mxu0 %v23869_v40  ;;  %v19997_v29 = vadd.f32 %v7098_v44, %v24090_v52  ;;  %v24092_v34 = vld [vmem:[#allocation49_spill] sm:$0xff] }
 0x345   : > { %v19976_v46 = vpop.f32.mrb[202].mxu0  ;;  %v16331_v41 = vpop.eup %16330  ;;  %24089 = vst [vmem:[#allocation54_spill] sm:$0xff] %v19989_v9  ;;  %v6824_v1 = vmul.f32 0.5, %v16329_v30  ;;  %v19999_v58 = vadd.f32 0.5, %v6939_v31  ;;  %14501 = vmatmul.mubr.msk.f32.vlgmr.msra.gmra.mrb[0].mxu1 %vm2560_vm1, %v19639_v48  ;;  %16344 = vtanh.f32 %v5746_v13  ;;  %v5748_v51 = vadd.f32 %v19885_v15, %v19503_v22  ;;  %v24096_v31 = vld [vmem:[#allocation44_spill] sm:$0xff] }
 0x346   : > { %v19984_v42 = vpop.f32.mrb[202].mxu1  ;;  %v19986_v5 = vpop.f32.mrb[203].mxu0  ;;  %24091 = vst [vmem:[#allocation48_spill] sm:$0xff] %v19997_v29  ;;  %v20006_v32 = vadd.f32 %v7100_v24, %v24092_v34  ;;  %v20008_v57 = vadd.f32 0.5, %v6941_v21  ;;  %7834 = vmatprep.mubr.f32.mxu1 %v23869_v40  ;;  %v20013_v44 = vadd.f32 %v19901_v59, %v24094_v20  ;;  %v20017_v30 = vadd.f32 %v19921_v35, %v24096_v31  ;;  %v24098_v20 = vld [vmem:[#allocation45_spill] sm:$0xff]  ;;  %v24100_v31 = vld [vmem:[#allocation46_spill] sm:$0xff] }
 0x347   : > { %v19994_v17 = vpop.f32.mrb[203].mxu1  ;;  %v6982_v13 = vadd.f32 0.5, %v6822_v36  ;;  %v6984_v52 = vadd.f32 0.5, %v6824_v1  ;;  %v6823_v15 = vmul.f32 0.5, %v16331_v41  ;;  %16346 = vtanh.f32 %v5659_v12  ;;  %14498 = vmatmul.mubr.msk.f32.gmra.mrb[2].mxu0 %vm2560_vm1, %v19664_v61  ;;  %v16333_v34 = vpop.eup %16332 }
 0x348   : > { %24093 = vst [vmem:[#allocation49_spill] sm:$0xff] %v20006_v32  ;;  %24095 = vst [vmem:[#allocation43_spill] sm:$0xff] %v20013_v44  ;;  %v15099_v59 = vpack.c.bf16 %v20017_v30, %v20013_v44  ;;  %v20031_v35 = vadd.f32 %v19907_v50, %v24098_v20  ;;  %v20035_v36 = vadd.f32 %v19934_v26, %v24100_v31  ;;  %7751 = vmatprep.mubr.f32.mxu0 %v23869_v40 }
 0x349   : > { %24097 = vst [vmem:[#allocation44_spill] sm:$0xff] %v20017_v30  ;;  %v20019_v4 = vpop.f32.mrb[204].mxu0  ;;  %v5663_v12 = vadd.f32 %v19896_v33, %v19511_v54  ;;  %16348 = vtanh.f32 %v5748_v51  ;;  %14502 = vmatmul.mubr.msk.f32.gmra.mrb[2].mxu1 %vm2560_vm1, %v19664_v61  ;;  %v5752_v1 = vadd.f32 %v19903_v11, %v19511_v54  ;;  %v15101_v50 = vpack.c.bf16 %v19910_v19, %v19893_v55 }
 0x34a   : > { %v20023_v21 = vpop.f32.mrb[204].mxu1  ;;  %v20025_v24 = vpop.f32.mrb[205].mxu0  ;;  %24099 = vst [vmem:[#allocation45_spill] sm:$0xff] %v20031_v35  ;;  %24101 = vst [vmem:[#allocation46_spill] sm:$0xff] %v20035_v36  ;;  %v15109_v26 = vpack.c.bf16 %v19919_v25, %v19899_v56  ;;  %15100 = vmatprep.subr.bf16.mxu0 %v15099_v59  ;;  %v15107_v33 = vpack.c.bf16 %v20035_v36, %v20031_v35  ;;  %v5665_v51 = vadd.f32 %v19905_v14, %v19511_v54 }
 0x34b   : > { %v20040_v41 = vpop.f32.mrb[205].mxu1  ;;  %v16335_v20 = vpop.eup %16334  ;;  %16350 = vtanh.f32 %v5663_v12  ;;  %v5754_v31 = vadd.f32 %v19916_v38, %v19511_v54  ;;  %7840 = vmatprep.mubr.f32.mxu1 %v23869_v40  ;;  %15102 = vmatpush1.bf16.msra.mxu0 %v15101_v50  ;;  %v5823_v59 = vadd.f32 %v19953_v47, %v19495_v16  ;;  %v5912_v12 = vadd.f32 %v19961_v60, %v19495_v16  ;;  %v24102_v38 = vld [vmem:[#allocation55_spill] sm:$0xff] }
 0x34c   : > { %v16337_v30 = vpop.eup %16336  ;;  %v6862_v19 = vmul.f32 0.5, %v16335_v20  ;;  %16352 = vtanh.f32 %v5752_v1  ;;  %v20068_v35 = vadd.f32 %v6982_v13, %v24102_v38  ;;  %15108 = vmatprep.subr.bf16.mxu1 %v15107_v33  ;;  %14499 = vmatmul.mubr.msk.f32.gmra.mrb[4].mxu0 %vm2560_vm1, %v19701_v62  ;;  %v5825_v47 = vadd.f32 %v19963_v10, %v19495_v16  ;;  %v24104_v10 = vld [vmem:[#allocation51_spill] sm:$0xff] }
 0x34d   : > { %v20057_v11 = vpop.f32.mrb[206].mxu0  ;;  %v16339_v25 = vpop.eup %16338  ;;  %v6864_v44 = vmul.f32 0.5, %v16337_v30  ;;  %16354 = vtanh.f32 %v5665_v51  ;;  %v6825_v50 = vmul.f32 0.5, %v16333_v34  ;;  %15110 = vmatpush1.bf16.msra.mxu1 %v15109_v26  ;;  %v5914_v13 = vadd.f32 %v19969_v7, %v19495_v16  ;;  %7757 = vmatprep.mubr.f32.mxu0 %v23869_v40  ;;  %v24106_v7 = vld [vmem:[#allocation50_spill] sm:$0xff] }
 0x34e   : > { %v20063_v36 = vpop.f32.mrb[206].mxu1  ;;  %v20065_v14 = vpop.f32.mrb[207].mxu0  ;;  %24103 = vst [vmem:[#allocation55_spill] sm:$0xff] %v20068_v35  ;;  %v7022_v20 = vadd.f32 0.5, %v6862_v19  ;;  %16356 = vtanh.f32 %v5754_v31  ;;  %v6863_v51 = vmul.f32 0.5, %v16339_v25  ;;  %14503 = vmatmul.mubr.msk.f32.gmra.mrb[4].mxu1 %vm2560_vm1, %v19701_v62  ;;  %v20083_v38 = vadd.f32 %v19999_v58, %v24104_v10 }
 0x34f   : > { %v20074_v1 = vpop.f32.mrb[207].mxu1  ;;  %v16341_v60 = vpop.eup %16340  ;;  %v7024_v33 = vadd.f32 0.5, %v6864_v44  ;;  %16358 = vtanh.f32 %v5823_v59  ;;  %7846 = vmatprep.mubr.f32.mxu1 %v23869_v40  ;;  %v20088_v31 = vadd.f32 %v19978_v28, %v24106_v7  ;;  %v24108_v44 = vld [vmem:[#allocation62_spill] sm:$0xff]  ;;  %v20093_v56 = vadd.f32 0.5, %v6823_v15 }
 0x350   : > { %v16343_v30 = vpop.eup %16342  ;;  %24105 = vst [vmem:[#allocation51_spill] sm:$0xff] %v20083_v38  ;;  %v6865_v19 = vmul.f32 0.5, %v16341_v60  ;;  %16360 = vtanh.f32 %v5912_v12  ;;  %v20091_v25 = vadd.f32 %v6984_v52, %v24108_v44  ;;  %14500 = vmatmul.mubr.msk.f32.gmra.mrb[6].mxu0 %vm2560_vm1, %v19726_v43  ;;  %v20099_v12 = vadd.f32 0.5, %v6825_v50  ;;  %v24114_v50 = vld [vmem:[#allocation52_spill] sm:$0xff] }
 0x351   : > { %v16345_v34 = vpop.eup %16344  ;;  %v6902_v26 = vmul.f32 0.5, %v16343_v30  ;;  %24107 = vst [vmem:[#allocation50_spill] sm:$0xff] %v20088_v31  ;;  %16362 = vtanh.f32 %v5825_v47  ;;  %v24110_v30 = vld [vmem:[#allocation56_spill] sm:$0xff]  ;;  %v15103_v28 = vpack.c.bf16 %v20083_v38, %v20088_v31  ;;  %7917 = vmatprep.mubr.f32.mxu0 %v23869_v40  ;;  %v24112_v47 = vld [vmem:[#allocation57_spill] sm:$0xff]  ;;  %v20114_v7 = vadd.f32 0.5, %v6863_v51 }
 0x352   : > { %24109 = vst [vmem:[#allocation62_spill] sm:$0xff] %v20091_v25  ;;  %v6904_v59 = vmul.f32 0.5, %v16345_v34  ;;  %v16347_v60 = vpop.eup %16346  ;;  %v20102_v10 = vadd.f32 %v7022_v20, %v24110_v30  ;;  %16364 = vtanh.f32 %v5914_v13  ;;  %v20112_v34 = vadd.f32 %v7024_v33, %v24112_v47  ;;  %14504 = vmatmul.mubr.msk.f32.gmra.mrb[6].mxu1 %vm2560_vm1, %v19726_v43  ;;  %v24116_v13 = vld [vmem:[#allocation53_spill] sm:$0xff] }
 0x353   : > { %v20120_v20 = vadd.f32 %v19991_v39, %v24114_v50  ;;  %v20124_v44 = vadd.f32 %v20008_v57, %v24116_v13  ;;  %v16349_v38 = vpop.eup %16348  ;;  %v20128_v31 = vadd.f32 0.5, %v6865_v19  ;;  %v7062_v33 = vadd.f32 0.5, %v6902_v26  ;;  %15104 = vmatprep.subr.bf16.mxu0 %v15103_v28  ;;  %8006 = vmatprep.mubr.f32.mxu1 %v23869_v40 }
 0x354   : > { %v20097_v58 = vpop.f32.mrb[208].mxu0  ;;  %24111 = vst [vmem:[#allocation56_spill] sm:$0xff] %v20102_v10  ;;  %24113 = vst [vmem:[#allocation57_spill] sm:$0xff] %v20112_v34  ;;  %v5829_v51 = vadd.f32 %v19976_v46, %v19499_v53  ;;  %v5918_v47 = vadd.f32 %v19984_v42, %v19499_v53  ;;  %v7064_v50 = vadd.f32 0.5, %v6904_v59  ;;  %v6903_v55 = vmul.f32 0.5, %v16347_v60 }
 0x355   : > { %v20107_v52 = vpop.f32.mrb[208].mxu1  ;;  %v20109_v15 = vpop.f32.mrb[209].mxu0  ;;  %24115 = vst [vmem:[#allocation52_spill] sm:$0xff] %v20120_v20  ;;  %24117 = vst [vmem:[#allocation53_spill] sm:$0xff] %v20124_v44  ;;  %v15111_v57 = vpack.c.bf16 %v20124_v44, %v20120_v20  ;;  %v15105_v19 = vpack.c.bf16 %v19997_v29, %v19974_v6  ;;  %v15113_v46 = vpack.c.bf16 %v20006_v32, %v19989_v9  ;;  %v6905_v20 = vmul.f32 0.5, %v16349_v38  ;;  %v24118_v6 = vld [vmem:[#allocation63_spill] sm:$0xff] }
 0x356   : > { %v20126_v30 = vpop.f32.mrb[209].mxu1  ;;  %v16351_v39 = vpop.eup %16350  ;;  %16366 = vtanh.f32 %v5829_v51  ;;  %v5831_v42 = vadd.f32 %v19986_v5, %v19499_v53  ;;  %v5920_v29 = vadd.f32 %v19994_v17, %v19499_v53  ;;  %v5835_v51 = vadd.f32 %v20019_v4, %v19503_v22 }
 0x357   : > { %v16353_v26 = vpop.eup %16352  ;;  %v6942_v28 = vmul.f32 0.5, %v16351_v39  ;;  %15112 = vmatprep.subr.bf16.mxu1 %v15111_v57  ;;  %16368 = vtanh.f32 %v5918_v47  ;;  %15106 = vmatpush1.bf16.msra.mxu0 %v15105_v19  ;;  %v5924_v9 = vadd.f32 %v20023_v21, %v19503_v22  ;;  %v5837_v17 = vadd.f32 %v20025_v24, %v19503_v22 }
 0x358   : > { %v20139_v13 = vpop.f32.mrb[210].mxu0  ;;  %v16355_v60 = vpop.eup %16354  ;;  %v6944_v44 = vmul.f32 0.5, %v16353_v26  ;;  %15114 = vmatpush1.bf16.msra.mxu1 %v15113_v46  ;;  %16370 = vtanh.f32 %v5831_v42  ;;  %v20162_v23 = vadd.f32 %v7062_v33, %v24118_v6  ;;  %v24120_v46 = vld [vmem:[#allocation64_spill] sm:$0xff]  ;;  %v20171_v42 = vadd.f32 0.5, %v6903_v55 }
 0x359   : > { %v20145_v63 = vpop.f32.mrb[210].mxu1  ;;  %v20147_v59 = vpop.f32.mrb[211].mxu0  ;;  %v7102_v5 = vadd.f32 0.5, %v6942_v28  ;;  %v6943_v47 = vmul.f32 0.5, %v16355_v60  ;;  %16372 = vtanh.f32 %v5920_v29  ;;  %v20169_v29 = vadd.f32 %v7064_v50, %v24120_v46  ;;  %v24122_v60 = vld [vmem:[#allocation65_spill] sm:$0xff]  ;;  %v24128_v46 = vld [vmem:[#allocation59_spill] sm:$0xff] }
 0x35a   : > { %v20153_v39 = vpop.f32.mrb[211].mxu1  ;;  %v16357_v32 = vpop.eup %16356  ;;  %v7104_v57 = vadd.f32 0.5, %v6944_v44  ;;  %24119 = vst [vmem:[#allocation63_spill] sm:$0xff] %v20162_v23  ;;  %14505 = vmatmul.mubr.msk.f32.vlgmr.msra.gmra.mrb[8].mxu0 %vm2560_vm1, %v19639_v48  ;;  %16374 = vtanh.f32 %v5835_v51  ;;  %v20178_v33 = vadd.f32 0.5, %v6905_v20  ;;  %v5926_v55 = vadd.f32 %v20040_v41, %v19503_v22 }
 0x35b   : > { %v16359_v26 = vpop.eup %16358  ;;  %v6945_v38 = vmul.f32 0.5, %v16357_v32  ;;  %24121 = vst [vmem:[#allocation64_spill] sm:$0xff] %v20169_v29  ;;  %14509 = vmatmul.mubr.msk.f32.vlgmr.msra.gmra.mrb[8].mxu1 %vm2560_vm1, %v19639_v48  ;;  %16376 = vtanh.f32 %v5924_v9  ;;  %7923 = vmatprep.mubr.f32.mxu0 %v23869_v40  ;;  %v20181_v51 = vadd.f32 %v7102_v5, %v24122_v60  ;;  %v24124_v48 = vld [vmem:[#allocation66_spill] sm:$0xff]  ;;  %v20199_v5 = vadd.f32 %v20114_v7, %v24128_v46  ;;  %v24130_v7 = vld [vmem:[#allocation60_spill] sm:$0xff] }
 0x35c   : > { %v20159_v19 = vpop.f32.mrb[212].mxu0  ;;  %v16361_v4 = vpop.eup %16360  ;;  %v6826_v28 = vmul.f32 0.5, %v16359_v26  ;;  %16378 = vtanh.f32 %v5837_v17  ;;  %8012 = vmatprep.mubr.f32.mxu1 %v23869_v40  ;;  %v20189_v9 = vadd.f32 %v7104_v57, %v24124_v48  ;;  %v20191_v26 = vadd.f32 0.5, %v6943_v47 }
 0x35d   : > { %v20166_v21 = vpop.f32.mrb[213].mxu0  ;;  %v16363_v44 = vpop.eup %16362  ;;  %v6828_v24 = vmul.f32 0.5, %v16361_v4  ;;  %24123 = vst [vmem:[#allocation65_spill] sm:$0xff] %v20181_v51  ;;  %v24126_v4 = vld [vmem:[#allocation58_spill] sm:$0xff]  ;;  %24129 = vst [vmem:[#allocation59_spill] sm:$0xff] %v20199_v5  ;;  %v20203_v41 = vadd.f32 0.5, %v6945_v38  ;;  %v20215_v48 = vadd.f32 %v20099_v12, %v24130_v7  ;;  %16380 = vtanh.f32 %v5926_v55 }
 0x35e   : > { %v20176_v6 = vpop.f32.mrb[212].mxu1  ;;  %v16365_v32 = vpop.eup %16364  ;;  %24125 = vst [vmem:[#allocation66_spill] sm:$0xff] %v20189_v9  ;;  %v20195_v20 = vadd.f32 %v20093_v56, %v24126_v4  ;;  %v6986_v60 = vadd.f32 0.5, %v6826_v28  ;;  %v6827_v27 = vmul.f32 0.5, %v16363_v44  ;;  %14506 = vmatmul.mubr.msk.f32.gmra.mrb[10].mxu0 %vm2560_vm1, %v19664_v61  ;;  %v24132_v38 = vld [vmem:[#allocation61_spill] sm:$0xff]  ;;  %v15117_v12 = vpack.c.bf16 %v20102_v10, %v20068_v35 }
 0x35f   : > { %v20186_v50 = vpop.f32.mrb[213].mxu1  ;;  %v6988_v2 = vadd.f32 0.5, %v6828_v24  ;;  %v6829_v47 = vmul.f32 0.5, %v16365_v32  ;;  %14510 = vmatmul.mubr.msk.f32.gmra.mrb[10].mxu1 %vm2560_vm1, %v19664_v61  ;;  %24131 = vst [vmem:[#allocation60_spill] sm:$0xff] %v20215_v48  ;;  %v20219_v28 = vadd.f32 %v20128_v31, %v24132_v38  ;;  %7929 = vmatprep.mubr.f32.mxu0 %v23869_v40  ;;  %v5841_v61 = vadd.f32 %v20057_v11, %v19511_v54 }
 0x360   : > { %24127 = vst [vmem:[#allocation58_spill] sm:$0xff] %v20195_v20  ;;  %v20201_v17 = vpop.f32.mrb[214].mxu0  ;;  %v15115_v56 = vpack.c.bf16 %v20199_v5, %v20195_v20  ;;  %v16367_v24 = vpop.eup %16366  ;;  %v5930_v32 = vadd.f32 %v20063_v36, %v19511_v54  ;;  %8018 = vmatprep.mubr.f32.mxu1 %v23869_v40  ;;  %v5843_v55 = vadd.f32 %v20065_v14, %v19511_v54 }
 0x361   : > { %v20207_v57 = vpop.f32.mrb[215].mxu0  ;;  %24133 = vst [vmem:[#allocation61_spill] sm:$0xff] %v20219_v28  ;;  %v16369_v31 = vpop.eup %16368  ;;  %v6866_v46 = vmul.f32 0.5, %v16367_v24  ;;  %v15123_v7 = vpack.c.bf16 %v20219_v28, %v20215_v48  ;;  %v5932_v11 = vadd.f32 %v20074_v1, %v19511_v54  ;;  %16382 = vtanh.f32 %v5841_v61  ;;  %v24134_v61 = vld [vmem:[#allocation71_spill] sm:$0xff] }
 0x362   : > { %v20222_v44 = vpop.f32.mrb[214].mxu1  ;;  %15116 = vmatprep.subr.bf16.mxu0 %v15115_v56  ;;  %v16371_v36 = vpop.eup %16370  ;;  %v6868_v38 = vmul.f32 0.5, %v16369_v31  ;;  %v15125_v5 = vpack.c.bf16 %v20112_v34, %v20091_v25  ;;  %v6001_v24 = vadd.f32 %v20097_v58, %v19495_v16  ;;  %16384 = vtanh.f32 %v5930_v32  ;;  %14507 = vmatmul.mubr.msk.f32.gmra.mrb[12].mxu0 %vm2560_vm1, %v19701_v62 }
 0x363   : > { %v20231_v4 = vpop.f32.mrb[215].mxu1  ;;  %15118 = vmatpush1.bf16.msra.mxu0 %v15117_v12  ;;  %v16373_v56 = vpop.eup %16372  ;;  %v7026_v10 = vadd.f32 0.5, %v6866_v46  ;;  %v6867_v20 = vmul.f32 0.5, %v16371_v36  ;;  %15124 = vmatprep.subr.bf16.mxu1 %v15123_v7  ;;  %v6090_v14 = vadd.f32 %v20107_v52, %v19495_v16  ;;  %v20248_v12 = vadd.f32 %v6986_v60, %v24134_v61  ;;  %v24142_v61 = vld [vmem:[#allocation67_spill] sm:$0xff] }
 0x364   : > { %v16375_v1 = vpop.eup %16374  ;;  %v7028_v31 = vadd.f32 0.5, %v6868_v38  ;;  %v6869_v28 = vmul.f32 0.5, %v16373_v56  ;;  %15126 = vmatpush1.bf16.msra.mxu1 %v15125_v5  ;;  %16386 = vtanh.f32 %v5843_v55  ;;  %7935 = vmatprep.mubr.f32.mxu0 %v23869_v40  ;;  %v20253_v32 = vadd.f32 0.5, %v6827_v27  ;;  %v24136_v5 = vld [vmem:[#allocation78_spill] sm:$0xff]  ;;  %v24138_v27 = vld [vmem:[#allocation72_spill] sm:$0xff] }
 0x365   : > { %24135 = vst [vmem:[#allocation71_spill] sm:$0xff] %v20248_v12  ;;  %v16377_v46 = vpop.eup %16376  ;;  %v6906_v7 = vmul.f32 0.5, %v16375_v1  ;;  %16388 = vtanh.f32 %v5932_v11  ;;  %14511 = vmatmul.mubr.msk.f32.gmra.mrb[12].mxu1 %vm2560_vm1, %v19701_v62  ;;  %v6003_v52 = vadd.f32 %v20109_v15, %v19495_v16  ;;  %v20262_v55 = vadd.f32 %v6988_v2, %v24136_v5  ;;  %v24140_v15 = vld [vmem:[#allocation73_spill] sm:$0xff] }
 0x366   : > { %v16379_v36 = vpop.eup %16378  ;;  %v20264_v38 = vadd.f32 0.5, %v6829_v47  ;;  %v6908_v56 = vmul.f32 0.5, %v16377_v46  ;;  %16390 = vtanh.f32 %v6001_v24  ;;  %8024 = vmatprep.mubr.f32.mxu1 %v23869_v40  ;;  %v20268_v11 = vadd.f32 %v7026_v10, %v24138_v27  ;;  %14508 = vmatmul.mubr.msk.f32.gmra.mrb[14].mxu0 %vm2560_vm1, %v19726_v43  ;;  %v24144_v46 = vld [vmem:[#allocation68_spill] sm:$0xff] }
 0x367   : > { %v20251_v58 = vpop.f32.mrb[216].mxu0  ;;  %24137 = vst [vmem:[#allocation78_spill] sm:$0xff] %v20262_v55  ;;  %v7027_v1 = vadd.f32 0.5, %v6867_v20  ;;  %16392 = vtanh.f32 %v6090_v14  ;;  %v6092_v62 = vadd.f32 %v20126_v30, %v19495_v16  ;;  %v20275_v2 = vadd.f32 %v7028_v31, %v24140_v15  ;;  %8095 = vmatprep.mubr.f32.mxu0 %v23869_v40  ;;  %v16381_v27 = vpop.eup %16380  ;;  %v24146_v15 = vld [vmem:[#allocation69_spill] sm:$0xff] }
 0x368   : > { %v20259_v60 = vpop.f32.mrb[217].mxu0  ;;  %24139 = vst [vmem:[#allocation72_spill] sm:$0xff] %v20268_v11  ;;  %v20277_v47 = vadd.f32 0.5, %v6869_v28  ;;  %v20281_v24 = vadd.f32 %v20171_v42, %v24142_v61  ;;  %v20285_v10 = vadd.f32 %v20191_v26, %v24144_v46  ;;  %v7066_v14 = vadd.f32 0.5, %v6906_v7  ;;  %v24148_v46 = vld [vmem:[#allocation70_spill] sm:$0xff] }
 0x369   : > { %24141 = vst [vmem:[#allocation73_spill] sm:$0xff] %v20275_v2  ;;  %v7068_v5 = vadd.f32 0.5, %v6908_v56  ;;  %v6907_v31 = vmul.f32 0.5, %v16379_v36  ;;  %16394 = vtanh.f32 %v6003_v52  ;;  %14512 = vmatmul.mubr.msk.f32.gmra.mrb[14].mxu1 %vm2560_vm1, %v19726_v43  ;;  %v20302_v61 = vadd.f32 %v20178_v33, %v24146_v15 }
 0x36a   : > { %24143 = vst [vmem:[#allocation67_spill] sm:$0xff] %v20281_v24  ;;  %24145 = vst [vmem:[#allocation68_spill] sm:$0xff] %v20285_v10  ;;  %v15119_v26 = vpack.c.bf16 %v20285_v10, %v20281_v24  ;;  %v20306_v7 = vadd.f32 %v20203_v41, %v24148_v46  ;;  %v6007_v52 = vadd.f32 %v20139_v13, %v19499_v53  ;;  %8184 = vmatprep.mubr.f32.mxu1 %v23869_v40 }
 0x36b   : > { %v20288_v20 = vpop.f32.mrb[216].mxu1  ;;  %v20290_v30 = vpop.f32.mrb[218].mxu0  ;;  %24147 = vst [vmem:[#allocation69_spill] sm:$0xff] %v20302_v61  ;;  %16396 = vtanh.f32 %v6092_v62  ;;  %v6096_v43 = vadd.f32 %v20145_v63, %v19499_v53  ;;  %v15121_v36 = vpack.c.bf16 %v20181_v51, %v20162_v23  ;;  %v15129_v33 = vpack.c.bf16 %v20189_v9, %v20169_v29  ;;  %v20343_v23 = vld [vmem:[%s23528_s2 + $0x40] sm:$0xff] }
 0x36c   : > { %v20294_v28 = vpop.f32.mrb[217].mxu1  ;;  %v20296_v42 = vpop.f32.mrb[219].mxu0  ;;  %24149 = vst [vmem:[#allocation70_spill] sm:$0xff] %v20306_v7  ;;  %15120 = vmatprep.subr.bf16.mxu0 %v15119_v26  ;;  %v15127_v41 = vpack.c.bf16 %v20306_v7, %v20302_v61  ;;  %16398 = vtanh.f32 %v6007_v52  ;;  %v6009_v13 = vadd.f32 %v20147_v59, %v19499_v53  ;;  %v6098_v62 = vadd.f32 %v20153_v39, %v19499_v53  ;;  %v24150_v39 = vld [vmem:[#allocation79_spill] sm:$0xff] }
 0x36d   : > { %v16383_v56 = vpop.eup %16382  ;;  %16400 = vtanh.f32 %v6096_v43  ;;  %15122 = vmatpush1.bf16.msra.mxu0 %v15121_v36  ;;  %v6013_v26 = vadd.f32 %v20159_v19, %v19503_v22  ;;  %v6102_v52 = vadd.f32 %v20176_v6, %v19503_v22  ;;  %v20336_v51 = vadd.f32 %v7066_v14, %v24150_v39  ;;  %v24152_v14 = vld [vmem:[#allocation75_spill] sm:$0xff] }
 0x36e   : > { %v16385_v46 = vpop.eup %16384  ;;  %v6946_v10 = vmul.f32 0.5, %v16383_v56  ;;  %15128 = vmatprep.subr.bf16.mxu1 %v15127_v41  ;;  %16402 = vtanh.f32 %v6009_v13  ;;  %v6015_v43 = vadd.f32 %v20166_v21, %v19503_v22  ;;  %v6909_v56 = vmul.f32 0.5, %v16381_v27  ;;  %v24154_v13 = vld [vmem:[#allocation74_spill] sm:$0xff] }
 0x36f   : > { %v20323_v15 = vpop.f32.mrb[218].mxu1  ;;  %v20325_v63 = vpop.f32.mrb[220].mxu0  ;;  %24151 = vst [vmem:[#allocation79_spill] sm:$0xff] %v20336_v51  ;;  %v6948_v61 = vmul.f32 0.5, %v16385_v46  ;;  %15130 = vmatpush1.bf16.msra.mxu1 %v15129_v33  ;;  %16404 = vtanh.f32 %v6098_v62  ;;  %v6104_v21 = vadd.f32 %v20186_v50, %v19503_v22  ;;  %v20350_v27 = vadd.f32 %v7027_v1, %v24152_v14  ;;  %v24156_v1 = vld [vmem:[#allocation86_spill] sm:$0xff] }
 0x370   : > { %v20331_v7 = vpop.f32.mrb[219].mxu1  ;;  %v20333_v59 = vpop.f32.mrb[221].mxu0  ;;  %v7106_v19 = vadd.f32 0.5, %v6946_v10  ;;  %14513 = vmatmul.mubr.msk.f32.vlgmr.msra.gmra.mrb[16].mxu0 %vm2560_vm1, %v20343_v23  ;;  %16406 = vtanh.f32 %v6013_v26  ;;  %v20359_v62 = vadd.f32 %v20253_v32, %v24154_v13  ;;  %v20366_v26 = vadd.f32 %v7068_v5, %v24156_v1 }
 0x371   : > { %v16387_v9 = vpop.eup %16386  ;;  %v7108_v29 = vadd.f32 0.5, %v6948_v61  ;;  %24153 = vst [vmem:[#allocation75_spill] sm:$0xff] %v20350_v27  ;;  %16408 = vtanh.f32 %v6102_v52  ;;  %8101 = vmatprep.mubr.f32.mxu0 %v23869_v40  ;;  %v20368_v39 = vadd.f32 0.5, %v6907_v31  ;;  %v24160_v31 = vld [vmem:[#allocation81_spill] sm:$0xff]  ;;  %v15141_v34 = vpack.c.bf16 %v20275_v2, %v20262_v55 }
 0x372   : > { %v16389_v36 = vpop.eup %16388  ;;  %v6947_v24 = vmul.f32 0.5, %v16387_v9  ;;  %24155 = vst [vmem:[#allocation74_spill] sm:$0xff] %v20359_v62  ;;  %24157 = vst [vmem:[#allocation86_spill] sm:$0xff] %v20366_v26  ;;  %14517 = vmatmul.mubr.msk.f32.vlgmr.msra.gmra.mrb[16].mxu1 %vm2560_vm1, %v20343_v23  ;;  %16410 = vtanh.f32 %v6015_v43  ;;  %v15131_v5 = vpack.c.bf16 %v20350_v27, %v20359_v62  ;;  %v20388_v43 = vld [vmem:[%s23528_s2 + $0x48] sm:$0xff]  ;;  %v6019_v27 = vadd.f32 %v20201_v17, %v19511_v54 }
 0x373   : > { %v16391_v6 = vpop.eup %16390  ;;  %v20352_v9 = vpop.f32.mrb[220].mxu1  ;;  %v6949_v33 = vmul.f32 0.5, %v16389_v36  ;;  %v20372_v36 = vadd.f32 0.5, %v6909_v56  ;;  %8190 = vmatprep.mubr.f32.mxu1 %v23869_v40  ;;  %v20383_v1 = vadd.f32 %v7108_v29, %v24160_v31  ;;  %16412 = vtanh.f32 %v6104_v21  ;;  %v24162_v56 = vld [vmem:[#allocation76_spill] sm:$0xff] }
 0x374   : > { %v20354_v10 = vpop.f32.mrb[222].mxu0  ;;  %v16393_v61 = vpop.eup %16392  ;;  %v6830_v41 = vmul.f32 0.5, %v16391_v6  ;;  %v24158_v6 = vld [vmem:[#allocation80_spill] sm:$0xff]  ;;  %v20377_v13 = vadd.f32 0.5, %v6947_v24  ;;  %14514 = vmatmul.mubr.msk.f32.gmra.mrb[18].mxu0 %vm2560_vm1, %v20388_v43  ;;  %v20394_v24 = vadd.f32 %v20264_v38, %v24162_v56  ;;  %15132 = vmatprep.subr.bf16.mxu0 %v15131_v5  ;;  %v6108_v62 = vadd.f32 %v20222_v44, %v19511_v54 }
 0x375   : > { %v20361_v46 = vpop.f32.mrb[221].mxu1  ;;  %v20363_v50 = vpop.f32.mrb[223].mxu0  ;;  %v6832_v14 = vmul.f32 0.5, %v16393_v61  ;;  %v20375_v32 = vadd.f32 %v7106_v19, %v24158_v6  ;;  %24161 = vst [vmem:[#allocation81_spill] sm:$0xff] %v20383_v1  ;;  %v24164_v19 = vld [vmem:[#allocation77_spill] sm:$0xff]  ;;  %v20402_v21 = vadd.f32 0.5, %v6949_v33  ;;  %8107 = vmatprep.mubr.f32.mxu0 %v23869_v40  ;;  %16414 = vtanh.f32 %v6019_v27 }
 0x376   : > { %v16395_v52 = vpop.eup %16394  ;;  %24163 = vst [vmem:[#allocation76_spill] sm:$0xff] %v20394_v24  ;;  %v20398_v61 = vadd.f32 %v20277_v47, %v24164_v19  ;;  %v6990_v31 = vadd.f32 0.5, %v6830_v41  ;;  %14518 = vmatmul.mubr.msk.f32.gmra.mrb[18].mxu1 %vm2560_vm1, %v20388_v43  ;;  %v15133_v41 = vpack.c.bf16 %v20268_v11, %v20248_v12  ;;  %16416 = vtanh.f32 %v6108_v62 }
 0x377   : > { %24159 = vst [vmem:[#allocation80_spill] sm:$0xff] %v20375_v32  ;;  %v20400_v6 = vpop.f32.mrb[222].mxu1  ;;  %v16397_v29 = vpop.eup %16396  ;;  %v6992_v47 = vadd.f32 0.5, %v6832_v14  ;;  %v6831_v19 = vmul.f32 0.5, %v16395_v52  ;;  %v6021_v14 = vadd.f32 %v20207_v57, %v19511_v54  ;;  %8196 = vmatprep.mubr.f32.mxu1 %v23869_v40  ;;  %v6110_v11 = vadd.f32 %v20231_v4, %v19511_v54 }
 0x378   : > { %24165 = vst [vmem:[#allocation77_spill] sm:$0xff] %v20398_v61  ;;  %v20409_v38 = vpop.f32.mrb[223].mxu1  ;;  %v16399_v56 = vpop.eup %16398  ;;  %v15139_v33 = vpack.c.bf16 %v20398_v61, %v20394_v24  ;;  %15134 = vmatpush1.bf16.msra.mxu0 %v15133_v41  ;;  %v6179_v27 = vadd.f32 %v20251_v58, %v19495_v16  ;;  %v6833_v24 = vmul.f32 0.5, %v16397_v29  ;;  %v6268_v4 = vadd.f32 %v20288_v20, %v19495_v16 }
 0x379   : > { %v20417_v17 = vpop.f32.mrb[224].mxu0  ;;  %v16401_v5 = vpop.eup %16400  ;;  %v6870_v44 = vmul.f32 0.5, %v16399_v56  ;;  %16418 = vtanh.f32 %v6021_v14  ;;  %v24166_v14 = vld [vmem:[#allocation87_spill] sm:$0xff] }
 0x37a   : > { %v20424_v52 = vpop.f32.mrb[225].mxu0  ;;  %v16403_v48 = vpop.eup %16402  ;;  %v6872_v61 = vmul.f32 0.5, %v16401_v5  ;;  %15140 = vmatprep.subr.bf16.mxu1 %v15139_v33  ;;  %v20435_v5 = vld [vmem:[%s23528_s2 + $0x50] sm:$0xff]  ;;  %16420 = vtanh.f32 %v6110_v11  ;;  %v20451_v55 = vadd.f32 %v6990_v31, %v24166_v14  ;;  %v20463_v49 = vadd.f32 0.5, %v6833_v24  ;;  %v24170_v31 = vld [vmem:[#allocation89_spill] sm:$0xff]  ;;  %v24172_v24 = vld [vmem:[#allocation90_spill] sm:$0xff] }
 0x37b   : > { %v20430_v56 = vpop.f32.mrb[224].mxu1  ;;  %v16405_v2 = vpop.eup %16404  ;;  %v7030_v57 = vadd.f32 0.5, %v6870_v44  ;;  %15142 = vmatpush1.bf16.msra.mxu1 %v15141_v34  ;;  %14515 = vmatmul.mubr.msk.f32.gmra.mrb[20].mxu0 %vm2560_vm1, %v20435_v5  ;;  %v6871_v41 = vmul.f32 0.5, %v16403_v48  ;;  %v6181_v34 = vadd.f32 %v20259_v60, %v19495_v16  ;;  %16422 = vtanh.f32 %v6179_v27 }
 0x37c   : > { %v20441_v62 = vpop.f32.mrb[225].mxu1  ;;  %v16407_v58 = vpop.eup %16406  ;;  %v7032_v33 = vadd.f32 0.5, %v6872_v61  ;;  %14519 = vmatmul.mubr.msk.f32.gmra.mrb[20].mxu1 %vm2560_vm1, %v20435_v5  ;;  %8113 = vmatprep.mubr.f32.mxu0 %v23869_v40  ;;  %24167 = vst [vmem:[#allocation87_spill] sm:$0xff] %v20451_v55  ;;  %v6873_v20 = vmul.f32 0.5, %v16405_v2  ;;  %v24168_v61 = vld [vmem:[#allocation88_spill] sm:$0xff]  ;;  %v20459_v60 = vadd.f32 0.5, %v6831_v19  ;;  %16424 = vtanh.f32 %v6268_v4 }
 0x37d   : > { %v20448_v29 = vpop.f32.mrb[226].mxu0  ;;  %v16409_v44 = vpop.eup %16408  ;;  %v6910_v12 = vmul.f32 0.5, %v16407_v58  ;;  %8202 = vmatprep.mubr.f32.mxu1 %v23869_v40  ;;  %v20457_v25 = vadd.f32 %v6992_v47, %v24168_v61  ;;  %v20466_v2 = vadd.f32 %v7030_v57, %v24170_v31  ;;  %16426 = vtanh.f32 %v6181_v34  ;;  %v20473_v47 = vld [vmem:[%s23528_s2 + $0x58] sm:$0xff] }
 0x37e   : > { %v20454_v48 = vpop.f32.mrb[227].mxu0  ;;  %v16411_v11 = vpop.eup %16410  ;;  %v6912_v35 = vmul.f32 0.5, %v16409_v44  ;;  %v6270_v27 = vadd.f32 %v20294_v28, %v19495_v16  ;;  %v20480_v58 = vadd.f32 %v7032_v33, %v24172_v24  ;;  %v20482_v57 = vadd.f32 0.5, %v6871_v41  ;;  %v24174_v28 = vld [vmem:[#allocation82_spill] sm:$0xff]  ;;  %v24176_v44 = vld [vmem:[#allocation83_spill] sm:$0xff] }
 0x37f   : > { %24169 = vst [vmem:[#allocation88_spill] sm:$0xff] %v20457_v25  ;;  %v20461_v45 = vpop.f32.mrb[226].mxu1  ;;  %24171 = vst [vmem:[#allocation89_spill] sm:$0xff] %v20466_v2  ;;  %14516 = vmatmul.mubr.msk.f32.gmra.mrb[22].mxu0 %vm2560_vm1, %v20473_v47  ;;  %v16413_v4 = vpop.eup %16412  ;;  %v20488_v34 = vadd.f32 %v20368_v39, %v24174_v28  ;;  %v20492_v14 = vadd.f32 %v20377_v13, %v24176_v44  ;;  %v20497_v31 = vadd.f32 0.5, %v6873_v20  ;;  %v7070_v33 = vadd.f32 0.5, %v6910_v12  ;;  %v24178_v28 = vld [vmem:[#allocation84_spill] sm:$0xff] }
 0x380   : > { %v20477_v19 = vpop.f32.mrb[227].mxu1  ;;  %24173 = vst [vmem:[#allocation90_spill] sm:$0xff] %v20480_v58  ;;  %14520 = vmatmul.mubr.msk.f32.gmra.mrb[22].mxu1 %vm2560_vm1, %v20473_v47  ;;  %8273 = vmatprep.mubr.f32.mxu0 %v23869_v40  ;;  %v6911_v41 = vmul.f32 0.5, %v16411_v11  ;;  %16428 = vtanh.f32 %v6270_v27  ;;  %v7072_v3 = vadd.f32 0.5, %v6912_v35  ;;  %v20506_v13 = vadd.f32 %v20372_v36, %v24178_v28  ;;  %v24180_v44 = vld [vmem:[#allocation85_spill] sm:$0xff]  ;;  %v16415_v12 = vpop.eup %16414 }
 0x381   : > { %24175 = vst [vmem:[#allocation82_spill] sm:$0xff] %v20488_v34  ;;  %24177 = vst [vmem:[#allocation83_spill] sm:$0xff] %v20492_v14  ;;  %v20495_v61 = vpop.f32.mrb[228].mxu0  ;;  %8362 = vmatprep.mubr.f32.mxu1 %v23869_v40  ;;  %v15135_v39 = vpack.c.bf16 %v20492_v14, %v20488_v34  ;;  %v20510_v0 = vadd.f32 %v20402_v21, %v24180_v44  ;;  %v6913_v11 = vmul.f32 0.5, %v16413_v4  ;;  %v16417_v36 = vpop.eup %16416  ;;  %v6950_v28 = vmul.f32 0.5, %v16415_v12 }
 0x382   : > { %v20500_v24 = vpop.f32.mrb[229].mxu0  ;;  %24179 = vst [vmem:[#allocation84_spill] sm:$0xff] %v20506_v13  ;;  %v6185_v27 = vadd.f32 %v20290_v30, %v19499_v53  ;;  %v6274_v35 = vadd.f32 %v20323_v15, %v19499_v53  ;;  %v15137_v14 = vpack.c.bf16 %v20375_v32, %v20336_v51  ;;  %v6187_v4 = vadd.f32 %v20296_v42, %v19499_v53 }
 0x383   : > { %24181 = vst [vmem:[#allocation85_spill] sm:$0xff] %v20510_v0  ;;  %v20512_v20 = vpop.f32.mrb[228].mxu1  ;;  %15136 = vmatprep.subr.bf16.mxu0 %v15135_v39  ;;  %v15143_v21 = vpack.c.bf16 %v20510_v0, %v20506_v13  ;;  %v6276_v30 = vadd.f32 %v20331_v7, %v19499_v53  ;;  %v16419_v15 = vpop.eup %16418  ;;  %v6952_v18 = vmul.f32 0.5, %v16417_v36  ;;  %v15145_v32 = vpack.c.bf16 %v20383_v1, %v20366_v26  ;;  %v24183_v13 = vld [vmem:[#allocation95_spill] sm:$0xff] }
 0x384   : > { %v20520_v34 = vpop.f32.mrb[229].mxu1  ;;  %16430 = vtanh.f32 %v6185_v27  ;;  %15138 = vmatpush1.bf16.msra.mxu0 %v15137_v14  ;;  %v6191_v39 = vadd.f32 %v20325_v63, %v19503_v22  ;;  %v16421_v0 = vpop.eup %16420  ;;  %v20537_v42 = vadd.f32 %v7070_v33, %v24183_v13  ;;  %v7110_v51 = vadd.f32 0.5, %v6950_v28  ;;  %v24185_v28 = vld [vmem:[#allocation102_spill] sm:$0xff] }
 0x385   : > { %v20528_v44 = vpop.f32.mrb[230].mxu0  ;;  %15144 = vmatprep.subr.bf16.mxu1 %v15143_v21  ;;  %16432 = vtanh.f32 %v6274_v35  ;;  %v6280_v7 = vadd.f32 %v20352_v9, %v19503_v22  ;;  %v16423_v14 = vpop.eup %16422  ;;  %v20543_v36 = vadd.f32 0.5, %v6911_v41  ;;  %v7112_v1 = vadd.f32 0.5, %v6952_v18 }
 0x386   : > { %v20534_v12 = vpop.f32.mrb[231].mxu0  ;;  %24184 = vst [vmem:[#allocation95_spill] sm:$0xff] %v20537_v42  ;;  %v6951_v26 = vmul.f32 0.5, %v16419_v15  ;;  %15146 = vmatpush1.bf16.msra.mxu1 %v15145_v32  ;;  %16434 = vtanh.f32 %v6187_v4  ;;  %v6953_v33 = vmul.f32 0.5, %v16421_v0  ;;  %v6834_v13 = vmul.f32 0.5, %v16423_v14  ;;  %v24188_v4 = vld [vmem:[#allocation96_spill] sm:$0xff] }
 0x387   : > { %24182 = vst [vmem:[#allocation160_spill] sm:$0xff] %v20534_v12  ;;  %v20541_v27 = vpop.f32.mrb[230].mxu1  ;;  %v16425_v12 = vpop.eup %16424  ;;  %16436 = vtanh.f32 %v6276_v30  ;;  %14521 = vmatmul.mubr.msk.f32.vlgmr.msra.gmra.mrb[24].mxu0 %vm2560_vm1, %v20343_v23  ;;  %v6193_v9 = vadd.f32 %v20333_v59, %v19503_v22  ;;  %v20554_v18 = vadd.f32 %v7072_v3, %v24185_v28  ;;  %v20556_v32 = vadd.f32 0.5, %v6913_v11  ;;  %v24190_v15 = vld [vmem:[#allocation97_spill] sm:$0xff] }
 0x388   : > { %v20545_v63 = vpop.f32.mrb[231].mxu1  ;;  %v16427_v41 = vpop.eup %16426  ;;  %v6836_v21 = vmul.f32 0.5, %v16425_v12  ;;  %16438 = vtanh.f32 %v6191_v39  ;;  %8279 = vmatprep.mubr.f32.mxu0 %v23869_v40  ;;  %v20562_v30 = vadd.f32 %v7110_v51, %v24188_v4  ;;  %v6282_v59 = vadd.f32 %v20361_v46, %v19503_v22  ;;  %v24192_v51 = vld [vmem:[#allocation91_spill] sm:$0xff] }
 0x389   : > { %v20551_v35 = vpop.f32.mrb[232].mxu0  ;;  %24186 = vst [vmem:[#allocation102_spill] sm:$0xff] %v20554_v18  ;;  %14525 = vmatmul.mubr.msk.f32.vlgmr.msra.gmra.mrb[24].mxu1 %vm2560_vm1, %v20343_v23  ;;  %16440 = vtanh.f32 %v6280_v7  ;;  %v20571_v12 = vadd.f32 %v7112_v1, %v24190_v15  ;;  %v20573_v39 = vadd.f32 0.5, %v6951_v26  ;;  %v17210_v14 = vmov 3   ;;  %v24194_v7 = vld [vmem:[#allocation92_spill] sm:$0xff]  ;;  %v20593_v26 = vld [vmem:[%s23529_s3] sm:$0xff] }
 0x38a   : > { %v20559_v0 = vpop.f32.mrb[233].mxu0  ;;  %24189 = vst [vmem:[#allocation96_spill] sm:$0xff] %v20562_v30  ;;  %v16429_v11 = vpop.eup %16428  ;;  %15553 = vset.pattern.permute.xlu0 %v17210_v14  ;;  %8368 = vmatprep.mubr.f32.mxu1 %v23869_v40  ;;  %v20578_v28 = vadd.f32 %v20459_v60, %v24192_v51  ;;  %v20582_v4 = vadd.f32 %v20482_v57, %v24194_v7  ;;  %v6994_v1 = vadd.f32 0.5, %v6834_v13  ;;  %v20588_v15 = vmul.f32 0.5, %v16427_v41  ;;  %v24197_v13 = vld [vmem:[#allocation93_spill] sm:$0xff]  ;;  %v24199_v41 = vld [vmem:[#allocation94_spill] sm:$0xff] }
 0x38b   : > { %24187 = vst [vmem:[#allocation161_spill] sm:$0xff] %v20559_v0  ;;  %v20568_v3 = vpop.f32.mrb[232].mxu1  ;;  %24191 = vst [vmem:[#allocation97_spill] sm:$0xff] %v20571_v12  ;;  %v20586_v0 = vadd.f32 0.5, %v6953_v33  ;;  %16442 = vtanh.f32 %v6193_v9  ;;  %15554 = vset.pattern.permute.xlu1 %v17210_v14  ;;  %7292 = vperm.xlu0 %15553, %v20593_v26   ;;  %v20598_v57 = vadd.f32 0.5, %v6836_v21  ;;  %v20606_v9 = vadd.f32 %v20463_v49, %v24197_v13  ;;  %v20621_v21 = vld [vmem:[%s23529_s3 + $0x8] sm:$0xff] }
 0x38c   : > { %24193 = vst [vmem:[#allocation91_spill] sm:$0xff] %v20578_v28  ;;  %24195 = vst [vmem:[#allocation92_spill] sm:$0xff] %v20582_v4  ;;  %v20584_v46 = vpop.f32.mrb[233].mxu1  ;;  %14522 = vmatmul.mubr.msk.f32.gmra.mrb[26].mxu0 %vm2560_vm1, %v20388_v43  ;;  %v15147_v33 = vpack.c.bf16 %v20582_v4, %v20578_v28  ;;  %v20610_v14 = vadd.f32 %v20497_v31, %v24199_v41  ;;  %v20614_v7 = vmul.f32 0.5, %v16429_v11  ;;  %7296 = vperm.xlu1 %15554, %v20621_v21  }
 0x38d   : > { %24196 = vst [vmem:[#allocation162_spill] sm:$0xff] %v20593_v26  ;;  %v20596_v60 = vpop.f32.mrb[234].mxu0  ;;  %24198 = vst [vmem:[#allocation93_spill] sm:$0xff] %v20606_v9  ;;  %14526 = vmatmul.mubr.msk.f32.gmra.mrb[26].mxu1 %vm2560_vm1, %v20388_v43  ;;  %v6197_v49 = vadd.f32 %v20354_v10, %v19511_v54  ;;  %v6286_v31 = vadd.f32 %v20400_v6, %v19511_v54  ;;  %v15149_v11 = vpack.c.bf16 %v20466_v2, %v20451_v55 }
 0x38e   : > { %24200 = vst [vmem:[#allocation94_spill] sm:$0xff] %v20610_v14  ;;  %v20612_v51 = vpop.f32.mrb[235].mxu0  ;;  %24201 = vst [vmem:[#allocation163_spill] sm:$0xff] %v20621_v21  ;;  %v16431_v41 = vpop.eup %16430  ;;  %16444 = vtanh.f32 %v6282_v59  ;;  %15148 = vmatprep.subr.bf16.mxu0 %v15147_v33  ;;  %v15155_v4 = vpack.c.bf16 %v20610_v14, %v20606_v9  ;;  %v6199_v28 = vadd.f32 %v20363_v50, %v19511_v54  ;;  %8285 = vmatprep.mubr.f32.mxu0 %v23869_v40 }
 0x38f   : > { %v20630_v13 = vpop.f32.mrb[234].mxu1  ;;  %v6288_v10 = vadd.f32 %v20409_v38, %v19511_v54  ;;  %v16433_v6 = vpop.eup %16432  ;;  %v6874_v26 = vmul.f32 0.5, %v16431_v41  ;;  %16446 = vtanh.f32 %v6197_v49  ;;  %15150 = vmatpush1.bf16.msra.mxu0 %v15149_v11  ;;  %v15157_v2 = vpack.c.bf16 %v20480_v58, %v20457_v25  ;;  %8374 = vmatprep.mubr.f32.mxu1 %v23869_v40 }
 0x390   : > { %v20638_v21 = vpop.f32.mrb[235].mxu1  ;;  %v6357_v59 = vadd.f32 %v20417_v17, %v19495_v16  ;;  %v16435_v50 = vpop.eup %16434  ;;  %v6876_v14 = vmul.f32 0.5, %v16433_v6  ;;  %15156 = vmatprep.subr.bf16.mxu1 %v15155_v4  ;;  %16448 = vtanh.f32 %v6286_v31  ;;  %v6446_v38 = vadd.f32 %v20430_v56, %v19495_v16  ;;  %14523 = vmatmul.mubr.msk.f32.gmra.mrb[28].mxu0 %vm2560_vm1, %v20435_v5 }
 0x391   : > { %v20645_v33 = vpop.f32.mrb[236].mxu0  ;;  %v6359_v49 = vadd.f32 %v20424_v52, %v19495_v16  ;;  %v16437_v41 = vpop.eup %16436  ;;  %v7034_v58 = vadd.f32 0.5, %v6874_v26  ;;  %v6875_v9 = vmul.f32 0.5, %v16435_v50  ;;  %15158 = vmatpush1.bf16.msra.mxu1 %v15157_v2  ;;  %16450 = vtanh.f32 %v6199_v28  ;;  %v20665_v52 = vld [vmem:[%s23529_s3 + $0x10] sm:$0xff]  ;;  %v24202_v2 = vld [vmem:[#allocation99_spill] sm:$0xff]  ;;  %v20680_v50 = vld [vmem:[%s23529_s3 + $0x18] sm:$0xff]  ;;  %8291 = vmatprep.mubr.f32.mxu0 %v23869_v40 }
 0x392   : > { %v20652_v11 = vpop.f32.mrb[237].mxu0  ;;  %v6448_v17 = vadd.f32 %v20441_v62, %v19495_v16  ;;  %v16439_v31 = vpop.eup %16438  ;;  %v7036_v56 = vadd.f32 0.5, %v6876_v14  ;;  %v6877_v6 = vmul.f32 0.5, %v16437_v41  ;;  %16452 = vtanh.f32 %v6288_v10  ;;  %14527 = vmatmul.mubr.msk.f32.gmra.mrb[28].mxu1 %vm2560_vm1, %v20435_v5  ;;  %7300 = vperm.xlu1 %15554, %v20665_v52   ;;  %24205 = vst [vmem:[#allocation165_spill] sm:$0xff] %v20680_v50  ;;  %v24206_v41 = vld [vmem:[#allocation98_spill] sm:$0xff] }
 0x393   : > { %v20658_v4 = vpop.f32.mrb[236].mxu1  ;;  %v20670_v28 = vadd.f32 %v20573_v39, %v24202_v2  ;;  %v16441_v26 = vpop.eup %16440  ;;  %v20675_v14 = vadd.f32 %v6994_v1, %v18487_v8  ;;  %v6914_v10 = vmul.f32 0.5, %v16439_v31  ;;  %7304 = vperm.xlu0 %15553, %v20680_v50   ;;  %16454 = vtanh.f32 %v6357_v59  ;;  %8380 = vmatprep.mubr.f32.mxu1 %v23869_v40 }
 0x394   : > { %v20672_v62 = vpop.f32.mrb[237].mxu1  ;;  %v20686_v39 = vadd.f32 %v20543_v36, %v24206_v41  ;;  %v20692_v8 = vadd.f32 %v20598_v57, %v18496_v37  ;;  %v20695_v1 = vadd.f32 0.5, %v20588_v15  ;;  %v6916_v31 = vmul.f32 0.5, %v16441_v26  ;;  %v24209_v36 = vld [vmem:[#allocation103_spill] sm:$0xff]  ;;  %14524 = vmatmul.mubr.msk.f32.gmra.mrb[30].mxu0 %vm2560_vm1, %v20473_v47  ;;  %v24211_v57 = vld [vmem:[#allocation104_spill] sm:$0xff] }
 0x395   : > { %24203 = vst [vmem:[#allocation99_spill] sm:$0xff] %v20670_v28  ;;  %24204 = vst [vmem:[#allocation164_spill] sm:$0xff] %v20675_v14  ;;  %v20688_v2 = vpop.f32.mrb[238].mxu0  ;;  %16456 = vtanh.f32 %v6446_v38  ;;  %v16443_v25 = vpop.eup %16442  ;;  %v20701_v55 = vadd.f32 0.5, %v20614_v7  ;;  %v20704_v41 = vadd.f32 %v7034_v58, %v24209_v36  ;;  %v20713_v38 = vadd.f32 %v7036_v56, %v24211_v57  ;;  %8451 = vmatprep.mubr.f32.mxu0 %v23869_v40  ;;  %v24215_v56 = vld [vmem:[#allocation101_spill] sm:$0xff] }
 0x396   : > { %24207 = vst [vmem:[#allocation98_spill] sm:$0xff] %v20686_v39  ;;  %24208 = vst [vmem:[#allocation166_spill] sm:$0xff] %v20692_v8  ;;  %v20698_v59 = vpop.f32.mrb[239].mxu0  ;;  %16458 = vtanh.f32 %v6359_v49  ;;  %v15151_v37 = vpack.c.bf16 %v20670_v28, %v20686_v39  ;;  %v20715_v26 = vadd.f32 0.5, %v6875_v9  ;;  %v20717_v50 = vadd.f32 0.5, %v6877_v6  ;;  %14528 = vmatmul.mubr.msk.f32.gmra.mrb[30].mxu1 %vm2560_vm1, %v20473_v47  ;;  %v24213_v49 = vld [vmem:[#allocation100_spill] sm:$0xff] }
 0x397   : > { %24210 = vst [vmem:[#allocation103_spill] sm:$0xff] %v20704_v41  ;;  %v20710_v15 = vpop.f32.mrb[238].mxu1  ;;  %24212 = vst [vmem:[#allocation104_spill] sm:$0xff] %v20713_v38  ;;  %16460 = vtanh.f32 %v6448_v17  ;;  %v7074_v7 = vadd.f32 0.5, %v6914_v10  ;;  %v20726_v36 = vadd.f32 %v20556_v32, %v24213_v49  ;;  %v20730_v9 = vadd.f32 %v20586_v0, %v24215_v56  ;;  %8540 = vmatprep.mubr.f32.mxu1 %v23869_v40 }
 0x398   : > { %v20722_v58 = vpop.f32.mrb[239].mxu1  ;;  %15152 = vmatprep.subr.bf16.mxu0 %v15151_v37  ;;  %v6363_v17 = vadd.f32 %v20448_v29, %v19499_v53  ;;  %v16445_v6 = vpop.eup %16444  ;;  %v7076_v57 = vadd.f32 0.5, %v6916_v31  ;;  %v6915_v28 = vmul.f32 0.5, %v16443_v25  ;;  %v6452_v10 = vadd.f32 %v20461_v45, %v19499_v53 }
 0x399   : > { %24214 = vst [vmem:[#allocation100_spill] sm:$0xff] %v20726_v36  ;;  %24216 = vst [vmem:[#allocation101_spill] sm:$0xff] %v20730_v9  ;;  %v15153_v37 = vpack.c.bf16 %v20562_v30, %v20537_v42  ;;  %v16447_v32 = vpop.eup %16446  ;;  %v15159_v49 = vpack.c.bf16 %v20730_v9, %v20726_v36  ;;  %v15161_v0 = vpack.c.bf16 %v20571_v12, %v20554_v18  ;;  %v6917_v39 = vmul.f32 0.5, %v16445_v6 }
 0x39a   : > { %16462 = vtanh.f32 %v6363_v17  ;;  %v6365_v29 = vadd.f32 %v20454_v48, %v19499_v53  ;;  %v16449_v56 = vpop.eup %16448  ;;  %v6954_v31 = vmul.f32 0.5, %v16447_v32  ;;  %v6454_v45 = vadd.f32 %v20477_v19, %v19499_v53 }
 0x39b   : > { %16464 = vtanh.f32 %v6452_v10  ;;  %15154 = vmatpush1.bf16.msra.mxu0 %v15153_v37  ;;  %v6369_v25 = vadd.f32 %v20495_v61, %v19503_v22  ;;  %v16451_v30 = vpop.eup %16450  ;;  %v6956_v9 = vmul.f32 0.5, %v16449_v56  ;;  %15160 = vmatprep.subr.bf16.mxu1 %v15159_v49  ;;  %v6458_v17 = vadd.f32 %v20512_v20, %v19503_v22  ;;  %v24217_v37 = vld [vmem:[#allocation105_spill] sm:$0xff]  ;;  %v24219_v49 = vld [vmem:[#allocation110_spill] sm:$0xff] }
 0x39c   : > { %16466 = vtanh.f32 %v6365_v29  ;;  %v16453_v12 = vpop.eup %16452  ;;  %v7114_v48 = vadd.f32 0.5, %v6954_v31  ;;  %v6955_v36 = vmul.f32 0.5, %v16451_v30  ;;  %15162 = vmatpush1.bf16.msra.mxu1 %v15161_v0  ;;  %v6371_v10 = vadd.f32 %v20500_v24, %v19503_v22  ;;  %v24221_v31 = vld [vmem:[#allocation106_spill] sm:$0xff] }
 0x39d   : > { %16468 = vtanh.f32 %v6454_v45  ;;  %v16455_v19 = vpop.eup %16454  ;;  %v20754_v32 = vadd.f32 %v7074_v7, %v24217_v37  ;;  %v7116_v61 = vadd.f32 0.5, %v6956_v9  ;;  %v6460_v20 = vadd.f32 %v20520_v34, %v19503_v22  ;;  %v24223_v45 = vld [vmem:[#allocation111_spill] sm:$0xff] }
 0x39e   : > { %14529 = vmatmul.mubr.msk.f32.vlgmr.msra.gmra.mrb[32].mxu0 %vm2560_vm1, %v20343_v23  ;;  %16470 = vtanh.f32 %v6369_v25  ;;  %v20761_v30 = vadd.f32 %v7076_v57, %v24219_v49  ;;  %v20763_v0 = vadd.f32 0.5, %v6915_v28  ;;  %v6838_v29 = vmul.f32 0.5, %v16455_v19 }
 0x39f   : > { %24218 = vst [vmem:[#allocation105_spill] sm:$0xff] %v20754_v32  ;;  %v16457_v6 = vpop.eup %16456  ;;  %16472 = vtanh.f32 %v6458_v17  ;;  %8457 = vmatprep.mubr.f32.mxu0 %v23869_v40  ;;  %v20766_v7 = vadd.f32 0.5, %v6917_v39  ;;  %v6957_v9 = vmul.f32 0.5, %v16453_v12  ;;  %14533 = vmatmul.mubr.msk.f32.vlgmr.msra.gmra.mrb[32].mxu1 %vm2560_vm1, %v20343_v23  ;;  %v20772_v34 = vadd.f32 %v20695_v1, %v24221_v31  ;;  %v24225_v39 = vld [vmem:[#allocation107_spill] sm:$0xff]  ;;  %v24227_v17 = vld [vmem:[#allocation112_spill] sm:$0xff] }
 0x3a0   : > { %24220 = vst [vmem:[#allocation110_spill] sm:$0xff] %v20761_v30  ;;  %v16459_v24 = vpop.eup %16458  ;;  %v6840_v56 = vmul.f32 0.5, %v16457_v6  ;;  %v20775_v28 = vadd.f32 %v7114_v48, %v24223_v45  ;;  %v20777_v25 = vadd.f32 0.5, %v6955_v36  ;;  %16474 = vtanh.f32 %v6371_v10  ;;  %8546 = vmatprep.mubr.f32.mxu1 %v23869_v40  ;;  %v24229_v1 = vld [vmem:[#allocation108_spill] sm:$0xff]  ;;  %v24231_v36 = vld [vmem:[#allocation109_spill] sm:$0xff] }
 0x3a1   : > { %24222 = vst [vmem:[#allocation106_spill] sm:$0xff] %v20772_v34  ;;  %v16461_v57 = vpop.eup %16460  ;;  %v20782_v12 = vadd.f32 %v20715_v26, %v24225_v39  ;;  %v20785_v19 = vadd.f32 %v7116_v61, %v24227_v17  ;;  %16476 = vtanh.f32 %v6460_v20  ;;  %v20791_v48 = vadd.f32 %v20701_v55, %v24229_v1  ;;  %v24233_v39 = vld [vmem:[#allocation160_spill] sm:$0xff] }
 0x3a2   : > { %24224 = vst [vmem:[#allocation111_spill] sm:$0xff] %v20775_v28  ;;  %14530 = vmatmul.mubr.msk.f32.gmra.mrb[34].mxu0 %vm2560_vm1, %v20388_v43  ;;  %v20795_v10 = vadd.f32 %v20717_v50, %v24231_v36  ;;  %v6998_v37 = vadd.f32 0.5, %v6838_v29  ;;  %v6839_v6 = vmul.f32 0.5, %v16459_v24  ;;  %v6375_v61 = vadd.f32 %v20528_v44, %v19511_v54 }
 0x3a3   : > { %24226 = vst [vmem:[#allocation107_spill] sm:$0xff] %v20782_v12  ;;  %24228 = vst [vmem:[#allocation112_spill] sm:$0xff] %v20785_v19  ;;  %v15163_v26 = vpack.c.bf16 %v20782_v12, %v20772_v34  ;;  %8463 = vmatprep.mubr.f32.mxu0 %v23869_v40  ;;  %v7000_v49 = vadd.f32 0.5, %v6840_v56  ;;  %v6841_v31 = vmul.f32 0.5, %v16461_v57  ;;  %14534 = vmatmul.mubr.msk.f32.gmra.mrb[34].mxu1 %vm2560_vm1, %v20388_v43 }
 0x3a4   : > { %24230 = vst [vmem:[#allocation108_spill] sm:$0xff] %v20791_v48  ;;  %24232 = vst [vmem:[#allocation109_spill] sm:$0xff] %v20795_v10  ;;  %v16463_v20 = vpop.eup %16462  ;;  %v15171_v55 = vpack.c.bf16 %v20795_v10, %v20791_v48  ;;  %v6464_v50 = vadd.f32 %v20541_v27, %v19511_v54  ;;  %16478 = vtanh.f32 %v6375_v61  ;;  %v15165_v44 = vpack.c.bf16 %v20704_v41, %v20675_v14 }
 0x3a5   : > { %v16465_v29 = vpop.eup %16464  ;;  %v6878_v24 = vmul.f32 0.5, %v16463_v20  ;;  %15164 = vmatprep.subr.bf16.mxu0 %v15163_v26  ;;  %v15173_v56 = vpack.c.bf16 %v20713_v38, %v20692_v8  ;;  %8552 = vmatprep.mubr.f32.mxu1 %v23869_v40  ;;  %v6377_v17 = vadd.f32 %v24233_v39, %v19511_v54  ;;  %v6466_v27 = vadd.f32 %v20545_v63, %v19511_v54  ;;  %v24234_v63 = vld [vmem:[#allocation161_spill] sm:$0xff] }
 0x3a6   : > { %v16467_v57 = vpop.eup %16466  ;;  %v6880_v45 = vmul.f32 0.5, %v16465_v29  ;;  %15172 = vmatprep.subr.bf16.mxu1 %v15171_v55  ;;  %16480 = vtanh.f32 %v6464_v50  ;;  %14531 = vmatmul.mubr.msk.f32.gmra.mrb[36].mxu0 %vm2560_vm1, %v20435_v5  ;;  %v6535_v61 = vadd.f32 %v20551_v35, %v19495_v16  ;;  %v6624_v20 = vadd.f32 %v20568_v3, %v19495_v16  ;;  %v24237_v3 = vld [vmem:[#allocation118_spill] sm:$0xff] }
 0x3a7   : > { %v16469_v1 = vpop.eup %16468  ;;  %v7038_v36 = vadd.f32 0.5, %v6878_v24  ;;  %v6879_v26 = vmul.f32 0.5, %v16467_v57  ;;  %15166 = vmatpush1.bf16.msra.mxu0 %v15165_v44  ;;  %15174 = vmatpush1.bf16.msra.mxu1 %v15173_v56  ;;  %16482 = vtanh.f32 %v6377_v17  ;;  %v6537_v39 = vadd.f32 %v24234_v63, %v19495_v16  ;;  %v24235_v56 = vld [vmem:[#allocation117_spill] sm:$0xff] }
 0x3a8   : > { %v16471_v55 = vpop.eup %16470  ;;  %v7040_v50 = vadd.f32 0.5, %v6880_v45  ;;  %v6881_v29 = vmul.f32 0.5, %v16469_v1  ;;  %14535 = vmatmul.mubr.msk.f32.gmra.mrb[36].mxu1 %vm2560_vm1, %v20435_v5  ;;  %8469 = vmatprep.mubr.f32.mxu0 %v23869_v40  ;;  %v7117_v44 = vadd.f32 0.5, %v6957_v9  ;;  %v20829_v57 = vadd.f32 %v6998_v37, %v24235_v56  ;;  %v24239_v9 = vld [vmem:[#allocation119_spill] sm:$0xff]  ;;  %v24249_v56 = vld [vmem:[#allocation116_spill] sm:$0xff] }
 0x3a9   : > { %v16473_v24 = vpop.eup %16472  ;;  %v6918_v35 = vmul.f32 0.5, %v16471_v55  ;;  %16484 = vtanh.f32 %v6466_v27  ;;  %8558 = vmatprep.mubr.f32.mxu1 %v23869_v40  ;;  %v20833_v45 = vadd.f32 %v7000_v49, %v24237_v3  ;;  %v20835_v17 = vadd.f32 0.5, %v6839_v6  ;;  %v24241_v6 = vld [vmem:[#allocation120_spill] sm:$0xff] }
 0x3aa   : > { %24236 = vst [vmem:[#allocation160_spill] sm:$0xff] %v20829_v57  ;;  %v6920_v1 = vmul.f32 0.5, %v16473_v24  ;;  %16486 = vtanh.f32 %v6535_v61  ;;  %14532 = vmatmul.mubr.msk.f32.gmra.mrb[38].mxu0 %vm2560_vm1, %v20473_v47  ;;  %v16475_v63 = vpop.eup %16474  ;;  %v20839_v10 = vadd.f32 0.5, %v6841_v31  ;;  %v20842_v37 = vadd.f32 %v7038_v36, %v24239_v9  ;;  %v24243_v36 = vld [vmem:[#allocation113_spill] sm:$0xff] }
 0x3ab   : > { %24238 = vst [vmem:[#allocation161_spill] sm:$0xff] %v20833_v45  ;;  %16488 = vtanh.f32 %v6624_v20  ;;  %v6626_v27 = vadd.f32 %v20584_v46, %v19495_v16  ;;  %8629 = vmatprep.mubr.f32.mxu0 %v23869_v40  ;;  %v16477_v49 = vpop.eup %16476  ;;  %v20848_v55 = vadd.f32 %v7040_v50, %v24241_v6  ;;  %v7039_v61 = vadd.f32 0.5, %v6879_v26  ;;  %v24245_v16 = vld [vmem:[#allocation114_spill] sm:$0xff] }
 0x3ac   : > { %24240 = vst [vmem:[#allocation117_spill] sm:$0xff] %v20842_v37  ;;  %v20850_v24 = vadd.f32 0.5, %v6881_v29  ;;  %16490 = vtanh.f32 %v6537_v39  ;;  %14536 = vmatmul.mubr.msk.f32.gmra.mrb[38].mxu1 %vm2560_vm1, %v20473_v47  ;;  %v7078_v31 = vadd.f32 0.5, %v6918_v35  ;;  %v20856_v20 = vadd.f32 %v20763_v0, %v24243_v36  ;;  %v24247_v29 = vld [vmem:[#allocation115_spill] sm:$0xff] }
 0x3ad   : > { %24242 = vst [vmem:[#allocation118_spill] sm:$0xff] %v20848_v55  ;;  %16492 = vtanh.f32 %v6626_v27  ;;  %v20860_v46 = vadd.f32 %v20777_v25, %v24245_v16  ;;  %8718 = vmatprep.mubr.f32.mxu1 %v23869_v40  ;;  %v7080_v50 = vadd.f32 0.5, %v6920_v1  ;;  %v6919_v26 = vmul.f32 0.5, %v16475_v63  ;;  %v24251_v16 = vld [vmem:[#allocation125_spill] sm:$0xff] }
 0x3ae   : > { %24244 = vst [vmem:[#allocation119_spill] sm:$0xff] %v20856_v20  ;;  %v20865_v39 = vadd.f32 %v20766_v7, %v24247_v29  ;;  %v20868_v3 = vadd.f32 %v7117_v44, %v24249_v56  ;;  %v16479_v35 = vpop.eup %16478  ;;  %v6921_v9 = vmul.f32 0.5, %v16477_v49  ;;  %v6541_v25 = vadd.f32 %v20596_v60, %v19499_v53 }
 0x3af   : > { %24246 = vst [vmem:[#allocation120_spill] sm:$0xff] %v20860_v46  ;;  %v15167_v0 = vpack.c.bf16 %v20860_v46, %v20856_v20  ;;  %v6630_v27 = vadd.f32 %v20630_v13, %v19499_v53  ;;  %v6958_v63 = vmul.f32 0.5, %v16479_v35  ;;  %v15169_v44 = vpack.c.bf16 %v20775_v28, %v20754_v32  ;;  %v24342_v20 = vld [vmem:[#allocation17_spill] sm:$0xff] }
 0x3b0   : > { %24248 = vst [vmem:[#allocation113_spill] sm:$0xff] %v20865_v39  ;;  %24250 = vst [vmem:[#allocation114_spill] sm:$0xff] %v20868_v3  ;;  %v16481_v1 = vpop.eup %16480  ;;  %v15175_v7 = vpack.c.bf16 %v20868_v3, %v20865_v39  ;;  %v6543_v49 = vadd.f32 %v20612_v51, %v19499_v53  ;;  %16494 = vtanh.f32 %v6541_v25  ;;  %v15177_v60 = vpack.c.bf16 %v20785_v19, %v20761_v30 }
 0x3b1   : > { %v6960_v6 = vmul.f32 0.5, %v16481_v1  ;;  %15168 = vmatprep.subr.bf16.mxu0 %v15167_v0  ;;  %v6632_v13 = vadd.f32 %v20638_v21, %v19499_v53  ;;  %v16483_v36 = vpop.eup %16482  ;;  %v20887_v29 = vadd.f32 %v7078_v31, %v24251_v16  ;;  %v7118_v56 = vadd.f32 0.5, %v6958_v63  ;;  %v24253_v63 = vld [vmem:[#allocation126_spill] sm:$0xff] }
 0x3b2   : > { %15176 = vmatprep.subr.bf16.mxu1 %v15175_v7  ;;  %16496 = vtanh.f32 %v6630_v27  ;;  %15170 = vmatpush1.bf16.msra.mxu0 %v15169_v44  ;;  %v6547_v51 = vadd.f32 %v20645_v33, %v19503_v22  ;;  %v6959_v25 = vmul.f32 0.5, %v16483_v36  ;;  %v6549_v1 = vadd.f32 %v20652_v11, %v19503_v22  ;;  %v24255_v44 = vld [vmem:[#allocation127_spill] sm:$0xff] }
 0x3b3   : > { %24252 = vst [vmem:[#allocation115_spill] sm:$0xff] %v20887_v29  ;;  %v16485_v35 = vpop.eup %16484  ;;  %v7120_v0 = vadd.f32 0.5, %v6960_v6  ;;  %15178 = vmatpush1.bf16.msra.mxu1 %v15177_v60  ;;  %16498 = vtanh.f32 %v6543_v49  ;;  %v7079_v21 = vadd.f32 0.5, %v6919_v26  ;;  %v6638_v31 = vadd.f32 %v20672_v62, %v19503_v22  ;;  %v24257_v49 = vld [vmem:[#allocation128_spill] sm:$0xff]  ;;  %v24259_v62 = vld [vmem:[#allocation121_spill] sm:$0xff] }
 0x3b4   : > { %v16487_v53 = vpop.eup %16486  ;;  %v6961_v3 = vmul.f32 0.5, %v16485_v35  ;;  %16500 = vtanh.f32 %v6632_v13  ;;  %v20896_v7 = vadd.f32 %v7080_v50, %v24253_v63  ;;  %v7081_v33 = vadd.f32 0.5, %v6921_v9  ;;  %v24261_v9 = vld [vmem:[#allocation122_spill] sm:$0xff] }
 0x3b5   : > { %v16489_v27 = vpop.eup %16488  ;;  %v20899_v6 = vadd.f32 %v7118_v56, %v24255_v44  ;;  %14537 = vmatmul.mubr.msk.f32.vlgmr.msra.gmra.mrb[40].mxu0 %vm2560_vm1, %v20343_v23  ;;  %v6636_v11 = vadd.f32 %v20658_v4, %v19503_v22  ;;  %v20906_v60 = vadd.f32 %v7120_v0, %v24257_v49  ;;  %16502 = vtanh.f32 %v6547_v51  ;;  %v24265_v51 = vld [vmem:[#allocation124_spill] sm:$0xff]  ;;  %v24267_v44 = vld [vmem:[#allocation129_spill] sm:$0xff] }
 0x3b6   : > { %24254 = vst [vmem:[#allocation116_spill] sm:$0xff] %v20896_v7  ;;  %v16491_v26 = vpop.eup %16490  ;;  %14541 = vmatmul.mubr.msk.f32.vlgmr.msra.gmra.mrb[40].mxu1 %vm2560_vm1, %v20343_v23  ;;  %8635 = vmatprep.mubr.f32.mxu0 %v23869_v40  ;;  %v20913_v50 = vadd.f32 %v20835_v17, %v24259_v62  ;;  %v20916_v13 = vadd.f32 %v7039_v61, %v24261_v9  ;;  %v7119_v16 = vadd.f32 0.5, %v6959_v25  ;;  %v6842_v22 = vmul.f32 0.5, %v16487_v53  ;;  %v24263_v17 = vld [vmem:[#allocation123_spill] sm:$0xff] }
 0x3b7   : > { %24256 = vst [vmem:[#allocation125_spill] sm:$0xff] %v20899_v6  ;;  %24258 = vst [vmem:[#allocation126_spill] sm:$0xff] %v20906_v60  ;;  %v16493_v36 = vpop.eup %16492  ;;  %v6843_v4 = vmul.f32 0.5, %v16491_v26  ;;  %16504 = vtanh.f32 %v6549_v1  ;;  %8724 = vmatprep.mubr.f32.mxu1 %v23869_v40  ;;  %v7121_v56 = vadd.f32 0.5, %v6961_v3  ;;  %v6844_v35 = vmul.f32 0.5, %v16489_v27  ;;  %v24271_v9 = vld [vmem:[#allocation131_spill] sm:$0xff] }
 0x3b8   : > { %24260 = vst [vmem:[#allocation127_spill] sm:$0xff] %v20913_v50  ;;  %24262 = vst [vmem:[#allocation128_spill] sm:$0xff] %v20916_v13  ;;  %16506 = vtanh.f32 %v6638_v31  ;;  %v15179_v23 = vpack.c.bf16 %v20916_v13, %v20913_v50  ;;  %v20925_v61 = vadd.f32 %v20839_v10, %v24263_v17  ;;  %v20929_v0 = vadd.f32 %v20850_v24, %v24265_v51 }
 0x3b9   : > { %16508 = vtanh.f32 %v6636_v11  ;;  %14538 = vmatmul.mubr.msk.f32.gmra.mrb[42].mxu0 %vm2560_vm1, %v20388_v43  ;;  %v6553_v3 = vadd.f32 %v20688_v2, %v19511_v54  ;;  %v7003_v25 = vadd.f32 0.5, %v6843_v4  ;;  %v6845_v1 = vmul.f32 0.5, %v16493_v36 }
 0x3ba   : > { %24264 = vst [vmem:[#allocation121_spill] sm:$0xff] %v20925_v61  ;;  %24266 = vst [vmem:[#allocation122_spill] sm:$0xff] %v20929_v0  ;;  %14542 = vmatmul.mubr.msk.f32.gmra.mrb[42].mxu1 %vm2560_vm1, %v20388_v43  ;;  %15180 = vmatprep.subr.bf16.mxu0 %v15179_v23  ;;  %v6642_v53 = vadd.f32 %v20710_v15, %v19511_v54  ;;  %v15181_v10 = vpack.c.bf16 %v20842_v37, %v20829_v57  ;;  %v16495_v31 = vpop.eup %16494 }
 0x3bb   : > { %v15187_v24 = vpack.c.bf16 %v20929_v0, %v20925_v61  ;;  %16510 = vtanh.f32 %v6553_v3  ;;  %v15189_v2 = vpack.c.bf16 %v20848_v55, %v20833_v45  ;;  %v6555_v27 = vadd.f32 %v20698_v59, %v19511_v54  ;;  %8641 = vmatprep.mubr.f32.mxu0 %v23869_v40  ;;  %8730 = vmatprep.mubr.f32.mxu1 %v23869_v40  ;;  %v24269_v59 = vld [vmem:[#allocation130_spill] sm:$0xff] }
 0x3bc   : > { %v16497_v43 = vpop.eup %16496  ;;  %v6882_v15 = vmul.f32 0.5, %v16495_v31  ;;  %16512 = vtanh.f32 %v6642_v53  ;;  %15182 = vmatpush1.bf16.msra.mxu0 %v15181_v10  ;;  %v6644_v63 = vadd.f32 %v20722_v58, %v19511_v54  ;;  %v20950_v11 = vadd.f32 %v7079_v21, %v24267_v44  ;;  %v24273_v54 = vld [vmem:[#allocation132_spill] sm:$0xff] }
 0x3bd   : > { %v16499_v26 = vpop.eup %16498  ;;  %v6884_v49 = vmul.f32 0.5, %v16497_v43  ;;  %15188 = vmatprep.subr.bf16.mxu1 %v15187_v24  ;;  %16514 = vtanh.f32 %v6555_v27  ;;  %14539 = vmatmul.mubr.msk.f32.gmra.mrb[44].mxu0 %vm2560_vm1, %v20435_v5  ;;  %v20955_v62 = vadd.f32 %v7119_v16, %v24269_v59  ;;  %v20958_v36 = vadd.f32 %v7081_v33, %v24271_v9  ;;  %v24281_v59 = vld [vmem:[#allocation136_spill] sm:$0xff] }
 0x3be   : > { %24268 = vst [vmem:[#allocation123_spill] sm:$0xff] %v20950_v11  ;;  %v16501_v4 = vpop.eup %16500  ;;  %v7042_v23 = vadd.f32 0.5, %v6882_v15  ;;  %v6883_v17 = vmul.f32 0.5, %v16499_v26  ;;  %15190 = vmatpush1.bf16.msra.mxu1 %v15189_v2  ;;  %16516 = vtanh.f32 %v6644_v63  ;;  %8647 = vmatprep.mubr.f32.mxu0 %v23869_v40  ;;  %v20962_v58 = vadd.f32 %v7121_v56, %v24273_v54  ;;  %v24275_v2 = vld [vmem:[#allocation133_spill] sm:$0xff]  ;;  %v24277_v63 = vld [vmem:[#allocation134_spill] sm:$0xff]  ;;  %v24279_v26 = vld [vmem:[#allocation135_spill] sm:$0xff] }
 0x3bf   : > { %24270 = vst [vmem:[#allocation124_spill] sm:$0xff] %v20955_v62  ;;  %24272 = vst [vmem:[#allocation129_spill] sm:$0xff] %v20958_v36  ;;  %v7005_v21 = vadd.f32 0.5, %v6845_v1  ;;  %v7044_v51 = vadd.f32 0.5, %v6884_v49  ;;  %v6885_v3 = vmul.f32 0.5, %v16501_v4  ;;  %14543 = vmatmul.mubr.msk.f32.gmra.mrb[44].mxu1 %vm2560_vm1, %v20435_v5  ;;  %v15183_v33 = vpack.c.bf16 %v20955_v62, %v20950_v11  ;;  %v16503_v16 = vpop.eup %16502  ;;  %v24283_v4 = vld [vmem:[#allocation137_spill] sm:$0xff] }
 0x3c0   : > { %24274 = vst [vmem:[#allocation130_spill] sm:$0xff] %v20962_v58  ;;  %v7002_v53 = vadd.f32 0.5, %v6842_v22  ;;  %v7043_v10 = vadd.f32 0.5, %v6883_v17  ;;  %8736 = vmatprep.mubr.f32.mxu1 %v23869_v40  ;;  %v15191_v31 = vpack.c.bf16 %v20962_v58, %v20958_v36  ;;  %v15185_v56 = vpack.c.bf16 %v20899_v6, %v20887_v29  ;;  %v24285_v17 = vld [vmem:[#allocation138_spill] sm:$0xff] }
 0x3c1   : > { %v16505_v1 = vpop.eup %16504  ;;  %v7004_v24 = vadd.f32 0.5, %v6844_v35  ;;  %v20974_v27 = vadd.f32 %v7042_v23, %v24275_v2  ;;  %v7045_v43 = vadd.f32 0.5, %v6885_v3  ;;  %14540 = vmatmul.mubr.msk.f32.gmra.mrb[46].mxu0 %vm2560_vm1, %v20473_v47  ;;  %15184 = vmatprep.subr.bf16.mxu0 %v15183_v33  ;;  %v15193_v15 = vpack.c.bf16 %v20906_v60, %v20896_v7 }
 0x3c2   : > { %v16507_v22 = vpop.eup %16506  ;;  %15192 = vmatprep.subr.bf16.mxu1 %v15191_v31  ;;  %15186 = vmatpush1.bf16.msra.mxu0 %v15185_v56  ;;  %v20981_v44 = vadd.f32 %v7003_v25, %v24277_v63  ;;  %v20984_v49 = vadd.f32 %v7043_v10, %v24279_v26  ;;  %v20987_v9 = vadd.f32 %v7044_v51, %v24281_v59  ;;  %v24287_v25 = vld [vmem:[#allocation139_spill] sm:$0xff]  ;;  %v6923_v33 = vmul.f32 0.5, %v16505_v1  ;;  %v24289_v31 = vld [vmem:[#allocation140_spill] sm:$0xff] }
 0x3c3   : > { %24276 = vst [vmem:[#allocation131_spill] sm:$0xff] %v20974_v27  ;;  %v16509_v35 = vpop.eup %16508  ;;  %14544 = vmatmul.mubr.msk.f32.gmra.mrb[46].mxu1 %vm2560_vm1, %v20473_v47  ;;  %8807 = vmatprep.mubr.f32.mxu0 %v23869_v40  ;;  %v20993_v23 = vadd.f32 %v7005_v21, %v24283_v4  ;;  %v20996_v54 = vadd.f32 %v7045_v43, %v24285_v17  ;;  %v6925_v2 = vmul.f32 0.5, %v16507_v22  ;;  %v17181_v21 = vld [vmem:[%s23528_s2 + $0x40] sm:$0xff]  ;;  %v6922_v43 = vmul.f32 0.5, %v16503_v16 }
 0x3c4   : > { %24278 = vst [vmem:[#allocation132_spill] sm:$0xff] %v20981_v44  ;;  %24280 = vst [vmem:[#allocation133_spill] sm:$0xff] %v20984_v49  ;;  %v20999_v3 = vadd.f32 %v7002_v53, %v24287_v25  ;;  %15194 = vmatpush1.bf16.msra.mxu1 %v15193_v15  ;;  %8896 = vmatprep.mubr.f32.mxu1 %v23869_v40  ;;  %v15195_v51 = vpack.c.bf16 %v20984_v49, %v20981_v44  ;;  %v6924_v15 = vmul.f32 0.5, %v16509_v35 }
 0x3c5   : > { %24282 = vst [vmem:[#allocation134_spill] sm:$0xff] %v20987_v9  ;;  %24284 = vst [vmem:[#allocation135_spill] sm:$0xff] %v20993_v23  ;;  %v16511_v10 = vpop.eup %16510  ;;  %v21005_v56 = vadd.f32 %v7004_v24, %v24289_v31  ;;  %14545 = vmatmul.mubr.msk.f32.vlgmr.msra.gmra.mrb[48].mxu0 %vm2560_vm1, %v17181_v21  ;;  %v15203_v53 = vpack.c.bf16 %v20996_v54, %v20993_v23  ;;  %v7083_v17 = vadd.f32 0.5, %v6923_v33  ;;  %v7085_v35 = vadd.f32 0.5, %v6925_v2  ;;  %v17182_v31 = vld [vmem:[%s23528_s2 + $0x48] sm:$0xff]  ;;  %v24293_v2 = vld [vmem:[#allocation144_spill] sm:$0xff] }
 0x3c6   : > { %24286 = vst [vmem:[#allocation136_spill] sm:$0xff] %v20996_v54  ;;  %24288 = vst [vmem:[#allocation137_spill] sm:$0xff] %v20999_v3  ;;  %v16513_v1 = vpop.eup %16512  ;;  %v6962_v63 = vmul.f32 0.5, %v16511_v10  ;;  %8813 = vmatprep.mubr.f32.mxu0 %v23869_v40  ;;  %15196 = vmatprep.subr.bf16.mxu0 %v15195_v51  ;;  %v15197_v24 = vpack.c.bf16 %v20974_v27, %v20999_v3 }
 0x3c7   : > { %24290 = vst [vmem:[#allocation138_spill] sm:$0xff] %v21005_v56  ;;  %v16515_v22 = vpop.eup %16514  ;;  %v6964_v26 = vmul.f32 0.5, %v16513_v1  ;;  %14549 = vmatmul.mubr.msk.f32.vlgmr.msra.gmra.mrb[48].mxu1 %vm2560_vm1, %v17181_v21  ;;  %15204 = vmatprep.subr.bf16.mxu1 %v15203_v53  ;;  %v15205_v59 = vpack.c.bf16 %v20987_v9, %v21005_v56  ;;  %v7082_v53 = vadd.f32 0.5, %v6922_v43  ;;  %v7084_v1 = vadd.f32 0.5, %v6924_v15  ;;  %v24299_v15 = vld [vmem:[#allocation145_spill] sm:$0xff] }
 0x3c8   : > { %v16517_v4 = vpop.eup %16516  ;;  %v7122_v25 = vadd.f32 0.5, %v6962_v63  ;;  %v6963_v16 = vmul.f32 0.5, %v16515_v22  ;;  %8902 = vmatprep.mubr.f32.mxu1 %v23869_v40  ;;  %15198 = vmatpush1.bf16.msra.mxu0 %v15197_v24  ;;  %v24291_v63 = vld [vmem:[#allocation143_spill] sm:$0xff] }
 0x3c9   : > { %v7124_v51 = vadd.f32 0.5, %v6964_v26  ;;  %v6965_v10 = vmul.f32 0.5, %v16517_v4  ;;  %14546 = vmatmul.mubr.msk.f32.gmra.mrb[50].mxu0 %vm2560_vm1, %v17182_v31  ;;  %15206 = vmatpush1.bf16.msra.mxu1 %v15205_v59  ;;  %v24295_v26 = vld [vmem:[#allocation141_spill] sm:$0xff]  ;;  %v24297_v59 = vld [vmem:[#allocation142_spill] sm:$0xff] }
 0x3ca   : > { %v7123_v54 = vadd.f32 0.5, %v6963_v16  ;;  %8819 = vmatprep.mubr.f32.mxu0 %v23869_v40  ;;  %v21027_v24 = vadd.f32 %v7122_v25, %v24291_v63  ;;  %v21034_v4 = vadd.f32 %v7083_v17, %v24295_v26  ;;  %v21042_v16 = vadd.f32 %v7085_v35, %v24299_v15  ;;  %v24303_v63 = vld [vmem:[#allocation147_spill] sm:$0xff] }
 0x3cb   : > { %v7125_v33 = vadd.f32 0.5, %v6965_v10  ;;  %14550 = vmatmul.mubr.msk.f32.gmra.mrb[50].mxu1 %vm2560_vm1, %v17182_v31  ;;  %v21030_v22 = vadd.f32 %v7124_v51, %v24293_v2  ;;  %v24301_v10 = vld [vmem:[#allocation146_spill] sm:$0xff]  ;;  %v21048_v51 = vadd.f32 %v7082_v53, %v24303_v63  ;;  %v24305_v2 = vld [vmem:[#allocation148_spill] sm:$0xff] }
 0x3cc   : > { %24292 = vst [vmem:[#allocation139_spill] sm:$0xff] %v21027_v24  ;;  %8908 = vmatprep.mubr.f32.mxu1 %v23869_v40  ;;  %24296 = vst [vmem:[#allocation143_spill] sm:$0xff] %v21034_v4  ;;  %v21037_v43 = vadd.f32 %v7123_v54, %v24297_v59  ;;  %v21051_v49 = vadd.f32 %v7084_v1, %v24305_v2 }
 0x3cd   : > { %24294 = vst [vmem:[#allocation140_spill] sm:$0xff] %v21030_v22  ;;  %14547 = vmatmul.mubr.msk.f32.gmra.mrb[52].mxu0 %vm2560_vm1, %v20435_v5  ;;  %24300 = vst [vmem:[#allocation141_spill] sm:$0xff] %v21042_v16  ;;  %v21045_v25 = vadd.f32 %v7125_v33, %v24301_v10  ;;  %v15201_v35 = vpack.c.bf16 %v21027_v24, %v21048_v51 }
 0x3ce   : > { %24298 = vst [vmem:[#allocation144_spill] sm:$0xff] %v21037_v43  ;;  %24304 = vst [vmem:[#allocation145_spill] sm:$0xff] %v21048_v51  ;;  %8825 = vmatprep.mubr.f32.mxu0 %v23869_v40  ;;  %v15199_v54 = vpack.c.bf16 %v21037_v43, %v21034_v4  ;;  %v15209_v53 = vpack.c.bf16 %v21030_v22, %v21051_v49 }
 0x3cf   : > { %24302 = vst [vmem:[#allocation142_spill] sm:$0xff] %v21045_v25  ;;  %24306 = vst [vmem:[#allocation146_spill] sm:$0xff] %v21051_v49  ;;  %14551 = vmatmul.mubr.msk.f32.gmra.mrb[52].mxu1 %vm2560_vm1, %v20435_v5  ;;  %v15207_v17 = vpack.c.bf16 %v21045_v25, %v21042_v16  ;;  %v17183_v5 = vld [vmem:[%s23528_s2 + $0x50] sm:$0xff] }
 0x3d0   : > { %8914 = vmatprep.mubr.f32.mxu1 %v23869_v40  ;;  %15200 = vmatprep.subr.bf16.mxu0 %v15199_v54 }
 0x3d1   : > { %14548 = vmatmul.mubr.msk.f32.gmra.mrb[54].mxu0 %vm2560_vm1, %v20473_v47  ;;  %15208 = vmatprep.subr.bf16.mxu1 %v15207_v17 }
 0x3d2   : > { %15202 = vmatpush1.bf16.msra.mxu0 %v15201_v35  ;;  %15210 = vmatpush1.bf16.msra.mxu1 %v15209_v53 }
 0x3d3   : > { %14552 = vmatmul.mubr.msk.f32.gmra.mrb[54].mxu1 %vm2560_vm1, %v20473_v47  ;;  %8985 = vmatprep.mubr.f32.mxu0 %v23869_v40 }
 0x3d4   : > { %9074 = vmatprep.mubr.f32.mxu1 %v23869_v40 }
 0x3d5   : > { %14553 = vmatmul.mubr.msk.f32.vlgmr.msra.gmra.mrb[56].mxu0 %vm2560_vm1, %v17181_v21 }
 0x3d6   : > { %8991 = vmatprep.mubr.f32.mxu0 %v23869_v40 }
 0x3d7   : > { %14557 = vmatmul.mubr.msk.f32.vlgmr.msra.gmra.mrb[56].mxu1 %vm2560_vm1, %v17181_v21 }
 0x3d8   : > { %9080 = vmatprep.mubr.f32.mxu1 %v23869_v40 }
 0x3d9   : > { %14554 = vmatmul.mubr.msk.f32.gmra.mrb[58].mxu0 %vm2560_vm1, %v17182_v31 }
 0x3da   : > { %8997 = vmatprep.mubr.f32.mxu0 %v23869_v40 }
 0x3db   : > { %14558 = vmatmul.mubr.msk.f32.gmra.mrb[58].mxu1 %vm2560_vm1, %v17182_v31 }
 0x3dc   : > { %9086 = vmatprep.mubr.f32.mxu1 %v23869_v40 }
 0x3dd   : > { %14555 = vmatmul.mubr.msk.f32.gmra.mrb[60].mxu0 %vm2560_vm1, %v17183_v5 }
 0x3de   : > { %9003 = vmatprep.mubr.f32.mxu0 %v23869_v40 }
 0x3df   : > { %14559 = vmatmul.mubr.msk.f32.gmra.mrb[60].mxu1 %vm2560_vm1, %v17183_v5 }
 0x3e0   : > { %9092 = vmatprep.mubr.f32.mxu1 %v23869_v40 }
 0x3e1   : > { %14556 = vmatmul.mubr.msk.f32.gmra.mrb[62].mxu0 %vm2560_vm1, %v20473_v47 }
 0x3e2   : > { %9676 = vmatprep.mubr.f32.mxu0 %v23869_v40 }
 0x3e3   : > { %14560 = vmatmul.mubr.msk.f32.gmra.mrb[62].mxu1 %vm2560_vm1, %v20473_v47 }
 0x3e4   : > { %9765 = vmatprep.mubr.f32.mxu1 %v23869_v40 }
 0x3ea   : > { %v7385_v21 = vpop.f32.mrb[240].mxu0 }
 0x3eb   : > { %v7387_v1 = vpop.f32.mrb[241].mxu0 }
 0x3ec   : > { %v7474_v31 = vpop.f32.mrb[240].mxu1 }
 0x3ed   : > { %v7476_v33 = vpop.f32.mrb[241].mxu1 }
 0x3ee   : > { %v7391_v26 = vpop.f32.mrb[242].mxu0 }
 0x3ef   : > { %v7393_v15 = vpop.f32.mrb[243].mxu0 }
 0x3f0   : > { %v7480_v59 = vpop.f32.mrb[242].mxu1 }
 0x3f1   : > { %v7482_v10 = vpop.f32.mrb[243].mxu1 }
 0x3f3   : > { %v7397_v63 = vpop.f32.mrb[244].mxu0 }
 0x3f4   : > { %v7399_v2 = vpop.f32.mrb[245].mxu0 }
 0x3f5   : > { %v7486_v54 = vpop.f32.mrb[244].mxu1 }
 0x3f6   : > { %v7488_v17 = vpop.f32.mrb[245].mxu1 }
 0x3f7   : > { %v7403_v35 = vpop.f32.mrb[246].mxu0 }
 0x3f8   : > { %v7405_v53 = vpop.f32.mrb[247].mxu0 }
 0x3f9   : > { %v7492_v5 = vpop.f32.mrb[246].mxu1 }
 0x3fa   : > { %v7494_v25 = vpop.f32.mrb[247].mxu1 }
 0x400   : > { %v7563_v43 = vpop.f32.mrb[248].mxu0 }
 0x401   : > { %v7652_v47 = vpop.f32.mrb[248].mxu1  ;;  %v7565_v22 = vpop.f32.mrb[249].mxu0 }
 0x402   : > { %v7654_v24 = vpop.f32.mrb[249].mxu1 }
 0x404   : > { %v7569_v16 = vpop.f32.mrb[250].mxu0 }
 0x405   : > { %v7658_v4 = vpop.f32.mrb[250].mxu1  ;;  %v7571_v49 = vpop.f32.mrb[251].mxu0 }
 0x406   : > { %v7660_v51 = vpop.f32.mrb[251].mxu1 }
 0x409   : > { %v7575_v56 = vpop.f32.mrb[252].mxu0 }
 0x40a   : > { %v21092_v9 = vpop.permute.xlu0 %7292  ;;  %v7664_v62 = vpop.f32.mrb[252].mxu1 }
 0x40b   : > { %v7386_v27 = vadd.f32 %v7385_v21, %v21092_v9  ;;  %v7475_v23 = vadd.f32 %v7474_v31, %v21092_v9  ;;  %v7388_v44 = vadd.f32 %v7387_v1, %v21092_v9  ;;  %v21097_v3 = vpop.permute.xlu1 %7296  ;;  %v7477_v58 = vadd.f32 %v7476_v33, %v21092_v9  ;;  %v7577_v6 = vpop.f32.mrb[253].mxu0 }
 0x40c   : > { %v7392_v60 = vadd.f32 %v7391_v26, %v21097_v3  ;;  %v7666_v36 = vpop.f32.mrb[253].mxu1  ;;  %v7481_v11 = vadd.f32 %v7480_v59, %v21097_v3  ;;  %v7394_v21 = vadd.f32 %v7393_v15, %v21097_v3  ;;  %v7483_v1 = vadd.f32 %v7482_v10, %v21097_v3  ;;  %v24308_v10 = vld [vmem:[#allocation163_spill] sm:$0xff] }
 0x40d   : > { %16518 = vtanh.f32 %v7386_v27  ;;  %v7581_v31 = vpop.f32.mrb[254].mxu0  ;;  %v21107_v27 = vadd.f32 %v7563_v43, %v21092_v9  ;;  %v21112_v59 = vadd.f32 %v7652_v47, %v21092_v9  ;;  %v21116_v15 = vadd.f32 %v7565_v22, %v21092_v9 }
 0x40e   : > { %16520 = vtanh.f32 %v7475_v23  ;;  %v7670_v7 = vpop.f32.mrb[254].mxu1  ;;  %v7583_v29 = vpop.f32.mrb[255].mxu0  ;;  %v21119_v43 = vadd.f32 %v7654_v24, %v21092_v9  ;;  %v21127_v47 = vadd.f32 %v7569_v16, %v21097_v3  ;;  %v21134_v24 = vadd.f32 %v7571_v49, %v21097_v3 }
 0x40f   : > { %16522 = vtanh.f32 %v7388_v44  ;;  %v7672_v26 = vpop.f32.mrb[255].mxu1 }
 0x410   : > { %16524 = vtanh.f32 %v7477_v58  ;;  %v17211_v58 = vmov 4  }
 0x411   : > { %16526 = vtanh.f32 %v7392_v60  ;;  %v21104_v33 = vpop.permute.xlu1 %7300  ;;  %15555 = vset.pattern.permute.xlu1 %v17211_v58  ;;  %15556 = vset.pattern.permute.xlu0 %v17211_v58 }
 0x412   : > { %16528 = vtanh.f32 %v7481_v11  ;;  %v7398_v23 = vadd.f32 %v7397_v63, %v21104_v33  ;;  %v7487_v44 = vadd.f32 %v7486_v54, %v21104_v33  ;;  %v7400_v60 = vadd.f32 %v7399_v2, %v21104_v33  ;;  %v24307_v11 = vld [vmem:[#allocation162_spill] sm:$0xff]  ;;  %9589 = vperm.xlu0 %15556, %v24308_v10   ;;  %v21123_v63 = vpop.permute.xlu0 %7304 }
 0x413   : > { %16530 = vtanh.f32 %v7394_v21  ;;  %9585 = vperm.xlu1 %15555, %v24307_v11   ;;  %v7489_v54 = vadd.f32 %v7488_v17, %v21104_v33  ;;  %v21130_v2 = vadd.f32 %v7658_v4, %v21097_v3  ;;  %v7404_v22 = vadd.f32 %v7403_v35, %v21123_v63 }
 0x414   : > { %16532 = vtanh.f32 %v7483_v1  ;;  %v21137_v21 = vadd.f32 %v7660_v51, %v21097_v3  ;;  %v7493_v1 = vadd.f32 %v7492_v5, %v21123_v63  ;;  %v7406_v17 = vadd.f32 %v7405_v53, %v21123_v63 }
 0x415   : > { %16534 = vtanh.f32 %v7398_v23  ;;  %v7495_v16 = vadd.f32 %v7494_v25, %v21123_v63  ;;  %v21143_v4 = vadd.f32 %v7575_v56, %v21104_v33  ;;  %v21146_v35 = vadd.f32 %v7664_v62, %v21104_v33 }
 0x416   : > { %16536 = vtanh.f32 %v7487_v44  ;;  %v21149_v49 = vadd.f32 %v7577_v6, %v21104_v33  ;;  %v21153_v53 = vadd.f32 %v7666_v36, %v21104_v33  ;;  %v21156_v25 = vadd.f32 %v7581_v31, %v21123_v63  ;;  %v7741_v5 = vpop.f32.mrb[0].mxu0 }
 0x417   : > { %v16519_v58 = vpop.eup %16518  ;;  %16538 = vtanh.f32 %v7400_v60  ;;  %9593 = vperm.xlu1 %15555, %v20665_v52   ;;  %v21159_v62 = vadd.f32 %v7670_v7, %v21123_v63  ;;  %v21162_v6 = vadd.f32 %v7583_v29, %v21123_v63  ;;  %v7743_v52 = vpop.f32.mrb[1].mxu0  ;;  %v21165_v36 = vadd.f32 %v7672_v26, %v21123_v63 }
 0x418   : > { %v16521_v51 = vpop.eup %16520  ;;  %v9259_v23 = vmul.f32 0.5, %v16519_v58  ;;  %16540 = vtanh.f32 %v7489_v54  ;;  %v21168_v31 = vadd.f32 %v7741_v5, %v21092_v9  ;;  %v7830_v10 = vpop.f32.mrb[0].mxu1  ;;  %v21173_v7 = vadd.f32 %v7743_v52, %v21092_v9 }
 0x419   : > { %v16523_v56 = vpop.eup %16522  ;;  %v9261_v44 = vmul.f32 0.5, %v16521_v51  ;;  %16542 = vtanh.f32 %v7404_v22  ;;  %v7832_v29 = vpop.f32.mrb[1].mxu1  ;;  %v24309_v51 = vld [vmem:[#allocation165_spill] sm:$0xff]  ;;  %v21179_v5 = vadd.f32 %v7830_v10, %v21092_v9 }
 0x41a   : > { %v16525_v60 = vpop.eup %16524  ;;  %v9260_v11 = vmul.f32 0.5, %v16523_v56  ;;  %16544 = vtanh.f32 %v7493_v1  ;;  %v21170_v58 = vadd.f32 0.5, %v9259_v23  ;;  %v7747_v0 = vpop.f32.mrb[2].mxu0 }
 0x41b   : > { %v16527_v54 = vpop.eup %16526  ;;  %v9262_v22 = vmul.f32 0.5, %v16525_v60  ;;  %16546 = vtanh.f32 %v7406_v17  ;;  %9597 = vperm.xlu1 %15555, %v24309_v51   ;;  %v21176_v1 = vadd.f32 0.5, %v9261_v44  ;;  %v21183_v17 = vadd.f32 %v7832_v29, %v21092_v9  ;;  %v7749_v52 = vpop.f32.mrb[3].mxu0 }
 0x41c   : > { %v16529_v56 = vpop.eup %16528  ;;  %v9299_v26 = vmul.f32 0.5, %v16527_v54  ;;  %16548 = vtanh.f32 %v7495_v16  ;;  %v9420_v23 = vadd.f32 0.5, %v9260_v11  ;;  %v7836_v16 = vpop.f32.mrb[2].mxu1  ;;  %v21188_v11 = vadd.f32 %v7747_v0, %v21097_v3 }
 0x41d   : > { %v16531_v13 = vpop.eup %16530  ;;  %v9301_v55 = vmul.f32 0.5, %v16529_v56  ;;  %16550 = vtanh.f32 %v21107_v27  ;;  %v9422_v51 = vadd.f32 0.5, %v9262_v22  ;;  %v7838_v27 = vpop.f32.mrb[3].mxu1  ;;  %v21196_v57 = vadd.f32 %v7749_v52, %v21097_v3 }
 0x41e   : > { %v16533_v60 = vpop.eup %16532  ;;  %v9459_v37 = vadd.f32 0.5, %v9299_v26  ;;  %v9300_v44 = vmul.f32 0.5, %v16531_v13  ;;  %16552 = vtanh.f32 %v21112_v59 }
 0x41f   : > { %v16535_v54 = vpop.eup %16534  ;;  %v9461_v10 = vadd.f32 0.5, %v9301_v55  ;;  %v9302_v61 = vmul.f32 0.5, %v16533_v60  ;;  %16554 = vtanh.f32 %v21116_v15  ;;  %v7753_v55 = vpop.f32.mrb[4].mxu0 }
 0x420   : > { %v16537_v56 = vpop.eup %16536  ;;  %v15213_v29 = vpack.c.bf16 %v9459_v37, %v21170_v58  ;;  %v9460_v50 = vadd.f32 0.5, %v9300_v44  ;;  %v9339_v45 = vmul.f32 0.5, %v16535_v54  ;;  %16556 = vtanh.f32 %v21119_v43  ;;  %v7755_v37 = vpop.f32.mrb[5].mxu0 }
 0x421   : > { %v16539_v13 = vpop.eup %16538  ;;  %v15221_v59 = vpack.c.bf16 %v9461_v10, %v21176_v1  ;;  %v9462_v22 = vadd.f32 0.5, %v9302_v61  ;;  %v9341_v26 = vmul.f32 0.5, %v16537_v56  ;;  %16558 = vtanh.f32 %v21127_v47  ;;  %v7842_v1 = vpop.f32.mrb[4].mxu1 }
 0x422   : > { %v16541_v15 = vpop.eup %16540  ;;  %v9340_v60 = vmul.f32 0.5, %v16539_v13  ;;  %16560 = vtanh.f32 %v21130_v2  ;;  %v15211_v0 = vpack.c.bf16 %v9460_v50, %v9420_v23  ;;  %v21200_v61 = vadd.f32 %v7836_v16, %v21097_v3  ;;  %v7844_v50 = vpop.f32.mrb[5].mxu1 }
 0x423   : > { %v16543_v58 = vpop.eup %16542  ;;  %v9342_v44 = vmul.f32 0.5, %v16541_v15  ;;  %16562 = vtanh.f32 %v21134_v24  ;;  %v15219_v43 = vpack.c.bf16 %v9462_v22, %v9422_v51  ;;  %v9499_v54 = vadd.f32 0.5, %v9339_v45  ;;  %v7759_v51 = vpop.f32.mrb[6].mxu0 }
 0x424   : > { %v16545_v47 = vpop.eup %16544  ;;  %v21202_v10 = vadd.f32 0.5, %v9341_v26  ;;  %v9379_v56 = vmul.f32 0.5, %v16543_v58  ;;  %16564 = vtanh.f32 %v21137_v21  ;;  %15212 = vmatprep.subr.bf16.mxu0 %v15211_v0  ;;  %v9500_v23 = vadd.f32 0.5, %v9340_v60  ;;  %v21210_v21 = vpop.f32.mrb[7].mxu0 }
 0x425   : > { %v16547_v2 = vpop.eup %16546  ;;  %v9381_v52 = vmul.f32 0.5, %v16545_v47  ;;  %16566 = vtanh.f32 %v21143_v4  ;;  %15220 = vmatprep.subr.bf16.mxu1 %v15219_v43  ;;  %15214 = vmatpush1.bf16.msra.mxu0 %v15213_v29  ;;  %v21207_v24 = vadd.f32 %v7838_v27, %v21097_v3  ;;  %v9502_v45 = vadd.f32 0.5, %v9342_v44  ;;  %v21216_v27 = vpop.f32.mrb[6].mxu1 }
 0x426   : > { %v16549_v16 = vpop.eup %16548  ;;  %v9539_v13 = vadd.f32 0.5, %v9379_v56  ;;  %v9380_v22 = vmul.f32 0.5, %v16547_v2  ;;  %16568 = vtanh.f32 %v21146_v35  ;;  %15222 = vmatpush1.bf16.msra.mxu1 %v15221_v59  ;;  %v21214_v4 = vadd.f32 %v7753_v55, %v21104_v33  ;;  %v21219_v35 = vpop.f32.mrb[7].mxu1 }
 0x427   : > { %v16551_v26 = vpop.eup %16550  ;;  %v9541_v15 = vadd.f32 0.5, %v9381_v52  ;;  %v9382_v60 = vmul.f32 0.5, %v16549_v16  ;;  %16570 = vtanh.f32 %v21149_v49 }
 0x428   : > { %v16553_v29 = vpop.eup %16552  ;;  %v15217_v0 = vpack.c.bf16 %v9539_v13, %v9499_v54  ;;  %v9540_v58 = vadd.f32 0.5, %v9380_v22  ;;  %v9263_v44 = vmul.f32 0.5, %v16551_v26  ;;  %16572 = vtanh.f32 %v21153_v53 }
 0x429   : > { %v16555_v59 = vpop.eup %16554  ;;  %v15225_v43 = vpack.c.bf16 %v9541_v15, %v21202_v10  ;;  %v9542_v47 = vadd.f32 0.5, %v9382_v60  ;;  %v9265_v56 = vmul.f32 0.5, %v16553_v29  ;;  %16574 = vtanh.f32 %v21156_v25 }
 0x42a   : > { %v16557_v49 = vpop.eup %16556  ;;  %v9264_v55 = vmul.f32 0.5, %v16555_v59  ;;  %16576 = vtanh.f32 %v21159_v62  ;;  %v15215_v2 = vpack.c.bf16 %v9540_v58, %v9500_v23  ;;  %v21225_v54 = vadd.f32 %v7842_v1, %v21104_v33 }
 0x42b   : > { %v16559_v52 = vpop.eup %16558  ;;  %v9266_v16 = vmul.f32 0.5, %v16557_v49  ;;  %16578 = vtanh.f32 %v21162_v6  ;;  %v15223_v53 = vpack.c.bf16 %v9542_v47, %v9502_v45  ;;  %v21229_v13 = vadd.f32 %v7755_v37, %v21104_v33  ;;  %v21240_v6 = vld [vmem:[%s23528_s2 + $0x60] sm:$0xff] }
 0x42c   : > { %v16561_v10 = vpop.eup %16560  ;;  %v21231_v22 = vadd.f32 0.5, %v9263_v44  ;;  %v21233_v25 = vadd.f32 0.5, %v9265_v56  ;;  %v9303_v26 = vmul.f32 0.5, %v16559_v52  ;;  %16580 = vtanh.f32 %v21165_v36  ;;  %15216 = vmatprep.subr.bf16.mxu0 %v15215_v2 }
 0x42d   : > { %v16563_v62 = vpop.eup %16562  ;;  %v9424_v1 = vadd.f32 0.5, %v9264_v55  ;;  %v9305_v23 = vmul.f32 0.5, %v16561_v10  ;;  %16582 = vtanh.f32 %v21168_v31  ;;  %15224 = vmatprep.subr.bf16.mxu1 %v15223_v53  ;;  %15218 = vmatpush1.bf16.msra.mxu0 %v15217_v0  ;;  %v21243_v37 = vadd.f32 %v7844_v50, %v21104_v33  ;;  %v21246_v29 = vpop.f32.mrb[8].mxu0 }
 0x42e   : > { %v16565_v45 = vpop.eup %16564  ;;  %v9426_v15 = vadd.f32 0.5, %v9266_v16  ;;  %v9463_v60 = vadd.f32 0.5, %v9303_v26  ;;  %v9304_v36 = vmul.f32 0.5, %v16563_v62  ;;  %16584 = vtanh.f32 %v21179_v5  ;;  %15226 = vmatpush1.bf16.msra.mxu1 %v15225_v43  ;;  %v21252_v59 = vpop.f32.mrb[8].mxu1 }
 0x42f   : > { %v16567_v31 = vpop.eup %16566  ;;  %v9465_v58 = vadd.f32 0.5, %v9305_v23  ;;  %v9306_v0 = vmul.f32 0.5, %v16565_v45  ;;  %16586 = vtanh.f32 %v21173_v7  ;;  %v21250_v44 = vadd.f32 %v7759_v51, %v21123_v63  ;;  %v21254_v50 = vpop.f32.mrb[9].mxu0 }
 0x430   : > { %v16569_v47 = vpop.eup %16568  ;;  %v15229_v56 = vpack.c.bf16 %v9463_v60, %v21231_v22  ;;  %v9464_v49 = vadd.f32 0.5, %v9304_v36  ;;  %v9343_v5 = vmul.f32 0.5, %v16567_v31  ;;  %16588 = vtanh.f32 %v21183_v17  ;;  %14565 = vmatmul.mubr.msk.f32.vlgmr.msra.gmra.mrb[64].mxu0 %vm2560_vm1, %v21240_v6  ;;  %v21260_v43 = vpop.f32.mrb[9].mxu1  ;;  %v21270_v17 = vld [vmem:[%s23528_s2 + $0x68] sm:$0xff] }
 0x431   : > { %v16571_v7 = vpop.eup %16570  ;;  %v15237_v51 = vpack.c.bf16 %v9465_v58, %v21233_v25  ;;  %v9466_v55 = vadd.f32 0.5, %v9306_v0  ;;  %v9345_v2 = vmul.f32 0.5, %v16569_v47  ;;  %16590 = vtanh.f32 %v21188_v11  ;;  %14569 = vmatmul.mubr.msk.f32.vlgmr.msra.gmra.mrb[64].mxu1 %vm2560_vm1, %v21240_v6  ;;  %9682 = vmatprep.mubr.f32.mxu0 %v23869_v40  ;;  %v21276_v10 = vpop.f32.mrb[10].mxu0 }
 0x432   : > { %v16573_v52 = vpop.eup %16572  ;;  %v9344_v16 = vmul.f32 0.5, %v16571_v7  ;;  %16592 = vtanh.f32 %v21200_v61  ;;  %9771 = vmatprep.mubr.f32.mxu1 %v23869_v40  ;;  %v15227_v53 = vpack.c.bf16 %v9464_v49, %v9424_v1  ;;  %v7849_v11 = vadd.f32 %v21216_v27, %v21123_v63  ;;  %v21281_v23 = vpop.f32.mrb[10].mxu1 }
 0x433   : > { %v16575_v22 = vpop.eup %16574  ;;  %v9346_v25 = vmul.f32 0.5, %v16573_v52  ;;  %16594 = vtanh.f32 %v21196_v57  ;;  %v15235_v26 = vpack.c.bf16 %v9466_v55, %v9426_v15  ;;  %v7762_v62 = vadd.f32 %v21210_v21, %v21123_v63  ;;  %v21283_v45 = vpop.f32.mrb[11].mxu0 }
 0x434   : > { %v16577_v61 = vpop.eup %16576  ;;  %v21285_v60 = vadd.f32 0.5, %v9343_v5  ;;  %v21287_v1 = vadd.f32 0.5, %v9345_v2  ;;  %v9383_v27 = vmul.f32 0.5, %v16575_v22  ;;  %16596 = vtanh.f32 %v21207_v24  ;;  %14566 = vmatmul.mubr.msk.f32.gmra.mrb[66].mxu0 %vm2560_vm1, %v21270_v17  ;;  %15228 = vmatprep.subr.bf16.mxu0 %v15227_v53  ;;  %v21292_v57 = vpop.f32.mrb[11].mxu1  ;;  %v21304_v24 = vld [vmem:[%s23528_s2 + $0x70] sm:$0xff] }
 0x435   : > { %v16579_v15 = vpop.eup %16578  ;;  %v21294_v21 = vadd.f32 0.5, %v9344_v16  ;;  %v9385_v36 = vmul.f32 0.5, %v16577_v61  ;;  %16598 = vtanh.f32 %v21214_v4  ;;  %14570 = vmatmul.mubr.msk.f32.gmra.mrb[66].mxu1 %vm2560_vm1, %v21270_v17  ;;  %15236 = vmatprep.subr.bf16.mxu1 %v15235_v26  ;;  %v7851_v31 = vadd.f32 %v21219_v35, %v21123_v63  ;;  %v21314_v55 = vpop.f32.mrb[12].mxu0 }
 0x436   : > { %v16581_v58 = vpop.eup %16580  ;;  %v9506_v0 = vadd.f32 0.5, %v9346_v25  ;;  %v9543_v47 = vadd.f32 0.5, %v9383_v27  ;;  %v9384_v49 = vmul.f32 0.5, %v16579_v15  ;;  %16600 = vtanh.f32 %v21225_v54  ;;  %15230 = vmatpush1.bf16.msra.mxu0 %v15229_v56  ;;  %15238 = vmatpush1.bf16.msra.mxu1 %v15237_v51 }
 0x437   : > { %v16583_v4 = vpop.eup %16582  ;;  %v21307_v5 = vadd.f32 0.5, %v9385_v36  ;;  %v9386_v7 = vmul.f32 0.5, %v16581_v58  ;;  %16602 = vtanh.f32 %v21229_v13  ;;  %9688 = vmatprep.mubr.f32.mxu0 %v23869_v40  ;;  %9777 = vmatprep.mubr.f32.mxu1 %v23869_v40  ;;  %v7920_v35 = vadd.f32 %v21246_v29, %v21092_v9  ;;  %v21320_v13 = vpop.f32.mrb[13].mxu0 }
 0x438   : > { %v16585_v2 = vpop.eup %16584  ;;  %v15233_v54 = vpack.c.bf16 %v9543_v47, %v21285_v60  ;;  %v9544_v56 = vadd.f32 0.5, %v9384_v49  ;;  %v9267_v51 = vmul.f32 0.5, %v16583_v4  ;;  %16604 = vtanh.f32 %v21243_v37  ;;  %14567 = vmatmul.mubr.msk.f32.gmra.mrb[68].mxu0 %vm2560_vm1, %v21304_v24  ;;  %v21331_v37 = vld [vmem:[%s23528_s2 + $0x78] sm:$0xff]  ;;  %v21333_v22 = vpop.f32.mrb[12].mxu1 }
 0x439   : > { %v16587_v52 = vpop.eup %16586  ;;  %v15241_v16 = vpack.c.bf16 %v21307_v5, %v21287_v1  ;;  %v9546_v53 = vadd.f32 0.5, %v9386_v7  ;;  %v9269_v29 = vmul.f32 0.5, %v16585_v2  ;;  %16606 = vtanh.f32 %v21250_v44  ;;  %14571 = vmatmul.mubr.msk.f32.gmra.mrb[68].mxu1 %vm2560_vm1, %v21304_v24  ;;  %9694 = vmatprep.mubr.f32.mxu0 %v23869_v40  ;;  %v21342_v60 = vpop.f32.mrb[13].mxu1 }
 0x43a   : > { %v16589_v25 = vpop.eup %16588  ;;  %v21335_v26 = vadd.f32 0.5, %v9267_v51  ;;  %16608 = vtanh.f32 %v7849_v11  ;;  %v8009_v61 = vadd.f32 %v21252_v59, %v21092_v9  ;;  %9783 = vmatprep.mubr.f32.mxu1 %v23869_v40  ;;  %v7922_v44 = vadd.f32 %v21254_v50, %v21092_v9  ;;  %v21347_v58 = vpop.f32.mrb[14].mxu0 }
 0x43b   : > { %v16591_v1 = vpop.eup %16590  ;;  %v9268_v27 = vmul.f32 0.5, %v16587_v52  ;;  %16610 = vtanh.f32 %v7762_v62  ;;  %v8011_v15 = vadd.f32 %v21260_v43, %v21092_v9  ;;  %v15231_v36 = vpack.c.bf16 %v9544_v56, %v21294_v21  ;;  %v21353_v49 = vpop.f32.mrb[15].mxu0 }
 0x43c   : > { %v16593_v11 = vpop.eup %16592  ;;  %v21349_v47 = vadd.f32 0.5, %v9269_v29  ;;  %v9307_v59 = vmul.f32 0.5, %v16591_v1  ;;  %16612 = vtanh.f32 %v7851_v31  ;;  %14568 = vmatmul.mubr.msk.f32.gmra.mrb[70].mxu0 %vm2560_vm1, %v21331_v37  ;;  %v15239_v50 = vpack.c.bf16 %v9546_v53, %v9506_v0  ;;  %v21359_v21 = vpop.f32.mrb[14].mxu1 }
 0x43d   : > { %v16595_v4 = vpop.eup %16594  ;;  %v9270_v62 = vmul.f32 0.5, %v16589_v25  ;;  %v9309_v5 = vmul.f32 0.5, %v16593_v11  ;;  %16614 = vtanh.f32 %v7920_v35  ;;  %14572 = vmatmul.mubr.msk.f32.gmra.mrb[70].mxu1 %vm2560_vm1, %v21331_v37  ;;  %15232 = vmatprep.subr.bf16.mxu0 %v15231_v36  ;;  %v7926_v43 = vadd.f32 %v21276_v10, %v21097_v3  ;;  %v21365_v35 = vpop.f32.mrb[15].mxu1 }
 0x43e   : > { %v16597_v31 = vpop.eup %16596  ;;  %v21361_v7 = vadd.f32 0.5, %v9307_v59  ;;  %v9308_v2 = vmul.f32 0.5, %v16595_v4  ;;  %16616 = vtanh.f32 %v8009_v61  ;;  %15240 = vmatprep.subr.bf16.mxu1 %v15239_v50  ;;  %15234 = vmatpush1.bf16.msra.mxu0 %v15233_v54  ;;  %v8015_v0 = vadd.f32 %v21281_v23, %v21097_v3 }
 0x43f   : > { %v16599_v56 = vpop.eup %16598  ;;  %v21367_v51 = vadd.f32 0.5, %v9309_v5  ;;  %v9310_v52 = vmul.f32 0.5, %v16597_v31  ;;  %16618 = vtanh.f32 %v7922_v44  ;;  %15242 = vmatpush1.bf16.msra.mxu1 %v15241_v16  ;;  %9854 = vmatprep.mubr.f32.mxu0 %v23869_v40  ;;  %v7928_v10 = vadd.f32 %v21283_v45, %v21097_v3 }
 0x440   : > { %v16601_v53 = vpop.eup %16600  ;;  %v15245_v54 = vpack.c.bf16 %v21361_v7, %v21335_v26  ;;  %v9347_v29 = vmul.f32 0.5, %v16599_v56  ;;  %16620 = vtanh.f32 %v8011_v15  ;;  %9943 = vmatprep.mubr.f32.mxu1 %v23869_v40  ;;  %v9428_v25 = vadd.f32 0.5, %v9268_v27 }
 0x441   : > { %v16603_v23 = vpop.eup %16602  ;;  %v15253_v61 = vpack.c.bf16 %v21367_v51, %v21349_v47  ;;  %16622 = vtanh.f32 %v7926_v43  ;;  %14573 = vmatmul.mubr.msk.f32.vlgmr.msra.gmra.mrb[72].mxu0 %vm2560_vm1, %v21240_v6  ;;  %v21379_v44 = vadd.f32 0.5, %v9270_v62  ;;  %v9468_v45 = vadd.f32 0.5, %v9308_v2 }
 0x442   : > { %v16605_v16 = vpop.eup %16604  ;;  %16624 = vtanh.f32 %v8015_v0  ;;  %v8017_v1 = vadd.f32 %v21292_v57, %v21097_v3  ;;  %14577 = vmatmul.mubr.msk.f32.vlgmr.msra.gmra.mrb[72].mxu1 %vm2560_vm1, %v21240_v6  ;;  %9860 = vmatprep.mubr.f32.mxu0 %v23869_v40  ;;  %v9470_v15 = vadd.f32 0.5, %v9310_v52  ;;  %v9349_v36 = vmul.f32 0.5, %v16601_v53 }
 0x443   : > { %v16607_v27 = vpop.eup %16606  ;;  %16626 = vtanh.f32 %v7928_v10  ;;  %v7932_v11 = vadd.f32 %v21314_v55, %v21104_v33  ;;  %9949 = vmatprep.mubr.f32.mxu1 %v23869_v40  ;;  %v21389_v50 = vadd.f32 0.5, %v9347_v29  ;;  %v8021_v57 = vadd.f32 %v21333_v22, %v21104_v33  ;;  %v8097_v62 = vpop.f32.mrb[16].mxu0 }
 0x444   : > { %v16609_v59 = vpop.eup %16608  ;;  %v9387_v4 = vmul.f32 0.5, %v16607_v27  ;;  %16628 = vtanh.f32 %v8017_v1  ;;  %v9348_v43 = vmul.f32 0.5, %v16603_v23  ;;  %v7934_v2 = vadd.f32 %v21320_v13, %v21104_v33  ;;  %v21397_v55 = vpop.f32.mrb[17].mxu0 }
 0x445   : > { %v16611_v5 = vpop.eup %16610  ;;  %v9389_v31 = vmul.f32 0.5, %v16609_v59  ;;  %16630 = vtanh.f32 %v7932_v11  ;;  %14574 = vmatmul.mubr.msk.f32.gmra.mrb[74].mxu0 %vm2560_vm1, %v21270_v17  ;;  %v8023_v22 = vadd.f32 %v21342_v60, %v21104_v33  ;;  %v8186_v10 = vpop.f32.mrb[16].mxu1  ;;  %v21406_v53 = vadd.f32 0.5, %v9349_v36 }
 0x446   : > { %v16613_v0 = vpop.eup %16612  ;;  %v21399_v56 = vadd.f32 0.5, %v9387_v4  ;;  %v9388_v52 = vmul.f32 0.5, %v16611_v5  ;;  %16632 = vtanh.f32 %v8021_v57  ;;  %14578 = vmatmul.mubr.msk.f32.gmra.mrb[74].mxu1 %vm2560_vm1, %v21270_v17  ;;  %9866 = vmatprep.mubr.f32.mxu0 %v23869_v40  ;;  %v15243_v1 = vpack.c.bf16 %v9468_v45, %v9428_v25  ;;  %v21411_v27 = vpop.f32.mrb[17].mxu1 }
 0x447   : > { %v16615_v13 = vpop.eup %16614  ;;  %v21408_v29 = vadd.f32 0.5, %v9389_v31  ;;  %v9390_v23 = vmul.f32 0.5, %v16613_v0  ;;  %9955 = vmatprep.mubr.f32.mxu1 %v23869_v40  ;;  %v9350_v59 = vmul.f32 0.5, %v16605_v16  ;;  %16634 = vtanh.f32 %v7934_v2  ;;  %v21415_v57 = vpop.f32.mrb[18].mxu0 }
 0x448   : > { %v16617_v11 = vpop.eup %16616  ;;  %v9271_v4 = vmul.f32 0.5, %v16615_v13  ;;  %16636 = vtanh.f32 %v8023_v22  ;;  %15244 = vmatprep.subr.bf16.mxu0 %v15243_v1  ;;  %v15251_v25 = vpack.c.bf16 %v9470_v15, %v21379_v44  ;;  %v21422_v16 = vpop.f32.mrb[19].mxu0  ;;  %v21424_v0 = vadd.f32 0.5, %v9348_v43 }
 0x449   : > { %v16619_v5 = vpop.eup %16618  ;;  %v9273_v31 = vmul.f32 0.5, %v16617_v11  ;;  %14575 = vmatmul.mubr.msk.f32.gmra.mrb[76].mxu0 %vm2560_vm1, %v21304_v24  ;;  %v21426_v2 = vadd.f32 0.5, %v9388_v52  ;;  %v7938_v22 = vadd.f32 %v21347_v58, %v21123_v63  ;;  %v8027_v44 = vadd.f32 %v21359_v21, %v21123_v63  ;;  %v21437_v15 = vpop.f32.mrb[18].mxu1 }
 0x44a   : > { %v16621_v45 = vpop.eup %16620  ;;  %15246 = vmatpush1.bf16.msra.mxu0 %v15245_v54  ;;  %14579 = vmatmul.mubr.msk.f32.gmra.mrb[76].mxu1 %vm2560_vm1, %v21304_v24  ;;  %v21439_v43 = vadd.f32 0.5, %v9390_v23  ;;  %v21441_v52 = vadd.f32 0.5, %v9271_v4  ;;  %v7940_v26 = vadd.f32 %v21353_v49, %v21123_v63  ;;  %v8029_v58 = vadd.f32 %v21365_v35, %v21123_v63  ;;  %v21448_v21 = vpop.f32.mrb[19].mxu1 }
 0x44b   : > { %v16623_v13 = vpop.eup %16622  ;;  %15252 = vmatprep.subr.bf16.mxu1 %v15251_v25  ;;  %9872 = vmatprep.mubr.f32.mxu0 %v23869_v40  ;;  %v9272_v54 = vmul.f32 0.5, %v16619_v5  ;;  %16638 = vtanh.f32 %v7938_v22  ;;  %v8098_v23 = vadd.f32 %v8097_v62, %v21092_v9  ;;  %v21455_v11 = vadd.f32 0.5, %v9273_v31 }
 0x44c   : > { %v16625_v7 = vpop.eup %16624  ;;  %v9311_v1 = vmul.f32 0.5, %v16623_v13  ;;  %15254 = vmatpush1.bf16.msra.mxu1 %v15253_v61  ;;  %9961 = vmatprep.mubr.f32.mxu1 %v23869_v40  ;;  %16640 = vtanh.f32 %v8027_v44  ;;  %v8187_v4 = vadd.f32 %v8186_v10, %v21092_v9  ;;  %v8100_v51 = vadd.f32 %v21397_v55, %v21092_v9 }
 0x44d   : > { %v16627_v49 = vpop.eup %16626  ;;  %v9313_v35 = vmul.f32 0.5, %v16625_v7  ;;  %14576 = vmatmul.mubr.msk.f32.gmra.mrb[78].mxu0 %vm2560_vm1, %v21331_v37  ;;  %16642 = vtanh.f32 %v7940_v26  ;;  %v9274_v31 = vmul.f32 0.5, %v16621_v45  ;;  %v8189_v45 = vadd.f32 %v21411_v27, %v21092_v9 }
 0x44e   : > { %v8109_v5 = vpop.f32.mrb[20].mxu0  ;;  %v16629_v25 = vpop.eup %16628  ;;  %v21460_v13 = vadd.f32 0.5, %v9311_v1  ;;  %v9312_v47 = vmul.f32 0.5, %v16627_v49  ;;  %14580 = vmatmul.mubr.msk.f32.gmra.mrb[78].mxu1 %vm2560_vm1, %v21331_v37  ;;  %10032 = vmatprep.mubr.f32.mxu0 %v23869_v40  ;;  %16644 = vtanh.f32 %v8029_v58  ;;  %v9510_v1 = vadd.f32 0.5, %v9350_v59 }
 0x44f   : > { %v8198_v61 = vpop.f32.mrb[20].mxu1  ;;  %v8111_v62 = vpop.f32.mrb[21].mxu0  ;;  %v21467_v22 = vadd.f32 0.5, %v9313_v35  ;;  %v9314_v44 = vmul.f32 0.5, %v16629_v25  ;;  %10121 = vmatprep.mubr.f32.mxu1 %v23869_v40  ;;  %16646 = vtanh.f32 %v8098_v23  ;;  %v15247_v59 = vpack.c.bf16 %v21426_v2, %v21424_v0 }
 0x450   : > { %v16631_v10 = vpop.eup %16630  ;;  %v8200_v7 = vpop.f32.mrb[21].mxu1  ;;  %16648 = vtanh.f32 %v8187_v4  ;;  %v9472_v25 = vadd.f32 0.5, %v9312_v47  ;;  %v9434_v23 = vadd.f32 0.5, %v9274_v31  ;;  %v15255_v36 = vpack.c.bf16 %v21439_v43, %v9510_v1 }
 0x451   : > { %v16633_v26 = vpop.eup %16632  ;;  %v9351_v49 = vmul.f32 0.5, %v16631_v10  ;;  %16650 = vtanh.f32 %v8100_v51  ;;  %v9432_v10 = vadd.f32 0.5, %v9272_v54  ;;  %v9474_v28 = vadd.f32 0.5, %v9314_v44  ;;  %15248 = vmatprep.subr.bf16.mxu0 %v15247_v59 }
 0x452   : > { %v9353_v60 = vmul.f32 0.5, %v16633_v26  ;;  %v8115_v35 = vpop.f32.mrb[22].mxu0  ;;  %v16635_v58 = vpop.eup %16634  ;;  %v8104_v27 = vadd.f32 %v21415_v57, %v21097_v3  ;;  %v8193_v47 = vadd.f32 %v21437_v15, %v21097_v3  ;;  %v8106_v0 = vadd.f32 %v21422_v16, %v21097_v3  ;;  %15256 = vmatprep.subr.bf16.mxu1 %v15255_v36 }
 0x453   : > { %v8204_v46 = vpop.f32.mrb[22].mxu1  ;;  %v8117_v19 = vpop.f32.mrb[23].mxu0  ;;  %v21481_v4 = vadd.f32 0.5, %v9351_v49  ;;  %v9352_v54 = vmul.f32 0.5, %v16635_v58  ;;  %16652 = vtanh.f32 %v8189_v45  ;;  %v24310_v43 = vpack.c.bf16 %v21399_v56, %v21389_v50 }
 0x454   : > { %v16637_v55 = vpop.eup %16636  ;;  %v21479_v26 = vpop.f32.mrb[23].mxu1  ;;  %v21489_v2 = vadd.f32 0.5, %v9353_v60  ;;  %v8195_v51 = vadd.f32 %v21448_v21, %v21097_v3  ;;  %v24311_v15 = vpack.c.bf16 %v21408_v29, %v21406_v53  ;;  %16654 = vtanh.f32 %v8104_v27 }
 0x455   : > { %15250 = vmatpush1.bf16.msra.mxu0 %v24310_v43  ;;  %v16639_v31 = vpop.eup %16638  ;;  %v9354_v57 = vmul.f32 0.5, %v16637_v55  ;;  %v8110_v60 = vadd.f32 %v8109_v5, %v21104_v33  ;;  %v15259_v16 = vpack.c.bf16 %v9472_v25, %v9432_v10  ;;  %16656 = vtanh.f32 %v8193_v47 }
 0x456   : > { %15258 = vmatpush1.bf16.msra.mxu1 %v24311_v15  ;;  %v16641_v44 = vpop.eup %16640  ;;  %v9391_v1 = vmul.f32 0.5, %v16639_v31  ;;  %v8199_v36 = vadd.f32 %v8198_v61, %v21104_v33  ;;  %v15267_v50 = vpack.c.bf16 %v9474_v28, %v9434_v23  ;;  %16658 = vtanh.f32 %v8106_v0 }
 0x457   : > { %v16643_v56 = vpop.eup %16642  ;;  %v9393_v49 = vmul.f32 0.5, %v16641_v44  ;;  %v8112_v21 = vadd.f32 %v8111_v62, %v21104_v33  ;;  %v8201_v53 = vadd.f32 %v8200_v7, %v21104_v33  ;;  %15260 = vmatprep.subr.bf16.mxu0 %v15259_v16  ;;  %16660 = vtanh.f32 %v8195_v51 }
 0x458   : > { %14581 = vmatmul.mubr.msk.f32.vlgmr.msra.gmra.mrb[80].mxu0 %vm2560_vm1, %v21240_v6  ;;  %v16645_v29 = vpop.eup %16644  ;;  %v21505_v5 = vadd.f32 0.5, %v9391_v1  ;;  %v9392_v55 = vmul.f32 0.5, %v16643_v56  ;;  %v8116_v28 = vadd.f32 %v8115_v35, %v21123_v63  ;;  %16662 = vtanh.f32 %v8110_v60  ;;  %15268 = vmatprep.subr.bf16.mxu1 %v15267_v50 }
 0x459   : > { %14585 = vmatmul.mubr.msk.f32.vlgmr.msra.gmra.mrb[80].mxu1 %vm2560_vm1, %v21240_v6  ;;  %10038 = vmatprep.mubr.f32.mxu0 %v23869_v40  ;;  %v16647_v61 = vpop.eup %16646  ;;  %v21511_v45 = vadd.f32 0.5, %v9393_v49  ;;  %v9394_v58 = vmul.f32 0.5, %v16645_v29  ;;  %v8205_v62 = vadd.f32 %v8204_v46, %v21123_v63  ;;  %16664 = vtanh.f32 %v8199_v36 }
 0x45a   : > { %10127 = vmatprep.mubr.f32.mxu1 %v23869_v40  ;;  %v8275_v7 = vpop.f32.mrb[24].mxu0  ;;  %v16649_v25 = vpop.eup %16648  ;;  %v15265_v59 = vpack.c.bf16 %v21505_v5, %v21481_v4  ;;  %v9275_v10 = vmul.f32 0.5, %v16647_v61  ;;  %v24312_v35 = vpack.c.bf16 %v21460_v13, %v21441_v52  ;;  %v24313_v23 = vpack.c.bf16 %v21467_v22, %v21455_v11 }
 0x45b   : > { %v8118_v27 = vadd.f32 %v8117_v19, %v21123_v63  ;;  %v8277_v47 = vpop.f32.mrb[25].mxu0  ;;  %v16651_v0 = vpop.eup %16650  ;;  %v15273_v46 = vpack.c.bf16 %v21511_v45, %v21489_v2  ;;  %v9552_v43 = vadd.f32 0.5, %v9392_v55  ;;  %v9554_v51 = vadd.f32 0.5, %v9394_v58 }
 0x45c   : > { %15262 = vmatpush1.bf16.msra.mxu0 %v24312_v35  ;;  %15270 = vmatpush1.bf16.msra.mxu1 %v24313_v23  ;;  %16666 = vtanh.f32 %v8112_v21  ;;  %v8364_v4 = vpop.f32.mrb[24].mxu1  ;;  %v9277_v52 = vmul.f32 0.5, %v16649_v25  ;;  %v8207_v19 = vadd.f32 %v21479_v26, %v21123_v63  ;;  %v9512_v13 = vadd.f32 0.5, %v9352_v54 }
 0x45d   : > { %14582 = vmatmul.mubr.msk.f32.gmra.mrb[82].mxu0 %vm2560_vm1, %v21270_v17  ;;  %16668 = vtanh.f32 %v8201_v53  ;;  %14586 = vmatmul.mubr.msk.f32.gmra.mrb[82].mxu1 %vm2560_vm1, %v21270_v17  ;;  %v8366_v11 = vpop.f32.mrb[25].mxu1  ;;  %v9514_v22 = vadd.f32 0.5, %v9354_v57  ;;  %v8276_v2 = vadd.f32 %v8275_v7, %v21092_v9  ;;  %v16653_v31 = vpop.eup %16652  ;;  %v21535_v15 = vadd.f32 0.5, %v9275_v10 }
 0x45e   : > { %10044 = vmatprep.mubr.f32.mxu0 %v23869_v40  ;;  %16670 = vtanh.f32 %v8116_v28  ;;  %10133 = vmatprep.mubr.f32.mxu1 %v23869_v40  ;;  %v9276_v60 = vmul.f32 0.5, %v16651_v0  ;;  %v8365_v16 = vadd.f32 %v8364_v4, %v21092_v9  ;;  %v16655_v1 = vpop.eup %16654  ;;  %v8278_v26 = vadd.f32 %v8277_v47, %v21092_v9 }
 0x45f   : > { %16672 = vtanh.f32 %v8205_v62  ;;  %v8281_v44 = vpop.f32.mrb[26].mxu0  ;;  %v15263_v54 = vpack.c.bf16 %v9552_v43, %v9512_v13  ;;  %v15271_v57 = vpack.c.bf16 %v9554_v51, %v9514_v22  ;;  %v16657_v56 = vpop.eup %16656  ;;  %v21541_v49 = vadd.f32 0.5, %v9277_v52 }
 0x460   : > { %16674 = vtanh.f32 %v8118_v27  ;;  %v8370_v36 = vpop.f32.mrb[26].mxu1  ;;  %v8283_v50 = vpop.f32.mrb[27].mxu0  ;;  %v9315_v21 = vmul.f32 0.5, %v16655_v1  ;;  %v8367_v53 = vadd.f32 %v8366_v11, %v21092_v9  ;;  %v9278_v55 = vmul.f32 0.5, %v16653_v31 }
 0x461   : > { %14583 = vmatmul.mubr.msk.f32.gmra.mrb[84].mxu0 %vm2560_vm1, %v21304_v24  ;;  %16676 = vtanh.f32 %v8207_v19  ;;  %14587 = vmatmul.mubr.msk.f32.gmra.mrb[84].mxu1 %vm2560_vm1, %v21304_v24  ;;  %v8372_v29 = vpop.f32.mrb[27].mxu1  ;;  %v16659_v5 = vpop.eup %16658  ;;  %v9317_v28 = vmul.f32 0.5, %v16657_v56  ;;  %v8282_v61 = vadd.f32 %v8281_v44, %v21097_v3  ;;  %v8371_v7 = vadd.f32 %v8370_v36, %v21097_v3 }
 0x462   : > { %10050 = vmatprep.mubr.f32.mxu0 %v23869_v40  ;;  %16678 = vtanh.f32 %v8276_v2  ;;  %10139 = vmatprep.mubr.f32.mxu1 %v23869_v40  ;;  %v16661_v45 = vpop.eup %16660  ;;  %v21549_v58 = vadd.f32 0.5, %v9315_v21  ;;  %v9316_v62 = vmul.f32 0.5, %v16659_v5  ;;  %v8284_v23 = vadd.f32 %v8283_v50, %v21097_v3 }
 0x463   : > { %15264 = vmatprep.subr.bf16.mxu0 %v15263_v54  ;;  %16680 = vtanh.f32 %v8365_v16  ;;  %15272 = vmatprep.subr.bf16.mxu1 %v15271_v57  ;;  %v16663_v25 = vpop.eup %16662  ;;  %v21552_v10 = vadd.f32 0.5, %v9317_v28  ;;  %v9318_v35 = vmul.f32 0.5, %v16661_v45  ;;  %v8287_v27 = vpop.f32.mrb[28].mxu0  ;;  %v9438_v2 = vadd.f32 0.5, %v9278_v55 }
 0x464   : > { %15266 = vmatpush1.bf16.msra.mxu0 %v15265_v59  ;;  %16682 = vtanh.f32 %v8278_v26  ;;  %15274 = vmatpush1.bf16.msra.mxu1 %v15273_v46  ;;  %v16665_v47 = vpop.eup %16664  ;;  %v15277_v0 = vpack.c.bf16 %v21549_v58, %v21535_v15  ;;  %v9355_v43 = vmul.f32 0.5, %v16663_v25  ;;  %v8373_v59 = vadd.f32 %v8372_v29, %v21097_v3  ;;  %v8289_v4 = vpop.f32.mrb[29].mxu0 }
 0x465   : > { %14584 = vmatmul.mubr.msk.f32.gmra.mrb[86].mxu0 %vm2560_vm1, %v21331_v37  ;;  %16684 = vtanh.f32 %v8367_v53  ;;  %14588 = vmatmul.mubr.msk.f32.gmra.mrb[86].mxu1 %vm2560_vm1, %v21331_v37  ;;  %v8376_v51 = vpop.f32.mrb[28].mxu1  ;;  %v9436_v46 = vadd.f32 0.5, %v9276_v60  ;;  %v15285_v19 = vpack.c.bf16 %v21552_v10, %v21541_v49  ;;  %v9357_v11 = vmul.f32 0.5, %v16665_v47 }
 0x466   : > { %10210 = vmatprep.mubr.f32.mxu0 %v23869_v40  ;;  %v16667_v52 = vpop.eup %16666  ;;  %16686 = vtanh.f32 %v8282_v61  ;;  %10299 = vmatprep.mubr.f32.mxu1 %v23869_v40  ;;  %v8378_v13 = vpop.f32.mrb[29].mxu1  ;;  %v9476_v31 = vadd.f32 0.5, %v9316_v62  ;;  %v8288_v16 = vadd.f32 %v8287_v27, %v21104_v33  ;;  %v9478_v1 = vadd.f32 0.5, %v9318_v35 }
 0x467   : > { %v16669_v22 = vpop.eup %16668  ;;  %16688 = vtanh.f32 %v8371_v7  ;;  %v21567_v26 = vadd.f32 0.5, %v9355_v43  ;;  %v8377_v60 = vadd.f32 %v8376_v51, %v21104_v33  ;;  %v8293_v54 = vpop.f32.mrb[30].mxu0  ;;  %v9356_v36 = vmul.f32 0.5, %v16667_v52 }
 0x468   : > { %v16671_v44 = vpop.eup %16670  ;;  %16690 = vtanh.f32 %v8284_v23  ;;  %v8290_v56 = vadd.f32 %v8289_v4, %v21104_v33  ;;  %v8295_v21 = vpop.f32.mrb[31].mxu0  ;;  %v21576_v29 = vadd.f32 0.5, %v9357_v11  ;;  %v8379_v55 = vadd.f32 %v8378_v13, %v21104_v33 }
 0x469   : > { %14589 = vmatmul.mubr.msk.f32.vlgmr.msra.gmra.mrb[88].mxu0 %vm2560_vm1, %v21240_v6  ;;  %v16673_v57 = vpop.eup %16672  ;;  %v9395_v50 = vmul.f32 0.5, %v16671_v44  ;;  %16692 = vtanh.f32 %v8373_v59  ;;  %14593 = vmatmul.mubr.msk.f32.vlgmr.msra.gmra.mrb[88].mxu1 %vm2560_vm1, %v21240_v6  ;;  %v8382_v49 = vpop.f32.mrb[30].mxu1  ;;  %v15275_v62 = vpack.c.bf16 %v9476_v31, %v9436_v46  ;;  %v15283_v35 = vpack.c.bf16 %v9478_v1, %v9438_v2 }
 0x46a   : > { %10216 = vmatprep.mubr.f32.mxu0 %v23869_v40  ;;  %v16675_v53 = vpop.eup %16674  ;;  %v9397_v5 = vmul.f32 0.5, %v16673_v57  ;;  %16694 = vtanh.f32 %v8288_v16  ;;  %10305 = vmatprep.mubr.f32.mxu1 %v23869_v40  ;;  %v8384_v28 = vpop.f32.mrb[31].mxu1  ;;  %v9358_v27 = vmul.f32 0.5, %v16669_v22  ;;  %v21590_v51 = vadd.f32 0.5, %v9356_v36 }
 0x46b   : > { %v16677_v61 = vpop.eup %16676  ;;  %v21580_v45 = vadd.f32 0.5, %v9395_v50  ;;  %v9396_v6 = vmul.f32 0.5, %v16675_v53  ;;  %16696 = vtanh.f32 %v8377_v60  ;;  %15276 = vmatprep.subr.bf16.mxu0 %v15275_v62  ;;  %15284 = vmatprep.subr.bf16.mxu1 %v15283_v35  ;;  %v8294_v46 = vadd.f32 %v8293_v54, %v21123_v63 }
 0x46c   : > { %v16679_v7 = vpop.eup %16678  ;;  %v21582_v25 = vadd.f32 0.5, %v9397_v5  ;;  %v9398_v10 = vmul.f32 0.5, %v16677_v61  ;;  %16698 = vtanh.f32 %v8290_v56  ;;  %15278 = vmatpush1.bf16.msra.mxu0 %v15277_v0  ;;  %15286 = vmatpush1.bf16.msra.mxu1 %v15285_v19  ;;  %v8296_v2 = vadd.f32 %v8295_v21, %v21123_v63 }
 0x46d   : > { %14590 = vmatmul.mubr.msk.f32.gmra.mrb[90].mxu0 %vm2560_vm1, %v21270_v17  ;;  %v16681_v23 = vpop.eup %16680  ;;  %v15281_v47 = vpack.c.bf16 %v21580_v45, %v21567_v26  ;;  %v9279_v43 = vmul.f32 0.5, %v16679_v7  ;;  %16700 = vtanh.f32 %v8379_v55  ;;  %14594 = vmatmul.mubr.msk.f32.gmra.mrb[90].mxu1 %vm2560_vm1, %v21270_v17  ;;  %v21598_v13 = vadd.f32 0.5, %v9396_v6 }
 0x46e   : > { %v16683_v59 = vpop.eup %16682  ;;  %v15289_v4 = vpack.c.bf16 %v21582_v25, %v21576_v29  ;;  %v9281_v52 = vmul.f32 0.5, %v16681_v23  ;;  %v21600_v22 = vadd.f32 0.5, %v9398_v10  ;;  %v8383_v17 = vadd.f32 %v8382_v49, %v21123_v63  ;;  %10222 = vmatprep.mubr.f32.mxu0 %v23869_v40  ;;  %10311 = vmatprep.mubr.f32.mxu1 %v23869_v40  ;;  %v21660_v29 = vld [vmem:[%s23528_s2 + $0x60] sm:$0xff] }
 0x46f   : > { %v16685_v11 = vpop.eup %16684  ;;  %v21605_v16 = vadd.f32 0.5, %v9279_v43  ;;  %v9280_v44 = vmul.f32 0.5, %v16683_v59  ;;  %16702 = vtanh.f32 %v8294_v46  ;;  %v8385_v15 = vadd.f32 %v8384_v28, %v21123_v63 }
 0x470   : > { %v16687_v31 = vpop.eup %16686  ;;  %v21611_v19 = vadd.f32 0.5, %v9281_v52  ;;  %16704 = vtanh.f32 %v8383_v17  ;;  %v9282_v36 = vmul.f32 0.5, %v16685_v11  ;;  %v9518_v35 = vadd.f32 0.5, %v9358_v27 }
 0x471   : > { %14591 = vmatmul.mubr.msk.f32.gmra.mrb[92].mxu0 %vm2560_vm1, %v21304_v24  ;;  %v8453_v58 = vpop.f32.mrb[32].mxu0  ;;  %v16689_v0 = vpop.eup %16688  ;;  %v9319_v1 = vmul.f32 0.5, %v16687_v31  ;;  %14595 = vmatmul.mubr.msk.f32.gmra.mrb[92].mxu1 %vm2560_vm1, %v21304_v24  ;;  %16706 = vtanh.f32 %v8296_v2  ;;  %v9440_v46 = vadd.f32 0.5, %v9280_v44 }
 0x472   : > { %v8454_v60 = vadd.f32 %v8453_v58, %v21092_v9  ;;  %10228 = vmatprep.mubr.f32.mxu0 %v23869_v40  ;;  %v8455_v54 = vpop.f32.mrb[33].mxu0  ;;  %v16691_v57 = vpop.eup %16690  ;;  %v9321_v50 = vmul.f32 0.5, %v16689_v0  ;;  %10317 = vmatprep.mubr.f32.mxu1 %v23869_v40  ;;  %16708 = vtanh.f32 %v8385_v15  ;;  %v9442_v31 = vadd.f32 0.5, %v9282_v36 }
 0x473   : > { %v8542_v56 = vpop.f32.mrb[32].mxu1  ;;  %v8456_v49 = vadd.f32 %v8455_v54, %v21092_v9  ;;  %v16693_v21 = vpop.eup %16692  ;;  %v21619_v53 = vadd.f32 0.5, %v9319_v1  ;;  %v9320_v5 = vmul.f32 0.5, %v16691_v57  ;;  %v15287_v44 = vpack.c.bf16 %v21600_v22, %v9518_v35 }
 0x474   : > { %v8543_v24 = vadd.f32 %v8542_v56, %v21092_v9  ;;  %v8544_v55 = vpop.f32.mrb[33].mxu1  ;;  %v16695_v28 = vpop.eup %16694  ;;  %v21622_v61 = vadd.f32 0.5, %v9321_v50  ;;  %v9322_v6 = vmul.f32 0.5, %v16693_v21  ;;  %16710 = vtanh.f32 %v8454_v60 }
 0x475   : > { %v8545_v62 = vadd.f32 %v8544_v55, %v21092_v9  ;;  %14592 = vmatmul.mubr.msk.f32.gmra.mrb[94].mxu0 %vm2560_vm1, %v21331_v37  ;;  %v8459_v7 = vpop.f32.mrb[34].mxu0  ;;  %v16697_v10 = vpop.eup %16696  ;;  %v15293_v23 = vpack.c.bf16 %v21619_v53, %v21605_v16  ;;  %v9359_v43 = vmul.f32 0.5, %v16695_v28  ;;  %14596 = vmatmul.mubr.msk.f32.gmra.mrb[94].mxu1 %vm2560_vm1, %v21331_v37  ;;  %v9480_v15 = vadd.f32 0.5, %v9320_v5 }
 0x476   : > { %16712 = vtanh.f32 %v8543_v24  ;;  %10388 = vmatprep.mubr.f32.mxu0 %v23869_v40  ;;  %v8461_v59 = vpop.f32.mrb[35].mxu0  ;;  %v16699_v52 = vpop.eup %16698  ;;  %v15301_v11 = vpack.c.bf16 %v21622_v61, %v21611_v19  ;;  %v9361_v17 = vmul.f32 0.5, %v16697_v10  ;;  %10477 = vmatprep.mubr.f32.mxu1 %v23869_v40  ;;  %v15279_v37 = vpack.c.bf16 %v21598_v13, %v21590_v51 }
 0x477   : > { %16714 = vtanh.f32 %v8456_v49  ;;  %v8548_v2 = vpop.f32.mrb[34].mxu1  ;;  %v16701_v27 = vpop.eup %16700  ;;  %v9482_v0 = vadd.f32 0.5, %v9322_v6  ;;  %v21637_v1 = vadd.f32 0.5, %v9359_v43  ;;  %v8460_v60 = vadd.f32 %v8459_v7, %v21097_v3  ;;  %15288 = vmatprep.subr.bf16.mxu1 %v15287_v44 }
 0x478   : > { %16716 = vtanh.f32 %v8545_v62  ;;  %v8550_v58 = vpop.f32.mrb[35].mxu1  ;;  %v9360_v57 = vmul.f32 0.5, %v16699_v52  ;;  %15280 = vmatprep.subr.bf16.mxu0 %v15279_v37  ;;  %v8549_v50 = vadd.f32 %v8548_v2, %v21097_v3  ;;  %v8462_v36 = vadd.f32 %v8461_v59, %v21097_v3  ;;  %15290 = vmatpush1.bf16.msra.mxu1 %v15289_v4 }
 0x479   : > { %v8465_v54 = vpop.f32.mrb[36].mxu0  ;;  %v8551_v56 = vadd.f32 %v8550_v58, %v21097_v3  ;;  %v16703_v21 = vpop.eup %16702  ;;  %v21644_v51 = vadd.f32 0.5, %v9361_v17  ;;  %v9362_v13 = vmul.f32 0.5, %v16701_v27  ;;  %15282 = vmatpush1.bf16.msra.mxu0 %v15281_v47  ;;  %16718 = vtanh.f32 %v8460_v60 }
 0x47a   : > { %v8467_v49 = vpop.f32.mrb[37].mxu0  ;;  %v8466_v22 = vadd.f32 %v8465_v54, %v21104_v33  ;;  %v16705_v24 = vpop.eup %16704  ;;  %v9399_v55 = vmul.f32 0.5, %v16703_v21  ;;  %16720 = vtanh.f32 %v8549_v50  ;;  %v15291_v62 = vpack.c.bf16 %v9480_v15, %v9440_v46 }
 0x47b   : > { %v8554_v5 = vpop.f32.mrb[36].mxu1  ;;  %v16707_v7 = vpop.eup %16706  ;;  %v9401_v10 = vmul.f32 0.5, %v16705_v24  ;;  %16722 = vtanh.f32 %v8462_v36  ;;  %v8468_v26 = vadd.f32 %v8467_v49, %v21104_v33  ;;  %v15299_v45 = vpack.c.bf16 %v9482_v0, %v9442_v31  ;;  %14601 = vmatmul.mubr.msk.f32.vlgmr.msra.gmra.mrb[96].mxu1 %vm2560_vm1, %v21660_v29 }
 0x47c   : > { %v8555_v28 = vadd.f32 %v8554_v5, %v21104_v33  ;;  %v8556_v6 = vpop.f32.mrb[37].mxu1  ;;  %v16709_v35 = vpop.eup %16708  ;;  %v21655_v43 = vadd.f32 0.5, %v9399_v55  ;;  %v9400_v59 = vmul.f32 0.5, %v16707_v7  ;;  %16724 = vtanh.f32 %v8551_v56  ;;  %14597 = vmatmul.mubr.msk.f32.vlgmr.msra.gmra.mrb[96].mxu0 %vm2560_vm1, %v21660_v29  ;;  %15292 = vmatprep.subr.bf16.mxu0 %v15291_v62  ;;  %v21686_v56 = vld [vmem:[%s23528_s2 + $0x68] sm:$0xff] }
 0x47d   : > { %v8471_v47 = vpop.f32.mrb[38].mxu0  ;;  %v8557_v25 = vadd.f32 %v8556_v6, %v21104_v33  ;;  %v21665_v46 = vadd.f32 0.5, %v9401_v10  ;;  %v9402_v17 = vmul.f32 0.5, %v16709_v35  ;;  %16726 = vtanh.f32 %v8466_v22  ;;  %10394 = vmatprep.mubr.f32.mxu0 %v23869_v40  ;;  %10483 = vmatprep.mubr.f32.mxu1 %v23869_v40  ;;  %v21699_v22 = vld [vmem:[%s23528_s2 + $0x70] sm:$0xff] }
 0x47e   : > { %v8473_v4 = vpop.f32.mrb[39].mxu0  ;;  %v16711_v52 = vpop.eup %16710  ;;  %v8472_v2 = vadd.f32 %v8471_v47, %v21123_v63  ;;  %v15297_v15 = vpack.c.bf16 %v21655_v43, %v21637_v1  ;;  %v9560_v37 = vadd.f32 0.5, %v9400_v59  ;;  %16728 = vtanh.f32 %v8555_v28  ;;  %15300 = vmatprep.subr.bf16.mxu1 %v15299_v45  ;;  %15294 = vmatpush1.bf16.msra.mxu0 %v15293_v23 }
 0x47f   : > { %v8560_v27 = vpop.f32.mrb[38].mxu1  ;;  %v15305_v44 = vpack.c.bf16 %v21665_v46, %v21644_v51  ;;  %v9562_v60 = vadd.f32 0.5, %v9402_v17  ;;  %16730 = vtanh.f32 %v8468_v26  ;;  %15302 = vmatpush1.bf16.msra.mxu1 %v15301_v11  ;;  %v8474_v1 = vadd.f32 %v8473_v4, %v21123_v63 }
 0x480   : > { %v16713_v31 = vpop.eup %16712  ;;  %v8562_v58 = vpop.f32.mrb[39].mxu1  ;;  %v9520_v50 = vadd.f32 0.5, %v9360_v57  ;;  %v9522_v36 = vadd.f32 0.5, %v9362_v13  ;;  %16732 = vtanh.f32 %v8557_v25  ;;  %14598 = vmatmul.mubr.msk.f32.gmra.mrb[98].mxu0 %vm2560_vm1, %v21686_v56  ;;  %v8561_v16 = vadd.f32 %v8560_v27, %v21123_v63  ;;  %14602 = vmatmul.mubr.msk.f32.gmra.mrb[98].mxu1 %vm2560_vm1, %v21686_v56 }
 0x481   : > { %v16715_v0 = vpop.eup %16714  ;;  %v9283_v53 = vmul.f32 0.5, %v16711_v52  ;;  %v9285_v23 = vmul.f32 0.5, %v16713_v31  ;;  %16734 = vtanh.f32 %v8472_v2  ;;  %10400 = vmatprep.mubr.f32.mxu0 %v23869_v40  ;;  %v8563_v19 = vadd.f32 %v8562_v58, %v21123_v63  ;;  %10489 = vmatprep.mubr.f32.mxu1 %v23869_v40 }
 0x482   : > { %v16717_v54 = vpop.eup %16716  ;;  %v9284_v61 = vmul.f32 0.5, %v16715_v0  ;;  %16736 = vtanh.f32 %v8561_v16  ;;  %v15295_v11 = vpack.c.bf16 %v9560_v37, %v9520_v50  ;;  %v15303_v57 = vpack.c.bf16 %v9562_v60, %v9522_v36  ;;  %v21728_v37 = vld [vmem:[%s23528_s2 + $0x78] sm:$0xff] }
 0x483   : > { %v16719_v49 = vpop.eup %16718  ;;  %v9286_v21 = vmul.f32 0.5, %v16717_v54  ;;  %16738 = vtanh.f32 %v8474_v1  ;;  %v21703_v24 = vadd.f32 0.5, %v9283_v53  ;;  %v21708_v6 = vadd.f32 0.5, %v9285_v23 }
 0x484   : > { %v16721_v51 = vpop.eup %16720  ;;  %v9323_v13 = vmul.f32 0.5, %v16719_v49  ;;  %16740 = vtanh.f32 %v8563_v19  ;;  %14599 = vmatmul.mubr.msk.f32.gmra.mrb[100].mxu0 %vm2560_vm1, %v21699_v22  ;;  %15296 = vmatprep.subr.bf16.mxu0 %v15295_v11  ;;  %v21710_v62 = vadd.f32 0.5, %v9284_v61 }
 0x485   : > { %v16723_v5 = vpop.eup %16722  ;;  %v9325_v55 = vmul.f32 0.5, %v16721_v51  ;;  %14603 = vmatmul.mubr.msk.f32.gmra.mrb[100].mxu1 %vm2560_vm1, %v21699_v22  ;;  %10406 = vmatprep.mubr.f32.mxu0 %v23869_v40  ;;  %v21715_v47 = vadd.f32 0.5, %v9286_v21 }
 0x486   : > { %v16725_v28 = vpop.eup %16724  ;;  %v21712_v7 = vadd.f32 0.5, %v9323_v13  ;;  %v9324_v10 = vmul.f32 0.5, %v16723_v5  ;;  %10495 = vmatprep.mubr.f32.mxu1 %v23869_v40  ;;  %15304 = vmatprep.subr.bf16.mxu1 %v15303_v57 }
 0x487   : > { %v16727_v45 = vpop.eup %16726  ;;  %v21717_v35 = vadd.f32 0.5, %v9325_v55  ;;  %v9326_v43 = vmul.f32 0.5, %v16725_v28  ;;  %15298 = vmatpush1.bf16.msra.mxu0 %v15297_v15  ;;  %15306 = vmatpush1.bf16.msra.mxu1 %v15305_v44 }
 0x488   : > { %v8631_v26 = vpop.f32.mrb[40].mxu0  ;;  %v16729_v52 = vpop.eup %16728  ;;  %v15309_v46 = vpack.c.bf16 %v21712_v7, %v21703_v24  ;;  %v21722_v17 = vadd.f32 0.5, %v9324_v10  ;;  %v9363_v2 = vmul.f32 0.5, %v16727_v45  ;;  %14600 = vmatmul.mubr.msk.f32.gmra.mrb[102].mxu0 %vm2560_vm1, %v21728_v37 }
 0x489   : > { %v8632_v59 = vadd.f32 %v8631_v26, %v21092_v9  ;;  %v8720_v25 = vpop.f32.mrb[40].mxu1  ;;  %v8633_v4 = vpop.f32.mrb[41].mxu0  ;;  %v15317_v58 = vpack.c.bf16 %v21717_v35, %v21708_v6  ;;  %v21734_v0 = vadd.f32 0.5, %v9326_v43  ;;  %v9365_v44 = vmul.f32 0.5, %v16729_v52  ;;  %14604 = vmatmul.mubr.msk.f32.gmra.mrb[102].mxu1 %vm2560_vm1, %v21728_v37  ;;  %10566 = vmatprep.mubr.f32.mxu0 %v23869_v40 }
 0x48a   : > { %v8721_v27 = vadd.f32 %v8720_v25, %v21092_v9  ;;  %v8722_v31 = vpop.f32.mrb[41].mxu1  ;;  %v16731_v15 = vpop.eup %16730  ;;  %v21739_v1 = vadd.f32 0.5, %v9363_v2  ;;  %v8634_v50 = vadd.f32 %v8633_v4, %v21092_v9  ;;  %10655 = vmatprep.mubr.f32.mxu1 %v23869_v40 }
 0x48b   : > { %16742 = vtanh.f32 %v8632_v59  ;;  %v16733_v60 = vpop.eup %16732  ;;  %v9364_v54 = vmul.f32 0.5, %v16731_v15  ;;  %v21743_v53 = vadd.f32 0.5, %v9365_v44  ;;  %v8723_v19 = vadd.f32 %v8722_v31, %v21092_v9 }
 0x48c   : > { %16744 = vtanh.f32 %v8721_v27  ;;  %v8637_v36 = vpop.f32.mrb[42].mxu0  ;;  %v16735_v16 = vpop.eup %16734  ;;  %v9366_v23 = vmul.f32 0.5, %v16733_v60  ;;  %14605 = vmatmul.mubr.msk.f32.vlgmr.msra.gmra.mrb[104].mxu0 %vm2560_vm1, %v21660_v29 }
 0x48d   : > { %v8638_v61 = vadd.f32 %v8637_v36, %v21097_v3  ;;  %v8726_v11 = vpop.f32.mrb[42].mxu1  ;;  %v8639_v57 = vpop.f32.mrb[43].mxu0  ;;  %v21747_v21 = vadd.f32 0.5, %v9364_v54  ;;  %v9403_v51 = vmul.f32 0.5, %v16735_v16  ;;  %16746 = vtanh.f32 %v8634_v50  ;;  %14609 = vmatmul.mubr.msk.f32.vlgmr.msra.gmra.mrb[104].mxu1 %vm2560_vm1, %v21660_v29  ;;  %10572 = vmatprep.mubr.f32.mxu0 %v23869_v40 }
 0x48e   : > { %v16737_v49 = vpop.eup %16736  ;;  %v8727_v13 = vadd.f32 %v8726_v11, %v21097_v3  ;;  %v8728_v5 = vpop.f32.mrb[43].mxu1  ;;  %v21752_v28 = vadd.f32 0.5, %v9366_v23  ;;  %16748 = vtanh.f32 %v8723_v19  ;;  %v8640_v26 = vadd.f32 %v8639_v57, %v21097_v3  ;;  %10661 = vmatprep.mubr.f32.mxu1 %v23869_v40 }
 0x48f   : > { %v16739_v55 = vpop.eup %16738  ;;  %v9405_v10 = vmul.f32 0.5, %v16737_v49  ;;  %v21758_v43 = vadd.f32 0.5, %v9403_v51  ;;  %16750 = vtanh.f32 %v8638_v61  ;;  %v8729_v25 = vadd.f32 %v8728_v5, %v21097_v3 }
 0x490   : > { %v16741_v45 = vpop.eup %16740  ;;  %v9404_v59 = vmul.f32 0.5, %v16739_v55  ;;  %v8643_v4 = vpop.f32.mrb[44].mxu0  ;;  %16752 = vtanh.f32 %v8727_v13  ;;  %14606 = vmatmul.mubr.msk.f32.gmra.mrb[106].mxu0 %vm2560_vm1, %v21686_v56  ;;  %v15307_v19 = vpack.c.bf16 %v21722_v17, %v21710_v62  ;;  %v15315_v61 = vpack.c.bf16 %v21734_v0, %v21715_v47 }
 0x491   : > { %v21762_v52 = vadd.f32 0.5, %v9405_v10  ;;  %v9406_v2 = vmul.f32 0.5, %v16741_v45  ;;  %v8644_v27 = vadd.f32 %v8643_v4, %v21104_v33  ;;  %v8645_v31 = vpop.f32.mrb[45].mxu0  ;;  %v15313_v15 = vpack.c.bf16 %v21758_v43, %v21739_v1  ;;  %14610 = vmatmul.mubr.msk.f32.gmra.mrb[106].mxu1 %vm2560_vm1, %v21686_v56  ;;  %10578 = vmatprep.mubr.f32.mxu0 %v23869_v40 }
 0x492   : > { %v9564_v44 = vadd.f32 0.5, %v9404_v59  ;;  %16754 = vtanh.f32 %v8640_v26  ;;  %v8732_v60 = vpop.f32.mrb[44].mxu1  ;;  %v8646_v54 = vadd.f32 %v8645_v31, %v21104_v33  ;;  %10667 = vmatprep.mubr.f32.mxu1 %v23869_v40  ;;  %15308 = vmatprep.subr.bf16.mxu0 %v15307_v19 }
 0x493   : > { %v15321_v50 = vpack.c.bf16 %v21762_v52, %v21743_v53  ;;  %v9566_v36 = vadd.f32 0.5, %v9406_v2  ;;  %16756 = vtanh.f32 %v8729_v25  ;;  %v8733_v16 = vadd.f32 %v8732_v60, %v21104_v33  ;;  %v8734_v23 = vpop.f32.mrb[45].mxu1  ;;  %15316 = vmatprep.subr.bf16.mxu1 %v15315_v61  ;;  %15310 = vmatpush1.bf16.msra.mxu0 %v15309_v46 }
 0x494   : > { %16758 = vtanh.f32 %v8644_v27  ;;  %v8735_v1 = vadd.f32 %v8734_v23, %v21104_v33  ;;  %v8649_v53 = vpop.f32.mrb[46].mxu0  ;;  %v15311_v51 = vpack.c.bf16 %v9564_v44, %v21747_v21  ;;  %15318 = vmatpush1.bf16.msra.mxu1 %v15317_v58  ;;  %14607 = vmatmul.mubr.msk.f32.gmra.mrb[108].mxu0 %vm2560_vm1, %v21699_v22 }
 0x495   : > { %v16743_v11 = vpop.eup %16742  ;;  %16760 = vtanh.f32 %v8733_v16  ;;  %v8650_v57 = vadd.f32 %v8649_v53, %v21123_v63  ;;  %v8651_v49 = vpop.f32.mrb[47].mxu0  ;;  %v15319_v13 = vpack.c.bf16 %v9566_v36, %v21752_v28  ;;  %14611 = vmatmul.mubr.msk.f32.gmra.mrb[108].mxu1 %vm2560_vm1, %v21699_v22  ;;  %10584 = vmatprep.mubr.f32.mxu0 %v23869_v40 }
 0x496   : > { %v16745_v5 = vpop.eup %16744  ;;  %v9287_v55 = vmul.f32 0.5, %v16743_v11  ;;  %16762 = vtanh.f32 %v8646_v54  ;;  %v8738_v62 = vpop.f32.mrb[46].mxu1  ;;  %v8652_v47 = vadd.f32 %v8651_v49, %v21123_v63  ;;  %10673 = vmatprep.mubr.f32.mxu1 %v23869_v40  ;;  %15312 = vmatprep.subr.bf16.mxu0 %v15311_v51 }
 0x497   : > { %v9289_v17 = vmul.f32 0.5, %v16745_v5  ;;  %16764 = vtanh.f32 %v8735_v1  ;;  %v8739_v0 = vadd.f32 %v8738_v62, %v21123_v63  ;;  %v8740_v21 = vpop.f32.mrb[47].mxu1  ;;  %v16747_v28 = vpop.eup %16746  ;;  %15320 = vmatprep.subr.bf16.mxu1 %v15319_v13  ;;  %15314 = vmatpush1.bf16.msra.mxu0 %v15313_v15 }
 0x498   : > { %16766 = vtanh.f32 %v8650_v57  ;;  %v8741_v10 = vadd.f32 %v8740_v21, %v21123_v63  ;;  %v8809_v26 = vpop.f32.mrb[48].mxu0  ;;  %v16749_v24 = vpop.eup %16748  ;;  %v21801_v46 = vadd.f32 0.5, %v9287_v55  ;;  %15322 = vmatpush1.bf16.msra.mxu1 %v15321_v50  ;;  %v9288_v27 = vmul.f32 0.5, %v16747_v28  ;;  %14608 = vmatmul.mubr.msk.f32.gmra.mrb[110].mxu0 %vm2560_vm1, %v21728_v37 }
 0x499   : > { %16768 = vtanh.f32 %v8739_v0  ;;  %v8810_v7 = vadd.f32 %v8809_v26, %v21092_v9  ;;  %v8811_v6 = vpop.f32.mrb[49].mxu0  ;;  %v16751_v35 = vpop.eup %16750  ;;  %v21804_v59 = vadd.f32 0.5, %v9289_v17  ;;  %14612 = vmatmul.mubr.msk.f32.gmra.mrb[110].mxu1 %vm2560_vm1, %v21728_v37  ;;  %10744 = vmatprep.mubr.f32.mxu0 %v23869_v40  ;;  %v9290_v57 = vmul.f32 0.5, %v16749_v24 }
 0x49a   : > { %16770 = vtanh.f32 %v8652_v47  ;;  %v8898_v58 = vpop.f32.mrb[48].mxu1  ;;  %v8812_v45 = vadd.f32 %v8811_v6, %v21092_v9  ;;  %v16753_v43 = vpop.eup %16752  ;;  %v9327_v25 = vmul.f32 0.5, %v16751_v35  ;;  %10833 = vmatprep.mubr.f32.mxu1 %v23869_v40  ;;  %v9448_v55 = vadd.f32 0.5, %v9288_v27 }
 0x49b   : > { %16772 = vtanh.f32 %v8741_v10  ;;  %v8899_v4 = vadd.f32 %v8898_v58, %v21092_v9  ;;  %v8900_v52 = vpop.f32.mrb[49].mxu1  ;;  %v9329_v31 = vmul.f32 0.5, %v16753_v43 }
 0x49c   : > { %v16755_v2 = vpop.eup %16754  ;;  %16774 = vtanh.f32 %v8810_v7  ;;  %v8901_v44 = vadd.f32 %v8900_v52, %v21092_v9  ;;  %v8815_v60 = vpop.f32.mrb[50].mxu0  ;;  %v21812_v36 = vadd.f32 0.5, %v9327_v25  ;;  %14613 = vmatmul.mubr.msk.f32.vlgmr.msra.gmra.mrb[112].mxu0 %vm2560_vm1, %v21660_v29 }
 0x49d   : > { %v16757_v54 = vpop.eup %16756  ;;  %v9328_v16 = vmul.f32 0.5, %v16755_v2  ;;  %16776 = vtanh.f32 %v8899_v4  ;;  %v8816_v15 = vadd.f32 %v8815_v60, %v21097_v3  ;;  %v8817_v50 = vpop.f32.mrb[51].mxu0  ;;  %v21817_v1 = vadd.f32 0.5, %v9329_v31  ;;  %14617 = vmatmul.mubr.msk.f32.vlgmr.msra.gmra.mrb[112].mxu1 %vm2560_vm1, %v21660_v29  ;;  %10750 = vmatprep.mubr.f32.mxu0 %v23869_v40 }
 0x49e   : > { %v16759_v23 = vpop.eup %16758  ;;  %v9330_v19 = vmul.f32 0.5, %v16757_v54  ;;  %16778 = vtanh.f32 %v8812_v45  ;;  %v8904_v61 = vpop.f32.mrb[50].mxu1  ;;  %v8818_v53 = vadd.f32 %v8817_v50, %v21097_v3  ;;  %v15325_v49 = vpack.c.bf16 %v21812_v36, %v21801_v46  ;;  %10839 = vmatprep.mubr.f32.mxu1 %v23869_v40 }
 0x49f   : > { %v16761_v11 = vpop.eup %16760  ;;  %v9367_v51 = vmul.f32 0.5, %v16759_v23  ;;  %16780 = vtanh.f32 %v8901_v44  ;;  %v8906_v13 = vpop.f32.mrb[51].mxu1  ;;  %v15333_v62 = vpack.c.bf16 %v21817_v1, %v21804_v59  ;;  %v9488_v21 = vadd.f32 0.5, %v9328_v16 }
 0x4a0   : > { %v16763_v5 = vpop.eup %16762  ;;  %v9369_v47 = vmul.f32 0.5, %v16761_v11  ;;  %16782 = vtanh.f32 %v8816_v15  ;;  %v8821_v17 = vpop.f32.mrb[52].mxu0  ;;  %v21828_v28 = vadd.f32 0.5, %v9330_v19  ;;  %v8905_v10 = vadd.f32 %v8904_v61, %v21097_v3  ;;  %14614 = vmatmul.mubr.msk.f32.gmra.mrb[114].mxu0 %vm2560_vm1, %v21686_v56 }
 0x4a1   : > { %v16765_v0 = vpop.eup %16764  ;;  %16784 = vtanh.f32 %v8818_v53  ;;  %v8823_v26 = vpop.f32.mrb[53].mxu0  ;;  %v21833_v7 = vadd.f32 0.5, %v9367_v51  ;;  %v9368_v6 = vmul.f32 0.5, %v16763_v5  ;;  %v8907_v35 = vadd.f32 %v8906_v13, %v21097_v3  ;;  %14618 = vmatmul.mubr.msk.f32.gmra.mrb[114].mxu1 %vm2560_vm1, %v21686_v56  ;;  %10756 = vmatprep.mubr.f32.mxu0 %v23869_v40 }
 0x4a2   : > { %v16767_v24 = vpop.eup %16766  ;;  %v8822_v58 = vadd.f32 %v8821_v17, %v21104_v33  ;;  %v8910_v45 = vpop.f32.mrb[52].mxu1  ;;  %v21837_v25 = vadd.f32 0.5, %v9369_v47  ;;  %16786 = vtanh.f32 %v8905_v10  ;;  %v9370_v31 = vmul.f32 0.5, %v16765_v0  ;;  %10845 = vmatprep.mubr.f32.mxu1 %v23869_v40 }
 0x4a3   : > { %v16769_v43 = vpop.eup %16768  ;;  %v9407_v4 = vmul.f32 0.5, %v16767_v24  ;;  %v8911_v52 = vadd.f32 %v8910_v45, %v21104_v33  ;;  %v8912_v2 = vpop.f32.mrb[53].mxu1  ;;  %16788 = vtanh.f32 %v8907_v35  ;;  %v8824_v60 = vadd.f32 %v8823_v26, %v21104_v33 }
 0x4a4   : > { %v16771_v27 = vpop.eup %16770  ;;  %v9409_v44 = vmul.f32 0.5, %v16769_v43  ;;  %v8827_v54 = vpop.f32.mrb[54].mxu0  ;;  %16790 = vtanh.f32 %v8822_v58  ;;  %v8913_v23 = vadd.f32 %v8912_v2, %v21104_v33  ;;  %v15323_v51 = vpack.c.bf16 %v9488_v21, %v9448_v55  ;;  %14615 = vmatmul.mubr.msk.f32.gmra.mrb[116].mxu0 %vm2560_vm1, %v21699_v22 }
 0x4a5   : > { %v16773_v16 = vpop.eup %16772  ;;  %v21845_v15 = vadd.f32 0.5, %v9407_v4  ;;  %v9408_v50 = vmul.f32 0.5, %v16771_v27  ;;  %v8829_v19 = vpop.f32.mrb[55].mxu0  ;;  %16792 = vtanh.f32 %v8911_v52  ;;  %v9450_v47 = vadd.f32 0.5, %v9290_v57  ;;  %14619 = vmatmul.mubr.msk.f32.gmra.mrb[116].mxu1 %vm2560_vm1, %v21699_v22  ;;  %10762 = vmatprep.mubr.f32.mxu0 %v23869_v40 }
 0x4a6   : > { %v16775_v61 = vpop.eup %16774  ;;  %v21850_v53 = vadd.f32 0.5, %v9409_v44  ;;  %v9410_v11 = vmul.f32 0.5, %v16773_v16  ;;  %v8916_v13 = vpop.f32.mrb[54].mxu1  ;;  %16794 = vtanh.f32 %v8824_v60  ;;  %v21854_v24 = vadd.f32 0.5, %v9368_v6  ;;  %15324 = vmatprep.subr.bf16.mxu0 %v15323_v51  ;;  %10851 = vmatprep.mubr.f32.mxu1 %v23869_v40 }
 0x4a7   : > { %v16777_v5 = vpop.eup %16776  ;;  %v15329_v17 = vpack.c.bf16 %v21845_v15, %v21833_v7  ;;  %v9291_v0 = vmul.f32 0.5, %v16775_v61  ;;  %v8918_v10 = vpop.f32.mrb[55].mxu1  ;;  %16796 = vtanh.f32 %v8913_v23  ;;  %v21860_v21 = vadd.f32 0.5, %v9370_v31  ;;  %15326 = vmatpush1.bf16.msra.mxu0 %v15325_v49 }
 0x4a8   : > { %v16779_v26 = vpop.eup %16778  ;;  %v15337_v35 = vpack.c.bf16 %v21850_v53, %v21837_v25  ;;  %v9293_v58 = vmul.f32 0.5, %v16777_v5  ;;  %v8987_v55 = vpop.f32.mrb[56].mxu0  ;;  %v9568_v45 = vadd.f32 0.5, %v9408_v50  ;;  %v15331_v43 = vpack.c.bf16 %v21828_v28, %v9450_v47  ;;  %14616 = vmatmul.mubr.msk.f32.gmra.mrb[118].mxu0 %vm2560_vm1, %v21728_v37 }
 0x4a9   : > { %v16781_v57 = vpop.eup %16780  ;;  %v8828_v6 = vadd.f32 %v8827_v54, %v21123_v63  ;;  %v8989_v4 = vpop.f32.mrb[57].mxu0  ;;  %v9570_v2 = vadd.f32 0.5, %v9410_v11  ;;  %v21869_v27 = vadd.f32 0.5, %v9291_v0  ;;  %v8917_v31 = vadd.f32 %v8916_v13, %v21123_v63  ;;  %14620 = vmatmul.mubr.msk.f32.gmra.mrb[118].mxu1 %vm2560_vm1, %v21728_v37  ;;  %10922 = vmatprep.mubr.f32.mxu0 %v23869_v40 }
 0x4aa   : > { %v16783_v52 = vpop.eup %16782  ;;  %v8830_v44 = vadd.f32 %v8829_v19, %v21123_v63  ;;  %v9076_v60 = vpop.f32.mrb[56].mxu1  ;;  %v9292_v36 = vmul.f32 0.5, %v16779_v26  ;;  %15332 = vmatprep.subr.bf16.mxu1 %v15331_v43  ;;  %v8919_v28 = vadd.f32 %v8918_v10, %v21123_v63  ;;  %v21876_v16 = vadd.f32 0.5, %v9293_v58  ;;  %11011 = vmatprep.mubr.f32.mxu1 %v23869_v40 }
 0x4ab   : > { %v16785_v46 = vpop.eup %16784  ;;  %v9331_v49 = vmul.f32 0.5, %v16783_v52  ;;  %16798 = vtanh.f32 %v8828_v6  ;;  %v9078_v54 = vpop.f32.mrb[57].mxu1  ;;  %v9294_v50 = vmul.f32 0.5, %v16781_v57  ;;  %15334 = vmatpush1.bf16.msra.mxu1 %v15333_v62  ;;  %v8988_v23 = vadd.f32 %v8987_v55, %v21092_v9 }
 0x4ac   : > { %16800 = vtanh.f32 %v8917_v31  ;;  %v8993_v19 = vpop.f32.mrb[58].mxu0  ;;  %v16787_v61 = vpop.eup %16786  ;;  %v9077_v51 = vadd.f32 %v9076_v60, %v21092_v9  ;;  %v8990_v13 = vadd.f32 %v8989_v4, %v21092_v9  ;;  %v9332_v5 = vmul.f32 0.5, %v16785_v46 }
 0x4ad   : > { %v21884_v11 = vadd.f32 0.5, %v9331_v49  ;;  %16802 = vtanh.f32 %v8830_v44  ;;  %v8995_v59 = vpop.f32.mrb[59].mxu0  ;;  %v16789_v1 = vpop.eup %16788  ;;  %v9333_v62 = vmul.f32 0.5, %v16787_v61  ;;  %v9079_v47 = vadd.f32 %v9078_v54, %v21092_v9 }
 0x4ae   : > { %16804 = vtanh.f32 %v8919_v28  ;;  %v9082_v0 = vpop.f32.mrb[58].mxu1  ;;  %v16791_v10 = vpop.eup %16790  ;;  %v9334_v58 = vmul.f32 0.5, %v16789_v1  ;;  %v15327_v55 = vpack.c.bf16 %v9568_v45, %v21854_v24  ;;  %v15335_v52 = vpack.c.bf16 %v9570_v2, %v21860_v21 }
 0x4af   : > { %v15341_v26 = vpack.c.bf16 %v21884_v11, %v21869_v27  ;;  %16806 = vtanh.f32 %v8988_v23  ;;  %v9084_v57 = vpop.f32.mrb[59].mxu1  ;;  %v16793_v43 = vpop.eup %16792  ;;  %v21896_v6 = vadd.f32 0.5, %v9333_v62  ;;  %v9371_v4 = vmul.f32 0.5, %v16791_v10 }
 0x4b0   : > { %16808 = vtanh.f32 %v9077_v51  ;;  %v8999_v9 = vpop.f32.mrb[60].mxu0  ;;  %v16795_v31 = vpop.eup %16794  ;;  %v9452_v44 = vadd.f32 0.5, %v9292_v36  ;;  %v9373_v60 = vmul.f32 0.5, %v16793_v43  ;;  %15328 = vmatprep.subr.bf16.mxu0 %v15327_v55  ;;  %v8994_v46 = vadd.f32 %v8993_v19, %v21097_v3  ;;  %15336 = vmatprep.subr.bf16.mxu1 %v15335_v52 }
 0x4b1   : > { %16810 = vtanh.f32 %v8990_v13  ;;  %v9001_v49 = vpop.f32.mrb[61].mxu0  ;;  %v16797_v28 = vpop.eup %16796  ;;  %v9454_v54 = vadd.f32 0.5, %v9294_v50  ;;  %v15349_v24 = vpack.c.bf16 %v21896_v6, %v21876_v16  ;;  %v9492_v45 = vadd.f32 0.5, %v9332_v5  ;;  %15330 = vmatpush1.bf16.msra.mxu0 %v15329_v17  ;;  %15338 = vmatpush1.bf16.msra.mxu1 %v15337_v35 }
 0x4b2   : > { %16812 = vtanh.f32 %v9079_v47  ;;  %v9088_v21 = vpop.f32.mrb[60].mxu1  ;;  %v9494_v2 = vadd.f32 0.5, %v9334_v58  ;;  %v21905_v36 = vadd.f32 0.5, %v9371_v4  ;;  %v9083_v50 = vadd.f32 %v9082_v0, %v21097_v3 }
 0x4b3   : > { %16814 = vtanh.f32 %v8994_v46  ;;  %v9090_v23 = vpop.f32.mrb[61].mxu1  ;;  %v9372_v19 = vmul.f32 0.5, %v16795_v31  ;;  %v8996_v61 = vadd.f32 %v8995_v59, %v21097_v3  ;;  %v9085_v51 = vadd.f32 %v9084_v57, %v21097_v3 }
 0x4b4   : > { %v9000_v7 = vadd.f32 %v8999_v9, %v21104_v33  ;;  %v9005_v15 = vpop.f32.mrb[62].mxu0  ;;  %v21914_v13 = vadd.f32 0.5, %v9373_v60  ;;  %v9374_v1 = vmul.f32 0.5, %v16797_v28  ;;  %16816 = vtanh.f32 %v9083_v50  ;;  %14621 = vmatmul.mubr.msk.f32.vlgmr.msra.gmra.mrb[120].mxu0 %vm2560_vm1, %v21660_v29  ;;  %14625 = vmatmul.mubr.msk.f32.vlgmr.msra.gmra.mrb[120].mxu1 %vm2560_vm1, %v21660_v29 }
 0x4b5   : > { %v16799_v17 = vpop.eup %16798  ;;  %v9089_v25 = vadd.f32 %v9088_v21, %v21104_v33  ;;  %v9007_v53 = vpop.f32.mrb[63].mxu0  ;;  %16818 = vtanh.f32 %v8996_v61  ;;  %10928 = vmatprep.mubr.f32.mxu0 %v23869_v40  ;;  %v9002_v3 = vadd.f32 %v9001_v49, %v21104_v33  ;;  %v15339_v59 = vpack.c.bf16 %v9492_v45, %v9452_v44  ;;  %11017 = vmatprep.mubr.f32.mxu1 %v23869_v40 }
 0x4b6   : > { %v16801_v35 = vpop.eup %16800  ;;  %v9411_v62 = vmul.f32 0.5, %v16799_v17  ;;  %v9094_v5 = vpop.f32.mrb[62].mxu1  ;;  %16820 = vtanh.f32 %v9085_v51  ;;  %v9091_v10 = vadd.f32 %v9090_v23, %v21104_v33  ;;  %v15347_v58 = vpack.c.bf16 %v9494_v2, %v9454_v54 }
 0x4b7   : > { %v16803_v47 = vpop.eup %16802  ;;  %v9413_v0 = vmul.f32 0.5, %v16801_v35  ;;  %v9096_v55 = vpop.f32.mrb[63].mxu1  ;;  %16822 = vtanh.f32 %v9000_v7  ;;  %15340 = vmatprep.subr.bf16.mxu0 %v15339_v59  ;;  %v9006_v52 = vadd.f32 %v9005_v15, %v21123_v63  ;;  %v9095_v60 = vadd.f32 %v9094_v5, %v21123_v63 }
 0x4b8   : > { %v16805_v57 = vpop.eup %16804  ;;  %v9571_v43 = vadd.f32 0.5, %v9411_v62  ;;  %v9412_v4 = vmul.f32 0.5, %v16803_v47  ;;  %16824 = vtanh.f32 %v9089_v25  ;;  %14622 = vmatmul.mubr.msk.f32.gmra.mrb[122].mxu0 %vm2560_vm1, %v21686_v56  ;;  %15348 = vmatprep.subr.bf16.mxu1 %v15347_v58  ;;  %v9008_v28 = vadd.f32 %v9007_v53, %v21123_v63 }
 0x4b9   : > { %v16807_v9 = vpop.eup %16806  ;;  %v9573_v31 = vadd.f32 0.5, %v9413_v0  ;;  %v9414_v44 = vmul.f32 0.5, %v16805_v57  ;;  %16826 = vtanh.f32 %v9002_v3  ;;  %14626 = vmatmul.mubr.msk.f32.gmra.mrb[122].mxu1 %vm2560_vm1, %v21686_v56  ;;  %15342 = vmatpush1.bf16.msra.mxu0 %v15341_v26  ;;  %v9532_v45 = vadd.f32 0.5, %v9372_v19 }
 0x4ba   : > { %v16809_v33 = vpop.eup %16808  ;;  %v15345_v46 = vpack.c.bf16 %v9571_v43, %v21905_v36  ;;  %v9572_v49 = vadd.f32 0.5, %v9412_v4  ;;  %16828 = vtanh.f32 %v9091_v10  ;;  %15350 = vmatpush1.bf16.msra.mxu1 %v15349_v24  ;;  %10934 = vmatprep.mubr.f32.mxu0 %v23869_v40  ;;  %v9534_v50 = vadd.f32 0.5, %v9374_v1 }
 0x4bb   : > { %v16811_v54 = vpop.eup %16810  ;;  %v15353_v21 = vpack.c.bf16 %v9573_v31, %v21914_v13  ;;  %v9574_v2 = vadd.f32 0.5, %v9414_v44  ;;  %v9295_v23 = vmul.f32 0.5, %v16807_v9  ;;  %16830 = vtanh.f32 %v9006_v52  ;;  %11023 = vmatprep.mubr.f32.mxu1 %v23869_v40 }
 0x4bc   : > { %v16813_v36 = vpop.eup %16812  ;;  %v9097_v27 = vadd.f32 %v9096_v55, %v21123_v63  ;;  %16832 = vtanh.f32 %v9095_v60  ;;  %14623 = vmatmul.mubr.msk.f32.gmra.mrb[124].mxu0 %vm2560_vm1, %v21699_v22  ;;  %v15343_v26 = vpack.c.bf16 %v9572_v49, %v9532_v45  ;;  %v9297_v19 = vmul.f32 0.5, %v16809_v33 }
 0x4bd   : > { %v16815_v11 = vpop.eup %16814  ;;  %16834 = vtanh.f32 %v9008_v28  ;;  %14627 = vmatmul.mubr.msk.f32.gmra.mrb[124].mxu1 %vm2560_vm1, %v21699_v22  ;;  %10940 = vmatprep.mubr.f32.mxu0 %v23869_v40  ;;  %v15351_v16 = vpack.c.bf16 %v9574_v2, %v9534_v50  ;;  %v9296_v24 = vmul.f32 0.5, %v16811_v54  ;;  %v9455_v51 = vadd.f32 0.5, %v9295_v23 }
 0x4be   : > { %v9335_v61 = vmul.f32 0.5, %v16815_v11  ;;  %v16817_v6 = vpop.eup %16816  ;;  %16836 = vtanh.f32 %v9097_v27  ;;  %11029 = vmatprep.mubr.f32.mxu1 %v23869_v40  ;;  %15344 = vmatprep.subr.bf16.mxu0 %v15343_v26  ;;  %v9298_v7 = vmul.f32 0.5, %v16813_v36  ;;  %v9457_v53 = vadd.f32 0.5, %v9297_v19 }
 0x4bf   : > { %v16819_v63 = vpop.eup %16818  ;;  %v9337_v17 = vmul.f32 0.5, %v16817_v6  ;;  %15352 = vmatprep.subr.bf16.mxu1 %v15351_v16  ;;  %15346 = vmatpush1.bf16.msra.mxu0 %v15345_v46  ;;  %v9456_v5 = vadd.f32 0.5, %v9296_v24  ;;  %v17188_v24 = vld [vmem:[%s23528_s2 + $0x60] sm:$0xff] }
 0x4c0   : > { %v9495_v15 = vadd.f32 0.5, %v9335_v61  ;;  %v16821_v13 = vpop.eup %16820  ;;  %v9336_v1 = vmul.f32 0.5, %v16819_v63  ;;  %14624 = vmatmul.mubr.msk.f32.gmra.mrb[126].mxu0 %vm2560_vm1, %v21728_v37  ;;  %15354 = vmatpush1.bf16.msra.mxu1 %v15353_v21  ;;  %v9458_v10 = vadd.f32 0.5, %v9298_v7 }
 0x4c1   : > { %v16823_v25 = vpop.eup %16822  ;;  %v9497_v62 = vadd.f32 0.5, %v9337_v17  ;;  %v9338_v3 = vmul.f32 0.5, %v16821_v13  ;;  %14628 = vmatmul.mubr.msk.f32.gmra.mrb[126].mxu1 %vm2560_vm1, %v21728_v37  ;;  %11100 = vmatprep.mubr.f32.mxu0 %v23869_v40 }
 0x4c2   : > { %v15357_v35 = vpack.c.bf16 %v9495_v15, %v9455_v51  ;;  %v16825_v59 = vpop.eup %16824  ;;  %v9496_v47 = vadd.f32 0.5, %v9336_v1  ;;  %11189 = vmatprep.mubr.f32.mxu1 %v23869_v40  ;;  %v9375_v43 = vmul.f32 0.5, %v16823_v25  ;;  %v22009_v1 = vpop.permute.xlu0 %9589 }
 0x4c3   : > { %v16827_v0 = vpop.eup %16826  ;;  %v15365_v58 = vpack.c.bf16 %v9497_v62, %v9457_v53  ;;  %v9498_v55 = vadd.f32 0.5, %v9338_v3  ;;  %v9377_v9 = vmul.f32 0.5, %v16825_v59 }
 0x4c4   : > { %v16829_v57 = vpop.eup %16828  ;;  %14629 = vmatmul.mubr.msk.f32.vlgmr.msra.gmra.mrb[128].mxu0 %vm2560_vm1, %v21660_v29  ;;  %v15355_v4 = vpack.c.bf16 %v9496_v47, %v9456_v5  ;;  %v9376_v60 = vmul.f32 0.5, %v16827_v0  ;;  %v9535_v45 = vadd.f32 0.5, %v9375_v43 }
 0x4c5   : > { %v16831_v52 = vpop.eup %16830  ;;  %14633 = vmatmul.mubr.msk.f32.vlgmr.msra.gmra.mrb[128].mxu1 %vm2560_vm1, %v21660_v29  ;;  %11106 = vmatprep.mubr.f32.mxu0 %v23869_v40  ;;  %v15363_v31 = vpack.c.bf16 %v9498_v55, %v9458_v10  ;;  %v9378_v49 = vmul.f32 0.5, %v16829_v57  ;;  %v9537_v29 = vadd.f32 0.5, %v9377_v9 }
 0x4c6   : > { %v16833_v44 = vpop.eup %16832  ;;  %v9415_v33 = vmul.f32 0.5, %v16831_v52  ;;  %11195 = vmatprep.mubr.f32.mxu1 %v23869_v40  ;;  %15356 = vmatprep.subr.bf16.mxu0 %v15355_v4  ;;  %v9536_v23 = vadd.f32 0.5, %v9376_v60 }
 0x4c7   : > { %v16835_v46 = vpop.eup %16834  ;;  %v9417_v28 = vmul.f32 0.5, %v16833_v44  ;;  %15364 = vmatprep.subr.bf16.mxu1 %v15363_v31  ;;  %15358 = vmatpush1.bf16.msra.mxu0 %v15357_v35  ;;  %v9538_v26 = vadd.f32 0.5, %v9378_v49 }
 0x4c8   : > { %v16837_v54 = vpop.eup %16836  ;;  %v9575_v21 = vadd.f32 0.5, %v9415_v33  ;;  %v9416_v2 = vmul.f32 0.5, %v16835_v46  ;;  %14630 = vmatmul.mubr.msk.f32.gmra.mrb[130].mxu0 %vm2560_vm1, %v21686_v56  ;;  %15366 = vmatpush1.bf16.msra.mxu1 %v15365_v58 }
 0x4c9   : > { %v9577_v36 = vadd.f32 0.5, %v9417_v28  ;;  %v9418_v50 = vmul.f32 0.5, %v16837_v54  ;;  %14634 = vmatmul.mubr.msk.f32.gmra.mrb[130].mxu1 %vm2560_vm1, %v21686_v56  ;;  %11112 = vmatprep.mubr.f32.mxu0 %v23869_v40 }
 0x4ca   : > { %v15361_v27 = vpack.c.bf16 %v9575_v21, %v9535_v45  ;;  %v9576_v11 = vadd.f32 0.5, %v9416_v2  ;;  %11201 = vmatprep.mubr.f32.mxu1 %v23869_v40 }
 0x4cb   : > { %v15369_v19 = vpack.c.bf16 %v9577_v36, %v9537_v29  ;;  %v9578_v61 = vadd.f32 0.5, %v9418_v50 }
 0x4cc   : > { %14631 = vmatmul.mubr.msk.f32.gmra.mrb[132].mxu0 %vm2560_vm1, %v21699_v22  ;;  %v15359_v16 = vpack.c.bf16 %v9576_v11, %v9536_v23 }
 0x4cd   : > { %14635 = vmatmul.mubr.msk.f32.gmra.mrb[132].mxu1 %vm2560_vm1, %v21699_v22  ;;  %11118 = vmatprep.mubr.f32.mxu0 %v23869_v40  ;;  %v15367_v6 = vpack.c.bf16 %v9578_v61, %v9538_v26 }
 0x4ce   : > { %11207 = vmatprep.mubr.f32.mxu1 %v23869_v40  ;;  %15360 = vmatprep.subr.bf16.mxu0 %v15359_v16 }
 0x4cf   : > { %15368 = vmatprep.subr.bf16.mxu1 %v15367_v6  ;;  %15362 = vmatpush1.bf16.msra.mxu0 %v15361_v27 }
 0x4d0   : > { %14632 = vmatmul.mubr.msk.f32.gmra.mrb[134].mxu0 %vm2560_vm1, %v21728_v37  ;;  %15370 = vmatpush1.bf16.msra.mxu1 %v15369_v19 }
 0x4d1   : > { %14636 = vmatmul.mubr.msk.f32.gmra.mrb[134].mxu1 %vm2560_vm1, %v21728_v37  ;;  %11278 = vmatprep.mubr.f32.mxu0 %v23869_v40 }
 0x4d2   : > { %11367 = vmatprep.mubr.f32.mxu1 %v23869_v40 }
 0x4d4   : > { %14637 = vmatmul.mubr.msk.f32.vlgmr.msra.gmra.mrb[136].mxu0 %vm2560_vm1, %v17188_v24 }
 0x4d5   : > { %14641 = vmatmul.mubr.msk.f32.vlgmr.msra.gmra.mrb[136].mxu1 %vm2560_vm1, %v17188_v24  ;;  %11284 = vmatprep.mubr.f32.mxu0 %v23869_v40  ;;  %v24314_v24 = vld [vmem:[#allocation149_spill] sm:$0xff] }
 0x4d6   : > { %11373 = vmatprep.mubr.f32.mxu1 %v23869_v40 }
 0x4d8   : > { %14638 = vmatmul.mubr.msk.f32.gmra.mrb[138].mxu0 %vm2560_vm1, %v21686_v56 }
 0x4d9   : > { %14642 = vmatmul.mubr.msk.f32.gmra.mrb[138].mxu1 %vm2560_vm1, %v21686_v56  ;;  %11290 = vmatprep.mubr.f32.mxu0 %v23869_v40  ;;  %v22004_v56 = vpop.permute.xlu1 %9585 }
 0x4da   : > { %11379 = vmatprep.mubr.f32.mxu1 %v23869_v40 }
 0x4dc   : > { %14639 = vmatmul.mubr.msk.f32.gmra.mrb[140].mxu0 %vm2560_vm1, %v21699_v22 }
 0x4dd   : > { %14643 = vmatmul.mubr.msk.f32.gmra.mrb[140].mxu1 %vm2560_vm1, %v21699_v22  ;;  %11296 = vmatprep.mubr.f32.mxu0 %v23869_v40  ;;  %v22013_v3 = vpop.permute.xlu1 %9593 }
 0x4de   : > { %11385 = vmatprep.mubr.f32.mxu1 %v23869_v40 }
 0x4e0   : > { %14640 = vmatmul.mubr.msk.f32.gmra.mrb[142].mxu0 %vm2560_vm1, %v21728_v37 }
 0x4e1   : > { %14644 = vmatmul.mubr.msk.f32.gmra.mrb[142].mxu1 %vm2560_vm1, %v21728_v37  ;;  %12286 = vmatprep.mubr.f32.mxu0 %v23869_v40  ;;  %v22022_v31 = vpop.permute.xlu1 %9597 }
 0x4e2   : > { %12369 = vmatprep.mubr.f32.mxu1 %v23869_v40 }
 0x503   : > { %v9678_v63 = vpop.f32.mrb[64].mxu0 }
 0x504   : > { %v9679_v51 = vadd.f32 %v9678_v63, %v22004_v56  ;;  %v9767_v22 = vpop.f32.mrb[64].mxu1  ;;  %v9680_v7 = vpop.f32.mrb[65].mxu0 }
 0x505   : > { %v9768_v15 = vadd.f32 %v9767_v22, %v22004_v56  ;;  %v9681_v17 = vadd.f32 %v9680_v7, %v22004_v56  ;;  %v9769_v13 = vpop.f32.mrb[65].mxu1 }
 0x506   : > { %16838 = vtanh.f32 %v9679_v51  ;;  %v9770_v37 = vadd.f32 %v9769_v13, %v22004_v56  ;;  %v24315_v13 = vld [vmem:[#allocation151_spill] sm:$0xff] }
 0x507   : > { %16840 = vtanh.f32 %v9768_v15  ;;  %v9684_v25 = vpop.f32.mrb[66].mxu0 }
 0x508   : > { %16842 = vtanh.f32 %v9681_v17  ;;  %v9685_v53 = vadd.f32 %v9684_v25, %v22009_v1  ;;  %v9773_v35 = vpop.f32.mrb[66].mxu1  ;;  %v9686_v62 = vpop.f32.mrb[67].mxu0 }
 0x509   : > { %16844 = vtanh.f32 %v9770_v37  ;;  %v9774_v59 = vadd.f32 %v9773_v35, %v22009_v1  ;;  %v9687_v5 = vadd.f32 %v9686_v62, %v22009_v1  ;;  %v9775_v47 = vpop.f32.mrb[67].mxu1 }
 0x50a   : > { %16846 = vtanh.f32 %v9685_v53  ;;  %v9776_v0 = vadd.f32 %v9775_v47, %v22009_v1  ;;  %v24316_v47 = vld [vmem:[#allocation150_spill] sm:$0xff] }
 0x50b   : > { %16848 = vtanh.f32 %v9774_v59  ;;  %v9690_v10 = vpop.f32.mrb[68].mxu0 }
 0x50c   : > { %16850 = vtanh.f32 %v9687_v5  ;;  %v9691_v58 = vadd.f32 %v9690_v10, %v22013_v3  ;;  %v9779_v55 = vpop.f32.mrb[68].mxu1  ;;  %v9692_v57 = vpop.f32.mrb[69].mxu0 }
 0x50d   : > { %16852 = vtanh.f32 %v9776_v0  ;;  %v9780_v43 = vadd.f32 %v9779_v55, %v22013_v3  ;;  %v9693_v4 = vadd.f32 %v9692_v57, %v22013_v3  ;;  %v9781_v52 = vpop.f32.mrb[69].mxu1 }
 0x50e   : > { %16854 = vtanh.f32 %v9691_v58  ;;  %v9782_v9 = vadd.f32 %v9781_v52, %v22013_v3 }
 0x50f   : > { %16856 = vtanh.f32 %v9780_v43  ;;  %v9696_v44 = vpop.f32.mrb[70].mxu0  ;;  %v24317_v43 = vld [vmem:[#allocation152_spill] sm:$0xff] }
 0x510   : > { %v16839_v60 = vpop.eup %16838  ;;  %16858 = vtanh.f32 %v9693_v4  ;;  %v9697_v33 = vadd.f32 %v9696_v44, %v22022_v31  ;;  %v9785_v46 = vpop.f32.mrb[70].mxu1 }
 0x511   : > { %v9698_v49 = vpop.f32.mrb[71].mxu0  ;;  %v16841_v28 = vpop.eup %16840  ;;  %v11552_v54 = vmul.f32 0.5, %v16839_v60  ;;  %16860 = vtanh.f32 %v9782_v9  ;;  %v9786_v45 = vadd.f32 %v9785_v46, %v22022_v31 }
 0x512   : > { %v9699_v21 = vadd.f32 %v9698_v49, %v22022_v31  ;;  %v9787_v2 = vpop.f32.mrb[71].mxu1  ;;  %v16843_v29 = vpop.eup %16842  ;;  %v11554_v36 = vmul.f32 0.5, %v16841_v28  ;;  %16862 = vtanh.f32 %v9697_v33  ;;  %v24318_v33 = vld [vmem:[#allocation153_spill] sm:$0xff] }
 0x513   : > { %v9788_v50 = vadd.f32 %v9787_v2, %v22022_v31  ;;  %v16845_v23 = vpop.eup %16844  ;;  %v11712_v27 = vadd.f32 0.5, %v11552_v54  ;;  %v11553_v11 = vmul.f32 0.5, %v16843_v29  ;;  %16864 = vtanh.f32 %v9786_v45  ;;  %v24319_v2 = vld [vmem:[#allocation154_spill] sm:$0xff] }
 0x514   : > { %v16847_v26 = vpop.eup %16846  ;;  %v11714_v19 = vadd.f32 0.5, %v11554_v36  ;;  %v11555_v61 = vmul.f32 0.5, %v16845_v23  ;;  %16866 = vtanh.f32 %v9699_v21  ;;  %v9856_v16 = vpop.f32.mrb[72].mxu0 }
 0x515   : > { %v16849_v6 = vpop.eup %16848  ;;  %v11872_v63 = vadd.f32 %v11712_v27, %v24314_v24  ;;  %v11713_v51 = vadd.f32 0.5, %v11553_v11  ;;  %v11592_v22 = vmul.f32 0.5, %v16847_v26  ;;  %16868 = vtanh.f32 %v9788_v50  ;;  %v9945_v7 = vpop.f32.mrb[72].mxu1 }
 0x516   : > { %v9858_v15 = vpop.f32.mrb[73].mxu0  ;;  %v16851_v17 = vpop.eup %16850  ;;  %v11874_v37 = vadd.f32 %v11714_v19, %v24315_v13  ;;  %v11715_v25 = vadd.f32 0.5, %v11555_v61  ;;  %v11594_v53 = vmul.f32 0.5, %v16849_v6  ;;  %v9857_v35 = vadd.f32 %v9856_v16, %v22004_v56  ;;  %v24320_v19 = vld [vmem:[#allocation156_spill] sm:$0xff] }
 0x517   : > { %v9947_v62 = vpop.f32.mrb[73].mxu1  ;;  %v16853_v59 = vpop.eup %16852  ;;  %v22031_v5 = vmul.f32 0.5, %v11872_v63  ;;  %v22034_v0 = vadd.f32 %v11713_v51, %v24316_v47  ;;  %v11752_v10 = vadd.f32 0.5, %v11592_v22  ;;  %v11593_v58 = vmul.f32 0.5, %v16851_v17  ;;  %v24321_v51 = vld [vmem:[#allocation157_spill] sm:$0xff] }
 0x518   : > { %v16855_v55 = vpop.eup %16854  ;;  %v22036_v57 = vmul.f32 0.5, %v11874_v37  ;;  %v22039_v4 = vadd.f32 %v11715_v25, %v24317_v43  ;;  %v11754_v52 = vadd.f32 0.5, %v11594_v53  ;;  %v11595_v9 = vmul.f32 0.5, %v16853_v59  ;;  %v9862_v44 = vpop.f32.mrb[74].mxu0 }
 0x519   : > { %v16857_v60 = vpop.eup %16856  ;;  %v11912_v46 = vadd.f32 %v11752_v10, %v24318_v33  ;;  %v11753_v49 = vadd.f32 0.5, %v11593_v58  ;;  %v11632_v28 = vmul.f32 0.5, %v16855_v55  ;;  %16870 = vtanh.f32 %v9857_v35  ;;  %v9951_v54 = vpop.f32.mrb[74].mxu1  ;;  %v24323_v55 = vld [vmem:[#allocation158_spill] sm:$0xff] }
 0x51a   : > { %v9864_v45 = vpop.f32.mrb[75].mxu0  ;;  %v16859_v21 = vpop.eup %16858  ;;  %v11914_v29 = vadd.f32 %v11754_v52, %v24319_v2  ;;  %v11755_v36 = vadd.f32 0.5, %v11595_v9  ;;  %v11634_v50 = vmul.f32 0.5, %v16857_v60  ;;  %v9946_v23 = vadd.f32 %v9945_v7, %v22004_v56  ;;  %v24322_v7 = vld [vmem:[#allocation155_spill] sm:$0xff] }
 0x51b   : > { %v9953_v27 = vpop.f32.mrb[75].mxu1  ;;  %v16861_v11 = vpop.eup %16860  ;;  %v22044_v26 = vmul.f32 0.5, %v11912_v46  ;;  %v22047_v61 = vadd.f32 %v11753_v49, %v24320_v19  ;;  %v11792_v16 = vadd.f32 0.5, %v11632_v28  ;;  %v11633_v6 = vmul.f32 0.5, %v16859_v21  ;;  %v24324_v28 = vld [vmem:[#allocation4_spill] sm:$0xff] }
 0x51c   : > { %v16863_v24 = vpop.eup %16862  ;;  %v22049_v63 = vmul.f32 0.5, %v11914_v29  ;;  %v22052_v22 = vadd.f32 %v11755_v36, %v24321_v51  ;;  %v11794_v17 = vadd.f32 0.5, %v11634_v50  ;;  %v11635_v13 = vmul.f32 0.5, %v16861_v11  ;;  %v9868_v37 = vpop.f32.mrb[76].mxu0  ;;  %v24325_v50 = vld [vmem:[#allocation6_spill] sm:$0xff] }
 0x51d   : > { %v16865_v25 = vpop.eup %16864  ;;  %v11952_v53 = vadd.f32 %v11792_v16, %v24322_v7  ;;  %v11793_v35 = vadd.f32 0.5, %v11633_v6  ;;  %v11672_v59 = vmul.f32 0.5, %v16863_v24  ;;  %16872 = vtanh.f32 %v9946_v23  ;;  %v9957_v47 = vpop.f32.mrb[76].mxu1  ;;  %v24326_v6 = vld [vmem:[#allocation159_spill] sm:$0xff] }
 0x51e   : > { %v9870_v10 = vpop.f32.mrb[77].mxu0  ;;  %v16867_v58 = vpop.eup %16866  ;;  %v11954_v43 = vadd.f32 %v11794_v17, %v24323_v55  ;;  %v11795_v52 = vadd.f32 0.5, %v11635_v13  ;;  %v11674_v9 = vmul.f32 0.5, %v16865_v25  ;;  %v9859_v60 = vadd.f32 %v9858_v15, %v22004_v56  ;;  %v24327_v25 = vld [vmem:[#allocation2_spill] sm:$0xff] }
 0x51f   : > { %v9959_v33 = vpop.f32.mrb[77].mxu1  ;;  %v16869_v46 = vpop.eup %16868  ;;  %v22057_v49 = vmul.f32 0.5, %v11952_v53  ;;  %v22060_v21 = vadd.f32 %v11793_v35, %v24324_v28  ;;  %v11832_v2 = vadd.f32 0.5, %v11672_v59  ;;  %v11673_v29 = vmul.f32 0.5, %v16867_v58 }
 0x520   : > { %v22062_v36 = vmul.f32 0.5, %v11954_v43  ;;  %v22065_v23 = vadd.f32 %v11795_v52, %v24325_v50  ;;  %v11834_v11 = vadd.f32 0.5, %v11674_v9  ;;  %v11675_v19 = vmul.f32 0.5, %v16869_v46  ;;  %v9874_v16 = vpop.f32.mrb[78].mxu0  ;;  %v24328_v52 = vld [vmem:[#allocation5_spill] sm:$0xff]  ;;  %v24329_v46 = vld [vmem:[#allocation7_spill] sm:$0xff] }
 0x521   : > { %v11992_v24 = vadd.f32 %v11832_v2, %v24326_v6  ;;  %v11833_v15 = vadd.f32 0.5, %v11673_v29  ;;  %16874 = vtanh.f32 %v9859_v60  ;;  %v9948_v51 = vadd.f32 %v9947_v62, %v22004_v56  ;;  %v9963_v17 = vpop.f32.mrb[78].mxu1  ;;  %v9876_v13 = vpop.f32.mrb[79].mxu0 }
 0x522   : > { %v11994_v7 = vadd.f32 %v11834_v11, %v24327_v25  ;;  %v11835_v53 = vadd.f32 0.5, %v11675_v19  ;;  %v9863_v35 = vadd.f32 %v9862_v44, %v22009_v1  ;;  %v9952_v59 = vadd.f32 %v9951_v54, %v22009_v1  ;;  %v9965_v58 = vpop.f32.mrb[79].mxu1 }
 0x523   : > { %v16871_v55 = vpop.eup %16870  ;;  %v22072_v43 = vmul.f32 0.5, %v11992_v24  ;;  %v22075_v9 = vadd.f32 %v11833_v15, %v24328_v52  ;;  %16876 = vtanh.f32 %v9948_v51  ;;  %v9865_v60 = vadd.f32 %v9864_v45, %v22009_v1  ;;  %v24330_v51 = vld [vmem:[#allocation3_spill] sm:$0xff] }
 0x524   : > { %v22078_v62 = vmul.f32 0.5, %v11994_v7  ;;  %v22081_v28 = vadd.f32 %v11835_v53, %v24329_v46  ;;  %v11556_v2 = vmul.f32 0.5, %v16871_v55  ;;  %16878 = vtanh.f32 %v9863_v35 }
 0x525   : > { %16880 = vtanh.f32 %v9952_v59  ;;  %v9954_v44 = vadd.f32 %v9953_v27, %v22009_v1  ;;  %v9869_v54 = vadd.f32 %v9868_v37, %v22013_v3  ;;  %v9958_v29 = vadd.f32 %v9957_v47, %v22013_v3 }
 0x526   : > { %v11716_v50 = vadd.f32 0.5, %v11556_v2  ;;  %16882 = vtanh.f32 %v9865_v60  ;;  %v9871_v11 = vadd.f32 %v9870_v10, %v22013_v3  ;;  %v9960_v45 = vadd.f32 %v9959_v33, %v22013_v3 }
 0x527   : > { %v16873_v19 = vpop.eup %16872  ;;  %16884 = vtanh.f32 %v9954_v44  ;;  %v9875_v6 = vadd.f32 %v9874_v16, %v22022_v31  ;;  %v9964_v24 = vadd.f32 %v9963_v17, %v22022_v31  ;;  %v9877_v15 = vadd.f32 %v9876_v13, %v22022_v31 }
 0x528   : > { %v11876_v27 = vadd.f32 %v11716_v50, %v24330_v51  ;;  %v11558_v25 = vmul.f32 0.5, %v16873_v19  ;;  %16886 = vtanh.f32 %v9869_v54  ;;  %v9966_v37 = vadd.f32 %v9965_v58, %v22022_v31  ;;  %v24331_v58 = vld [vmem:[#allocation8_spill] sm:$0xff] }
 0x529   : > { %16888 = vtanh.f32 %v9958_v29  ;;  %v12033_v47 = vmul.f32 0.5, %v22034_v0  ;;  %v12073_v10 = vmul.f32 0.5, %v22047_v61  ;;  %v12035_v33 = vmul.f32 0.5, %v22039_v4 }
 0x52a   : > { %v22096_v7 = vmul.f32 0.5, %v11876_v27  ;;  %v11718_v16 = vadd.f32 0.5, %v11558_v25  ;;  %16890 = vtanh.f32 %v9871_v11  ;;  %v12075_v17 = vmul.f32 0.5, %v22052_v22 }
 0x52b   : > { %v16875_v13 = vpop.eup %16874  ;;  %16892 = vtanh.f32 %v9960_v45  ;;  %v15371_v53 = vpack.c.bf16 %v12073_v10, %v12033_v47  ;;  %v15373_v35 = vpack.c.bf16 %v22044_v26, %v22031_v5  ;;  %v15381_v59 = vpack.c.bf16 %v22049_v63, %v22036_v57  ;;  %v10034_v0 = vpop.f32.mrb[80].mxu0 }
 0x52c   : > { %v11878_v61 = vadd.f32 %v11718_v16, %v24331_v58  ;;  %v11557_v55 = vmul.f32 0.5, %v16875_v13  ;;  %16894 = vtanh.f32 %v9875_v6  ;;  %v15379_v4 = vpack.c.bf16 %v12075_v17, %v12035_v33  ;;  %v10123_v52 = vpop.f32.mrb[80].mxu1  ;;  %v10036_v60 = vpop.f32.mrb[81].mxu0  ;;  %v24334_v58 = vld [vmem:[#allocation9_spill] sm:$0xff] }
 0x52d   : > { %v16877_v46 = vpop.eup %16876  ;;  %16896 = vtanh.f32 %v9964_v24  ;;  %15372 = vmatprep.subr.bf16.mxu0 %v15371_v53  ;;  %v10035_v22 = vadd.f32 %v10034_v0, %v22004_v56  ;;  %v10124_v2 = vadd.f32 %v10123_v52, %v22004_v56  ;;  %v10037_v5 = vadd.f32 %v10036_v60, %v22004_v56  ;;  %v10125_v26 = vpop.f32.mrb[81].mxu1  ;;  %v24332_v24 = vld [vmem:[#allocation12_spill] sm:$0xff] }
 0x52e   : > { %v16879_v44 = vpop.eup %16878  ;;  %v22107_v57 = vmul.f32 0.5, %v11878_v61  ;;  %v11717_v63 = vadd.f32 0.5, %v11557_v55  ;;  %v11559_v54 = vmul.f32 0.5, %v16877_v46  ;;  %16898 = vtanh.f32 %v9877_v15  ;;  %15380 = vmatprep.subr.bf16.mxu1 %v15379_v4  ;;  %15374 = vmatpush1.bf16.msra.mxu0 %v15373_v35  ;;  %v24335_v46 = vld [vmem:[#allocation10_spill] sm:$0xff] }
 0x52f   : > { %v16881_v29 = vpop.eup %16880  ;;  %v11596_v50 = vmul.f32 0.5, %v16879_v44  ;;  %16900 = vtanh.f32 %v9966_v37  ;;  %15382 = vmatpush1.bf16.msra.mxu1 %v15381_v59  ;;  %v10126_v11 = vadd.f32 %v10125_v26, %v22004_v56  ;;  %v22111_v19 = vmul.f32 0.5, %v22060_v21  ;;  %v24333_v21 = vld [vmem:[#allocation15_spill] sm:$0xff] }
 0x530   : > { %v10040_v45 = vpop.f32.mrb[82].mxu0  ;;  %v16883_v6 = vpop.eup %16882  ;;  %v22114_v51 = vadd.f32 %v11717_v63, %v24332_v24  ;;  %v11719_v27 = vadd.f32 0.5, %v11559_v54  ;;  %v11598_v25 = vmul.f32 0.5, %v16881_v29  ;;  %16902 = vtanh.f32 %v10035_v22  ;;  %v24336_v29 = vld [vmem:[#allocation13_spill] sm:$0xff] }
 0x531   : > { %v10129_v15 = vpop.f32.mrb[82].mxu1  ;;  %v10042_v47 = vpop.f32.mrb[83].mxu0  ;;  %v11756_v33 = vadd.f32 0.5, %v11596_v50  ;;  %v11597_v16 = vmul.f32 0.5, %v16883_v6  ;;  %16904 = vtanh.f32 %v10124_v2  ;;  %v10041_v37 = vadd.f32 %v10040_v45, %v22009_v1 }
 0x532   : > { %v16885_v10 = vpop.eup %16884  ;;  %v22117_v17 = vpop.f32.mrb[83].mxu1  ;;  %v22120_v53 = vadd.f32 %v11719_v27, %v24333_v21  ;;  %v11758_v35 = vadd.f32 0.5, %v11598_v25  ;;  %16906 = vtanh.f32 %v10037_v5  ;;  %v24337_v25 = vld [vmem:[#allocation16_spill] sm:$0xff]  ;;  %v12115_v14 = vmul.f32 0.5, %v22065_v23 }
 0x533   : > { %v16887_v13 = vpop.eup %16886  ;;  %v11599_v59 = vmul.f32 0.5, %v16885_v10  ;;  %v11916_v61 = vadd.f32 %v11756_v33, %v24334_v58  ;;  %v11757_v55 = vadd.f32 0.5, %v11597_v16  ;;  %16908 = vtanh.f32 %v10126_v11 }
 0x534   : > { %v16889_v0 = vpop.eup %16888  ;;  %v11636_v4 = vmul.f32 0.5, %v16887_v13  ;;  %v22123_v52 = vpop.f32.mrb[84].mxu0  ;;  %v11918_v22 = vadd.f32 %v11758_v35, %v24335_v46  ;;  %16910 = vtanh.f32 %v10041_v37  ;;  %v24338_v13 = vld [vmem:[#allocation11_spill] sm:$0xff] }
 0x535   : > { %v16891_v60 = vpop.eup %16890  ;;  %v11759_v2 = vadd.f32 0.5, %v11599_v59  ;;  %v11638_v26 = vmul.f32 0.5, %v16889_v0  ;;  %v22126_v44 = vpop.f32.mrb[84].mxu1  ;;  %v22130_v5 = vmul.f32 0.5, %v11916_v61  ;;  %v22133_v50 = vadd.f32 %v11757_v55, %v24336_v29  ;;  %v24339_v55 = vld [vmem:[#allocation14_spill] sm:$0xff] }
 0x536   : > { %v22128_v63 = vpop.f32.mrb[85].mxu0  ;;  %v16893_v54 = vpop.eup %16892  ;;  %v11796_v45 = vadd.f32 0.5, %v11636_v4  ;;  %v11637_v11 = vmul.f32 0.5, %v16891_v60  ;;  %v22137_v27 = vmul.f32 0.5, %v11918_v22  ;;  %v10130_v0 = vadd.f32 %v10129_v15, %v22009_v1 }
 0x537   : > { %v22135_v6 = vpop.f32.mrb[85].mxu1  ;;  %v16895_v24 = vpop.eup %16894  ;;  %v22140_v10 = vadd.f32 %v11759_v2, %v24337_v25  ;;  %v11798_v33 = vadd.f32 0.5, %v11638_v26  ;;  %v11639_v16 = vmul.f32 0.5, %v16893_v54  ;;  %v10043_v22 = vadd.f32 %v10042_v47, %v22009_v1 }
 0x538   : > { %v16897_v37 = vpop.eup %16896  ;;  %v11956_v21 = vadd.f32 %v11796_v45, %v24338_v13  ;;  %v11797_v35 = vadd.f32 0.5, %v11637_v11  ;;  %v11676_v59 = vmul.f32 0.5, %v16895_v24  ;;  %v22144_v58 = vpop.f32.mrb[86].mxu0  ;;  %v24340_v45 = vld [vmem:[#allocation19_spill] sm:$0xff]  ;;  %16912 = vtanh.f32 %v10130_v0 }
 0x539   : > { %v16899_v61 = vpop.eup %16898  ;;  %v11958_v4 = vadd.f32 %v11798_v33, %v24339_v55  ;;  %v11799_v60 = vadd.f32 0.5, %v11639_v16  ;;  %v11678_v46 = vmul.f32 0.5, %v16897_v37  ;;  %v22148_v2 = vpop.f32.mrb[86].mxu1  ;;  %v24341_v16 = vld [vmem:[#allocation21_spill] sm:$0xff]  ;;  %16914 = vtanh.f32 %v10043_v22 }
 0x53a   : > { %v22150_v26 = vpop.f32.mrb[87].mxu0  ;;  %v16901_v54 = vpop.eup %16900  ;;  %v22152_v29 = vmul.f32 0.5, %v11956_v21  ;;  %v22155_v11 = vadd.f32 %v11797_v35, %v24340_v45  ;;  %v11836_v15 = vadd.f32 0.5, %v11676_v59  ;;  %v11677_v24 = vmul.f32 0.5, %v16899_v61  ;;  %v24343_v61 = vld [vmem:[#allocation18_spill] sm:$0xff] }
 0x53b   : > { %v22157_v25 = vpop.f32.mrb[87].mxu1  ;;  %v16903_v13 = vpop.eup %16902  ;;  %v22159_v33 = vmul.f32 0.5, %v11958_v4  ;;  %v22162_v37 = vadd.f32 %v11799_v60, %v24341_v16  ;;  %v11838_v47 = vadd.f32 0.5, %v11678_v46  ;;  %v11679_v55 = vmul.f32 0.5, %v16901_v54  ;;  %v24344_v16 = vld [vmem:[#allocation20_spill] sm:$0xff] }
 0x53c   : > { %v16905_v39 = vpop.eup %16904  ;;  %v11996_v30 = vadd.f32 %v11836_v15, %v24342_v20  ;;  %v11837_v21 = vadd.f32 0.5, %v11677_v24  ;;  %v11560_v32 = vmul.f32 0.5, %v16903_v13  ;;  %v22165_v35 = vpop.f32.mrb[88].mxu0 }
 0x53d   : > { %v16907_v59 = vpop.eup %16906  ;;  %v11998_v45 = vadd.f32 %v11838_v47, %v24343_v61  ;;  %v11839_v12 = vadd.f32 0.5, %v11679_v55  ;;  %v11562_v38 = vmul.f32 0.5, %v16905_v39  ;;  %v22168_v4 = vpop.f32.mrb[88].mxu1  ;;  %v24345_v47 = vld [vmem:[#allocation22_spill] sm:$0xff]  ;;  %v24346_v61 = vld [vmem:[#allocation23_spill] sm:$0xff] }
 0x53e   : > { %v22170_v60 = vpop.f32.mrb[89].mxu0  ;;  %v16909_v46 = vpop.eup %16908  ;;  %v22172_v54 = vmul.f32 0.5, %v11996_v30  ;;  %v22175_v20 = vadd.f32 %v11837_v21, %v24344_v16  ;;  %v11720_v15 = vadd.f32 0.5, %v11560_v32  ;;  %v11561_v0 = vmul.f32 0.5, %v16907_v59  ;;  %v24347_v32 = vld [vmem:[#allocation30_spill] sm:$0xff] }
 0x53f   : > { %v22177_v24 = vpop.f32.mrb[89].mxu1  ;;  %v16911_v13 = vpop.eup %16910  ;;  %v22179_v41 = vmul.f32 0.5, %v11998_v45  ;;  %v22182_v39 = vadd.f32 %v11839_v12, %v24345_v47  ;;  %v11722_v22 = vadd.f32 0.5, %v11562_v38  ;;  %v11563_v55 = vmul.f32 0.5, %v16909_v46 }
 0x540   : > { %v11880_v48 = vadd.f32 %v11720_v15, %v24346_v61  ;;  %v11721_v34 = vadd.f32 0.5, %v11561_v0  ;;  %v11600_v30 = vmul.f32 0.5, %v16911_v13  ;;  %v10132_v21 = vadd.f32 %v22117_v17, %v22009_v1  ;;  %v22187_v16 = vpop.f32.mrb[90].mxu0  ;;  %v22192_v12 = vpop.f32.mrb[90].mxu1  ;;  %v24348_v15 = vld [vmem:[#allocation26_spill] sm:$0xff]  ;;  %v24350_v61 = vld [vmem:[#allocation24_spill] sm:$0xff] }
 0x541   : > { %v11882_v59 = vadd.f32 %v11722_v22, %v24347_v32  ;;  %v11723_v8 = vadd.f32 0.5, %v11563_v55  ;;  %v12153_v45 = vmul.f32 0.5, %v22075_v9  ;;  %v22194_v38 = vpop.f32.mrb[91].mxu0  ;;  %v22201_v17 = vpop.f32.mrb[91].mxu1  ;;  %v24349_v22 = vld [vmem:[#allocation28_spill] sm:$0xff]  ;;  %v12155_v9 = vmul.f32 0.5, %v22081_v28 }
 0x542   : > { %v22196_v46 = vmul.f32 0.5, %v11880_v48  ;;  %v22199_v0 = vadd.f32 %v11721_v34, %v24348_v15  ;;  %v11760_v13 = vadd.f32 0.5, %v11600_v30  ;;  %16916 = vtanh.f32 %v10132_v21 }
 0x543   : > { %v22203_v47 = vmul.f32 0.5, %v11882_v59  ;;  %v22206_v55 = vadd.f32 %v11723_v8, %v24349_v22  ;;  %v15375_v23 = vpack.c.bf16 %v12153_v45, %v22111_v19  ;;  %v15377_v48 = vpack.c.bf16 %v22072_v43, %v22057_v49 }
 0x544   : > { %v11920_v32 = vadd.f32 %v11760_v13, %v24350_v61  ;;  %v15385_v34 = vpack.c.bf16 %v22078_v62, %v22062_v36  ;;  %v10047_v30 = vadd.f32 %v22123_v52, %v22013_v3  ;;  %v22217_v21 = vpop.f32.mrb[92].mxu0  ;;  %v15383_v8 = vpack.c.bf16 %v12155_v9, %v12115_v14  ;;  %v22225_v49 = vpop.f32.mrb[92].mxu1  ;;  %v22234_v14 = vld [vmem:[%s23528_s2 + $0x80] sm:$0xff] }
 0x545   : > { %15376 = vmatprep.subr.bf16.mxu0 %v15375_v23  ;;  %v10136_v19 = vadd.f32 %v22126_v44, %v22013_v3  ;;  %v10049_v28 = vadd.f32 %v22128_v63, %v22013_v3  ;;  %v10138_v59 = vadd.f32 %v22135_v6, %v22013_v3  ;;  %v22227_v43 = vpop.f32.mrb[93].mxu0  ;;  %v16913_v36 = vpop.eup %16912  ;;  %v10053_v52 = vadd.f32 %v22144_v58, %v22022_v31 }
 0x546   : > { %v22229_v62 = vmul.f32 0.5, %v11920_v32  ;;  %15378 = vmatpush1.bf16.msra.mxu0 %v15377_v48  ;;  %16918 = vtanh.f32 %v10047_v30  ;;  %v10142_v44 = vadd.f32 %v22148_v2, %v22022_v31  ;;  %v22240_v63 = vpop.f32.mrb[93].mxu1  ;;  %v16915_v6 = vpop.eup %16914  ;;  %v11602_v45 = vmul.f32 0.5, %v16913_v36  ;;  %15384 = vmatprep.subr.bf16.mxu1 %v15383_v8 }
 0x547   : > { %16920 = vtanh.f32 %v10136_v19  ;;  %v10055_v15 = vadd.f32 %v22150_v26, %v22022_v31  ;;  %v10144_v13 = vadd.f32 %v22157_v25, %v22022_v31  ;;  %v11601_v22 = vmul.f32 0.5, %v16915_v6  ;;  %15386 = vmatpush1.bf16.msra.mxu1 %v15385_v34 }
 0x548   : > { %16922 = vtanh.f32 %v10049_v28  ;;  %v12037_v58 = vmul.f32 0.5, %v22114_v51  ;;  %v12077_v23 = vmul.f32 0.5, %v22133_v50  ;;  %v22248_v2 = vpop.f32.mrb[94].mxu0  ;;  %v11762_v9 = vadd.f32 0.5, %v11602_v45  ;;  %v22254_v32 = vpop.f32.mrb[94].mxu1  ;;  %v22262_v51 = vld [vmem:[%s23528_s2 + $0x88] sm:$0xff] }
 0x549   : > { %16924 = vtanh.f32 %v10138_v59  ;;  %14649 = vmatmul.mubr.msk.f32.vlgmr.msra.gmra.mrb[144].mxu0 %vm2560_vm1, %v22234_v14  ;;  %v12039_v61 = vmul.f32 0.5, %v22120_v53  ;;  %v12079_v26 = vmul.f32 0.5, %v22140_v10  ;;  %v22256_v25 = vpop.f32.mrb[95].mxu0  ;;  %v11761_v48 = vadd.f32 0.5, %v11601_v22  ;;  %v22266_v53 = vpop.f32.mrb[95].mxu1  ;;  %v24351_v10 = vld [vmem:[#allocation25_spill] sm:$0xff] }
 0x54a   : > { %16926 = vtanh.f32 %v10053_v52  ;;  %12292 = vmatprep.mubr.f32.mxu0 %v23869_v40  ;;  %v15387_v50 = vpack.c.bf16 %v12077_v23, %v12037_v58  ;;  %v15389_v34 = vpack.c.bf16 %v22130_v5, %v22096_v7  ;;  %v11922_v30 = vadd.f32 %v11762_v9, %v24351_v10  ;;  %14653 = vmatmul.mubr.msk.f32.vlgmr.msra.gmra.mrb[144].mxu1 %vm2560_vm1, %v22234_v14  ;;  %v24352_v59 = vld [vmem:[#allocation27_spill] sm:$0xff]  ;;  %v24354_v58 = vld [vmem:[#allocation29_spill] sm:$0xff] }
 0x54b   : > { %16928 = vtanh.f32 %v10142_v44  ;;  %v15395_v8 = vpack.c.bf16 %v12079_v26, %v12039_v61  ;;  %v15397_v19 = vpack.c.bf16 %v22137_v27, %v22107_v57  ;;  %v22274_v36 = vadd.f32 %v11761_v48, %v24352_v59  ;;  %12375 = vmatprep.mubr.f32.mxu1 %v23869_v40 }
 0x54c   : > { %v16917_v28 = vpop.eup %16916  ;;  %16930 = vtanh.f32 %v10055_v15  ;;  %15388 = vmatprep.subr.bf16.mxu0 %v15387_v50  ;;  %v10213_v7 = vadd.f32 %v22165_v35, %v22004_v56  ;;  %v10302_v5 = vadd.f32 %v22168_v4, %v22004_v56  ;;  %v22281_v52 = vmul.f32 0.5, %v11922_v30  ;;  %v22292_v35 = vld [vmem:[%s23528_s2 + $0x90] sm:$0xff] }
 0x54d   : > { %v11603_v44 = vmul.f32 0.5, %v16917_v28  ;;  %16932 = vtanh.f32 %v10144_v13  ;;  %14650 = vmatmul.mubr.msk.f32.gmra.mrb[146].mxu0 %vm2560_vm1, %v22262_v51  ;;  %15396 = vmatprep.subr.bf16.mxu1 %v15395_v8  ;;  %v10215_v57 = vadd.f32 %v22170_v60, %v22004_v56  ;;  %v10304_v27 = vadd.f32 %v22177_v24, %v22004_v56  ;;  %24353 = vst [vmem:[#allocation147_spill] sm:$0xff] %v22292_v35 }
 0x54e   : > { %15390 = vmatpush1.bf16.msra.mxu0 %v15389_v34  ;;  %15398 = vmatpush1.bf16.msra.mxu1 %v15397_v19  ;;  %16934 = vtanh.f32 %v10213_v7  ;;  %v10219_v4 = vadd.f32 %v22187_v16, %v22009_v1  ;;  %v10308_v6 = vadd.f32 %v22192_v12, %v22009_v1  ;;  %v10221_v60 = vadd.f32 %v22194_v38, %v22009_v1  ;;  %v22325_v48 = vpop.f32.mrb[96].mxu1  ;;  %v24355_v7 = vld [vmem:[#allocation31_spill] sm:$0xff] }
 0x54f   : > { %v11763_v45 = vadd.f32 0.5, %v11603_v44  ;;  %14654 = vmatmul.mubr.msk.f32.gmra.mrb[146].mxu1 %vm2560_vm1, %v22262_v51  ;;  %16936 = vtanh.f32 %v10302_v5  ;;  %12296 = vmatprep.mubr.f32.mxu0 %v23869_v40  ;;  %v10310_v24 = vadd.f32 %v22201_v17, %v22009_v1  ;;  %v12117_v16 = vmul.f32 0.5, %v22155_v11  ;;  %v22315_v17 = vpop.f32.mrb[96].mxu0  ;;  %v22321_v11 = vld [vmem:[%s23528_s2 + $0x98] sm:$0xff]  ;;  %v22331_v8 = vpop.f32.mrb[97].mxu1 }
 0x550   : > { %v16919_v15 = vpop.eup %16918  ;;  %12379 = vmatprep.mubr.f32.mxu1 %v23869_v40  ;;  %16938 = vtanh.f32 %v10215_v57  ;;  %v12157_v12 = vmul.f32 0.5, %v22175_v20  ;;  %v12119_v13 = vmul.f32 0.5, %v22162_v37  ;;  %v12159_v38 = vmul.f32 0.5, %v22182_v39  ;;  %v22327_v50 = vpop.f32.mrb[97].mxu0 }
 0x551   : > { %v16921_v22 = vpop.eup %16920  ;;  %v22310_v23 = vadd.f32 %v11763_v45, %v24354_v58  ;;  %v11640_v9 = vmul.f32 0.5, %v16919_v15  ;;  %16940 = vtanh.f32 %v10304_v27  ;;  %14651 = vmatmul.mubr.msk.f32.gmra.mrb[148].mxu0 %vm2560_vm1, %v22292_v35  ;;  %v15393_v20 = vpack.c.bf16 %v22172_v54, %v22152_v29 }
 0x552   : > { %v16923_v61 = vpop.eup %16922  ;;  %v11642_v26 = vmul.f32 0.5, %v16921_v22  ;;  %16942 = vtanh.f32 %v10219_v4  ;;  %12300 = vmatprep.mubr.f32.mxu0 %v23869_v40  ;;  %v15391_v37 = vpack.c.bf16 %v12157_v12, %v12117_v16  ;;  %v15399_v30 = vpack.c.bf16 %v12159_v38, %v12119_v13  ;;  %v24357_v13 = vld [vmem:[#allocation34_spill] sm:$0xff] }
 0x553   : > { %v16925_v39 = vpop.eup %16924  ;;  %v11800_v34 = vadd.f32 0.5, %v11640_v9  ;;  %v11641_v10 = vmul.f32 0.5, %v16923_v61  ;;  %14655 = vmatmul.mubr.msk.f32.gmra.mrb[148].mxu1 %vm2560_vm1, %v22292_v35  ;;  %16944 = vtanh.f32 %v10308_v6  ;;  %v15401_v29 = vpack.c.bf16 %v22179_v41, %v22159_v33  ;;  %v22339_v27 = vpop.f32.mrb[98].mxu0  ;;  %v24356_v6 = vld [vmem:[#allocation38_spill] sm:$0xff] }
 0x554   : > { %v16927_v19 = vpop.eup %16926  ;;  %v11802_v28 = vadd.f32 0.5, %v11642_v26  ;;  %v11643_v59 = vmul.f32 0.5, %v16925_v39  ;;  %12383 = vmatprep.mubr.f32.mxu1 %v23869_v40  ;;  %16946 = vtanh.f32 %v10221_v60  ;;  %15392 = vmatprep.subr.bf16.mxu0 %v15391_v37  ;;  %v10225_v41 = vadd.f32 %v22217_v21, %v22013_v3  ;;  %v22344_v33 = vpop.f32.mrb[98].mxu1  ;;  %v24358_v26 = vld [vmem:[#allocation36_spill] sm:$0xff] }
 0x555   : > { %v16929_v54 = vpop.eup %16928  ;;  %v11960_v5 = vadd.f32 %v11800_v34, %v24355_v7  ;;  %v11801_v44 = vadd.f32 0.5, %v11641_v10  ;;  %v11680_v57 = vmul.f32 0.5, %v16927_v19  ;;  %16948 = vtanh.f32 %v10310_v24  ;;  %14652 = vmatmul.mubr.msk.f32.gmra.mrb[150].mxu0 %vm2560_vm1, %v22321_v11  ;;  %15400 = vmatprep.subr.bf16.mxu1 %v15399_v30  ;;  %v22346_v16 = vpop.f32.mrb[99].mxu0  ;;  %v24359_v10 = vld [vmem:[#allocation32_spill] sm:$0xff] }
 0x556   : > { %v16931_v4 = vpop.eup %16930  ;;  %v11962_v45 = vadd.f32 %v11802_v28, %v24356_v6  ;;  %v11803_v60 = vadd.f32 0.5, %v11643_v59  ;;  %v11682_v15 = vmul.f32 0.5, %v16929_v54  ;;  %15394 = vmatpush1.bf16.msra.mxu0 %v15393_v20  ;;  %15402 = vmatpush1.bf16.msra.mxu1 %v15401_v29  ;;  %v22356_v38 = vpop.f32.mrb[99].mxu1  ;;  %16950 = vtanh.f32 %v10225_v41  ;;  %v24360_v54 = vld [vmem:[#allocation33_spill] sm:$0xff] }
 0x557   : > { %v16933_v24 = vpop.eup %16932  ;;  %v22348_v12 = vmul.f32 0.5, %v11960_v5  ;;  %v22351_v22 = vadd.f32 %v11801_v44, %v24357_v13  ;;  %v11840_v58 = vadd.f32 0.5, %v11680_v57  ;;  %v11681_v9 = vmul.f32 0.5, %v16931_v4  ;;  %14656 = vmatmul.mubr.msk.f32.gmra.mrb[150].mxu1 %vm2560_vm1, %v22321_v11  ;;  %12452 = vmatprep.mubr.f32.mxu0 %v23869_v40  ;;  %v22367_v59 = vpop.f32.mrb[100].mxu0 }
 0x558   : > { %v16935_v21 = vpop.eup %16934  ;;  %v22358_v61 = vmul.f32 0.5, %v11962_v45  ;;  %v22361_v37 = vadd.f32 %v11803_v60, %v24358_v26  ;;  %v11842_v20 = vadd.f32 0.5, %v11682_v15  ;;  %v11683_v39 = vmul.f32 0.5, %v16933_v24  ;;  %12535 = vmatprep.mubr.f32.mxu1 %v23869_v40  ;;  %v22373_v4 = vpop.f32.mrb[100].mxu1  ;;  %v24361_v15 = vld [vmem:[#allocation35_spill] sm:$0xff] }
 0x559   : > { %v16937_v34 = vpop.eup %16936  ;;  %v12000_v30 = vadd.f32 %v11840_v58, %v24359_v10  ;;  %v11841_v19 = vadd.f32 0.5, %v11681_v9  ;;  %v11564_v28 = vmul.f32 0.5, %v16935_v21  ;;  %14657 = vmatmul.mubr.msk.f32.vlgmr.msra.gmra.mrb[152].mxu0 %vm2560_vm1, %v22234_v14  ;;  %v10314_v57 = vadd.f32 %v22225_v49, %v22013_v3  ;;  %v22375_v6 = vpop.f32.mrb[101].mxu0  ;;  %v24362_v21 = vld [vmem:[#allocation37_spill] sm:$0xff]  ;;  %v24363_v10 = vld [vmem:[#allocation39_spill] sm:$0xff] }
 0x55a   : > { %v16939_v29 = vpop.eup %16938  ;;  %v12002_v7 = vadd.f32 %v11842_v20, %v24360_v54  ;;  %v11843_v5 = vadd.f32 0.5, %v11683_v39  ;;  %v11566_v44 = vmul.f32 0.5, %v16937_v34  ;;  %12458 = vmatprep.mubr.f32.mxu0 %v23869_v40  ;;  %v22384_v58 = vpop.f32.mrb[101].mxu1 }
 0x55b   : > { %v16941_v45 = vpop.eup %16940  ;;  %v22377_v60 = vmul.f32 0.5, %v12000_v30  ;;  %v22380_v41 = vadd.f32 %v11841_v19, %v24361_v15  ;;  %v11724_v24 = vadd.f32 0.5, %v11564_v28  ;;  %v11565_v13 = vmul.f32 0.5, %v16939_v29  ;;  %14661 = vmatmul.mubr.msk.f32.vlgmr.msra.gmra.mrb[152].mxu1 %vm2560_vm1, %v22234_v14  ;;  %v22395_v29 = vpop.f32.mrb[102].mxu0 }
 0x55c   : > { %v16943_v49 = vpop.eup %16942  ;;  %v22386_v9 = vmul.f32 0.5, %v12002_v7  ;;  %v22389_v26 = vadd.f32 %v11843_v5, %v24362_v21  ;;  %v11726_v20 = vadd.f32 0.5, %v11566_v44  ;;  %v11567_v39 = vmul.f32 0.5, %v16941_v45  ;;  %12541 = vmatprep.mubr.f32.mxu1 %v23869_v40  ;;  %v24364_v7 = vld [vmem:[#allocation40_spill] sm:$0xff]  ;;  %v22401_v45 = vpop.f32.mrb[102].mxu1 }
 0x55d   : > { %v16945_v34 = vpop.eup %16944  ;;  %v11884_v30 = vadd.f32 %v11724_v24, %v24363_v10  ;;  %v11725_v19 = vadd.f32 0.5, %v11565_v13  ;;  %v11604_v28 = vmul.f32 0.5, %v16943_v49  ;;  %16952 = vtanh.f32 %v10314_v57  ;;  %14658 = vmatmul.mubr.msk.f32.gmra.mrb[154].mxu0 %vm2560_vm1, %v22262_v51  ;;  %v22403_v24 = vpop.f32.mrb[103].mxu0  ;;  %v24367_v49 = vld [vmem:[#allocation43_spill] sm:$0xff] }
 0x55e   : > { %v16947_v54 = vpop.eup %16946  ;;  %v11886_v15 = vadd.f32 %v11726_v20, %v24364_v7  ;;  %v11727_v5 = vadd.f32 0.5, %v11567_v39  ;;  %v11606_v21 = vmul.f32 0.5, %v16945_v34  ;;  %v10227_v44 = vadd.f32 %v22227_v43, %v22013_v3  ;;  %12462 = vmatprep.mubr.f32.mxu0 %v23869_v40  ;;  %24365 = vst [vmem:[#allocation148_spill] sm:$0xff] %v22403_v24  ;;  %v22412_v20 = vpop.f32.mrb[103].mxu1  ;;  %v24368_v39 = vld [vmem:[#allocation45_spill] sm:$0xff] }
 0x55f   : > { %v16949_v57 = vpop.eup %16948  ;;  %v22405_v13 = vmul.f32 0.5, %v11884_v30  ;;  %v22408_v10 = vadd.f32 %v11725_v19, %v24367_v49  ;;  %v11764_v18 = vadd.f32 0.5, %v11604_v28  ;;  %v11605_v42 = vmul.f32 0.5, %v16947_v54  ;;  %14662 = vmatmul.mubr.msk.f32.gmra.mrb[154].mxu1 %vm2560_vm1, %v22262_v51  ;;  %v24369_v30 = vld [vmem:[#allocation41_spill] sm:$0xff]  ;;  %v22425_v54 = vpop.f32.mrb[104].mxu0 }
 0x560   : > { %v22414_v43 = vmul.f32 0.5, %v11886_v15  ;;  %v22417_v34 = vadd.f32 %v11727_v5, %v24368_v39  ;;  %v11766_v7 = vadd.f32 0.5, %v11606_v21  ;;  %v11607_v24 = vmul.f32 0.5, %v16949_v57  ;;  %12545 = vmatprep.mubr.f32.mxu1 %v23869_v40  ;;  %v24370_v15 = vld [vmem:[#allocation42_spill] sm:$0xff]  ;;  %v24372_v39 = vld [vmem:[#allocation44_spill] sm:$0xff] }
 0x561   : > { %24366 = vst [vmem:[#allocation162_spill] sm:$0xff] %v22405_v13  ;;  %v11924_v13 = vadd.f32 %v11764_v18, %v24369_v30  ;;  %v11765_v19 = vadd.f32 0.5, %v11605_v42  ;;  %16954 = vtanh.f32 %v10227_v44  ;;  %v10316_v28 = vadd.f32 %v22240_v63, %v22013_v3  ;;  %14659 = vmatmul.mubr.msk.f32.gmra.mrb[156].mxu0 %vm2560_vm1, %v22292_v35  ;;  %v22433_v42 = vpop.f32.mrb[104].mxu1  ;;  %v22435_v18 = vpop.f32.mrb[105].mxu0 }
 0x562   : > { %v11926_v49 = vadd.f32 %v11766_v7, %v24370_v15  ;;  %v11767_v5 = vadd.f32 0.5, %v11607_v24  ;;  %v10231_v21 = vadd.f32 %v22248_v2, %v22022_v31  ;;  %v10320_v57 = vadd.f32 %v22254_v32, %v22022_v31  ;;  %12466 = vmatprep.mubr.f32.mxu0 %v23869_v40  ;;  %24371 = vst [vmem:[#allocation163_spill] sm:$0xff] %v22435_v18  ;;  %v16951_v63 = vpop.eup %16950  ;;  %v22446_v2 = vpop.f32.mrb[105].mxu1  ;;  %v24373_v7 = vld [vmem:[#allocation46_spill] sm:$0xff] }
 0x563   : > { %v22437_v44 = vmul.f32 0.5, %v11924_v13  ;;  %v22440_v30 = vadd.f32 %v11765_v19, %v24372_v39  ;;  %16956 = vtanh.f32 %v10316_v28  ;;  %v10233_v24 = vadd.f32 %v22256_v25, %v22022_v31  ;;  %14663 = vmatmul.mubr.msk.f32.gmra.mrb[156].mxu1 %vm2560_vm1, %v22292_v35  ;;  %v22460_v28 = vpop.f32.mrb[106].mxu0 }
 0x564   : > { %v22448_v32 = vmul.f32 0.5, %v11926_v49  ;;  %v22451_v15 = vadd.f32 %v11767_v5, %v24373_v7  ;;  %v11644_v18 = vmul.f32 0.5, %v16951_v63  ;;  %16958 = vtanh.f32 %v10231_v21  ;;  %12549 = vmatprep.mubr.f32.mxu1 %v23869_v40 }
 0x565   : > { %16960 = vtanh.f32 %v10320_v57  ;;  %v10322_v13 = vadd.f32 %v22266_v53, %v22022_v31  ;;  %v12041_v25 = vmul.f32 0.5, %v22199_v0  ;;  %v12081_v19 = vmul.f32 0.5, %v22274_v36  ;;  %14660 = vmatmul.mubr.msk.f32.gmra.mrb[158].mxu0 %vm2560_vm1, %v22321_v11  ;;  %v22465_v57 = vpop.f32.mrb[106].mxu1  ;;  %v22467_v53 = vpop.f32.mrb[107].mxu0 }
 0x566   : > { %v11804_v49 = vadd.f32 0.5, %v11644_v18  ;;  %16962 = vtanh.f32 %v10233_v24  ;;  %v12043_v5 = vmul.f32 0.5, %v22206_v55  ;;  %v12083_v21 = vmul.f32 0.5, %v22310_v23  ;;  %12618 = vmatprep.mubr.f32.mxu0 %v23869_v40  ;;  %24374 = vst [vmem:[#allocation165_spill] sm:$0xff] %v22467_v53  ;;  %v22475_v55 = vpop.f32.mrb[107].mxu1  ;;  %v24375_v23 = vld [vmem:[#allocation47_spill] sm:$0xff] }
 0x567   : > { %v16953_v0 = vpop.eup %16952  ;;  %16964 = vtanh.f32 %v10322_v13  ;;  %v15403_v36 = vpack.c.bf16 %v12081_v19, %v12041_v25  ;;  %v15405_v63 = vpack.c.bf16 %v22229_v62, %v22196_v46  ;;  %v15413_v18 = vpack.c.bf16 %v22281_v52, %v22203_v47  ;;  %14664 = vmatmul.mubr.msk.f32.gmra.mrb[158].mxu1 %vm2560_vm1, %v22321_v11 }
 0x568   : > { %v11964_v39 = vadd.f32 %v11804_v49, %v24375_v23  ;;  %v11646_v24 = vmul.f32 0.5, %v16953_v0  ;;  %v15411_v7 = vpack.c.bf16 %v12083_v21, %v12043_v5  ;;  %v10391_v53 = vadd.f32 %v22315_v17, %v22004_v56  ;;  %12701 = vmatprep.mubr.f32.mxu1 %v23869_v40  ;;  %v22500_v49 = vpop.f32.mrb[108].mxu1  ;;  %v24376_v5 = vld [vmem:[#allocation54_spill] sm:$0xff] }
 0x569   : > { %15404 = vmatprep.subr.bf16.mxu0 %v15403_v36  ;;  %v10480_v46 = vadd.f32 %v22325_v48, %v22004_v56  ;;  %v10393_v47 = vadd.f32 %v22327_v50, %v22004_v56  ;;  %v10482_v62 = vadd.f32 %v22331_v8, %v22004_v56  ;;  %v10397_v52 = vadd.f32 %v22339_v27, %v22009_v1  ;;  %v22498_v27 = vpop.f32.mrb[108].mxu0  ;;  %v22506_v36 = vpop.f32.mrb[109].mxu1 }
 0x56a   : > { %v22489_v13 = vmul.f32 0.5, %v11964_v39  ;;  %v11806_v25 = vadd.f32 0.5, %v11646_v24  ;;  %15412 = vmatprep.subr.bf16.mxu1 %v15411_v7  ;;  %15406 = vmatpush1.bf16.msra.mxu0 %v15405_v63  ;;  %16966 = vtanh.f32 %v10391_v53  ;;  %v10486_v17 = vadd.f32 %v22344_v33, %v22009_v1  ;;  %v22504_v0 = vpop.f32.mrb[109].mxu0 }
 0x56b   : > { %v16955_v19 = vpop.eup %16954  ;;  %15414 = vmatpush1.bf16.msra.mxu1 %v15413_v18  ;;  %16968 = vtanh.f32 %v10480_v46  ;;  %v10399_v48 = vadd.f32 %v22346_v16, %v22009_v1  ;;  %v10488_v50 = vadd.f32 %v22356_v38, %v22009_v1  ;;  %v12121_v8 = vmul.f32 0.5, %v22351_v22 }
 0x56c   : > { %v11966_v21 = vadd.f32 %v11806_v25, %v24376_v5  ;;  %v11645_v53 = vmul.f32 0.5, %v16955_v19  ;;  %16970 = vtanh.f32 %v10393_v47  ;;  %v12161_v33 = vmul.f32 0.5, %v22380_v41  ;;  %v22514_v25 = vpop.f32.mrb[110].mxu0 }
 0x56d   : > { %v16957_v16 = vpop.eup %16956  ;;  %16972 = vtanh.f32 %v10482_v62  ;;  %v12123_v38 = vmul.f32 0.5, %v22361_v37  ;;  %v12163_v22 = vmul.f32 0.5, %v22389_v26  ;;  %v15409_v63 = vpack.c.bf16 %v22377_v60, %v22348_v12  ;;  %v22516_v62 = vpop.f32.mrb[110].mxu1  ;;  %v24377_v26 = vld [vmem:[#allocation50_spill] sm:$0xff] }
 0x56e   : > { %v16959_v18 = vpop.eup %16958  ;;  %v22512_v23 = vmul.f32 0.5, %v11966_v21  ;;  %v11805_v39 = vadd.f32 0.5, %v11645_v53  ;;  %v11647_v24 = vmul.f32 0.5, %v16957_v16  ;;  %16974 = vtanh.f32 %v10397_v52  ;;  %v22521_v5 = vpop.f32.mrb[111].mxu0 }
 0x56f   : > { %v16961_v41 = vpop.eup %16960  ;;  %v11684_v7 = vmul.f32 0.5, %v16959_v18  ;;  %16976 = vtanh.f32 %v10486_v17  ;;  %v15407_v46 = vpack.c.bf16 %v12161_v33, %v12121_v8  ;;  %v15415_v47 = vpack.c.bf16 %v12163_v22, %v12123_v38  ;;  %v22523_v21 = vpop.f32.mrb[111].mxu1  ;;  %v24378_v33 = vld [vmem:[#allocation52_spill] sm:$0xff] }
 0x570   : > { %v16963_v37 = vpop.eup %16962  ;;  %v22519_v19 = vadd.f32 %v11805_v39, %v24377_v26  ;;  %v11807_v12 = vadd.f32 0.5, %v11647_v24  ;;  %v11686_v60 = vmul.f32 0.5, %v16961_v41  ;;  %16978 = vtanh.f32 %v10399_v48  ;;  %v24379_v18 = vld [vmem:[#allocation48_spill] sm:$0xff] }
 0x571   : > { %v16965_v52 = vpop.eup %16964  ;;  %v11844_v53 = vadd.f32 0.5, %v11684_v7  ;;  %v11685_v17 = vmul.f32 0.5, %v16963_v37  ;;  %16980 = vtanh.f32 %v10488_v50  ;;  %15408 = vmatprep.subr.bf16.mxu0 %v15407_v46  ;;  %15416 = vmatprep.subr.bf16.mxu1 %v15415_v47  ;;  %v15417_v8 = vpack.c.bf16 %v22386_v9, %v22358_v61  ;;  %v22537_v61 = vpop.f32.mrb[112].mxu0  ;;  %v24380_v46 = vld [vmem:[#allocation49_spill] sm:$0xff] }
 0x572   : > { %v22528_v16 = vadd.f32 %v11807_v12, %v24378_v33  ;;  %v11846_v38 = vadd.f32 0.5, %v11686_v60  ;;  %v11687_v22 = vmul.f32 0.5, %v16965_v52  ;;  %15410 = vmatpush1.bf16.msra.mxu0 %v15409_v63  ;;  %v10403_v48 = vadd.f32 %v22367_v59, %v22013_v3  ;;  %v22539_v9 = vpop.f32.mrb[112].mxu1  ;;  %v22544_v37 = vpop.f32.mrb[113].mxu0 }
 0x573   : > { %v12004_v39 = vadd.f32 %v11844_v53, %v24379_v18  ;;  %v11845_v24 = vadd.f32 0.5, %v11685_v17  ;;  %15418 = vmatpush1.bf16.msra.mxu1 %v15417_v8  ;;  %v10492_v50 = vadd.f32 %v22373_v4, %v22013_v3  ;;  %v10405_v41 = vadd.f32 %v22375_v6, %v22013_v3  ;;  %v22546_v26 = vpop.f32.mrb[113].mxu1  ;;  %v24382_v6 = vld [vmem:[#allocation51_spill] sm:$0xff]  ;;  %v24383_v8 = vld [vmem:[#allocation53_spill] sm:$0xff] }
 0x574   : > { %v16967_v7 = vpop.eup %16966  ;;  %v12006_v63 = vadd.f32 %v11846_v38, %v24380_v46  ;;  %v11847_v47 = vadd.f32 0.5, %v11687_v22  ;;  %16982 = vtanh.f32 %v10403_v48  ;;  %v10494_v59 = vadd.f32 %v22384_v58, %v22013_v3  ;;  %24381 = vst [vmem:[#allocation149_spill] sm:$0xff] %v22546_v26  ;;  %v24396_v26 = vld [vmem:[#allocation56_spill] sm:$0xff] }
 0x575   : > { %v16969_v4 = vpop.eup %16968  ;;  %v22548_v12 = vmul.f32 0.5, %v12004_v39  ;;  %v22551_v60 = vadd.f32 %v11845_v24, %v24382_v6  ;;  %v11568_v52 = vmul.f32 0.5, %v16967_v7  ;;  %16984 = vtanh.f32 %v10492_v50  ;;  %14665 = vmatmul.mubr.msk.f32.vlgmr.msra.gmra.mrb[160].mxu0 %vm2560_vm1, %v22234_v14  ;;  %v22566_v39 = vpop.f32.mrb[114].mxu0  ;;  %v24389_v6 = vld [vmem:[#allocation55_spill] sm:$0xff] }
 0x576   : > { %v16971_v53 = vpop.eup %16970  ;;  %v22555_v17 = vmul.f32 0.5, %v12006_v63  ;;  %v22558_v58 = vadd.f32 %v11847_v47, %v24383_v8  ;;  %v11570_v33 = vmul.f32 0.5, %v16969_v4  ;;  %16986 = vtanh.f32 %v10405_v41  ;;  %14669 = vmatmul.mubr.msk.f32.vlgmr.msra.gmra.mrb[160].mxu1 %vm2560_vm1, %v22234_v14  ;;  %12624 = vmatprep.mubr.f32.mxu0 %v23869_v40  ;;  %24384 = vst [vmem:[#allocation151_spill] sm:$0xff] %v22566_v39  ;;  %v22568_v24 = vpop.f32.mrb[114].mxu1  ;;  %v24386_v63 = vld [vmem:[#allocation148_spill] sm:$0xff] }
 0x577   : > { %v16973_v38 = vpop.eup %16972  ;;  %v11728_v22 = vadd.f32 0.5, %v11568_v52  ;;  %v11569_v48 = vmul.f32 0.5, %v16971_v53  ;;  %16988 = vtanh.f32 %v10494_v59  ;;  %v10409_v18 = vadd.f32 %v22395_v29, %v22022_v31  ;;  %12707 = vmatprep.mubr.f32.mxu1 %v23869_v40  ;;  %24385 = vst [vmem:[#allocation150_spill] sm:$0xff] %v22568_v24  ;;  %v22574_v4 = vpop.f32.mrb[115].mxu0 }
 0x578   : > { %v16975_v50 = vpop.eup %16974  ;;  %v11730_v41 = vadd.f32 0.5, %v11570_v33  ;;  %v11571_v7 = vmul.f32 0.5, %v16973_v38  ;;  %v10498_v46 = vadd.f32 %v22401_v45, %v22022_v31  ;;  %v10411_v47 = vadd.f32 %v24386_v63, %v22022_v31  ;;  %24387 = vst [vmem:[#allocation152_spill] sm:$0xff] %v22574_v4  ;;  %v22576_v59 = vpop.f32.mrb[115].mxu1  ;;  %v24390_v38 = vld [vmem:[#allocation62_spill] sm:$0xff] }
 0x579   : > { %24388 = vst [vmem:[#allocation153_spill] sm:$0xff] %v22576_v59  ;;  %v16977_v29 = vpop.eup %16976  ;;  %v11888_v52 = vadd.f32 %v11728_v22, %v24389_v6  ;;  %v11729_v53 = vadd.f32 0.5, %v11569_v48  ;;  %v11608_v8 = vmul.f32 0.5, %v16975_v50  ;;  %16990 = vtanh.f32 %v10409_v18  ;;  %14666 = vmatmul.mubr.msk.f32.gmra.mrb[162].mxu0 %vm2560_vm1, %v22262_v51  ;;  %v24391_v22 = vld [vmem:[#allocation58_spill] sm:$0xff]  ;;  %v22591_v6 = vpop.f32.mrb[116].mxu0 }
 0x57a   : > { %v16979_v33 = vpop.eup %16978  ;;  %v11890_v24 = vadd.f32 %v11730_v41, %v24390_v38  ;;  %v11731_v45 = vadd.f32 0.5, %v11571_v7  ;;  %v11610_v39 = vmul.f32 0.5, %v16977_v29  ;;  %16992 = vtanh.f32 %v10498_v46  ;;  %14670 = vmatmul.mubr.msk.f32.gmra.mrb[162].mxu1 %vm2560_vm1, %v22262_v51  ;;  %12628 = vmatprep.mubr.f32.mxu0 %v23869_v40  ;;  %24392 = vst [vmem:[#allocation154_spill] sm:$0xff] %v22591_v6  ;;  %v24393_v7 = vld [vmem:[#allocation60_spill] sm:$0xff]  ;;  %v22598_v4 = vpop.f32.mrb[116].mxu1 }
 0x57b   : > { %v16981_v63 = vpop.eup %16980  ;;  %v22585_v59 = vmul.f32 0.5, %v11888_v52  ;;  %v22588_v48 = vadd.f32 %v11729_v53, %v24391_v22  ;;  %v11768_v18 = vadd.f32 0.5, %v11608_v8  ;;  %v11609_v50 = vmul.f32 0.5, %v16979_v33  ;;  %12711 = vmatprep.mubr.f32.mxu1 %v23869_v40  ;;  %24394 = vst [vmem:[#allocation156_spill] sm:$0xff] %v22598_v4  ;;  %v22600_v52 = vpop.f32.mrb[117].mxu0 }
 0x57c   : > { %v22593_v41 = vmul.f32 0.5, %v11890_v24  ;;  %v22596_v46 = vadd.f32 %v11731_v45, %v24393_v7  ;;  %v11770_v29 = vadd.f32 0.5, %v11610_v39  ;;  %v11611_v38 = vmul.f32 0.5, %v16981_v63  ;;  %24395 = vst [vmem:[#allocation157_spill] sm:$0xff] %v22600_v52  ;;  %v22607_v24 = vpop.f32.mrb[117].mxu1  ;;  %v24398_v45 = vld [vmem:[#allocation57_spill] sm:$0xff] }
 0x57d   : > { %v11928_v53 = vadd.f32 %v11768_v18, %v24396_v26  ;;  %v11769_v22 = vadd.f32 0.5, %v11609_v50  ;;  %16994 = vtanh.f32 %v10411_v47  ;;  %v10500_v8 = vadd.f32 %v22412_v20, %v22022_v31  ;;  %14667 = vmatmul.mubr.msk.f32.gmra.mrb[164].mxu0 %vm2560_vm1, %v22292_v35  ;;  %24397 = vst [vmem:[#allocation155_spill] sm:$0xff] %v22607_v24  ;;  %v24399_v47 = vld [vmem:[#allocation59_spill] sm:$0xff]  ;;  %v22628_v6 = vpop.f32.mrb[118].mxu1 }
 0x57e   : > { %v16983_v33 = vpop.eup %16982  ;;  %v11930_v39 = vadd.f32 %v11770_v29, %v24398_v45  ;;  %v11771_v63 = vadd.f32 0.5, %v11611_v38  ;;  %v12045_v7 = vmul.f32 0.5, %v22408_v10  ;;  %v12085_v52 = vmul.f32 0.5, %v22440_v30  ;;  %14671 = vmatmul.mubr.msk.f32.gmra.mrb[164].mxu1 %vm2560_vm1, %v22292_v35  ;;  %12632 = vmatprep.mubr.f32.mxu0 %v23869_v40  ;;  %v22621_v29 = vpop.f32.mrb[118].mxu0  ;;  %v24400_v30 = vld [vmem:[#allocation61_spill] sm:$0xff] }
 0x57f   : > { %v16985_v26 = vpop.eup %16984  ;;  %v22615_v20 = vmul.f32 0.5, %v11928_v53  ;;  %v22618_v18 = vadd.f32 %v11769_v22, %v24399_v47  ;;  %v11648_v50 = vmul.f32 0.5, %v16983_v33  ;;  %16996 = vtanh.f32 %v10500_v8  ;;  %12715 = vmatprep.mubr.f32.mxu1 %v23869_v40  ;;  %v22630_v53 = vpop.f32.mrb[119].mxu0 }
 0x580   : > { %v16987_v10 = vpop.eup %16986  ;;  %v22623_v38 = vmul.f32 0.5, %v11930_v39  ;;  %v22626_v45 = vadd.f32 %v11771_v63, %v24400_v30  ;;  %v11650_v24 = vmul.f32 0.5, %v16985_v26  ;;  %v15419_v4 = vpack.c.bf16 %v12085_v52, %v12045_v7  ;;  %24401 = vst [vmem:[#allocation158_spill] sm:$0xff] %v22630_v53  ;;  %v22636_v39 = vpop.f32.mrb[119].mxu1  ;;  %v24403_v52 = vld [vmem:[#allocation162_spill] sm:$0xff] }
 0x581   : > { %v16989_v22 = vpop.eup %16988  ;;  %v11808_v47 = vadd.f32 0.5, %v11648_v50  ;;  %v11649_v33 = vmul.f32 0.5, %v16987_v10  ;;  %v12047_v8 = vmul.f32 0.5, %v22417_v34  ;;  %v12087_v35 = vmul.f32 0.5, %v22451_v15  ;;  %14668 = vmatmul.mubr.msk.f32.gmra.mrb[166].mxu0 %vm2560_vm1, %v22321_v11  ;;  %24402 = vst [vmem:[#allocation4_spill] sm:$0xff] %v22636_v39  ;;  %v24404_v50 = vld [vmem:[#allocation63_spill] sm:$0xff] }
 0x582   : > { %v11810_v63 = vadd.f32 0.5, %v11650_v24  ;;  %v11651_v30 = vmul.f32 0.5, %v16989_v22  ;;  %15420 = vmatprep.subr.bf16.mxu0 %v15419_v4  ;;  %v15421_v7 = vpack.c.bf16 %v22437_v44, %v24403_v52  ;;  %v15429_v26 = vpack.c.bf16 %v22448_v32, %v22414_v43  ;;  %14672 = vmatmul.mubr.msk.f32.gmra.mrb[166].mxu1 %vm2560_vm1, %v22321_v11  ;;  %v24405_v44 = vld [vmem:[#allocation64_spill] sm:$0xff] }
 0x583   : > { %v16991_v34 = vpop.eup %16990  ;;  %v11968_v15 = vadd.f32 %v11808_v47, %v24404_v50  ;;  %v11809_v10 = vadd.f32 0.5, %v11649_v33  ;;  %v15427_v53 = vpack.c.bf16 %v12087_v35, %v12047_v8  ;;  %v10569_v39 = vadd.f32 %v22425_v54, %v22004_v56  ;;  %12784 = vmatprep.mubr.f32.mxu0 %v23869_v40  ;;  %12867 = vmatprep.mubr.f32.mxu1 %v23869_v40  ;;  %v24406_v47 = vld [vmem:[#allocation67_spill] sm:$0xff]  ;;  %v24407_v8 = vld [vmem:[#allocation69_spill] sm:$0xff] }
 0x584   : > { %v16993_v4 = vpop.eup %16992  ;;  %v11970_v24 = vadd.f32 %v11810_v63, %v24405_v44  ;;  %v11811_v22 = vadd.f32 0.5, %v11651_v30  ;;  %v11688_v43 = vmul.f32 0.5, %v16991_v34  ;;  %15422 = vmatpush1.bf16.msra.mxu0 %v15421_v7  ;;  %v10658_v32 = vadd.f32 %v22433_v42, %v22004_v56  ;;  %v24408_v42 = vld [vmem:[#allocation163_spill] sm:$0xff] }
 0x585   : > { %v22652_v52 = vmul.f32 0.5, %v11968_v15  ;;  %v22655_v35 = vadd.f32 %v11809_v10, %v24406_v47  ;;  %v11690_v33 = vmul.f32 0.5, %v16993_v4  ;;  %15428 = vmatprep.subr.bf16.mxu1 %v15427_v53  ;;  %16998 = vtanh.f32 %v10569_v39  ;;  %v24409_v39 = vld [vmem:[#allocation65_spill] sm:$0xff] }
 0x586   : > { %v22657_v54 = vmul.f32 0.5, %v11970_v24  ;;  %v22660_v50 = vadd.f32 %v11811_v22, %v24407_v8  ;;  %v11848_v63 = vadd.f32 0.5, %v11688_v43  ;;  %15430 = vmatpush1.bf16.msra.mxu1 %v15429_v26  ;;  %17000 = vtanh.f32 %v10658_v32  ;;  %v24410_v26 = vld [vmem:[#allocation165_spill] sm:$0xff]  ;;  %v24411_v32 = vld [vmem:[#allocation66_spill] sm:$0xff] }
 0x587   : > { %v16995_v30 = vpop.eup %16994  ;;  %v11850_v7 = vadd.f32 0.5, %v11690_v33  ;;  %v10571_v34 = vadd.f32 %v24408_v42, %v22004_v56  ;;  %v10660_v15 = vadd.f32 %v22446_v2, %v22004_v56  ;;  %v10575_v53 = vadd.f32 %v22460_v28, %v22009_v1  ;;  %v22673_v22 = vpop.f32.mrb[120].mxu0 }
 0x588   : > { %v12008_v10 = vadd.f32 %v11848_v63, %v24409_v39  ;;  %v11689_v4 = vmul.f32 0.5, %v16995_v30  ;;  %v10664_v44 = vadd.f32 %v22465_v57, %v22009_v1  ;;  %v10577_v24 = vadd.f32 %v24410_v26, %v22009_v1  ;;  %v22679_v33 = vpop.f32.mrb[120].mxu1  ;;  %v22681_v8 = vpop.f32.mrb[121].mxu0 }
 0x589   : > { %v16997_v43 = vpop.eup %16996  ;;  %v12010_v47 = vadd.f32 %v11850_v7, %v24411_v32  ;;  %17002 = vtanh.f32 %v10571_v34  ;;  %v10666_v2 = vadd.f32 %v22475_v55, %v22009_v1  ;;  %v12125_v28 = vmul.f32 0.5, %v22519_v19  ;;  %v22685_v42 = vpop.f32.mrb[121].mxu1  ;;  %v24412_v34 = vld [vmem:[#allocation68_spill] sm:$0xff] }
 0x58a   : > { %v22683_v63 = vmul.f32 0.5, %v12008_v10  ;;  %v11849_v57 = vadd.f32 0.5, %v11689_v4  ;;  %v11691_v30 = vmul.f32 0.5, %v16997_v43  ;;  %17004 = vtanh.f32 %v10660_v15  ;;  %v24413_v43 = vld [vmem:[#allocation70_spill] sm:$0xff] }
 0x58b   : > { %v22687_v39 = vmul.f32 0.5, %v12010_v47  ;;  %17006 = vtanh.f32 %v10575_v53  ;;  %v12165_v7 = vmul.f32 0.5, %v22551_v60  ;;  %v12127_v55 = vmul.f32 0.5, %v22528_v16  ;;  %v22695_v32 = vpop.f32.mrb[122].mxu0 }
 0x58c   : > { %v22692_v19 = vadd.f32 %v11849_v57, %v24412_v34  ;;  %v11851_v26 = vadd.f32 0.5, %v11691_v30  ;;  %17008 = vtanh.f32 %v10664_v44  ;;  %v12167_v10 = vmul.f32 0.5, %v22558_v58  ;;  %v22701_v60 = vpop.f32.mrb[122].mxu1  ;;  %v22703_v16 = vpop.f32.mrb[123].mxu0 }
 0x58d   : > { %17010 = vtanh.f32 %v10577_v24  ;;  %v15423_v15 = vpack.c.bf16 %v12165_v7, %v12125_v28  ;;  %v15425_v4 = vpack.c.bf16 %v22548_v12, %v22489_v13  ;;  %v15433_v53 = vpack.c.bf16 %v22555_v17, %v22512_v23  ;;  %v22710_v24 = vpop.f32.mrb[123].mxu1 }
 0x58e   : > { %v22706_v47 = vadd.f32 %v11851_v26, %v24413_v43  ;;  %17012 = vtanh.f32 %v10666_v2  ;;  %v15431_v44 = vpack.c.bf16 %v12167_v10, %v12127_v55  ;;  %v10581_v58 = vadd.f32 %v22498_v27, %v22013_v3 }
 0x58f   : > { %v16999_v28 = vpop.eup %16998  ;;  %15424 = vmatprep.subr.bf16.mxu0 %v15423_v15  ;;  %v10670_v13 = vadd.f32 %v22500_v49, %v22013_v3  ;;  %v10583_v23 = vadd.f32 %v22504_v0, %v22013_v3  ;;  %v10672_v12 = vadd.f32 %v22506_v36, %v22013_v3  ;;  %v10587_v17 = vadd.f32 %v22514_v25, %v22022_v31  ;;  %v22724_v30 = vpop.f32.mrb[124].mxu0 }
 0x590   : > { %v17001_v2 = vpop.eup %17000  ;;  %v11572_v57 = vmul.f32 0.5, %v16999_v28  ;;  %15432 = vmatprep.subr.bf16.mxu1 %v15431_v44  ;;  %15426 = vmatpush1.bf16.msra.mxu0 %v15425_v4  ;;  %17014 = vtanh.f32 %v10581_v58  ;;  %v10676_v27 = vadd.f32 %v22516_v62, %v22022_v31  ;;  %v10589_v49 = vadd.f32 %v22521_v5, %v22022_v31  ;;  %v22729_v7 = vpop.f32.mrb[124].mxu1  ;;  %v24415_v28 = vld [vmem:[#allocation78_spill] sm:$0xff] }
 0x591   : > { %v11574_v0 = vmul.f32 0.5, %v17001_v2  ;;  %15434 = vmatpush1.bf16.msra.mxu1 %v15433_v53  ;;  %17016 = vtanh.f32 %v10670_v13  ;;  %v10678_v36 = vadd.f32 %v22523_v21, %v22022_v31  ;;  %v12049_v25 = vmul.f32 0.5, %v22588_v48  ;;  %v22731_v55 = vpop.f32.mrb[125].mxu0  ;;  %v22735_v26 = vpop.f32.mrb[125].mxu1  ;;  %v24414_v53 = vld [vmem:[#allocation71_spill] sm:$0xff] }
 0x592   : > { %v11732_v34 = vadd.f32 0.5, %v11572_v57  ;;  %17018 = vtanh.f32 %v10583_v23  ;;  %v12089_v62 = vmul.f32 0.5, %v22618_v18  ;;  %v12051_v5 = vmul.f32 0.5, %v22596_v46 }
 0x593   : > { %v17003_v10 = vpop.eup %17002  ;;  %v11734_v15 = vadd.f32 0.5, %v11574_v0  ;;  %17020 = vtanh.f32 %v10672_v12  ;;  %14673 = vmatmul.mubr.msk.f32.vlgmr.msra.gmra.mrb[168].mxu0 %vm2560_vm1, %v22234_v14  ;;  %v12091_v21 = vmul.f32 0.5, %v22626_v45  ;;  %v15437_v48 = vpack.c.bf16 %v22615_v20, %v22585_v59  ;;  %v22746_v18 = vpop.f32.mrb[126].mxu0 }
 0x594   : > { %v17005_v4 = vpop.eup %17004  ;;  %v11892_v43 = vadd.f32 %v11732_v34, %v24414_v53  ;;  %v11573_v44 = vmul.f32 0.5, %v17003_v10  ;;  %14677 = vmatmul.mubr.msk.f32.vlgmr.msra.gmra.mrb[168].mxu1 %vm2560_vm1, %v22234_v14  ;;  %17022 = vtanh.f32 %v10587_v17  ;;  %12790 = vmatprep.mubr.f32.mxu0 %v23869_v40  ;;  %v15435_v46 = vpack.c.bf16 %v12089_v62, %v12049_v25  ;;  %v22750_v20 = vpop.f32.mrb[126].mxu1 }
 0x595   : > { %v17007_v58 = vpop.eup %17006  ;;  %v11894_v13 = vadd.f32 %v11734_v15, %v24415_v28  ;;  %v11575_v45 = vmul.f32 0.5, %v17005_v4  ;;  %17024 = vtanh.f32 %v10676_v27  ;;  %12873 = vmatprep.mubr.f32.mxu1 %v23869_v40  ;;  %v15443_v59 = vpack.c.bf16 %v12091_v21, %v12051_v5  ;;  %v22752_v23 = vpop.f32.mrb[127].mxu0  ;;  %v24417_v5 = vld [vmem:[#allocation74_spill] sm:$0xff] }
 0x596   : > { %v17009_v12 = vpop.eup %17008  ;;  %v22754_v14 = vmul.f32 0.5, %v11892_v43  ;;  %v11733_v17 = vadd.f32 0.5, %v11573_v44  ;;  %v11612_v2 = vmul.f32 0.5, %v17007_v58  ;;  %17026 = vtanh.f32 %v10589_v49  ;;  %15436 = vmatprep.subr.bf16.mxu0 %v15435_v46  ;;  %v22756_v57 = vpop.f32.mrb[127].mxu1 }
 0x597   : > { %24416 = vst [vmem:[#allocation6_spill] sm:$0xff] %v22756_v57  ;;  %v17011_v0 = vpop.eup %17010  ;;  %v22758_v25 = vmul.f32 0.5, %v11894_v13  ;;  %v11735_v27 = vadd.f32 0.5, %v11575_v45  ;;  %v11614_v34 = vmul.f32 0.5, %v17009_v12  ;;  %17028 = vtanh.f32 %v10678_v36  ;;  %14674 = vmatmul.mubr.msk.f32.gmra.mrb[170].mxu0 %vm2560_vm1, %v22262_v51  ;;  %15444 = vmatprep.subr.bf16.mxu1 %v15443_v59  ;;  %v22769_v4 = vpop.f32.mrb[128].mxu0  ;;  %v24419_v36 = vld [vmem:[#allocation76_spill] sm:$0xff] }
 0x598   : > { %v17013_v62 = vpop.eup %17012  ;;  %v22763_v10 = vadd.f32 %v11733_v17, %v24417_v5  ;;  %v11772_v15 = vadd.f32 0.5, %v11612_v2  ;;  %v11613_v21 = vmul.f32 0.5, %v17011_v0  ;;  %14678 = vmatmul.mubr.msk.f32.gmra.mrb[170].mxu1 %vm2560_vm1, %v22262_v51  ;;  %15438 = vmatpush1.bf16.msra.mxu0 %v15437_v48  ;;  %v15445_v49 = vpack.c.bf16 %v22623_v38, %v22593_v41  ;;  %24418 = vst [vmem:[#allocation159_spill] sm:$0xff] %v22769_v4  ;;  %v22778_v58 = vpop.f32.mrb[128].mxu1  ;;  %v24422_v41 = vld [vmem:[#allocation72_spill] sm:$0xff]  ;;  %v24424_v12 = vld [vmem:[#allocation73_spill] sm:$0xff] }
 0x599   : > { %v22772_v53 = vadd.f32 %v11735_v27, %v24419_v36  ;;  %v11774_v43 = vadd.f32 0.5, %v11614_v34  ;;  %v11615_v44 = vmul.f32 0.5, %v17013_v62  ;;  %v10747_v46 = vadd.f32 %v22537_v61, %v22004_v56  ;;  %12794 = vmatprep.mubr.f32.mxu0 %v23869_v40  ;;  %12877 = vmatprep.mubr.f32.mxu1 %v23869_v40  ;;  %24420 = vst [vmem:[#allocation2_spill] sm:$0xff] %v22778_v58  ;;  %v22780_v51 = vpop.f32.mrb[129].mxu0  ;;  %v22787_v61 = vpop.f32.mrb[129].mxu1  ;;  %v24425_v27 = vld [vmem:[#allocation147_spill] sm:$0xff] }
 0x59a   : > { %24421 = vst [vmem:[#allocation5_spill] sm:$0xff] %v22780_v51  ;;  %v17015_v48 = vpop.eup %17014  ;;  %v11932_v38 = vadd.f32 %v11772_v15, %v24422_v41  ;;  %v11773_v28 = vadd.f32 0.5, %v11613_v21  ;;  %15446 = vmatpush1.bf16.msra.mxu1 %v15445_v49  ;;  %v10836_v13 = vadd.f32 %v22539_v9, %v22004_v56  ;;  %v10749_v45 = vadd.f32 %v22544_v37, %v22004_v56  ;;  %v24426_v5 = vld [vmem:[#allocation75_spill] sm:$0xff]  ;;  %v24428_v36 = vld [vmem:[#allocation77_spill] sm:$0xff]  ;;  %v24442_v51 = vld [vmem:[#allocation80_spill] sm:$0xff] }
 0x59b   : > { %24423 = vst [vmem:[#allocation7_spill] sm:$0xff] %v22787_v61  ;;  %v17017_v59 = vpop.eup %17016  ;;  %v11934_v17 = vadd.f32 %v11774_v43, %v24424_v12  ;;  %v11775_v2 = vadd.f32 0.5, %v11615_v44  ;;  %v11652_v0 = vmul.f32 0.5, %v17015_v48  ;;  %17030 = vtanh.f32 %v10747_v46  ;;  %14675 = vmatmul.mubr.msk.f32.gmra.mrb[172].mxu0 %vm2560_vm1, %v24425_v27  ;;  %v22800_v37 = vpop.f32.mrb[130].mxu0  ;;  %v24444_v58 = vld [vmem:[#allocation81_spill] sm:$0xff] }
 0x59c   : > { %v17019_v34 = vpop.eup %17018  ;;  %v22792_v62 = vmul.f32 0.5, %v11932_v38  ;;  %v22795_v15 = vadd.f32 %v11773_v28, %v24426_v5  ;;  %v11654_v9 = vmul.f32 0.5, %v17017_v59  ;;  %17032 = vtanh.f32 %v10836_v13  ;;  %14679 = vmatmul.mubr.msk.f32.gmra.mrb[172].mxu1 %vm2560_vm1, %v24425_v27  ;;  %12798 = vmatprep.mubr.f32.mxu0 %v23869_v40  ;;  %24427 = vst [vmem:[#allocation3_spill] sm:$0xff] %v22800_v37  ;;  %v22808_v48 = vpop.f32.mrb[130].mxu1  ;;  %v24431_v59 = vld [vmem:[#allocation149_spill] sm:$0xff] }
 0x59d   : > { %v17021_v21 = vpop.eup %17020  ;;  %v22802_v49 = vmul.f32 0.5, %v11934_v17  ;;  %v22805_v43 = vadd.f32 %v11775_v2, %v24428_v36  ;;  %v11812_v44 = vadd.f32 0.5, %v11652_v0  ;;  %v11653_v46 = vmul.f32 0.5, %v17019_v34  ;;  %12881 = vmatprep.mubr.f32.mxu1 %v23869_v40  ;;  %24429 = vst [vmem:[#allocation8_spill] sm:$0xff] %v22808_v48  ;;  %v22810_v41 = vpop.f32.mrb[131].mxu0  ;;  %v24433_v2 = vld [vmem:[#allocation79_spill] sm:$0xff] }
 0x59e   : > { %24430 = vst [vmem:[#allocation12_spill] sm:$0xff] %v22810_v41  ;;  %v17023_v38 = vpop.eup %17022  ;;  %v11814_v28 = vadd.f32 0.5, %v11654_v9  ;;  %v11655_v13 = vmul.f32 0.5, %v17021_v21  ;;  %17034 = vtanh.f32 %v10749_v45  ;;  %v10838_v12 = vadd.f32 %v24431_v59, %v22004_v56  ;;  %v22814_v17 = vpop.f32.mrb[131].mxu1  ;;  %v24434_v36 = vld [vmem:[#allocation151_spill] sm:$0xff]  ;;  %v24435_v9 = vld [vmem:[#allocation86_spill] sm:$0xff] }
 0x59f   : > { %24432 = vst [vmem:[#allocation15_spill] sm:$0xff] %v22814_v17  ;;  %v17025_v27 = vpop.eup %17024  ;;  %v11972_v5 = vadd.f32 %v11812_v44, %v24433_v2  ;;  %v11813_v0 = vadd.f32 0.5, %v11653_v46  ;;  %v11692_v34 = vmul.f32 0.5, %v17023_v38  ;;  %v10753_v37 = vadd.f32 %v24434_v36, %v22009_v1  ;;  %14676 = vmatmul.mubr.msk.f32.gmra.mrb[174].mxu0 %vm2560_vm1, %v22321_v11  ;;  %v22825_v59 = vld [vmem:[%s23528_s2 + $0x98] sm:$0xff]  ;;  %v22830_v44 = vpop.f32.mrb[132].mxu0  ;;  %v24437_v38 = vld [vmem:[#allocation82_spill] sm:$0xff] }
 0x5a0   : > { %v17027_v41 = vpop.eup %17026  ;;  %v11974_v21 = vadd.f32 %v11814_v28, %v24435_v9  ;;  %v11815_v45 = vadd.f32 0.5, %v11655_v13  ;;  %v11694_v48 = vmul.f32 0.5, %v17025_v27  ;;  %17036 = vtanh.f32 %v10838_v12  ;;  %14680 = vmatmul.mubr.msk.f32.gmra.mrb[174].mxu1 %vm2560_vm1, %v22825_v59  ;;  %12950 = vmatprep.mubr.f32.mxu0 %v23869_v40  ;;  %24436 = vst [vmem:[#allocation9_spill] sm:$0xff] %v22830_v44  ;;  %v22838_v27 = vpop.f32.mrb[132].mxu1  ;;  %v24440_v9 = vld [vmem:[#allocation84_spill] sm:$0xff] }
 0x5a1   : > { %v17029_v46 = vpop.eup %17028  ;;  %v22832_v11 = vmul.f32 0.5, %v11972_v5  ;;  %v22835_v28 = vadd.f32 %v11813_v0, %v24437_v38  ;;  %v11852_v13 = vadd.f32 0.5, %v11692_v34  ;;  %v11693_v12 = vmul.f32 0.5, %v17027_v41  ;;  %13033 = vmatprep.mubr.f32.mxu1 %v23869_v40  ;;  %24438 = vst [vmem:[#allocation10_spill] sm:$0xff] %v22838_v27  ;;  %v22840_v2 = vpop.f32.mrb[133].mxu0  ;;  %v24443_v41 = vld [vmem:[#allocation150_spill] sm:$0xff] }
 0x5a2   : > { %24439 = vst [vmem:[#allocation13_spill] sm:$0xff] %v22840_v2  ;;  %v22842_v36 = vmul.f32 0.5, %v11974_v21  ;;  %v22845_v17 = vadd.f32 %v11815_v45, %v24440_v9  ;;  %v11854_v44 = vadd.f32 0.5, %v11694_v48  ;;  %v11695_v61 = vmul.f32 0.5, %v17029_v46  ;;  %v22847_v5 = vpop.f32.mrb[133].mxu1  ;;  %v24445_v21 = vld [vmem:[#allocation152_spill] sm:$0xff] }
 0x5a3   : > { %24441 = vst [vmem:[#allocation16_spill] sm:$0xff] %v22847_v5  ;;  %v12012_v0 = vadd.f32 %v11852_v13, %v24442_v51  ;;  %v11853_v38 = vadd.f32 0.5, %v11693_v12  ;;  %17038 = vtanh.f32 %v10753_v37  ;;  %v10842_v34 = vadd.f32 %v24443_v41, %v22009_v1  ;;  %v24446_v45 = vld [vmem:[#allocation153_spill] sm:$0xff]  ;;  %v22857_v48 = vpop.f32.mrb[134].mxu0  ;;  %v24448_v51 = vld [vmem:[#allocation83_spill] sm:$0xff] }
 0x5a4   : > { %v12014_v27 = vadd.f32 %v11854_v44, %v24444_v58  ;;  %v11855_v4 = vadd.f32 0.5, %v11695_v61  ;;  %v10755_v2 = vadd.f32 %v24445_v21, %v22009_v1  ;;  %v10844_v9 = vadd.f32 %v24446_v45, %v22009_v1  ;;  %24447 = vst [vmem:[#allocation11_spill] sm:$0xff] %v22857_v48  ;;  %v22865_v12 = vpop.f32.mrb[134].mxu1  ;;  %v22867_v58 = vpop.f32.mrb[135].mxu0  ;;  %v24451_v41 = vld [vmem:[#allocation85_spill] sm:$0xff] }
 0x5a5   : > { %v17031_v46 = vpop.eup %17030  ;;  %v22859_v5 = vmul.f32 0.5, %v12012_v0  ;;  %v22862_v13 = vadd.f32 %v11853_v38, %v24448_v51  ;;  %17040 = vtanh.f32 %v10842_v34  ;;  %v12129_v37 = vmul.f32 0.5, %v22655_v35  ;;  %24449 = vst [vmem:[#allocation14_spill] sm:$0xff] %v22865_v12  ;;  %24450 = vst [vmem:[#allocation19_spill] sm:$0xff] %v22867_v58  ;;  %v22874_v0 = vpop.f32.mrb[135].mxu1 }
 0x5a6   : > { %v17033_v61 = vpop.eup %17032  ;;  %v22869_v44 = vmul.f32 0.5, %v12014_v27  ;;  %v22872_v21 = vadd.f32 %v11855_v4, %v24451_v41  ;;  %v11576_v45 = vmul.f32 0.5, %v17031_v46  ;;  %17042 = vtanh.f32 %v10755_v2  ;;  %24452 = vst [vmem:[#allocation21_spill] sm:$0xff] %v22874_v0 }
 0x5a7   : > { %v11578_v48 = vmul.f32 0.5, %v17033_v61  ;;  %17044 = vtanh.f32 %v10844_v9  ;;  %v12169_v38 = vmul.f32 0.5, %v22692_v19  ;;  %v12131_v35 = vmul.f32 0.5, %v22660_v50  ;;  %v22883_v46 = vpop.f32.mrb[136].mxu0  ;;  %v24453_v9 = vld [vmem:[#allocation154_spill] sm:$0xff] }
 0x5a8   : > { %v17035_v34 = vpop.eup %17034  ;;  %v11736_v51 = vadd.f32 0.5, %v11576_v45  ;;  %v12171_v58 = vmul.f32 0.5, %v22706_v47  ;;  %v15441_v27 = vpack.c.bf16 %v22683_v63, %v22652_v52  ;;  %v15449_v4 = vpack.c.bf16 %v22687_v39, %v22657_v54  ;;  %v22887_v0 = vpop.f32.mrb[136].mxu1  ;;  %v24455_v47 = vld [vmem:[#allocation87_spill] sm:$0xff]  ;;  %v24456_v52 = vld [vmem:[#allocation156_spill] sm:$0xff]  ;;  %v24457_v54 = vld [vmem:[#allocation157_spill] sm:$0xff] }
 0x5a9   : > { %v11738_v2 = vadd.f32 0.5, %v11578_v48  ;;  %v11577_v41 = vmul.f32 0.5, %v17035_v34  ;;  %v15439_v61 = vpack.c.bf16 %v12169_v38, %v12129_v37  ;;  %v10759_v19 = vadd.f32 %v24453_v9, %v22013_v3  ;;  %24454 = vst [vmem:[#allocation17_spill] sm:$0xff] %v22887_v0  ;;  %v22889_v50 = vpop.f32.mrb[137].mxu0  ;;  %v22896_v48 = vpop.f32.mrb[137].mxu1  ;;  %v24458_v37 = vld [vmem:[#allocation88_spill] sm:$0xff] }
 0x5aa   : > { %v17037_v45 = vpop.eup %17036  ;;  %v11896_v12 = vadd.f32 %v11736_v51, %v24455_v47  ;;  %v15447_v57 = vpack.c.bf16 %v12171_v58, %v12131_v35  ;;  %v10848_v63 = vadd.f32 %v24456_v52, %v22013_v3  ;;  %v10761_v39 = vadd.f32 %v24457_v54, %v22013_v3  ;;  %v24459_v58 = vld [vmem:[#allocation155_spill] sm:$0xff] }
 0x5ab   : > { %v11898_v38 = vadd.f32 %v11738_v2, %v24458_v37  ;;  %v11737_v34 = vadd.f32 0.5, %v11577_v41  ;;  %v11579_v9 = vmul.f32 0.5, %v17037_v45  ;;  %15440 = vmatprep.subr.bf16.mxu0 %v15439_v61  ;;  %17046 = vtanh.f32 %v10759_v19  ;;  %v22905_v47 = vpop.f32.mrb[138].mxu0  ;;  %v24460_v2 = vld [vmem:[#allocation91_spill] sm:$0xff]  ;;  %v24462_v19 = vld [vmem:[#allocation158_spill] sm:$0xff] }
 0x5ac   : > { %v22899_v0 = vmul.f32 0.5, %v11896_v12  ;;  %15448 = vmatprep.subr.bf16.mxu1 %v15447_v57  ;;  %15442 = vmatpush1.bf16.msra.mxu0 %v15441_v27  ;;  %17048 = vtanh.f32 %v10848_v63  ;;  %v10850_v35 = vadd.f32 %v24459_v58, %v22013_v3  ;;  %v10765_v51 = vadd.f32 %v22621_v29, %v22022_v31  ;;  %v22912_v57 = vpop.f32.mrb[138].mxu1  ;;  %v22914_v12 = vpop.f32.mrb[139].mxu0 }
 0x5ad   : > { %v17039_v52 = vpop.eup %17038  ;;  %v22907_v54 = vmul.f32 0.5, %v11898_v38  ;;  %v22910_v41 = vadd.f32 %v11737_v34, %v24460_v2  ;;  %v11739_v61 = vadd.f32 0.5, %v11579_v9  ;;  %15450 = vmatpush1.bf16.msra.mxu1 %v15449_v4  ;;  %17050 = vtanh.f32 %v10761_v39  ;;  %24461 = vst [vmem:[#allocation18_spill] sm:$0xff] %v22914_v12  ;;  %v22920_v63 = vpop.f32.mrb[139].mxu1  ;;  %v24464_v38 = vld [vmem:[#allocation93_spill] sm:$0xff]  ;;  %v22928_v4 = vld [vmem:[%s23528_s2 + $0x80] sm:$0xff] }
 0x5ae   : > { %v11616_v27 = vmul.f32 0.5, %v17039_v52  ;;  %17052 = vtanh.f32 %v10850_v35  ;;  %v10854_v29 = vadd.f32 %v22628_v6, %v22022_v31  ;;  %v10767_v45 = vadd.f32 %v24462_v19, %v22022_v31  ;;  %24463 = vst [vmem:[#allocation20_spill] sm:$0xff] %v22920_v63  ;;  %v24465_v6 = vld [vmem:[#allocation4_spill] sm:$0xff] }
 0x5af   : > { %v17041_v37 = vpop.eup %17040  ;;  %v22923_v34 = vadd.f32 %v11739_v61, %v24464_v38  ;;  %14681 = vmatmul.mubr.msk.f32.vlgmr.msra.gmra.mrb[176].mxu0 %vm2560_vm1, %v22928_v4  ;;  %17054 = vtanh.f32 %v10765_v51  ;;  %v10856_v39 = vadd.f32 %v24465_v6, %v22022_v31  ;;  %v12053_v9 = vmul.f32 0.5, %v22763_v10  ;;  %v22939_v61 = vpop.f32.mrb[140].mxu0 }
 0x5b0   : > { %v17043_v58 = vpop.eup %17042  ;;  %v11776_v35 = vadd.f32 0.5, %v11616_v27  ;;  %v11618_v52 = vmul.f32 0.5, %v17041_v37  ;;  %14685 = vmatmul.mubr.msk.f32.vlgmr.msra.gmra.mrb[176].mxu1 %vm2560_vm1, %v22928_v4  ;;  %17056 = vtanh.f32 %v10854_v29  ;;  %12956 = vmatprep.mubr.f32.mxu0 %v23869_v40  ;;  %v12093_v2 = vmul.f32 0.5, %v22795_v15  ;;  %24466 = vst [vmem:[#allocation22_spill] sm:$0xff] %v22939_v61  ;;  %v22944_v37 = vpop.f32.mrb[140].mxu1  ;;  %v24467_v29 = vld [vmem:[#allocation89_spill] sm:$0xff] }
 0x5b1   : > { %v17045_v19 = vpop.eup %17044  ;;  %v11617_v51 = vmul.f32 0.5, %v17043_v58  ;;  %13039 = vmatprep.mubr.f32.mxu1 %v23869_v40  ;;  %17058 = vtanh.f32 %v10767_v45  ;;  %v12055_v10 = vmul.f32 0.5, %v22772_v53  ;;  %v12095_v27 = vmul.f32 0.5, %v22805_v43  ;;  %v22946_v38 = vpop.f32.mrb[141].mxu0  ;;  %v22954_v45 = vld [vmem:[%s23528_s2 + $0x88] sm:$0xff] }
 0x5b2   : > { %v11936_v6 = vadd.f32 %v11776_v35, %v24467_v29  ;;  %v11778_v63 = vadd.f32 0.5, %v11618_v52  ;;  %v11619_v12 = vmul.f32 0.5, %v17045_v19  ;;  %17060 = vtanh.f32 %v10856_v39  ;;  %v22949_v15 = vpop.f32.mrb[141].mxu1  ;;  %v24469_v52 = vld [vmem:[#allocation90_spill] sm:$0xff] }
 0x5b3   : > { %24468 = vst [vmem:[#allocation23_spill] sm:$0xff] %v22949_v15  ;;  %v11777_v61 = vadd.f32 0.5, %v11617_v51  ;;  %14682 = vmatmul.mubr.msk.f32.gmra.mrb[178].mxu0 %vm2560_vm1, %v22954_v45  ;;  %v15451_v53 = vpack.c.bf16 %v12093_v2, %v12053_v9  ;;  %v15459_v43 = vpack.c.bf16 %v12095_v27, %v12055_v10  ;;  %v15453_v58 = vpack.c.bf16 %v22792_v62, %v22754_v14  ;;  %v22968_v29 = vpop.f32.mrb[142].mxu0  ;;  %v24471_v2 = vld [vmem:[#allocation92_spill] sm:$0xff] }
 0x5b4   : > { %v22960_v35 = vmul.f32 0.5, %v11936_v6  ;;  %v11938_v39 = vadd.f32 %v11778_v63, %v24469_v52  ;;  %v11779_v19 = vadd.f32 0.5, %v11619_v12  ;;  %14686 = vmatmul.mubr.msk.f32.gmra.mrb[178].mxu1 %vm2560_vm1, %v22954_v45  ;;  %v15461_v51 = vpack.c.bf16 %v22802_v49, %v22758_v25  ;;  %12960 = vmatprep.mubr.f32.mxu0 %v23869_v40  ;;  %24470 = vst [vmem:[#allocation30_spill] sm:$0xff] %v22968_v29  ;;  %v22980_v25 = vpop.f32.mrb[142].mxu1  ;;  %v22982_v49 = vpop.f32.mrb[143].mxu0 }
 0x5b5   : > { %v17047_v9 = vpop.eup %17046  ;;  %v22971_v10 = vadd.f32 %v11777_v61, %v24471_v2  ;;  %15452 = vmatprep.subr.bf16.mxu0 %v15451_v53  ;;  %15460 = vmatprep.subr.bf16.mxu1 %v15459_v43  ;;  %v10925_v14 = vadd.f32 %v22673_v22, %v22004_v56  ;;  %v11014_v62 = vadd.f32 %v22679_v33, %v22004_v56  ;;  %v22978_v12 = vmul.f32 0.5, %v22835_v28  ;;  %v24474_v61 = vld [vmem:[#allocation94_spill] sm:$0xff]  ;;  %v22991_v33 = vpop.f32.mrb[143].mxu1 }
 0x5b6   : > { %24472 = vst [vmem:[#allocation26_spill] sm:$0xff] %v22980_v25  ;;  %24473 = vst [vmem:[#allocation28_spill] sm:$0xff] %v22982_v49  ;;  %v17049_v63 = vpop.eup %17048  ;;  %v22984_v27 = vmul.f32 0.5, %v11938_v39  ;;  %v22987_v6 = vadd.f32 %v11779_v19, %v24474_v61  ;;  %v11656_v53 = vmul.f32 0.5, %v17047_v9  ;;  %15454 = vmatpush1.bf16.msra.mxu0 %v15453_v58  ;;  %15462 = vmatpush1.bf16.msra.mxu1 %v15461_v51  ;;  %v22999_v39 = vld [vmem:[%s23528_s2 + $0x90] sm:$0xff]  ;;  %v24476_v61 = vld [vmem:[#allocation95_spill] sm:$0xff] }
 0x5b7   : > { %v10927_v22 = vadd.f32 %v22681_v8, %v22004_v56  ;;  %24475 = vst [vmem:[#allocation24_spill] sm:$0xff] %v22991_v33  ;;  %v17051_v28 = vpop.eup %17050  ;;  %v11658_v43 = vmul.f32 0.5, %v17049_v63  ;;  %17062 = vtanh.f32 %v10925_v14  ;;  %13043 = vmatprep.mubr.f32.mxu1 %v23869_v40  ;;  %v11016_v52 = vadd.f32 %v22685_v42, %v22004_v56  ;;  %14683 = vmatmul.mubr.msk.f32.gmra.mrb[180].mxu0 %vm2560_vm1, %v22999_v39  ;;  %v24477_v49 = vld [vmem:[#allocation102_spill] sm:$0xff] }
 0x5b8   : > { %v10931_v8 = vadd.f32 %v22695_v32, %v22009_v1  ;;  %v17053_v58 = vpop.eup %17052  ;;  %v11816_v19 = vadd.f32 0.5, %v11656_v53  ;;  %v11657_v51 = vmul.f32 0.5, %v17051_v28  ;;  %17064 = vtanh.f32 %v11014_v62  ;;  %14687 = vmatmul.mubr.msk.f32.gmra.mrb[180].mxu1 %vm2560_vm1, %v22999_v39  ;;  %12964 = vmatprep.mubr.f32.mxu0 %v23869_v40 }
 0x5b9   : > { %v11020_v42 = vadd.f32 %v22701_v60, %v22009_v1  ;;  %v17055_v9 = vpop.eup %17054  ;;  %v11818_v2 = vadd.f32 0.5, %v11658_v43  ;;  %v11659_v14 = vmul.f32 0.5, %v17053_v58  ;;  %17066 = vtanh.f32 %v10927_v22  ;;  %13047 = vmatprep.mubr.f32.mxu1 %v23869_v40  ;;  %v24478_v58 = vld [vmem:[#allocation98_spill] sm:$0xff] }
 0x5ba   : > { %v10933_v32 = vadd.f32 %v22703_v16, %v22009_v1  ;;  %v17057_v63 = vpop.eup %17056  ;;  %v11976_v62 = vadd.f32 %v11816_v19, %v24476_v61  ;;  %v11817_v53 = vadd.f32 0.5, %v11657_v51  ;;  %v11696_v28 = vmul.f32 0.5, %v17055_v9  ;;  %v24481_v61 = vld [vmem:[#allocation97_spill] sm:$0xff] }
 0x5bb   : > { %17068 = vtanh.f32 %v11016_v52  ;;  %v17059_v33 = vpop.eup %17058  ;;  %v11978_v60 = vadd.f32 %v11818_v2, %v24477_v49  ;;  %v11819_v25 = vadd.f32 0.5, %v11659_v14  ;;  %v11698_v29 = vmul.f32 0.5, %v17057_v63  ;;  %14684 = vmatmul.mubr.msk.f32.gmra.mrb[182].mxu0 %vm2560_vm1, %v22825_v59  ;;  %v24479_v52 = vld [vmem:[#allocation100_spill] sm:$0xff] }
 0x5bc   : > { %17070 = vtanh.f32 %v10931_v8  ;;  %v17061_v22 = vpop.eup %17060  ;;  %v23017_v43 = vmul.f32 0.5, %v11976_v62  ;;  %v23020_v16 = vadd.f32 %v11817_v53, %v24478_v58  ;;  %v11856_v15 = vadd.f32 0.5, %v11696_v28  ;;  %14688 = vmatmul.mubr.msk.f32.gmra.mrb[182].mxu1 %vm2560_vm1, %v22825_v59  ;;  %13116 = vmatprep.mubr.f32.mxu0 %v23869_v40  ;;  %v24480_v2 = vld [vmem:[#allocation96_spill] sm:$0xff] }
 0x5bd   : > { %v11697_v19 = vmul.f32 0.5, %v17059_v33  ;;  %v23025_v49 = vmul.f32 0.5, %v11978_v60  ;;  %v23028_v8 = vadd.f32 %v11819_v25, %v24479_v52  ;;  %v11858_v51 = vadd.f32 0.5, %v11698_v29  ;;  %13199 = vmatprep.mubr.f32.mxu1 %v23869_v40  ;;  %v24482_v25 = vld [vmem:[#allocation99_spill] sm:$0xff] }
 0x5be   : > { %v11699_v9 = vmul.f32 0.5, %v17061_v22  ;;  %v12016_v14 = vadd.f32 %v11856_v15, %v24480_v2  ;;  %17072 = vtanh.f32 %v11020_v42  ;;  %v11022_v33 = vadd.f32 %v22710_v24, %v22009_v1  ;;  %v24483_v42 = vld [vmem:[#allocation101_spill] sm:$0xff] }
 0x5bf   : > { %v11857_v63 = vadd.f32 0.5, %v11697_v19  ;;  %v12018_v62 = vadd.f32 %v11858_v51, %v24481_v61  ;;  %17074 = vtanh.f32 %v10933_v32  ;;  %v12173_v28 = vmul.f32 0.5, %v22862_v13 }
 0x5c0   : > { %v11859_v53 = vadd.f32 0.5, %v11699_v9  ;;  %v23036_v60 = vmul.f32 0.5, %v12016_v14  ;;  %17076 = vtanh.f32 %v11022_v33  ;;  %v12135_v22 = vmul.f32 0.5, %v22845_v17 }
 0x5c1   : > { %v23039_v29 = vadd.f32 %v11857_v63, %v24482_v25  ;;  %v17063_v15 = vpop.eup %17062  ;;  %v23042_v58 = vmul.f32 0.5, %v12018_v62  ;;  %v15455_v24 = vpack.c.bf16 %v12173_v28, %v22978_v12  ;;  %v12175_v32 = vmul.f32 0.5, %v22872_v21  ;;  %v24485_v25 = vld [vmem:[#allocation166_spill] sm:$0xff] }
 0x5c2   : > { %v23045_v19 = vadd.f32 %v11859_v53, %v24483_v42  ;;  %v17065_v52 = vpop.eup %17064  ;;  %v11580_v13 = vmul.f32 0.5, %v17063_v15  ;;  %v15457_v51 = vpack.c.bf16 %v22859_v5, %v22832_v11  ;;  %v15465_v9 = vpack.c.bf16 %v22869_v44, %v22842_v36 }
 0x5c3   : > { %v10937_v17 = vadd.f32 %v22724_v30, %v22013_v3  ;;  %v17067_v2 = vpop.eup %17066  ;;  %v11582_v14 = vmul.f32 0.5, %v17065_v52  ;;  %15456 = vmatprep.subr.bf16.mxu0 %v15455_v24  ;;  %v15463_v63 = vpack.c.bf16 %v12175_v32, %v12135_v22  ;;  %v11026_v12 = vadd.f32 %v22729_v7, %v22013_v3  ;;  %v24484_v7 = vld [vmem:[#allocation164_spill] sm:$0xff] }
 0x5c4   : > { %v10939_v21 = vadd.f32 %v22731_v55, %v22013_v3  ;;  %v11740_v61 = vadd.f32 0.5, %v11580_v13  ;;  %v11581_v62 = vmul.f32 0.5, %v17067_v2  ;;  %15458 = vmatpush1.bf16.msra.mxu0 %v15457_v51  ;;  %v11028_v11 = vadd.f32 %v22735_v26, %v22013_v3 }
 0x5c5   : > { %v17069_v33 = vpop.eup %17068  ;;  %17078 = vtanh.f32 %v10937_v17  ;;  %v11742_v30 = vadd.f32 0.5, %v11582_v14  ;;  %15464 = vmatprep.subr.bf16.mxu1 %v15463_v63  ;;  %v10943_v44 = vadd.f32 %v22746_v18, %v22022_v31  ;;  %v11032_v26 = vadd.f32 %v22750_v20, %v22022_v31  ;;  %v24486_v18 = vld [vmem:[#allocation106_spill] sm:$0xff]  ;;  %v24488_v14 = vld [vmem:[#allocation103_spill] sm:$0xff] }
 0x5c6   : > { %v17071_v36 = vpop.eup %17070  ;;  %v11583_v5 = vmul.f32 0.5, %v17069_v33  ;;  %17080 = vtanh.f32 %v11026_v12  ;;  %v11900_v53 = vadd.f32 %v11740_v61, %v24484_v7  ;;  %v11741_v28 = vadd.f32 0.5, %v11581_v62  ;;  %15466 = vmatpush1.bf16.msra.mxu1 %v15465_v9  ;;  %v24487_v9 = vld [vmem:[#allocation108_spill] sm:$0xff]  ;;  %v24489_v33 = vld [vmem:[#allocation6_spill] sm:$0xff] }
 0x5c7   : > { %v11620_v55 = vmul.f32 0.5, %v17071_v36  ;;  %17082 = vtanh.f32 %v10939_v21  ;;  %v11902_v22 = vadd.f32 %v11742_v30, %v24485_v25  ;;  %14689 = vmatmul.mubr.msk.f32.vlgmr.msra.gmra.mrb[184].mxu0 %vm2560_vm1, %v22928_v4  ;;  %v10945_v21 = vadd.f32 %v22752_v23, %v22022_v31  ;;  %v24490_v23 = vld [vmem:[#allocation104_spill] sm:$0xff] }
 0x5c8   : > { %v11743_v15 = vadd.f32 0.5, %v11583_v5  ;;  %17084 = vtanh.f32 %v11028_v11  ;;  %v17073_v42 = vpop.eup %17072  ;;  %v23069_v24 = vmul.f32 0.5, %v11900_v53  ;;  %v23072_v32 = vadd.f32 %v11741_v28, %v24486_v18  ;;  %13122 = vmatprep.mubr.f32.mxu0 %v23869_v40  ;;  %v24492_v18 = vld [vmem:[#allocation109_spill] sm:$0xff] }
 0x5c9   : > { %v11780_v52 = vadd.f32 0.5, %v11620_v55  ;;  %17086 = vtanh.f32 %v10943_v44  ;;  %v17075_v13 = vpop.eup %17074  ;;  %v23075_v51 = vmul.f32 0.5, %v11902_v22  ;;  %v11622_v2 = vmul.f32 0.5, %v17073_v42  ;;  %14693 = vmatmul.mubr.msk.f32.vlgmr.msra.gmra.mrb[184].mxu1 %vm2560_vm1, %v22928_v4 }
 0x5ca   : > { %v23078_v17 = vadd.f32 %v11743_v15, %v24487_v9  ;;  %17088 = vtanh.f32 %v11032_v26  ;;  %v17077_v20 = vpop.eup %17076  ;;  %v11621_v12 = vmul.f32 0.5, %v17075_v13  ;;  %13205 = vmatprep.mubr.f32.mxu1 %v23869_v40  ;;  %v11034_v61 = vadd.f32 %v24489_v33, %v22022_v31  ;;  %v24493_v9 = vld [vmem:[#allocation159_spill] sm:$0xff] }
 0x5cb   : > { %v11940_v63 = vadd.f32 %v11780_v52, %v24488_v14  ;;  %v11782_v62 = vadd.f32 0.5, %v11622_v2  ;;  %v11623_v11 = vmul.f32 0.5, %v17077_v20  ;;  %14690 = vmatmul.mubr.msk.f32.gmra.mrb[186].mxu0 %vm2560_vm1, %v22954_v45  ;;  %v12057_v36 = vmul.f32 0.5, %v22910_v41  ;;  %v24491_v41 = vld [vmem:[#allocation107_spill] sm:$0xff] }
 0x5cc   : > { %v12097_v30 = vmul.f32 0.5, %v22971_v10  ;;  %v11781_v44 = vadd.f32 0.5, %v11621_v12  ;;  %17090 = vtanh.f32 %v10945_v21  ;;  %v12059_v7 = vmul.f32 0.5, %v22923_v34  ;;  %13126 = vmatprep.mubr.f32.mxu0 %v23869_v40  ;;  %v24495_v21 = vld [vmem:[#allocation5_spill] sm:$0xff] }
 0x5cd   : > { %v23092_v5 = vmul.f32 0.5, %v11940_v63  ;;  %v11942_v53 = vadd.f32 %v11782_v62, %v24490_v23  ;;  %v11783_v28 = vadd.f32 0.5, %v11623_v11  ;;  %17092 = vtanh.f32 %v11034_v61  ;;  %14694 = vmatmul.mubr.msk.f32.gmra.mrb[186].mxu1 %vm2560_vm1, %v22954_v45  ;;  %v24497_v23 = vld [vmem:[#allocation105_spill] sm:$0xff] }
 0x5ce   : > { %v15467_v55 = vpack.c.bf16 %v12097_v30, %v12057_v36  ;;  %v23100_v22 = vadd.f32 %v11781_v44, %v24491_v41  ;;  %v12099_v10 = vmul.f32 0.5, %v22987_v6  ;;  %v15469_v15 = vpack.c.bf16 %v22960_v35, %v22899_v0  ;;  %13209 = vmatprep.mubr.f32.mxu1 %v23869_v40  ;;  %v24496_v36 = vld [vmem:[#allocation7_spill] sm:$0xff]  ;;  %v17193_v44 = vld [vmem:[%s23529_s3] sm:$0xff] }
 0x5cf   : > { %v17079_v25 = vpop.eup %17078  ;;  %v15477_v34 = vpack.c.bf16 %v22984_v27, %v22907_v54  ;;  %v23108_v42 = vmul.f32 0.5, %v11942_v53  ;;  %v23111_v52 = vadd.f32 %v11783_v28, %v24492_v18  ;;  %v11103_v2 = vadd.f32 %v24493_v9, %v22004_v56  ;;  %14691 = vmatmul.mubr.msk.f32.gmra.mrb[188].mxu0 %vm2560_vm1, %v22999_v39  ;;  %v24494_v54 = vld [vmem:[#allocation2_spill] sm:$0xff]  ;;  %v24499_v18 = vld [vmem:[#allocation119_spill] sm:$0xff] }
 0x5d0   : > { %v17081_v26 = vpop.eup %17080  ;;  %v11660_v13 = vmul.f32 0.5, %v17079_v25  ;;  %15468 = vmatprep.subr.bf16.mxu0 %v15467_v55  ;;  %v15475_v6 = vpack.c.bf16 %v12099_v10, %v12059_v7  ;;  %v11192_v27 = vadd.f32 %v24494_v54, %v22004_v56  ;;  %13130 = vmatprep.mubr.f32.mxu0 %v23869_v40  ;;  %v17212_v12 = vmov 5   ;;  %v24498_v25 = vld [vmem:[#allocation110_spill] sm:$0xff] }
 0x5d1   : > { %v17083_v0 = vpop.eup %17082  ;;  %v11662_v35 = vmul.f32 0.5, %v17081_v26  ;;  %15470 = vmatpush1.bf16.msra.mxu0 %v15469_v15  ;;  %17094 = vtanh.f32 %v11103_v2  ;;  %15557 = vset.pattern.permute.xlu0 %v17212_v12  ;;  %v11105_v33 = vadd.f32 %v24495_v21, %v22004_v56  ;;  %v11194_v30 = vadd.f32 %v24496_v36, %v22004_v56  ;;  %v24500_v2 = vld [vmem:[#allocation3_spill] sm:$0xff] }
 0x5d2   : > { %v17085_v20 = vpop.eup %17084  ;;  %v11820_v14 = vadd.f32 0.5, %v11660_v13  ;;  %v11661_v63 = vmul.f32 0.5, %v17083_v0  ;;  %14695 = vmatmul.mubr.msk.f32.gmra.mrb[188].mxu1 %vm2560_vm1, %v22999_v39  ;;  %15476 = vmatprep.subr.bf16.mxu1 %v15475_v6  ;;  %17096 = vtanh.f32 %v11192_v27  ;;  %v24501_v6 = vld [vmem:[#allocation113_spill] sm:$0xff]  ;;  %v24503_v12 = vld [vmem:[#allocation111_spill] sm:$0xff] }
 0x5d3   : > { %v17087_v61 = vpop.eup %17086  ;;  %v11822_v62 = vadd.f32 0.5, %v11662_v35  ;;  %v11663_v11 = vmul.f32 0.5, %v17085_v20  ;;  %12198 = vperm.xlu0 %15557, %v17193_v44   ;;  %15478 = vmatpush1.bf16.msra.mxu1 %v15477_v34  ;;  %17098 = vtanh.f32 %v11105_v33  ;;  %v11109_v34 = vadd.f32 %v24500_v2, %v22009_v1  ;;  %v24502_v20 = vld [vmem:[#allocation8_spill] sm:$0xff]  ;;  %v24506_v44 = vld [vmem:[#allocation15_spill] sm:$0xff] }
 0x5d4   : > { %v17089_v7 = vpop.eup %17088  ;;  %v11980_v53 = vadd.f32 %v11820_v14, %v24497_v23  ;;  %v11821_v28 = vadd.f32 0.5, %v11661_v63  ;;  %v11700_v55 = vmul.f32 0.5, %v17087_v61  ;;  %13213 = vmatprep.mubr.f32.mxu1 %v23869_v40  ;;  %17100 = vtanh.f32 %v11194_v30  ;;  %14692 = vmatmul.mubr.msk.f32.gmra.mrb[190].mxu0 %vm2560_vm1, %v22825_v59  ;;  %v24504_v61 = vld [vmem:[#allocation12_spill] sm:$0xff] }
 0x5d5   : > { %v11982_v41 = vadd.f32 %v11822_v62, %v24498_v25  ;;  %v11823_v10 = vadd.f32 0.5, %v11663_v11  ;;  %v11702_v15 = vmul.f32 0.5, %v17089_v7  ;;  %13282 = vmatprep.mubr.f32.mxu0 %v23869_v40  ;;  %v11198_v14 = vadd.f32 %v24502_v20, %v22009_v1  ;;  %v24505_v11 = vld [vmem:[#allocation112_spill] sm:$0xff] }
 0x5d6   : > { %v23134_v26 = vmul.f32 0.5, %v11980_v53  ;;  %v23137_v13 = vadd.f32 %v11821_v28, %v24499_v18  ;;  %v11860_v9 = vadd.f32 0.5, %v11700_v55  ;;  %14696 = vmatmul.mubr.msk.f32.gmra.mrb[190].mxu1 %vm2560_vm1, %v22825_v59  ;;  %v17091_v0 = vpop.eup %17090  ;;  %17102 = vtanh.f32 %v11109_v34 }
 0x5d7   : > { %v23144_v35 = vmul.f32 0.5, %v11982_v41  ;;  %v23147_v54 = vadd.f32 %v11823_v10, %v24501_v6  ;;  %v11862_v27 = vadd.f32 0.5, %v11702_v15  ;;  %13365 = vmatprep.mubr.f32.mxu1 %v23869_v40  ;;  %v17093_v63 = vpop.eup %17092  ;;  %v11701_v33 = vmul.f32 0.5, %v17091_v0  ;;  %v24507_v15 = vld [vmem:[#allocation120_spill] sm:$0xff]  ;;  %v24508_v6 = vld [vmem:[#allocation114_spill] sm:$0xff] }
 0x5d8   : > { %v12020_v21 = vadd.f32 %v11860_v9, %v24503_v12  ;;  %v11111_v62 = vadd.f32 %v24504_v61, %v22009_v1  ;;  %v11703_v30 = vmul.f32 0.5, %v17093_v63  ;;  %17104 = vtanh.f32 %v11198_v14 }
 0x5d9   : > { %v12022_v36 = vadd.f32 %v11862_v27, %v24505_v11  ;;  %v11200_v7 = vadd.f32 %v24506_v44, %v22009_v1  ;;  %v11861_v53 = vadd.f32 0.5, %v11701_v33  ;;  %v12137_v28 = vmul.f32 0.5, %v23020_v16  ;;  %v24513_v44 = vld [vmem:[#allocation11_spill] sm:$0xff] }
 0x5da   : > { %v23158_v23 = vmul.f32 0.5, %v12020_v21  ;;  %17106 = vtanh.f32 %v11111_v62  ;;  %v11863_v25 = vadd.f32 0.5, %v11703_v30  ;;  %v12177_v41 = vmul.f32 0.5, %v23039_v29  ;;  %v24509_v21 = vld [vmem:[#allocation9_spill] sm:$0xff] }
 0x5db   : > { %v23161_v55 = vmul.f32 0.5, %v12022_v36  ;;  %17108 = vtanh.f32 %v11200_v7  ;;  %v17095_v10 = vpop.eup %17094  ;;  %v23165_v18 = vadd.f32 %v11861_v53, %v24507_v15  ;;  %v12139_v9 = vmul.f32 0.5, %v23028_v8  ;;  %v24511_v62 = vld [vmem:[#allocation13_spill] sm:$0xff]  ;;  %v24512_v36 = vld [vmem:[#allocation16_spill] sm:$0xff] }
 0x5dc   : > { %v12179_v2 = vmul.f32 0.5, %v23045_v19  ;;  %v15473_v34 = vpack.c.bf16 %v23036_v60, %v23017_v43  ;;  %v17097_v0 = vpop.eup %17096  ;;  %v23172_v16 = vadd.f32 %v11863_v25, %v24508_v6  ;;  %v11584_v27 = vmul.f32 0.5, %v17095_v10  ;;  %v24510_v19 = vld [vmem:[#allocation10_spill] sm:$0xff]  ;;  %v24514_v53 = vld [vmem:[#allocation160_spill] sm:$0xff]  ;;  %v24517_v6 = vld [vmem:[#allocation19_spill] sm:$0xff] }
 0x5dd   : > { %v15471_v20 = vpack.c.bf16 %v12177_v41, %v12137_v28  ;;  %v15481_v29 = vpack.c.bf16 %v23042_v58, %v23025_v49  ;;  %v17099_v14 = vpop.eup %17098  ;;  %v11586_v63 = vmul.f32 0.5, %v17097_v0  ;;  %v11115_v8 = vadd.f32 %v24509_v21, %v22013_v3  ;;  %v24515_v41 = vld [vmem:[#allocation14_spill] sm:$0xff] }
 0x5de   : > { %v15479_v12 = vpack.c.bf16 %v12179_v2, %v12139_v9  ;;  %v11204_v33 = vadd.f32 %v24510_v19, %v22013_v3  ;;  %v17101_v61 = vpop.eup %17100  ;;  %v11744_v43 = vadd.f32 0.5, %v11584_v27  ;;  %v11585_v60 = vmul.f32 0.5, %v17099_v14  ;;  %v24516_v9 = vld [vmem:[#allocation161_spill] sm:$0xff]  ;;  %v24518_v14 = vld [vmem:[#allocation127_spill] sm:$0xff] }
 0x5df   : > { %15472 = vmatprep.subr.bf16.mxu0 %v15471_v20  ;;  %v11117_v11 = vadd.f32 %v24511_v62, %v22013_v3  ;;  %v11206_v30 = vadd.f32 %v24512_v36, %v22013_v3  ;;  %v11746_v49 = vadd.f32 0.5, %v11586_v63  ;;  %v11587_v58 = vmul.f32 0.5, %v17101_v61  ;;  %v24520_v62 = vld [vmem:[#allocation21_spill] sm:$0xff] }
 0x5e0   : > { %15480 = vmatprep.subr.bf16.mxu1 %v15479_v12  ;;  %15474 = vmatpush1.bf16.msra.mxu0 %v15473_v34  ;;  %17110 = vtanh.f32 %v11115_v8  ;;  %v11121_v7 = vadd.f32 %v24513_v44, %v22022_v31  ;;  %v11904_v28 = vadd.f32 %v11744_v43, %v24514_v53  ;;  %v11745_v25 = vadd.f32 0.5, %v11585_v60  ;;  %v17103_v15 = vpop.eup %17102  ;;  %v24519_v8 = vld [vmem:[#allocation121_spill] sm:$0xff] }
 0x5e1   : > { %15482 = vmatpush1.bf16.msra.mxu1 %v15481_v29  ;;  %17112 = vtanh.f32 %v11204_v33  ;;  %v11210_v10 = vadd.f32 %v24515_v41, %v22022_v31  ;;  %v11906_v2 = vadd.f32 %v11746_v49, %v24516_v9  ;;  %v11747_v0 = vadd.f32 0.5, %v11587_v58  ;;  %v24521_v58 = vld [vmem:[#allocation117_spill] sm:$0xff]  ;;  %v24523_v9 = vld [vmem:[#allocation128_spill] sm:$0xff] }
 0x5e2   : > { %17114 = vtanh.f32 %v11117_v11  ;;  %v11123_v34 = vadd.f32 %v24517_v6, %v22022_v31  ;;  %v17105_v27 = vpop.eup %17104  ;;  %v23192_v20 = vmul.f32 0.5, %v11904_v28  ;;  %v23195_v63 = vadd.f32 %v11745_v25, %v24518_v14  ;;  %v24522_v28 = vld [vmem:[#allocation118_spill] sm:$0xff] }
 0x5e3   : > { %v11624_v12 = vmul.f32 0.5, %v17103_v15  ;;  %17116 = vtanh.f32 %v11206_v30  ;;  %14697 = vmatmul.mubr.msk.f32.vlgmr.msra.gmra.mrb[192].mxu0 %vm2560_vm1, %v22928_v4  ;;  %v23199_v21 = vmul.f32 0.5, %v11906_v2  ;;  %v23202_v19 = vadd.f32 %v11747_v0, %v24519_v8 }
 0x5e4   : > { %v17107_v29 = vpop.eup %17106  ;;  %v11626_v33 = vmul.f32 0.5, %v17105_v27  ;;  %14701 = vmatmul.mubr.msk.f32.vlgmr.msra.gmra.mrb[192].mxu1 %vm2560_vm1, %v22928_v4  ;;  %17118 = vtanh.f32 %v11121_v7  ;;  %13288 = vmatprep.mubr.f32.mxu0 %v23869_v40  ;;  %v11212_v11 = vadd.f32 %v24520_v62, %v22022_v31  ;;  %v12061_v49 = vmul.f32 0.5, %v23072_v32  ;;  %v24524_v27 = vld [vmem:[#allocation122_spill] sm:$0xff] }
 0x5e5   : > { %v17109_v61 = vpop.eup %17108  ;;  %v11784_v43 = vadd.f32 0.5, %v11624_v12  ;;  %v11625_v60 = vmul.f32 0.5, %v17107_v29  ;;  %17120 = vtanh.f32 %v11210_v10  ;;  %13371 = vmatprep.mubr.f32.mxu1 %v23869_v40  ;;  %v12101_v7 = vmul.f32 0.5, %v23100_v22 }
 0x5e6   : > { %v11786_v36 = vadd.f32 0.5, %v11626_v33  ;;  %v11627_v30 = vmul.f32 0.5, %v17109_v61  ;;  %17122 = vtanh.f32 %v11123_v34  ;;  %v12063_v10 = vmul.f32 0.5, %v23078_v17 }
 0x5e7   : > { %v11944_v44 = vadd.f32 %v11784_v43, %v24521_v58  ;;  %v11785_v53 = vadd.f32 0.5, %v11625_v60  ;;  %17124 = vtanh.f32 %v11212_v11  ;;  %14698 = vmatmul.mubr.msk.f32.gmra.mrb[194].mxu0 %vm2560_vm1, %v22954_v45  ;;  %v12103_v15 = vmul.f32 0.5, %v23111_v52 }
 0x5e8   : > { %v11946_v25 = vadd.f32 %v11786_v36, %v24522_v28  ;;  %v11787_v41 = vadd.f32 0.5, %v11627_v30  ;;  %14702 = vmatmul.mubr.msk.f32.gmra.mrb[194].mxu1 %vm2560_vm1, %v22954_v45  ;;  %13292 = vmatprep.mubr.f32.mxu0 %v23869_v40  ;;  %v15483_v0 = vpack.c.bf16 %v12101_v7, %v12061_v49  ;;  %v15485_v22 = vpack.c.bf16 %v23092_v5, %v23069_v24  ;;  %v24525_v24 = vld [vmem:[#allocation17_spill] sm:$0xff] }
 0x5e9   : > { %v23221_v32 = vmul.f32 0.5, %v11944_v44  ;;  %v23224_v2 = vadd.f32 %v11785_v53, %v24523_v9  ;;  %13375 = vmatprep.mubr.f32.mxu1 %v23869_v40  ;;  %v15491_v52 = vpack.c.bf16 %v12103_v15, %v12063_v10  ;;  %v15493_v14 = vpack.c.bf16 %v23108_v42, %v23075_v51 }
 0x5ea   : > { %v17111_v6 = vpop.eup %17110  ;;  %v23229_v34 = vmul.f32 0.5, %v11946_v25  ;;  %v23232_v17 = vadd.f32 %v11787_v41, %v24524_v27  ;;  %15484 = vmatprep.subr.bf16.mxu0 %v15483_v0  ;;  %v11281_v8 = vadd.f32 %v22883_v46, %v22004_v56  ;;  %v11370_v5 = vadd.f32 %v24525_v24, %v22004_v56  ;;  %v24529_v25 = vld [vmem:[#allocation116_spill] sm:$0xff]  ;;  %v24530_v0 = vld [vmem:[#allocation123_spill] sm:$0xff]  ;;  %v24532_v24 = vld [vmem:[#allocation125_spill] sm:$0xff] }
 0x5eb   : > { %v17113_v12 = vpop.eup %17112  ;;  %v11664_v29 = vmul.f32 0.5, %v17111_v6  ;;  %v11283_v33 = vadd.f32 %v22889_v50, %v22004_v56  ;;  %14699 = vmatmul.mubr.msk.f32.gmra.mrb[196].mxu0 %vm2560_vm1, %v22999_v39  ;;  %15492 = vmatprep.subr.bf16.mxu1 %v15491_v52  ;;  %v11372_v51 = vadd.f32 %v22896_v48, %v22004_v56  ;;  %v11287_v42 = vadd.f32 %v22905_v47, %v22009_v1  ;;  %v24526_v50 = vld [vmem:[#allocation18_spill] sm:$0xff]  ;;  %v24527_v56 = vld [vmem:[#allocation20_spill] sm:$0xff] }
 0x5ec   : > { %v17115_v61 = vpop.eup %17114  ;;  %v11666_v43 = vmul.f32 0.5, %v17113_v12  ;;  %15486 = vmatpush1.bf16.msra.mxu0 %v15485_v22  ;;  %v11376_v46 = vadd.f32 %v22912_v57, %v22009_v1  ;;  %15494 = vmatpush1.bf16.msra.mxu1 %v15493_v14  ;;  %17126 = vtanh.f32 %v11281_v8  ;;  %v11289_v36 = vadd.f32 %v24526_v50, %v22009_v1  ;;  %v24528_v57 = vld [vmem:[#allocation115_spill] sm:$0xff]  ;;  %v24531_v14 = vld [vmem:[#allocation129_spill] sm:$0xff]  ;;  %v24534_v50 = vld [vmem:[#allocation124_spill] sm:$0xff] }
 0x5ed   : > { %v17117_v60 = vpop.eup %17116  ;;  %v11824_v62 = vadd.f32 0.5, %v11664_v29  ;;  %v11665_v11 = vmul.f32 0.5, %v17115_v61  ;;  %13296 = vmatprep.mubr.f32.mxu0 %v23869_v40  ;;  %17128 = vtanh.f32 %v11370_v5  ;;  %14703 = vmatmul.mubr.msk.f32.gmra.mrb[196].mxu1 %vm2560_vm1, %v22999_v39  ;;  %v11378_v48 = vadd.f32 %v24527_v56, %v22009_v1 }
 0x5ee   : > { %v17119_v30 = vpop.eup %17118  ;;  %v11826_v49 = vadd.f32 0.5, %v11666_v43  ;;  %v11667_v58 = vmul.f32 0.5, %v17117_v60  ;;  %17130 = vtanh.f32 %v11283_v33  ;;  %13379 = vmatprep.mubr.f32.mxu1 %v23869_v40  ;;  %v12141_v61 = vmul.f32 0.5, %v23137_v13  ;;  %v24533_v43 = vld [vmem:[#allocation126_spill] sm:$0xff] }
 0x5ef   : > { %v17121_v47 = vpop.eup %17120  ;;  %v11984_v44 = vadd.f32 %v11824_v62, %v24528_v57  ;;  %v11825_v53 = vadd.f32 0.5, %v11665_v11  ;;  %v11704_v7 = vmul.f32 0.5, %v17119_v30  ;;  %14700 = vmatmul.mubr.msk.f32.gmra.mrb[198].mxu0 %vm2560_vm1, %v22825_v59  ;;  %17132 = vtanh.f32 %v11372_v51 }
 0x5f0   : > { %v17123_v28 = vpop.eup %17122  ;;  %v11986_v41 = vadd.f32 %v11826_v49, %v24529_v25  ;;  %v11827_v10 = vadd.f32 0.5, %v11667_v58  ;;  %v11706_v15 = vmul.f32 0.5, %v17121_v47  ;;  %13448 = vmatprep.mubr.f32.mxu0 %v23869_v40  ;;  %17134 = vtanh.f32 %v11287_v42  ;;  %v24535_v42 = vld [vmem:[#allocation130_spill] sm:$0xff] }
 0x5f1   : > { %v17125_v1 = vpop.eup %17124  ;;  %v23263_v9 = vmul.f32 0.5, %v11984_v44  ;;  %v23266_v22 = vadd.f32 %v11825_v53, %v24530_v0  ;;  %v11864_v6 = vadd.f32 0.5, %v11704_v7  ;;  %v11705_v27 = vmul.f32 0.5, %v17123_v28  ;;  %14704 = vmatmul.mubr.msk.f32.gmra.mrb[198].mxu1 %vm2560_vm1, %v22825_v59 }
 0x5f2   : > { %v23268_v52 = vmul.f32 0.5, %v11986_v41  ;;  %v23271_v12 = vadd.f32 %v11827_v10, %v24531_v14  ;;  %v11866_v29 = vadd.f32 0.5, %v11706_v15  ;;  %v11707_v8 = vmul.f32 0.5, %v17125_v1  ;;  %13531 = vmatprep.mubr.f32.mxu1 %v23869_v40 }
 0x5f3   : > { %v12024_v5 = vadd.f32 %v11864_v6, %v24532_v24  ;;  %v11865_v33 = vadd.f32 0.5, %v11705_v27  ;;  %17136 = vtanh.f32 %v11376_v46  ;;  %v12181_v62 = vmul.f32 0.5, %v23165_v18  ;;  %v24541_v6 = vld [vmem:[#allocation137_spill] sm:$0xff] }
 0x5f4   : > { %v12026_v51 = vadd.f32 %v11866_v29, %v24533_v43  ;;  %v11867_v60 = vadd.f32 0.5, %v11707_v8  ;;  %17138 = vtanh.f32 %v11289_v36  ;;  %v12143_v59 = vmul.f32 0.5, %v23147_v54  ;;  %v24536_v36 = vld [vmem:[#allocation22_spill] sm:$0xff]  ;;  %v24542_v29 = vld [vmem:[#allocation24_spill] sm:$0xff] }
 0x5f5   : > { %v23280_v11 = vmul.f32 0.5, %v12024_v5  ;;  %v23283_v30 = vadd.f32 %v11865_v33, %v24534_v50  ;;  %17140 = vtanh.f32 %v11378_v48  ;;  %v15487_v58 = vpack.c.bf16 %v12181_v62, %v12141_v61  ;;  %v24543_v5 = vld [vmem:[#allocation138_spill] sm:$0xff]  ;;  %v24544_v62 = vld [vmem:[#allocation132_spill] sm:$0xff] }
 0x5f6   : > { %v23286_v49 = vmul.f32 0.5, %v12026_v51  ;;  %v23289_v13 = vadd.f32 %v11867_v60, %v24535_v42  ;;  %v17127_v56 = vpop.eup %17126  ;;  %v12183_v46 = vmul.f32 0.5, %v23172_v16  ;;  %v15489_v18 = vpack.c.bf16 %v23158_v23, %v23134_v26  ;;  %v24537_v16 = vld [vmem:[#allocation23_spill] sm:$0xff] }
 0x5f7   : > { %v15497_v47 = vpack.c.bf16 %v23161_v55, %v23144_v35  ;;  %v11293_v57 = vadd.f32 %v24536_v36, %v22013_v3  ;;  %v17129_v54 = vpop.eup %17128  ;;  %v11588_v44 = vmul.f32 0.5, %v17127_v56  ;;  %15488 = vmatprep.subr.bf16.mxu0 %v15487_v58  ;;  %v11382_v53 = vadd.f32 %v22944_v37, %v22013_v3  ;;  %v24538_v35 = vld [vmem:[#allocation30_spill] sm:$0xff] }
 0x5f8   : > { %v11295_v48 = vadd.f32 %v22946_v38, %v22013_v3  ;;  %v11384_v7 = vadd.f32 %v24537_v16, %v22013_v3  ;;  %v17131_v28 = vpop.eup %17130  ;;  %v11590_v26 = vmul.f32 0.5, %v17129_v54  ;;  %v15495_v23 = vpack.c.bf16 %v12183_v46, %v12143_v59  ;;  %15490 = vmatpush1.bf16.msra.mxu0 %v15489_v18  ;;  %v24539_v37 = vld [vmem:[#allocation26_spill] sm:$0xff]  ;;  %v24540_v3 = vld [vmem:[#allocation28_spill] sm:$0xff] }
 0x5f9   : > { %17142 = vtanh.f32 %v11293_v57  ;;  %v11299_v55 = vadd.f32 %v24538_v35, %v22022_v31  ;;  %v17133_v25 = vpop.eup %17132  ;;  %v11748_v41 = vadd.f32 0.5, %v11588_v44  ;;  %v11589_v10 = vmul.f32 0.5, %v17131_v28 }
 0x5fa   : > { %17144 = vtanh.f32 %v11382_v53  ;;  %v11388_v15 = vadd.f32 %v24539_v37, %v22022_v31  ;;  %v11750_v1 = vadd.f32 0.5, %v11590_v26  ;;  %v11591_v38 = vmul.f32 0.5, %v17133_v25  ;;  %15496 = vmatprep.subr.bf16.mxu1 %v15495_v23  ;;  %v17135_v24 = vpop.eup %17134  ;;  %v24547_v23 = vld [vmem:[#allocation134_spill] sm:$0xff] }
 0x5fb   : > { %17146 = vtanh.f32 %v11295_v48  ;;  %v11301_v0 = vadd.f32 %v24540_v3, %v22022_v31  ;;  %v11908_v27 = vadd.f32 %v11748_v41, %v24541_v6  ;;  %v11749_v14 = vadd.f32 0.5, %v11589_v10  ;;  %15498 = vmatpush1.bf16.msra.mxu1 %v15497_v47  ;;  %14705 = vmatmul.mubr.msk.f32.vlgmr.msra.gmra.mrb[200].mxu0 %vm2560_vm1, %v22928_v4  ;;  %v24548_v41 = vld [vmem:[#allocation133_spill] sm:$0xff] }
 0x5fc   : > { %17148 = vtanh.f32 %v11384_v7  ;;  %v11390_v8 = vadd.f32 %v24542_v29, %v22022_v31  ;;  %v11910_v33 = vadd.f32 %v11750_v1, %v24543_v5  ;;  %v11751_v61 = vadd.f32 0.5, %v11591_v38  ;;  %13454 = vmatprep.mubr.f32.mxu0 %v23869_v40  ;;  %v24545_v31 = vld [vmem:[#allocation135_spill] sm:$0xff]  ;;  %v24549_v1 = vld [vmem:[#allocation136_spill] sm:$0xff]  ;;  %v24550_v5 = vld [vmem:[#allocation145_spill] sm:$0xff] }
 0x5fd   : > { %17150 = vtanh.f32 %v11299_v55  ;;  %v12065_v43 = vmul.f32 0.5, %v23195_v63  ;;  %v17137_v51 = vpop.eup %17136  ;;  %v23318_v60 = vmul.f32 0.5, %v11908_v27  ;;  %v23321_v50 = vadd.f32 %v11749_v14, %v24544_v62 }
 0x5fe   : > { %v11628_v59 = vmul.f32 0.5, %v17135_v24  ;;  %17152 = vtanh.f32 %v11388_v15  ;;  %v17139_v42 = vpop.eup %17138  ;;  %v23323_v58 = vmul.f32 0.5, %v11910_v33  ;;  %v23326_v56 = vadd.f32 %v11751_v61, %v24545_v31  ;;  %14709 = vmatmul.mubr.msk.f32.vlgmr.msra.gmra.mrb[200].mxu1 %vm2560_vm1, %v22928_v4  ;;  %v24546_v4 = vld [vmem:[#allocation131_spill] sm:$0xff] }
 0x5ff   : > { %v11630_v46 = vmul.f32 0.5, %v17137_v51  ;;  %17154 = vtanh.f32 %v11301_v0  ;;  %v17141_v63 = vpop.eup %17140  ;;  %v11629_v47 = vmul.f32 0.5, %v17139_v42  ;;  %13537 = vmatprep.mubr.f32.mxu1 %v23869_v40  ;;  %14706 = vmatmul.mubr.msk.f32.gmra.mrb[202].mxu0 %vm2560_vm1, %v22954_v45  ;;  %v12105_v36 = vmul.f32 0.5, %v23224_v2  ;;  %v24551_v51 = vld [vmem:[#allocation146_spill] sm:$0xff] }
 0x600   : > { %v11788_v18 = vadd.f32 0.5, %v11628_v59  ;;  %17156 = vtanh.f32 %v11390_v8  ;;  %v11631_v54 = vmul.f32 0.5, %v17141_v63  ;;  %v12067_v44 = vmul.f32 0.5, %v23202_v19  ;;  %13458 = vmatprep.mubr.f32.mxu0 %v23869_v40 }
 0x601   : > { %v11790_v57 = vadd.f32 0.5, %v11630_v46  ;;  %v12107_v53 = vmul.f32 0.5, %v23232_v17  ;;  %v11789_v16 = vadd.f32 0.5, %v11629_v47  ;;  %v15499_v7 = vpack.c.bf16 %v12105_v36, %v12065_v43  ;;  %v23372_v36 = vld [vmem:[%s23528_s2 + $0x98] sm:$0xff] }
 0x602   : > { %v11948_v48 = vadd.f32 %v11788_v18, %v24546_v4  ;;  %v15501_v28 = vpack.c.bf16 %v23221_v32, %v23192_v20  ;;  %v11791_v55 = vadd.f32 0.5, %v11631_v54  ;;  %14710 = vmatmul.mubr.msk.f32.gmra.mrb[202].mxu1 %vm2560_vm1, %v22954_v45  ;;  %v15509_v19 = vpack.c.bf16 %v23229_v34, %v23199_v21  ;;  %v24553_v54 = vld [vmem:[#allocation141_spill] sm:$0xff] }
 0x603   : > { %v17143_v26 = vpop.eup %17142  ;;  %v11950_v35 = vadd.f32 %v11790_v57, %v24547_v23  ;;  %v15507_v2 = vpack.c.bf16 %v12107_v53, %v12067_v44  ;;  %v11949_v10 = vadd.f32 %v11789_v16, %v24548_v41  ;;  %15500 = vmatprep.subr.bf16.mxu0 %v15499_v7  ;;  %13541 = vmatprep.mubr.f32.mxu1 %v23869_v40  ;;  %v12145_v20 = vmul.f32 0.5, %v23266_v22  ;;  %v17195_v41 = vld [vmem:[%s23528_s2 + $0x80] sm:$0xff] }
 0x604   : > { %v17145_v17 = vpop.eup %17144  ;;  %v23345_v25 = vmul.f32 0.5, %v11948_v48  ;;  %v11668_v37 = vmul.f32 0.5, %v17143_v26  ;;  %v11951_v45 = vadd.f32 %v11791_v55, %v24549_v1  ;;  %15502 = vmatpush1.bf16.msra.mxu0 %v15501_v28  ;;  %v12185_v21 = vmul.f32 0.5, %v23283_v30  ;;  %v24555_v28 = vld [vmem:[#allocation140_spill] sm:$0xff] }
 0x605   : > { %v17147_v32 = vpop.eup %17146  ;;  %v23350_v15 = vmul.f32 0.5, %v11950_v35  ;;  %v11670_v38 = vmul.f32 0.5, %v17145_v17  ;;  %15508 = vmatprep.subr.bf16.mxu1 %v15507_v2  ;;  %14707 = vmatmul.mubr.msk.f32.gmra.mrb[204].mxu0 %vm2560_vm1, %v22999_v39  ;;  %v12147_v6 = vmul.f32 0.5, %v23271_v12  ;;  %v12187_v22 = vmul.f32 0.5, %v23289_v13 }
 0x606   : > { %v17149_v34 = vpop.eup %17148  ;;  %v11828_v3 = vadd.f32 0.5, %v11668_v37  ;;  %v11669_v0 = vmul.f32 0.5, %v17147_v32  ;;  %15510 = vmatpush1.bf16.msra.mxu1 %v15509_v19  ;;  %13462 = vmatprep.mubr.f32.mxu0 %v23869_v40  ;;  %v15503_v30 = vpack.c.bf16 %v12185_v21, %v12145_v20  ;;  %v15505_v8 = vpack.c.bf16 %v23280_v11, %v23263_v9  ;;  %v24552_v9 = vld [vmem:[#allocation143_spill] sm:$0xff]  ;;  %v24556_v19 = vld [vmem:[#allocation144_spill] sm:$0xff]  ;;  %v24557_v20 = vld [vmem:[#allocation142_spill] sm:$0xff] }
 0x607   : > { %v17151_v27 = vpop.eup %17150  ;;  %v11830_v14 = vadd.f32 0.5, %v11670_v38  ;;  %v11671_v29 = vmul.f32 0.5, %v17149_v34  ;;  %14711 = vmatmul.mubr.msk.f32.gmra.mrb[204].mxu1 %vm2560_vm1, %v22999_v39  ;;  %v15511_v12 = vpack.c.bf16 %v12187_v22, %v12147_v6  ;;  %v15513_v31 = vpack.c.bf16 %v23286_v49, %v23268_v52  ;;  %v24554_v49 = vld [vmem:[#allocation139_spill] sm:$0xff] }
 0x608   : > { %v17153_v24 = vpop.eup %17152  ;;  %v11988_v33 = vadd.f32 %v11828_v3, %v24550_v5  ;;  %v11829_v61 = vadd.f32 0.5, %v11669_v0  ;;  %v11708_v43 = vmul.f32 0.5, %v17151_v27  ;;  %13545 = vmatprep.mubr.f32.mxu1 %v23869_v40  ;;  %15504 = vmatprep.subr.bf16.mxu0 %v15503_v30  ;;  %v12069_v16 = vmul.f32 0.5, %v23321_v50  ;;  %v17196_v3 = vld [vmem:[%s23528_s2 + $0x88] sm:$0xff] }
 0x609   : > { %v17155_v13 = vpop.eup %17154  ;;  %v11990_v62 = vadd.f32 %v11830_v14, %v24551_v51  ;;  %v11831_v59 = vadd.f32 0.5, %v11671_v29  ;;  %v11710_v42 = vmul.f32 0.5, %v17153_v24  ;;  %14708 = vmatmul.mubr.msk.f32.gmra.mrb[206].mxu0 %vm2560_vm1, %v23372_v36  ;;  %15512 = vmatprep.subr.bf16.mxu1 %v15511_v12  ;;  %v12109_v7 = vmul.f32 0.5, %v11949_v10 }
 0x60a   : > { %v17157_v46 = vpop.eup %17156  ;;  %v12148_v63 = vmul.f32 0.5, %v11988_v33  ;;  %v11989_v11 = vadd.f32 %v11829_v61, %v24552_v9  ;;  %v11868_v18 = vadd.f32 0.5, %v11708_v43  ;;  %v11709_v47 = vmul.f32 0.5, %v17155_v13  ;;  %15506 = vmatpush1.bf16.msra.mxu0 %v15505_v8  ;;  %15514 = vmatpush1.bf16.msra.mxu1 %v15513_v31 }
 0x60b   : > { %v12150_v57 = vmul.f32 0.5, %v11990_v62  ;;  %v11991_v44 = vadd.f32 %v11831_v59, %v24553_v54  ;;  %v11870_v53 = vadd.f32 0.5, %v11710_v42  ;;  %v11711_v52 = vmul.f32 0.5, %v17157_v46  ;;  %14712 = vmatmul.mubr.msk.f32.gmra.mrb[206].mxu1 %vm2560_vm1, %v23372_v36  ;;  %13614 = vmatprep.mubr.f32.mxu0 %v23869_v40 }
 0x60c   : > { %v12028_v4 = vadd.f32 %v11868_v18, %v24554_v49  ;;  %v11869_v48 = vadd.f32 0.5, %v11709_v47  ;;  %13697 = vmatprep.mubr.f32.mxu1 %v23869_v40  ;;  %v12071_v35 = vmul.f32 0.5, %v23326_v56  ;;  %v12111_v55 = vmul.f32 0.5, %v11951_v45 }
 0x60d   : > { %v12030_v26 = vadd.f32 %v11870_v53, %v24555_v28  ;;  %v11871_v23 = vadd.f32 0.5, %v11711_v52  ;;  %14713 = vmatmul.mubr.msk.f32.vlgmr.msra.gmra.mrb[208].mxu0 %vm2560_vm1, %v17195_v41  ;;  %v15515_v37 = vpack.c.bf16 %v12109_v7, %v12069_v16  ;;  %v15517_v50 = vpack.c.bf16 %v23345_v25, %v23318_v60 }
 0x60e   : > { %v12188_v2 = vmul.f32 0.5, %v12028_v4  ;;  %v12029_v17 = vadd.f32 %v11869_v48, %v24556_v19  ;;  %13620 = vmatprep.mubr.f32.mxu0 %v23869_v40  ;;  %v15523_v56 = vpack.c.bf16 %v12111_v55, %v12071_v35  ;;  %v15525_v1 = vpack.c.bf16 %v23350_v15, %v23323_v58  ;;  %v17197_v15 = vld [vmem:[%s23528_s2 + $0x90] sm:$0xff] }
 0x60f   : > { %v12190_v10 = vmul.f32 0.5, %v12030_v26  ;;  %v12031_v32 = vadd.f32 %v11871_v23, %v24557_v20  ;;  %14717 = vmatmul.mubr.msk.f32.vlgmr.msra.gmra.mrb[208].mxu1 %vm2560_vm1, %v17195_v41  ;;  %15516 = vmatprep.subr.bf16.mxu0 %v15515_v37  ;;  %v12149_v45 = vmul.f32 0.5, %v11989_v11  ;;  %v12151_v60 = vmul.f32 0.5, %v11991_v44 }
 0x610   : > { %13703 = vmatprep.mubr.f32.mxu1 %v23869_v40  ;;  %v12189_v38 = vmul.f32 0.5, %v12029_v17  ;;  %v15521_v21 = vpack.c.bf16 %v12188_v2, %v12148_v63  ;;  %15524 = vmatprep.subr.bf16.mxu1 %v15523_v56  ;;  %v13929_v48 = vlaneseq }
 0x611   : > { %15518 = vmatpush1.bf16.msra.mxu0 %v15517_v50  ;;  %v12191_v25 = vmul.f32 0.5, %v12031_v32  ;;  %v15529_v34 = vpack.c.bf16 %v12190_v10, %v12150_v57  ;;  %15526 = vmatpush1.bf16.msra.mxu1 %v15525_v1 }
 0x612   : > { %14714 = vmatmul.mubr.msk.f32.gmra.mrb[210].mxu0 %vm2560_vm1, %v17196_v3  ;;  %v15519_v0 = vpack.c.bf16 %v12189_v38, %v12149_v45  ;;  %v13930_v35 = vshrl.u32 %v13929_v48, 7 }
 0x613   : > { %14718 = vmatmul.mubr.msk.f32.gmra.mrb[210].mxu1 %vm2560_vm1, %v17196_v3  ;;  %13624 = vmatprep.mubr.f32.mxu0 %v23869_v40  ;;  %v15527_v58 = vpack.c.bf16 %v12191_v25, %v12151_v60 }
 0x614   : > { %13707 = vmatprep.mubr.f32.mxu1 %v23869_v40  ;;  %15520 = vmatprep.subr.bf16.mxu0 %v15519_v0 }
 0x615   : > { %15528 = vmatprep.subr.bf16.mxu1 %v15527_v58  ;;  %15522 = vmatpush1.bf16.msra.mxu0 %v15521_v21 }
 0x616   : > { %14715 = vmatmul.mubr.msk.f32.gmra.mrb[212].mxu0 %vm2560_vm1, %v22999_v39  ;;  %15530 = vmatpush1.bf16.msra.mxu1 %v15529_v34 }
 0x617   : > { %14719 = vmatmul.mubr.msk.f32.gmra.mrb[212].mxu1 %vm2560_vm1, %v17197_v15  ;;  %13628 = vmatprep.mubr.f32.mxu0 %v23869_v40 }
 0x618   : > { %13711 = vmatprep.mubr.f32.mxu1 %v23869_v40 }
 0x61a   : > { %14716 = vmatmul.mubr.msk.f32.gmra.mrb[214].mxu0 %vm2560_vm1, %v23372_v36 }
 0x61b   : > { %14720 = vmatmul.mubr.msk.f32.gmra.mrb[214].mxu1 %vm2560_vm1, %v23372_v36  ;;  %13780 = vmatprep.mubr.f32.mxu0 %v23869_v40 }
 0x61c   : > { %13863 = vmatprep.mubr.f32.mxu1 %v23869_v40  ;;  %v23419_v39 = vpop.f32.mrb[144].mxu0 }
 0x61d   : > { %v12290_v6 = vpop.f32.mrb[145].mxu0  ;;  %v12371_v22 = vpop.f32.mrb[144].mxu1 }
 0x61e   : > { %14721 = vmatmul.mubr.msk.f32.vlgmr.msra.gmra.mrb[216].mxu0 %vm2560_vm1, %v17195_v41  ;;  %v12373_v27 = vpop.f32.mrb[145].mxu1 }
 0x61f   : > { %14725 = vmatmul.mubr.msk.f32.vlgmr.msra.gmra.mrb[216].mxu1 %vm2560_vm1, %v17195_v41  ;;  %13786 = vmatprep.mubr.f32.mxu0 %v23869_v40 }
 0x620   : > { %13869 = vmatprep.mubr.f32.mxu1 %v23869_v40  ;;  %v12294_v14 = vpop.f32.mrb[146].mxu0 }
 0x621   : > { %v12295_v29 = vpop.f32.mrb[147].mxu0 }
 0x622   : > { %14722 = vmatmul.mubr.msk.f32.gmra.mrb[218].mxu0 %vm2560_vm1, %v17196_v3  ;;  %v12377_v30 = vpop.f32.mrb[146].mxu1 }
 0x623   : > { %14726 = vmatmul.mubr.msk.f32.gmra.mrb[218].mxu1 %vm2560_vm1, %v17196_v3  ;;  %13790 = vmatprep.mubr.f32.mxu0 %v23869_v40  ;;  %v12378_v8 = vpop.f32.mrb[147].mxu1 }
 0x624   : > { %13873 = vmatprep.mubr.f32.mxu1 %v23869_v40  ;;  %v12298_v24 = vpop.f32.mrb[148].mxu0 }
 0x625   : > { %v12299_v5 = vpop.f32.mrb[149].mxu0 }
 0x626   : > { %14723 = vmatmul.mubr.msk.f32.gmra.mrb[220].mxu0 %vm2560_vm1, %v17197_v15  ;;  %v12381_v33 = vpop.f32.mrb[148].mxu1 }
 0x627   : > { %14727 = vmatmul.mubr.msk.f32.gmra.mrb[220].mxu1 %vm2560_vm1, %v17197_v15  ;;  %13794 = vmatprep.mubr.f32.mxu0 %v23869_v40  ;;  %v12382_v61 = vpop.f32.mrb[149].mxu1 }
 0x628   : > { %13877 = vmatprep.mubr.f32.mxu1 %v23869_v40  ;;  %v12302_v43 = vpop.f32.mrb[150].mxu0 }
 0x629   : > { %v12303_v12 = vpop.f32.mrb[151].mxu0 }
 0x62a   : > { %14724 = vmatmul.mubr.msk.f32.gmra.mrb[222].mxu0 %vm2560_vm1, %v23372_v36  ;;  %v12385_v13 = vpop.f32.mrb[150].mxu1 }
 0x62b   : > { %14728 = vmatmul.mubr.msk.f32.gmra.mrb[222].mxu1 %vm2560_vm1, %v23372_v36  ;;  %v12386_v51 = vpop.f32.mrb[151].mxu1  ;;  %v17213_v36 = vmov 1966171168  }
 0x62c   : > { %v12454_v62 = vpop.f32.mrb[152].mxu0  ;;  %v13927_v4 = vunpack.c.l.s4 %v17213_v36 }
 0x62d   : > { %v12456_v59 = vpop.f32.mrb[153].mxu0 }
 0x62e   : > { %v12537_v42 = vpop.f32.mrb[152].mxu1  ;;  %v13928_v23 = vunpack.c.0.s8 %v13927_v4 }
 0x62f   : > { %v12539_v31 = vpop.f32.mrb[153].mxu1 }
 0x630   : > { %v12460_v46 = vpop.f32.mrb[154].mxu0  ;;  %v23439_v37 = vsub.s32 %v13928_v23, %v13930_v35 }
 0x631   : > { %v12461_v63 = vpop.f32.mrb[155].mxu0 }
 0x632   : > { %v12543_v9 = vpop.f32.mrb[154].mxu1 }
 0x633   : > { %v12544_v11 = vpop.f32.mrb[155].mxu1 }
 0x634   : > { %v12464_v40 = vpop.f32.mrb[156].mxu0 }
 0x635   : > { %v12465_v18 = vpop.f32.mrb[157].mxu0 }
 0x636   : > { %v12547_v47 = vpop.f32.mrb[156].mxu1 }
 0x637   : > { %v12548_v57 = vpop.f32.mrb[157].mxu1 }
 0x638   : > { %v12468_v54 = vpop.f32.mrb[158].mxu0 }
 0x639   : > { %v12469_v44 = vpop.f32.mrb[159].mxu0 }
 0x63a   : > { %v12551_v53 = vpop.f32.mrb[158].mxu1 }
 0x63b   : > { %v12552_v52 = vpop.f32.mrb[159].mxu1 }
 0x648   : > { %v12620_v49 = vpop.f32.mrb[160].mxu0 }
 0x649   : > { %v12703_v16 = vpop.f32.mrb[160].mxu1  ;;  %v12622_v7 = vpop.f32.mrb[161].mxu0 }
 0x64a   : > { %v12705_v28 = vpop.f32.mrb[161].mxu1 }
 0x64c   : > { %v12626_v26 = vpop.f32.mrb[162].mxu0 }
 0x64d   : > { %v12709_v55 = vpop.f32.mrb[162].mxu1  ;;  %v12627_v2 = vpop.f32.mrb[163].mxu0 }
 0x64e   : > { %v12710_v19 = vpop.f32.mrb[163].mxu1 }
 0x650   : > { %v12630_v17 = vpop.f32.mrb[164].mxu0 }
 0x651   : > { %v12713_v50 = vpop.f32.mrb[164].mxu1  ;;  %v12631_v1 = vpop.f32.mrb[165].mxu0 }
 0x652   : > { %v23437_v41 = vpop.permute.xlu0 %12198  ;;  %v12714_v45 = vpop.f32.mrb[165].mxu1 }
 0x653   : > { %v12289_v10 = vadd.f32 %v23419_v39, %v23437_v41  ;;  %v12291_v20 = vadd.f32 %v12290_v6, %v23437_v41  ;;  %v12372_v32 = vadd.f32 %v12371_v22, %v23437_v41  ;;  %v12374_v56 = vadd.f32 %v12373_v27, %v23437_v41 }
 0x654   : > { %v12455_v38 = vadd.f32 %v12454_v62, %v23437_v41  ;;  %v12538_v21 = vadd.f32 %v12537_v42, %v23437_v41  ;;  %v12457_v60 = vadd.f32 %v12456_v59, %v23437_v41  ;;  %v12540_v25 = vadd.f32 %v12539_v31, %v23437_v41  ;;  %v12634_v15 = vpop.f32.mrb[166].mxu0 }
 0x655   : > { %v13922_v34 = vcombine.low %v12289_v10, %v12291_v20  ;;  %v13923_v3 = vcombine.low %v12372_v32, %v12374_v56  ;;  %v12621_v0 = vadd.f32 %v12620_v49, %v23437_v41  ;;  %v12704_v58 = vadd.f32 %v12703_v16, %v23437_v41  ;;  %v12717_v14 = vpop.f32.mrb[166].mxu1  ;;  %v12635_v29 = vpop.f32.mrb[167].mxu0 }
 0x656   : > { %v13924_v39 = vcombine.low %v12455_v38, %v12457_v60  ;;  %v13925_v6 = vcombine.low %v12538_v21, %v12540_v25  ;;  %v12623_v22 = vadd.f32 %v12622_v7, %v23437_v41  ;;  %v12706_v27 = vadd.f32 %v12705_v28, %v23437_v41  ;;  %v12718_v24 = vpop.f32.mrb[167].mxu1 }
 0x657   : > { %v13932_v30 = vrot.slane %v13922_v34, %v23439_v37  ;;  %v13939_v8 = vrot.slane %v13923_v3, %v23439_v37 }
 0x658   : > { %v13946_v5 = vrot.slane %v13924_v39, %v23439_v37  ;;  %v13953_v33 = vrot.slane %v13925_v6, %v23439_v37  ;;  %v13971_v61 = vcombine.low %v12621_v0, %v12623_v22  ;;  %v13972_v43 = vcombine.low %v12704_v58, %v12706_v27 }
 0x659   : > { %v13954_v12 = vcombine.low %v13932_v30, %v13939_v8 }
 0x65a   : > { %v13955_v13 = vcombine.low %v13946_v5, %v13953_v33  ;;  %v13981_v51 = vrot.slane %v13971_v61, %v23439_v37  ;;  %v13988_v62 = vrot.slane %v13972_v43, %v23439_v37 }
 0x65b   : > { %v13962_v59 = vrot.slane %v13954_v12, %v23439_v37 }
 0x65c   : > { %v13969_v42 = vrot.slane %v13955_v13, %v23439_v37  ;;  %v14003_v31 = vcombine.low %v13981_v51, %v13988_v62 }
 0x65e   : > { %v13970_v46 = vcombine.low %v13962_v59, %v13969_v42  ;;  %v14011_v55 = vrot.slane %v14003_v31, %v23439_v37 }
 0x660   : > { %14172 = vst [vmem:[%s23466_s14] sm:$0xff] %v13970_v46 }
 0x666   : > { %v12786_v63 = vpop.f32.mrb[168].mxu0 }
 0x667   : > { %v12787_v9 = vadd.f32 %v12786_v63, %v23437_v41  ;;  %v12869_v11 = vpop.f32.mrb[168].mxu1  ;;  %v12788_v40 = vpop.f32.mrb[169].mxu0 }
 0x668   : > { %v12870_v18 = vadd.f32 %v12869_v11, %v23437_v41  ;;  %v12789_v47 = vadd.f32 %v12788_v40, %v23437_v41  ;;  %v12871_v57 = vpop.f32.mrb[169].mxu1 }
 0x669   : > { %v12872_v54 = vadd.f32 %v12871_v57, %v23437_v41 }
 0x66a   : > { %v13973_v44 = vcombine.low %v12787_v9, %v12789_v47  ;;  %v12792_v53 = vpop.f32.mrb[170].mxu0 }
 0x66b   : > { %v13974_v52 = vcombine.low %v12870_v18, %v12872_v54  ;;  %v12875_v49 = vpop.f32.mrb[170].mxu1  ;;  %v12793_v36 = vpop.f32.mrb[171].mxu0 }
 0x66c   : > { %v13995_v4 = vrot.slane %v13973_v44, %v23439_v37  ;;  %v12876_v48 = vpop.f32.mrb[171].mxu1 }
 0x66d   : > { %v14002_v16 = vrot.slane %v13974_v52, %v23439_v37 }
 0x66e   : > { %v12796_v7 = vpop.f32.mrb[172].mxu0 }
 0x66f   : > { %v14004_v28 = vcombine.low %v13995_v4, %v14002_v16  ;;  %v12879_v26 = vpop.f32.mrb[172].mxu1  ;;  %v12797_v23 = vpop.f32.mrb[173].mxu0 }
 0x670   : > { %v12880_v35 = vpop.f32.mrb[173].mxu1 }
 0x671   : > { %v14018_v2 = vrot.slane %v14004_v28, %v23439_v37 }
 0x672   : > { %v12800_v19 = vpop.f32.mrb[174].mxu0 }
 0x673   : > { %v14019_v17 = vcombine.low %v14011_v55, %v14018_v2  ;;  %v12883_v50 = vpop.f32.mrb[174].mxu1  ;;  %v12801_v10 = vpop.f32.mrb[175].mxu0 }
 0x674   : > { %v12884_v20 = vpop.f32.mrb[175].mxu1 }
 0x675   : > { %14173 = vst [vmem:[%s23466_s14 + $0x8] sm:$0xff] %v14019_v17 }
 0x682   : > { %v12952_v32 = vpop.f32.mrb[176].mxu0 }
 0x683   : > { %v12953_v56 = vadd.f32 %v12952_v32, %v23437_v41  ;;  %v13035_v1 = vpop.f32.mrb[176].mxu1  ;;  %v12954_v45 = vpop.f32.mrb[177].mxu0 }
 0x684   : > { %v13036_v38 = vadd.f32 %v13035_v1, %v23437_v41  ;;  %v12955_v21 = vadd.f32 %v12954_v45, %v23437_v41  ;;  %v13037_v60 = vpop.f32.mrb[177].mxu1 }
 0x685   : > { %v13038_v25 = vadd.f32 %v13037_v60, %v23437_v41 }
 0x686   : > { %v14020_v34 = vcombine.low %v12953_v56, %v12955_v21  ;;  %v12958_v3 = vpop.f32.mrb[178].mxu0 }
 0x687   : > { %v14021_v0 = vcombine.low %v13036_v38, %v13038_v25  ;;  %v13041_v58 = vpop.f32.mrb[178].mxu1  ;;  %v12959_v15 = vpop.f32.mrb[179].mxu0 }
 0x688   : > { %v14030_v39 = vrot.slane %v14020_v34, %v23439_v37  ;;  %v13042_v6 = vpop.f32.mrb[179].mxu1 }
 0x689   : > { %v14037_v22 = vrot.slane %v14021_v0, %v23439_v37 }
 0x68a   : > { %v12962_v27 = vpop.f32.mrb[180].mxu0 }
 0x68b   : > { %v14052_v14 = vcombine.low %v14030_v39, %v14037_v22  ;;  %v13045_v29 = vpop.f32.mrb[180].mxu1  ;;  %v12963_v30 = vpop.f32.mrb[181].mxu0 }
 0x68c   : > { %v13046_v8 = vpop.f32.mrb[181].mxu1 }
 0x68d   : > { %v14060_v36 = vrot.slane %v14052_v14, %v23439_v37 }
 0x68e   : > { %v12966_v24 = vpop.f32.mrb[182].mxu0 }
 0x68f   : > { %v13049_v5 = vpop.f32.mrb[182].mxu1  ;;  %v12967_v33 = vpop.f32.mrb[183].mxu0 }
 0x690   : > { %v13050_v61 = vpop.f32.mrb[183].mxu1 }
 0x69a   : > { %v13118_v43 = vpop.f32.mrb[184].mxu0 }
 0x69b   : > { %v13119_v12 = vadd.f32 %v13118_v43, %v23437_v41  ;;  %v13120_v13 = vpop.f32.mrb[185].mxu0 }
 0x69c   : > { %v13201_v51 = vpop.f32.mrb[184].mxu1  ;;  %v13121_v62 = vadd.f32 %v13120_v13, %v23437_v41 }
 0x69d   : > { %v13202_v59 = vadd.f32 %v13201_v51, %v23437_v41  ;;  %v13203_v42 = vpop.f32.mrb[185].mxu1 }
 0x69e   : > { %v14022_v31 = vcombine.low %v13119_v12, %v13121_v62  ;;  %v13204_v46 = vadd.f32 %v13203_v42, %v23437_v41  ;;  %v13124_v63 = vpop.f32.mrb[186].mxu0 }
 0x69f   : > { %v13125_v9 = vpop.f32.mrb[187].mxu0 }
 0x6a0   : > { %v14044_v11 = vrot.slane %v14022_v31, %v23439_v37  ;;  %v14023_v40 = vcombine.low %v13202_v59, %v13204_v46  ;;  %v13207_v18 = vpop.f32.mrb[186].mxu1 }
 0x6a1   : > { %v13208_v47 = vpop.f32.mrb[187].mxu1 }
 0x6a2   : > { %v14051_v57 = vrot.slane %v14023_v40, %v23439_v37  ;;  %v13128_v54 = vpop.f32.mrb[188].mxu0 }
 0x6a3   : > { %v13129_v44 = vpop.f32.mrb[189].mxu0 }
 0x6a4   : > { %v14053_v53 = vcombine.low %v14044_v11, %v14051_v57 }
 0x6a5   : > { %v13211_v52 = vpop.f32.mrb[188].mxu1 }
 0x6a6   : > { %v13212_v49 = vpop.f32.mrb[189].mxu1  ;;  %v14067_v4 = vrot.slane %v14053_v53, %v23439_v37 }
 0x6a7   : > { %v13132_v48 = vpop.f32.mrb[190].mxu0 }
 0x6a8   : > { %v14068_v16 = vcombine.low %v14060_v36, %v14067_v4  ;;  %v13133_v28 = vpop.f32.mrb[191].mxu0 }
 0x6a9   : > { %v13215_v7 = vpop.f32.mrb[190].mxu1 }
 0x6aa   : > { %v13216_v26 = vpop.f32.mrb[191].mxu1  ;;  %14174 = vst [vmem:[%s23466_s14 + $0x10] sm:$0xff] %v14068_v16 }
 0x6b6   : > { %v13284_v23 = vpop.f32.mrb[192].mxu0 }
 0x6b7   : > { %v13285_v35 = vadd.f32 %v13284_v23, %v23437_v41  ;;  %v13367_v55 = vpop.f32.mrb[192].mxu1  ;;  %v13286_v2 = vpop.f32.mrb[193].mxu0 }
 0x6b8   : > { %v13368_v19 = vadd.f32 %v13367_v55, %v23437_v41  ;;  %v13287_v17 = vadd.f32 %v13286_v2, %v23437_v41  ;;  %v13369_v50 = vpop.f32.mrb[193].mxu1 }
 0x6b9   : > { %v13370_v10 = vadd.f32 %v13369_v50, %v23437_v41 }
 0x6ba   : > { %v14069_v20 = vcombine.low %v13285_v35, %v13287_v17  ;;  %v13290_v32 = vpop.f32.mrb[194].mxu0 }
 0x6bb   : > { %v14070_v56 = vcombine.low %v13368_v19, %v13370_v10  ;;  %v13373_v1 = vpop.f32.mrb[194].mxu1  ;;  %v13291_v45 = vpop.f32.mrb[195].mxu0 }
 0x6bc   : > { %v14079_v38 = vrot.slane %v14069_v20, %v23439_v37  ;;  %v13374_v21 = vpop.f32.mrb[195].mxu1 }
 0x6bd   : > { %v14086_v60 = vrot.slane %v14070_v56, %v23439_v37 }
 0x6be   : > { %v13294_v25 = vpop.f32.mrb[196].mxu0 }
 0x6bf   : > { %v14101_v34 = vcombine.low %v14079_v38, %v14086_v60  ;;  %v13295_v3 = vpop.f32.mrb[197].mxu0 }
 0x6c0   : > { %v13377_v0 = vpop.f32.mrb[196].mxu1 }
 0x6c1   : > { %v13378_v58 = vpop.f32.mrb[197].mxu1  ;;  %v14109_v40 = vrot.slane %v14101_v34, %v23439_v37 }
 0x6c2   : > { %v13298_v15 = vpop.f32.mrb[198].mxu0 }
 0x6c3   : > { %v13299_v39 = vpop.f32.mrb[199].mxu0 }
 0x6c4   : > { %v13381_v6 = vpop.f32.mrb[198].mxu1 }
 0x6c5   : > { %v13382_v22 = vpop.f32.mrb[199].mxu1 }
 0x6ce   : > { %v13450_v27 = vpop.f32.mrb[200].mxu0 }
 0x6cf   : > { %v13451_v14 = vadd.f32 %v13450_v27, %v23437_v41  ;;  %v13452_v29 = vpop.f32.mrb[201].mxu0 }
 0x6d0   : > { %v13453_v30 = vadd.f32 %v13452_v29, %v23437_v41 }
 0x6d1   : > { %v13533_v8 = vpop.f32.mrb[200].mxu1 }
 0x6d2   : > { %v13534_v24 = vadd.f32 %v13533_v8, %v23437_v41  ;;  %v14071_v5 = vcombine.low %v13451_v14, %v13453_v30  ;;  %v13535_v33 = vpop.f32.mrb[201].mxu1  ;;  %v13456_v61 = vpop.f32.mrb[202].mxu0 }
 0x6d3   : > { %v13536_v43 = vadd.f32 %v13535_v33, %v23437_v41  ;;  %v13457_v12 = vpop.f32.mrb[203].mxu0 }
 0x6d4   : > { %v14093_v13 = vrot.slane %v14071_v5, %v23439_v37 }
 0x6d5   : > { %v14072_v51 = vcombine.low %v13534_v24, %v13536_v43  ;;  %v13539_v62 = vpop.f32.mrb[202].mxu1 }
 0x6d6   : > { %v13540_v59 = vpop.f32.mrb[203].mxu1 }
 0x6d7   : > { %v14100_v42 = vrot.slane %v14072_v51, %v23439_v37 }
 0x6d8   : > { %v13460_v31 = vpop.f32.mrb[204].mxu0 }
 0x6d9   : > { %v14102_v46 = vcombine.low %v14093_v13, %v14100_v42  ;;  %v13461_v9 = vpop.f32.mrb[205].mxu0 }
 0x6da   : > { %v13543_v63 = vpop.f32.mrb[204].mxu1 }
 0x6db   : > { %v13544_v11 = vpop.f32.mrb[205].mxu1  ;;  %v14116_v18 = vrot.slane %v14102_v46, %v23439_v37 }
 0x6dc   : > { %v13464_v47 = vpop.f32.mrb[206].mxu0 }
 0x6dd   : > { %v14117_v57 = vcombine.low %v14109_v40, %v14116_v18  ;;  %v13465_v44 = vpop.f32.mrb[207].mxu0 }
 0x6de   : > { %v13547_v54 = vpop.f32.mrb[206].mxu1 }
 0x6df   : > { %v13548_v53 = vpop.f32.mrb[207].mxu1  ;;  %14175 = vst [vmem:[%s23466_s14 + $0x18] sm:$0xff] %v14117_v57 }
 0x6e0   : > { %v13616_v52 = vpop.f32.mrb[208].mxu0 }
 0x6e1   : > { %v13617_v49 = vadd.f32 %v13616_v52, %v23437_v41  ;;  %v13618_v4 = vpop.f32.mrb[209].mxu0 }
 0x6e2   : > { %v13699_v36 = vpop.f32.mrb[208].mxu1  ;;  %v13619_v16 = vadd.f32 %v13618_v4, %v23437_v41 }
 0x6e3   : > { %v13700_v48 = vadd.f32 %v13699_v36, %v23437_v41  ;;  %v13701_v7 = vpop.f32.mrb[209].mxu1 }
 0x6e4   : > { %v13702_v28 = vadd.f32 %v13701_v7, %v23437_v41  ;;  %v14118_v26 = vcombine.low %v13617_v49, %v13619_v16 }
 0x6e5   : > { %v13622_v23 = vpop.f32.mrb[210].mxu0 }
 0x6e6   : > { %v14119_v35 = vcombine.low %v13700_v48, %v13702_v28  ;;  %v13705_v55 = vpop.f32.mrb[210].mxu1  ;;  %v13623_v2 = vpop.f32.mrb[211].mxu0  ;;  %v14128_v19 = vrot.slane %v14118_v26, %v23439_v37 }
 0x6e7   : > { %v13706_v17 = vpop.f32.mrb[211].mxu1 }
 0x6e8   : > { %v14135_v50 = vrot.slane %v14119_v35, %v23439_v37 }
 0x6e9   : > { %v13626_v10 = vpop.f32.mrb[212].mxu0 }
 0x6ea   : > { %v14150_v20 = vcombine.low %v14128_v19, %v14135_v50  ;;  %v13709_v32 = vpop.f32.mrb[212].mxu1  ;;  %v13627_v56 = vpop.f32.mrb[213].mxu0 }
 0x6eb   : > { %v13710_v1 = vpop.f32.mrb[213].mxu1 }
 0x6ec   : > { %v14158_v51 = vrot.slane %v14150_v20, %v23439_v37 }
 0x6ed   : > { %v13630_v45 = vpop.f32.mrb[214].mxu0 }
 0x6ee   : > { %v13713_v38 = vpop.f32.mrb[214].mxu1  ;;  %v13631_v21 = vpop.f32.mrb[215].mxu0 }
 0x6ef   : > { %v13714_v60 = vpop.f32.mrb[215].mxu1 }
 0x6f1   : > { %v13782_v25 = vpop.f32.mrb[216].mxu0 }
 0x6f2   : > { %v13783_v34 = vadd.f32 %v13782_v25, %v23437_v41  ;;  %v13865_v3 = vpop.f32.mrb[216].mxu1  ;;  %v13784_v0 = vpop.f32.mrb[217].mxu0 }
 0x6f3   : > { %v13866_v58 = vadd.f32 %v13865_v3, %v23437_v41  ;;  %v13785_v15 = vadd.f32 %v13784_v0, %v23437_v41  ;;  %v13867_v39 = vpop.f32.mrb[217].mxu1 }
 0x6f4   : > { %v13868_v6 = vadd.f32 %v13867_v39, %v23437_v41 }
 0x6f5   : > { %v14120_v22 = vcombine.low %v13783_v34, %v13785_v15  ;;  %v13788_v27 = vpop.f32.mrb[218].mxu0 }
 0x6f6   : > { %v14121_v14 = vcombine.low %v13866_v58, %v13868_v6  ;;  %v13871_v29 = vpop.f32.mrb[218].mxu1  ;;  %v13789_v30 = vpop.f32.mrb[219].mxu0 }
 0x6f7   : > { %v14142_v8 = vrot.slane %v14120_v22, %v23439_v37  ;;  %v13872_v24 = vpop.f32.mrb[219].mxu1 }
 0x6f8   : > { %v14149_v5 = vrot.slane %v14121_v14, %v23439_v37 }
 0x6f9   : > { %v13792_v33 = vpop.f32.mrb[220].mxu0 }
 0x6fa   : > { %v14151_v61 = vcombine.low %v14142_v8, %v14149_v5  ;;  %v13875_v43 = vpop.f32.mrb[220].mxu1  ;;  %v13793_v12 = vpop.f32.mrb[221].mxu0 }
 0x6fb   : > { %v13876_v13 = vpop.f32.mrb[221].mxu1 }
 0x6fc   : > { %v14165_v41 = vrot.slane %v14151_v61, %v23439_v37 }
 0x6fd   : > { %v13796_v62 = vpop.f32.mrb[222].mxu0 }
 0x6fe   : > { %v14166_v59 = vcombine.low %v14158_v51, %v14165_v41  ;;  %v13879_v42 = vpop.f32.mrb[222].mxu1  ;;  %v13797_v31 = vpop.f32.mrb[223].mxu0 }
 0x6ff   : > { %v13880_v46 = vpop.f32.mrb[223].mxu1 }
 0x700   : > { %14176 = vst [vmem:[%s23466_s14 + $0x20] sm:$0xff] %v14166_v59 }
 0x701 PF: > { %s14_s15 = sadd.s32 1, %s17204_s15  }
 0x702   : > { %p11_p4 = scmp.ge.s32.totalorder %s14_s15, 4  }
 0x704   :  { %13 = sbr.rel (!%p11_p4) target bundleno = 1 (0x1), region = 70 }

</bundles_post_ra>
